<compile_context>
chip_gen: v7x
topology: tpu7x:2x2x1
jax: 0.10.0
libtpu: 0.0.40
codegen_flags: <defaults>
</compile_context>

<pallas_src>
import functools

import jax
import jax.numpy as jnp
import numpy as np
from jax import lax
from jax.experimental import pallas as pl
from jax.experimental.pallas import tpu as pltpu


def _round_up(x, m):
    return ((x + m - 1) // m) * m


def _silu(x):
    # exp and the approximate reciprocal both run on the EUP slot.
    return x * pl.reciprocal(1.0 + jnp.exp(-x), approx=True)


def _groupnorm(x, gamma, beta, memb, memb_t, group_size, eps):
    """Centered two-pass GroupNorm over an (HW, C) f32 tile.

    memb is a (C, G) one-hot membership matrix, memb_t its transpose; the tiny
    M=1 matmuls do the group reduce / per-channel broadcast-back.
    """
    n = jnp.float32(x.shape[0] * group_size)
    s = jnp.sum(x, axis=0, keepdims=True)                                   # (1, C)
    gmean = jnp.dot(s, memb, preferred_element_type=jnp.float32) / n        # (1, G)
    mean_c = jnp.dot(gmean, memb_t, preferred_element_type=jnp.float32)     # (1, C)
    xc = x - mean_c
    ss = jnp.sum(xc * xc, axis=0, keepdims=True)                            # (1, C)
    gvar = jnp.dot(ss, memb, preferred_element_type=jnp.float32) / n        # (1, G)
    ginv = lax.rsqrt(gvar + eps)
    inv_c = jnp.dot(ginv, memb_t, preferred_element_type=jnp.float32)       # (1, C)
    return xc * (inv_c * gamma) + beta


def _conv3x3(h, pad_ref, col_ref, w_ref, bias, H, W, cin, cpad, pad_rows,
             mask_left, mask_right, use_im2col):
    """3x3 'same' conv of h (HW, cin) f32 -> (HW, cout) f32 (bf16 MXU, f32 acc).

    use_im2col=True : build a lane-aligned (HW, 9*cpad) bf16 slab (tap stride
                      cpad = round_up(cin, 128)) and run ONE wide-K matmul;
                      best MXU occupancy at small cin.
    use_im2col=False: tap-wise path for large cin - 9 K=cin matmuls directly
                      from shifted pad_ref views accumulated into a visible
                      f32 `acc +=` chain (no slab VMEM / vst traffic).

    w_ref: (9*cpad, cout) bf16, rows ordered (ky, kx, ci) with zero rows for
    ci in [cin, cpad).  bias: (1, cout) f32.
    """
    HW = H * W
    # Stage SiLU'd activations (bf16) into the interior rows of the shared
    # padded buffer; its halo rows were zeroed at the start of the program.
    pad_ref[pl.ds(pad_rows, HW), pl.ds(0, cin)] = h.astype(jnp.bfloat16)

    # Hoisted per-conv mask broadcasts (JAX does not CSE broadcast_in_dim).
    mask_l = jnp.broadcast_to(mask_left, (HW, cin))
    mask_r = jnp.broadcast_to(mask_right, (HW, cin))

    def tap_patch(ky, kx):
        off = pad_rows + (ky - 1) * W + (kx - 1)            # static offset
        patch = pad_ref[pl.ds(off, HW), pl.ds(0, cin)]       # shifted image view
        if kx == 0:                                          # mask column wraparound
            patch = jnp.where(mask_l, patch, 0)
        elif kx == 2:
            patch = jnp.where(mask_r, patch, 0)
        return patch

    if use_im2col:
        if cin < cpad:
            # Zero the pad lanes of each lane-aligned tap slot (re-done every
            # program: the slab is shared between convs / grid steps).
            zpad = jnp.zeros((HW, cpad - cin), jnp.bfloat16)
            for t in range(9):
                col_ref[:, pl.ds(t * cpad + cin, cpad - cin)] = zpad
        for ky in range(3):
            for kx in range(3):
                t = ky * 3 + kx
                col_ref[:, pl.ds(t * cpad, cin)] = tap_patch(ky, kx)
        acc = jnp.dot(col_ref[:, pl.ds(0, 9 * cpad)], w_ref[...],
                      preferred_element_type=jnp.float32)
    else:
        acc = None
        for ky in range(3):
            for kx in range(3):
                t = ky * 3 + kx
                part = jnp.dot(tap_patch(ky, kx),
                               w_ref[pl.ds(t * cpad, cin), :],   # skip zero rows
                               preferred_element_type=jnp.float32)
                acc = part if acc is None else acc + part
    return acc + bias


def _resblock_kernel(H, W, cin, cout, cpad1, cpad2, groups, eps, pad_rows,
                     conv1_im2col, conv2_im2col,
                     feat_ref, temb_ref,
                     gn1_g, gn1_b, m1, m1t, w1, b1,
                     gn2_g, gn2_b, m2, m2t, w2, b2,
                     wr, br,
                     out_ref,
                     pad_ref, col_ref):
    HW = H * W

    # Hoisted edge masks shared by both convs (iota + compare, computed once).
    col_ids = lax.broadcasted_iota(jnp.int32, (HW, 1), 0) % W
    mask_left = col_ids >= 1
    mask_right = col_ids < (W - 1)

    # Zero only the halo rows of the shared padded scratch (interior rows are
    # fully overwritten by each conv's staging store).  Done every program:
    # with a "parallel" batch axis each core owns its own scratch instance.
    zero_halo = jnp.zeros((pad_rows, pad_ref.shape[1]), jnp.bfloat16)
    pad_ref[pl.ds(0, pad_rows), :] = zero_halo
    pad_ref[pl.ds(pad_rows + HW, pad_rows), :] = zero_halo

    x_bf16 = feat_ref[0]                                     # (HW, cin) bf16
    x = x_bf16.astype(jnp.float32)

    # GroupNorm(feature) -> SiLU -> Conv3x3
    h = _groupnorm(x, gn1_g[...], gn1_b[...], m1[...], m1t[...], cin // groups, eps)
    h = _silu(h)
    h = _conv3x3(h, pad_ref, col_ref, w1, b1[...], H, W, cin, cpad1, pad_rows,
                 mask_left, mask_right, conv1_im2col)

    # + time embedding (precomputed in the wrapper) -> GroupNorm -> SiLU -> Conv3x3
    merged = h + temb_ref[0]                                 # (HW,cout) + (1,cout)
    m = _groupnorm(merged, gn2_g[...], gn2_b[...], m2[...], m2t[...],
                   cout // groups, eps)
    m = _silu(m)
    m = _conv3x3(m, pad_ref, col_ref, w2, b2[...], H, W, cout, cpad2, pad_rows,
                 mask_left, mask_right, conv2_im2col)

    # Residual 1x1 conv on the original input (bf16 MXU, f32 accumulate).
    res = jnp.dot(x_bf16, wr[...], preferred_element_type=jnp.float32) + br[...]
    out_ref[0] = (m + res).astype(out_ref.dtype)


def _membership(c, groups):
    gsz = c // groups
    return (jnp.arange(c)[:, None] // gsz == jnp.arange(groups)[None, :]
            ).astype(jnp.float32)


def _pack_conv3x3(w_hwio, cpad):
    # (3,3,cin,cout) f32 -> (9*cpad, cout) bf16 with zero rows for ci >= cin.
    kh, kw, cin, cout = w_hwio.shape
    w = jnp.zeros((kh * kw, cpad, cout), jnp.float32)
    w = w.at[:, :cin, :].set(w_hwio.reshape(kh * kw, cin, cout))
    return w.reshape(kh * kw * cpad, cout).astype(jnp.bfloat16)


def _const_pspec(shape):
    """Full-array spec for a grid-invariant parameter; single-buffered when
    the installed jax supports BlockSpec.pipeline_mode."""
    idx = (0,) * len(shape)
    index_map = lambda b: idx
    if hasattr(pl, "Buffered"):
        try:
            return pl.BlockSpec(shape, index_map, pipeline_mode=pl.Buffered(1))
        except TypeError:                      # older BlockSpec signature
            pass
    return pl.BlockSpec(shape, index_map)


def unet_residual_block(feature_nchw, time, params, *, groups=32, eps=1e-5,
                        tap_threshold=256):
    """UNET_ResidualBlock forward.

    feature_nchw: (B, Cin, H, W) f32 (PyTorch NCHW), time: (B, n_time) f32.
    tap_threshold: convs whose input-channel count is >= this use the tap-wise
    accumulation path (use 128 on v5e).
    """
    B, cin, H, W = feature_nchw.shape
    cout = params["b1"].shape[-1]
    HW = H * W
    pad_rows = _round_up(W + 1, 8)               # halo >= W+1, 8-sublane aligned
    cpad1 = _round_up(cin, 128)
    cpad2 = _round_up(cout, 128)
    conv1_im2col = cin < tap_threshold
    conv2_im2col = cout < tap_threshold

    # TODO(synk): in production keep the surrounding model NHWC and drop these
    # transposes (each is a full HBM pass over the activations).
    feat = jnp.transpose(feature_nchw, (0, 2, 3, 1)).reshape(B, HW, cin)
    feat = feat.astype(jnp.bfloat16)             # bf16 across the HBM boundary

    # Time embedding for the whole batch in plain JAX (keeps the degenerate
    # M=1 matmul and the (n_time, cout) weight out of the kernel).
    temb = (jax.nn.silu(time) @ params["wt"] + params["bt"]).reshape(B, 1, cout)

    # Kernel-layout parameters.
    gn1_g = params["gn1_g"].reshape(1, cin)
    gn1_b = params["gn1_b"].reshape(1, cin)
    gn2_g = params["gn2_g"].reshape(1, cout)
    gn2_b = params["gn2_b"].reshape(1, cout)
    b1 = params["b1"].reshape(1, cout)
    b2 = params["b2"].reshape(1, cout)
    br = params["br"].reshape(1, cout)
    m1 = _membership(cin, groups)
    m2 = _membership(cout, groups)
    m1t, m2t = m1.T, m2.T
    w1_flat = _pack_conv3x3(params["w1_hwio"], cpad1)
    w2_flat = _pack_conv3x3(params["w2_hwio"], cpad2)
    wr_flat = params["wr_hwio"].reshape(cin, cout).astype(jnp.bfloat16)

    # Scratch: shared padded staging buffer; im2col slab only if actually used.
    pad_shape = (HW + 2 * pad_rows, max(cpad1, cpad2))
    col_cpads = [c for c, use in ((cpad1, conv1_im2col), (cpad2, conv2_im2col)) if use]
    col_shape = (HW, 9 * max(col_cpads)) if col_cpads else (8, 128)

    in_specs = [
        pl.BlockSpec((1, HW, cin), lambda b: (b, 0, 0)),
        pl.BlockSpec((1, 1, cout), lambda b: (b, 0, 0)),
        _const_pspec((1, cin)), _const_pspec((1, cin)),
        _const_pspec((cin, groups)), _const_pspec((groups, cin)),
        _const_pspec((9 * cpad1, cout)), _const_pspec((1, cout)),
        _const_pspec((1, cout)), _const_pspec((1, cout)),
        _const_pspec((cout, groups)), _const_pspec((groups, cout)),
        _const_pspec((9 * cpad2, cout)), _const_pspec((1, cout)),
        _const_pspec((cin, cout)), _const_pspec((1, cout)),
    ]

    # Explicit VMEM budget derived from the per-program footprint (+ headroom
    # for live f32 temporaries).  Capped at 96 MiB; production SD shapes on
    # v7x (64 MiB physical) need the strip-tiled variant (TODO in header).
    param_arrays = (gn1_g, gn1_b, m1, m1t, w1_flat, b1,
                    gn2_g, gn2_b, m2, m2t, w2_flat, b2, wr_flat, br)
    param_bytes = sum(int(a.size) * a.dtype.itemsize for a in param_arrays)
    blk_bytes = 2 * (HW * cin * 2 + HW * cout * 2 + cout * 4)   # feat/out/temb x2 bufs
    scratch_bytes = 2 * (pad_shape[0] * pad_shape[1] + col_shape[0] * col_shape[1])
    temp_bytes = 8 * HW * max(cin, cout) * 4                    # live f32 temporaries
    est = blk_bytes + param_bytes + scratch_bytes + temp_bytes
    vmem_limit = int(min(max(2 * est, 32 * 2**20), 96 * 2**20))

    kernel = functools.partial(_resblock_kernel, H, W, cin, cout, cpad1, cpad2,
                               groups, eps, pad_rows, conv1_im2col, conv2_im2col)

    out = pl.pallas_call(
        kernel,
        out_shape=jax.ShapeDtypeStruct((B, HW, cout), jnp.bfloat16),
        grid=(B,),
        in_specs=in_specs,
        out_specs=pl.BlockSpec((1, HW, cout), lambda b: (b, 0, 0)),
        scratch_shapes=[
            pltpu.VMEM(pad_shape, jnp.bfloat16),    # shared padded staging buffer
            pltpu.VMEM(col_shape, jnp.bfloat16),    # im2col slab (dummy if unused)
        ],
        compiler_params=pltpu.CompilerParams(
            dimension_semantics=("parallel",),
            vmem_limit_bytes=vmem_limit),
    )(feat, temb,
      gn1_g, gn1_b, m1, m1t, w1_flat, b1,
      gn2_g, gn2_b, m2, m2t, w2_flat, b2,
      wr_flat, br)

    # f32 NCHW for comparison against the PyTorch-semantics reference
    # (production would stay bf16 / NHWC).
    out = out.astype(jnp.float32)
    return jnp.transpose(out.reshape(B, H, W, cout), (0, 3, 1, 2))


def make_params(key, cin, cout, n_time):
    ks = jax.random.split(key, 12)

    def nrm(k, shape, scale=0.05):
        return (scale * jax.random.normal(k, shape)).astype(jnp.float32)

    return dict(
        w1_hwio=nrm(ks[0], (3, 3, cin, cout)),
        b1=nrm(ks[1], (cout,)),
        w2_hwio=nrm(ks[2], (3, 3, cout, cout)),
        b2=nrm(ks[3], (cout,)),
        wr_hwio=nrm(ks[4], (1, 1, cin, cout)),
        br=nrm(ks[5], (cout,)),
        wt=nrm(ks[6], (n_time, cout)),
        bt=nrm(ks[7], (cout,)),
        gn1_g=1.0 + nrm(ks[8], (cin,)),
        gn1_b=nrm(ks[9], (cin,)),
        gn2_g=1.0 + nrm(ks[10], (cout,)),
        gn2_b=nrm(ks[11], (cout,)),
    )


def reference_forward(feature, time, p, groups=32, eps=1e-5):
    # Pure-JAX f32 reference mirroring the PyTorch forward (NCHW).
    def gn(x, gamma, beta):
        B, C, H, W = x.shape
        xg = x.reshape(B, groups, (C // groups) * H * W)
        mean = xg.mean(axis=-1, keepdims=True)
        var = xg.var(axis=-1, keepdims=True)
        xg = (xg - mean) / jnp.sqrt(var + eps)
        x = xg.reshape(B, C, H, W)
        return x * gamma[None, :, None, None] + beta[None, :, None, None]

    def conv(x, w_hwio, b, pad):
        y = lax.conv_general_dilated(
            x, w_hwio, window_strides=(1, 1), padding=[(pad, pad), (pad, pad)],
            dimension_numbers=("NCHW", "HWIO", "NCHW"))
        return y + b[None, :, None, None]

    h = jax.nn.silu(gn(feature, p["gn1_g"], p["gn1_b"]))
    h = conv(h, p["w1_hwio"], p["b1"], 1)
    t = jax.nn.silu(time) @ p["wt"] + p["bt"]
    merged = h + t[:, :, None, None]
    m = jax.nn.silu(gn(merged, p["gn2_g"], p["gn2_b"]))
    m = conv(m, p["w2_hwio"], p["b2"], 1)
    res = conv(feature, p["wr_hwio"], p["br"], 0)
    return m + res


if __name__ == "__main__":
    def run_case(B, Cin, Cout, H, W, n_time, tap_threshold=256):
        key = jax.random.PRNGKey(0)
        kf, kt, kp = jax.random.split(key, 3)
        feature = jax.random.normal(kf, (B, Cin, H, W), jnp.float32)
        time = jax.random.normal(kt, (B, n_time), jnp.float32)
        params = make_params(kp, Cin, Cout, n_time)
        out = jax.block_until_ready(
            unet_residual_block(feature, time, params, tap_threshold=tap_threshold))
        ref = reference_forward(feature, time, params)
        # bf16 MXU matmuls + bf16 activations across the HBM boundary -> loose
        # tolerance; structural bugs produce O(0.3+) errors.
        np.testing.assert_allclose(np.asarray(out), np.asarray(ref),
                                   atol=1.2e-1, rtol=6e-2)

    # Case 1: small channels -> lane-aligned im2col path for both convs
    # (Cout=128 keeps output stores lane-dense / unmasked).
    run_case(B=2, Cin=64, Cout=128, H=16, W=16, n_time=128)
    # Case 2: Cin >= tap threshold -> tap-wise accumulation path for conv1
    # (conv2 with cin=128 stays on im2col), exercising the mixed-path kernel.
    run_case(B=1, Cin=256, Cout=128, H=8, W=8, n_time=64)

    print("KERNEL_OK")
</pallas_src>

<mosaic_0001>
module attributes {stable_mosaic.version = 11 : i64} {
  func.func @_resblock_kernel(%arg0: i32, %arg1: memref<1x256x64xbf16, #tpu.memory_space<vmem>>, %arg2: memref<1x1x128xf32, #tpu.memory_space<vmem>>, %arg3: memref<1x64xf32, #tpu.memory_space<vmem>>, %arg4: memref<1x64xf32, #tpu.memory_space<vmem>>, %arg5: memref<64x32xf32, #tpu.memory_space<vmem>>, %arg6: memref<32x64xf32, #tpu.memory_space<vmem>>, %arg7: memref<1152x128xbf16, #tpu.memory_space<vmem>>, %arg8: memref<1x128xf32, #tpu.memory_space<vmem>>, %arg9: memref<1x128xf32, #tpu.memory_space<vmem>>, %arg10: memref<1x128xf32, #tpu.memory_space<vmem>>, %arg11: memref<128x32xf32, #tpu.memory_space<vmem>>, %arg12: memref<32x128xf32, #tpu.memory_space<vmem>>, %arg13: memref<1152x128xbf16, #tpu.memory_space<vmem>>, %arg14: memref<1x128xf32, #tpu.memory_space<vmem>>, %arg15: memref<64x128xbf16, #tpu.memory_space<vmem>>, %arg16: memref<1x128xf32, #tpu.memory_space<vmem>>, %arg17: memref<1x256x128xbf16, #tpu.memory_space<vmem>>, %arg18: memref<304x128xbf16, #tpu.memory_space<vmem>>, %arg19: memref<256x1152xbf16, #tpu.memory_space<vmem>>) attributes {dimension_semantics = [#tpu.dimension_semantics<parallel>], iteration_bounds = array<i64: 2>, scalar_prefetch = 0 : i64, scratch_operands = 2 : i64, tpu.core_type = #tpu.core_type<tc>, window_params = [{transform_indices = @transform_0, window_bounds = array<i64: 1, 256, 64>}, {transform_indices = @transform_1, window_bounds = array<i64: 1, 1, 128>}, {pipeline_mode = #tpu.pipeline_mode<synchronous>, transform_indices = @transform_2, window_bounds = array<i64: 1, 64>}, {pipeline_mode = #tpu.pipeline_mode<synchronous>, transform_indices = @transform_3, window_bounds = array<i64: 1, 64>}, {pipeline_mode = #tpu.pipeline_mode<synchronous>, transform_indices = @transform_4, window_bounds = array<i64: 64, 32>}, {pipeline_mode = #tpu.pipeline_mode<synchronous>, transform_indices = @transform_5, window_bounds = array<i64: 32, 64>}, {pipeline_mode = #tpu.pipeline_mode<synchronous>, transform_indices = @transform_6, window_bounds = array<i64: 1152, 128>}, {pipeline_mode = #tpu.pipeline_mode<synchronous>, transform_indices = @transform_7, window_bounds = array<i64: 1, 128>}, {pipeline_mode = #tpu.pipeline_mode<synchronous>, transform_indices = @transform_8, window_bounds = array<i64: 1, 128>}, {pipeline_mode = #tpu.pipeline_mode<synchronous>, transform_indices = @transform_9, window_bounds = array<i64: 1, 128>}, {pipeline_mode = #tpu.pipeline_mode<synchronous>, transform_indices = @transform_10, window_bounds = array<i64: 128, 32>}, {pipeline_mode = #tpu.pipeline_mode<synchronous>, transform_indices = @transform_11, window_bounds = array<i64: 32, 128>}, {pipeline_mode = #tpu.pipeline_mode<synchronous>, transform_indices = @transform_12, window_bounds = array<i64: 1152, 128>}, {pipeline_mode = #tpu.pipeline_mode<synchronous>, transform_indices = @transform_13, window_bounds = array<i64: 1, 128>}, {pipeline_mode = #tpu.pipeline_mode<synchronous>, transform_indices = @transform_14, window_bounds = array<i64: 64, 128>}, {pipeline_mode = #tpu.pipeline_mode<synchronous>, transform_indices = @transform_15, window_bounds = array<i64: 1, 128>}, {transform_indices = @transform_16, window_bounds = array<i64: 1, 256, 128>}]} {
    %0 = tpu.iota {dimensions = array<i32: 0>} : vector<256x1xi32>
    %c16_i32 = arith.constant 16 : i32
    %c0_i32 = arith.constant 0 : i32
    %1 = arith.cmpi eq, %c16_i32, %c0_i32 : i32
    %c1_i32 = arith.constant 1 : i32
    %2 = arith.select %1, %c1_i32, %c16_i32 : i32
    %3 = vector.broadcast %2 : i32 to vector<256x1xi32>
    %4 = arith.remsi %0, %3 : vector<256x1xi32>
    %c0_i32_0 = arith.constant 0 : i32
    %5 = vector.broadcast %c0_i32_0 : i32 to vector<256x1xi32>
    %6 = arith.cmpi ne, %4, %5 : vector<256x1xi32>
    %c0_i32_1 = arith.constant 0 : i32
    %7 = vector.broadcast %c0_i32_1 : i32 to vector<256x1xi32>
    %8 = arith.cmpi slt, %4, %7 : vector<256x1xi32>
    %c0_i32_2 = arith.constant 0 : i32
    %9 = arith.cmpi slt, %2, %c0_i32_2 : i32
    %10 = vector.broadcast %9 : i1 to vector<256x1xi1>
    %11 = vector.broadcast %10 : vector<256x1xi1> to vector<256x1xi1>
    %12 = arith.xori %8, %11 : vector<256x1xi1>
    %13 = arith.andi %12, %6 : vector<256x1xi1>
    %14 = vector.broadcast %2 : i32 to vector<256x1xi32>
    %15 = arith.addi %4, %14 : vector<256x1xi32>
    %16 = arith.select %13, %15, %4 : vector<256x1xi1>, vector<256x1xi32>
    %c1_i32_3 = arith.constant 1 : i32
    %17 = vector.broadcast %c1_i32_3 : i32 to vector<256x1xi32>
    %18 = arith.cmpi sge, %16, %17 : vector<256x1xi32>
    %c15_i32 = arith.constant 15 : i32
    %19 = vector.broadcast %c15_i32 : i32 to vector<256x1xi32>
    %20 = arith.cmpi slt, %16, %19 : vector<256x1xi32>
    %cst = arith.constant 0.000000e+00 : bf16
    %21 = vector.broadcast %cst : bf16 to vector<24x128xbf16>
    %c0 = arith.constant 0 : index
    %c0_4 = arith.constant 0 : index
    %22 = vector.load %arg18[%c0, %c0_4] : memref<304x128xbf16, #tpu.memory_space<vmem>>, vector<24x128xbf16>
    tpu.vector_store %arg18[%c0, %c0_4], %21 {strides = array<i32>} : memref<304x128xbf16, #tpu.memory_space<vmem>>, vector<24x128xbf16>,
    %c280 = arith.constant 280 : index
    %c0_5 = arith.constant 0 : index
    %23 = vector.load %arg18[%c280, %c0_5] : memref<304x128xbf16, #tpu.memory_space<vmem>>, vector<24x128xbf16>
    tpu.vector_store %arg18[%c280, %c0_5], %21 {strides = array<i32>} : memref<304x128xbf16, #tpu.memory_space<vmem>>, vector<24x128xbf16>,
    %c0_6 = arith.constant 0 : index
    %c0_7 = arith.constant 0 : index
    %c0_8 = arith.constant 0 : index
    %24 = vector.load %arg1[%c0_6, %c0_7, %c0_8] : memref<1x256x64xbf16, #tpu.memory_space<vmem>>, vector<1x256x64xbf16>
    %25 = vector.shape_cast %24 : vector<1x256x64xbf16> to vector<256x64xbf16>
    %26 = arith.extf %25 : vector<256x64xbf16> to vector<256x64xf32>
    %c0_9 = arith.constant 0 : index
    %c0_10 = arith.constant 0 : index
    %27 = vector.load %arg3[%c0_9, %c0_10] : memref<1x64xf32, #tpu.memory_space<vmem>>, vector<1x64xf32>
    %c0_11 = arith.constant 0 : index
    %c0_12 = arith.constant 0 : index
    %28 = vector.load %arg4[%c0_11, %c0_12] : memref<1x64xf32, #tpu.memory_space<vmem>>, vector<1x64xf32>
    %c0_13 = arith.constant 0 : index
    %c0_14 = arith.constant 0 : index
    %29 = vector.load %arg5[%c0_13, %c0_14] : memref<64x32xf32, #tpu.memory_space<vmem>>, vector<64x32xf32>
    %c0_15 = arith.constant 0 : index
    %c0_16 = arith.constant 0 : index
    %30 = vector.load %arg6[%c0_15, %c0_16] : memref<32x64xf32, #tpu.memory_space<vmem>>, vector<32x64xf32>
    %cst_17 = arith.constant dense<0.000000e+00> : vector<64xf32>
    %31 = vector.multi_reduction <add>, %26, %cst_17 [0] : vector<256x64xf32> to vector<64xf32>
    %32 = vector.shape_cast %31 : vector<64xf32> to vector<1x64xf32>
    %cst_18 = arith.constant dense<0.000000e+00> : vector<1x32xf32>
    %33 = tpu.matmul %32, %29, %cst_18 {dimension_numbers = #tpu.dot_dimension_numbers<[1], [0], [0], [1], [0, 0, 1, 1], [], []>} : vector<1x64xf32>, vector<64x32xf32>, vector<1x32xf32> -> vector<1x32xf32>
    %cst_19 = arith.constant 5.120000e+02 : f32
    %34 = vector.broadcast %cst_19 : f32 to vector<1x32xf32>
    %35 = arith.divf %33, %34 : vector<1x32xf32>
    %cst_20 = arith.constant dense<0.000000e+00> : vector<1x64xf32>
    %36 = tpu.matmul %35, %30, %cst_20 {dimension_numbers = #tpu.dot_dimension_numbers<[1], [0], [0], [1], [0, 0, 1, 1], [], []>} : vector<1x32xf32>, vector<32x64xf32>, vector<1x64xf32> -> vector<1x64xf32>
    %37 = vector.broadcast %36 : vector<1x64xf32> to vector<256x64xf32>
    %38 = arith.subf %26, %37 : vector<256x64xf32>
    %39 = arith.mulf %38, %38 : vector<256x64xf32>
    %cst_21 = arith.constant dense<0.000000e+00> : vector<64xf32>
    %40 = vector.multi_reduction <add>, %39, %cst_21 [0] : vector<256x64xf32> to vector<64xf32>
    %41 = vector.shape_cast %40 : vector<64xf32> to vector<1x64xf32>
    %cst_22 = arith.constant dense<0.000000e+00> : vector<1x32xf32>
    %42 = tpu.matmul %41, %29, %cst_22 {dimension_numbers = #tpu.dot_dimension_numbers<[1], [0], [0], [1], [0, 0, 1, 1], [], []>} : vector<1x64xf32>, vector<64x32xf32>, vector<1x32xf32> -> vector<1x32xf32>
    %cst_23 = arith.constant 5.120000e+02 : f32
    %43 = vector.broadcast %cst_23 : f32 to vector<1x32xf32>
    %44 = arith.divf %42, %43 : vector<1x32xf32>
    %cst_24 = arith.constant 9.99999974E-6 : f32
    %45 = vector.broadcast %cst_24 : f32 to vector<1x32xf32>
    %46 = arith.addf %44, %45 : vector<1x32xf32>
    %47 = math.rsqrt %46 : vector<1x32xf32>
    %cst_25 = arith.constant dense<0.000000e+00> : vector<1x64xf32>
    %48 = tpu.matmul %47, %30, %cst_25 {dimension_numbers = #tpu.dot_dimension_numbers<[1], [0], [0], [1], [0, 0, 1, 1], [], []>} : vector<1x32xf32>, vector<32x64xf32>, vector<1x64xf32> -> vector<1x64xf32>
    %49 = arith.mulf %48, %27 : vector<1x64xf32>
    %50 = vector.broadcast %49 : vector<1x64xf32> to vector<256x64xf32>
    %51 = arith.mulf %38, %50 : vector<256x64xf32>
    %52 = vector.broadcast %28 : vector<1x64xf32> to vector<256x64xf32>
    %53 = arith.addf %51, %52 : vector<256x64xf32>
    %cst_26 = arith.constant 0.000000e+00 : f32
    %54 = vector.broadcast %cst_26 : f32 to vector<256x64xf32>
    %55 = arith.subf %54, %53 : vector<256x64xf32>
    %56 = math.exp %55 : vector<256x64xf32>
    %cst_27 = arith.constant 1.000000e+00 : f32
    %57 = vector.broadcast %cst_27 : f32 to vector<256x64xf32>
    %58 = arith.addf %57, %56 : vector<256x64xf32>
    %59 = tpu.reciprocal %58 {approx = true} : vector<256x64xf32> -> vector<256x64xf32>
    %60 = arith.mulf %53, %59 : vector<256x64xf32>
    %c0_28 = arith.constant 0 : index
    %c0_29 = arith.constant 0 : index
    %61 = vector.load %arg8[%c0_28, %c0_29] : memref<1x128xf32, #tpu.memory_space<vmem>>, vector<1x128xf32>
    %62 = arith.truncf %60 : vector<256x64xf32> to vector<256x64xbf16>
    %c24 = arith.constant 24 : index
    %c0_30 = arith.constant 0 : index
    %63 = vector.load %arg18[%c24, %c0_30] : memref<304x128xbf16, #tpu.memory_space<vmem>>, vector<256x64xbf16>
    tpu.vector_store %arg18[%c24, %c0_30], %62 {strides = array<i32>} : memref<304x128xbf16, #tpu.memory_space<vmem>>, vector<256x64xbf16>,
    %64 = vector.shape_cast %18 : vector<256x1xi1> to vector<256x1xi1>
    %65 = vector.broadcast %64 : vector<256x1xi1> to vector<256x64xi1>
    %66 = vector.shape_cast %20 : vector<256x1xi1> to vector<256x1xi1>
    %67 = vector.broadcast %66 : vector<256x1xi1> to vector<256x64xi1>
    %cst_31 = arith.constant 0.000000e+00 : bf16
    %68 = vector.broadcast %cst_31 : bf16 to vector<256x64xbf16>
    %c0_32 = arith.constant 0 : index
    %c64 = arith.constant 64 : index
    %69 = vector.load %arg19[%c0_32, %c64] : memref<256x1152xbf16, #tpu.memory_space<vmem>>, vector<256x64xbf16>
    tpu.vector_store %arg19[%c0_32, %c64], %68 {strides = array<i32>} : memref<256x1152xbf16, #tpu.memory_space<vmem>>, vector<256x64xbf16>,
    %c0_33 = arith.constant 0 : index
    %c192 = arith.constant 192 : index
    %70 = vector.load %arg19[%c0_33, %c192] : memref<256x1152xbf16, #tpu.memory_space<vmem>>, vector<256x64xbf16>
    tpu.vector_store %arg19[%c0_33, %c192], %68 {strides = array<i32>} : memref<256x1152xbf16, #tpu.memory_space<vmem>>, vector<256x64xbf16>,
    %c0_34 = arith.constant 0 : index
    %c320 = arith.constant 320 : index
    %71 = vector.load %arg19[%c0_34, %c320] : memref<256x1152xbf16, #tpu.memory_space<vmem>>, vector<256x64xbf16>
    tpu.vector_store %arg19[%c0_34, %c320], %68 {strides = array<i32>} : memref<256x1152xbf16, #tpu.memory_space<vmem>>, vector<256x64xbf16>,
    %c0_35 = arith.constant 0 : index
    %c448 = arith.constant 448 : index
    %72 = vector.load %arg19[%c0_35, %c448] : memref<256x1152xbf16, #tpu.memory_space<vmem>>, vector<256x64xbf16>
    tpu.vector_store %arg19[%c0_35, %c448], %68 {strides = array<i32>} : memref<256x1152xbf16, #tpu.memory_space<vmem>>, vector<256x64xbf16>,
    %c0_36 = arith.constant 0 : index
    %c576 = arith.constant 576 : index
    %73 = vector.load %arg19[%c0_36, %c576] : memref<256x1152xbf16, #tpu.memory_space<vmem>>, vector<256x64xbf16>
    tpu.vector_store %arg19[%c0_36, %c576], %68 {strides = array<i32>} : memref<256x1152xbf16, #tpu.memory_space<vmem>>, vector<256x64xbf16>,
    %c0_37 = arith.constant 0 : index
    %c704 = arith.constant 704 : index
    %74 = vector.load %arg19[%c0_37, %c704] : memref<256x1152xbf16, #tpu.memory_space<vmem>>, vector<256x64xbf16>
    tpu.vector_store %arg19[%c0_37, %c704], %68 {strides = array<i32>} : memref<256x1152xbf16, #tpu.memory_space<vmem>>, vector<256x64xbf16>,
    %c0_38 = arith.constant 0 : index
    %c832 = arith.constant 832 : index
    %75 = vector.load %arg19[%c0_38, %c832] : memref<256x1152xbf16, #tpu.memory_space<vmem>>, vector<256x64xbf16>
    tpu.vector_store %arg19[%c0_38, %c832], %68 {strides = array<i32>} : memref<256x1152xbf16, #tpu.memory_space<vmem>>, vector<256x64xbf16>,
    %c0_39 = arith.constant 0 : index
    %c960 = arith.constant 960 : index
    %76 = vector.load %arg19[%c0_39, %c960] : memref<256x1152xbf16, #tpu.memory_space<vmem>>, vector<256x64xbf16>
    tpu.vector_store %arg19[%c0_39, %c960], %68 {strides = array<i32>} : memref<256x1152xbf16, #tpu.memory_space<vmem>>, vector<256x64xbf16>,
    %c0_40 = arith.constant 0 : index
    %c1088 = arith.constant 1088 : index
    %77 = vector.load %arg19[%c0_40, %c1088] : memref<256x1152xbf16, #tpu.memory_space<vmem>>, vector<256x64xbf16>
    tpu.vector_store %arg19[%c0_40, %c1088], %68 {strides = array<i32>} : memref<256x1152xbf16, #tpu.memory_space<vmem>>, vector<256x64xbf16>,
    %c7 = arith.constant 7 : index
    %c0_41 = arith.constant 0 : index
    %78 = vector.load %arg18[%c7, %c0_41] : memref<304x128xbf16, #tpu.memory_space<vmem>>, vector<256x64xbf16>
    %c0_i32_42 = arith.constant 0 : i32
    %79 = arith.sitofp %c0_i32_42 : i32 to bf16
    %80 = vector.broadcast %79 : bf16 to vector<256x64xbf16>
    %81 = arith.select %65, %78, %80 : vector<256x64xi1>, vector<256x64xbf16>
    %c0_43 = arith.constant 0 : index
    %c0_44 = arith.constant 0 : index
    %82 = vector.load %arg19[%c0_43, %c0_44] : memref<256x1152xbf16, #tpu.memory_space<vmem>>, vector<256x64xbf16>
    tpu.vector_store %arg19[%c0_43, %c0_44], %81 {strides = array<i32>} : memref<256x1152xbf16, #tpu.memory_space<vmem>>, vector<256x64xbf16>,
    %c8 = arith.constant 8 : index
    %c0_45 = arith.constant 0 : index
    %83 = vector.load %arg18[%c8, %c0_45] : memref<304x128xbf16, #tpu.memory_space<vmem>>, vector<256x64xbf16>
    %c0_46 = arith.constant 0 : index
    %c128 = arith.constant 128 : index
    %84 = vector.load %arg19[%c0_46, %c128] : memref<256x1152xbf16, #tpu.memory_space<vmem>>, vector<256x64xbf16>
    tpu.vector_store %arg19[%c0_46, %c128], %83 {strides = array<i32>} : memref<256x1152xbf16, #tpu.memory_space<vmem>>, vector<256x64xbf16>,
    %c9 = arith.constant 9 : index
    %c0_47 = arith.constant 0 : index
    %85 = vector.load %arg18[%c9, %c0_47] : memref<304x128xbf16, #tpu.memory_space<vmem>>, vector<256x64xbf16>
    %c0_i32_48 = arith.constant 0 : i32
    %86 = arith.sitofp %c0_i32_48 : i32 to bf16
    %87 = vector.broadcast %86 : bf16 to vector<256x64xbf16>
    %88 = arith.select %67, %85, %87 : vector<256x64xi1>, vector<256x64xbf16>
    %c0_49 = arith.constant 0 : index
    %c256 = arith.constant 256 : index
    %89 = vector.load %arg19[%c0_49, %c256] : memref<256x1152xbf16, #tpu.memory_space<vmem>>, vector<256x64xbf16>
    tpu.vector_store %arg19[%c0_49, %c256], %88 {strides = array<i32>} : memref<256x1152xbf16, #tpu.memory_space<vmem>>, vector<256x64xbf16>,
    %c23 = arith.constant 23 : index
    %c0_50 = arith.constant 0 : index
    %90 = vector.load %arg18[%c23, %c0_50] : memref<304x128xbf16, #tpu.memory_space<vmem>>, vector<256x64xbf16>
    %c0_i32_51 = arith.constant 0 : i32
    %91 = arith.sitofp %c0_i32_51 : i32 to bf16
    %92 = vector.broadcast %91 : bf16 to vector<256x64xbf16>
    %93 = arith.select %65, %90, %92 : vector<256x64xi1>, vector<256x64xbf16>
    %c0_52 = arith.constant 0 : index
    %c384 = arith.constant 384 : index
    %94 = vector.load %arg19[%c0_52, %c384] : memref<256x1152xbf16, #tpu.memory_space<vmem>>, vector<256x64xbf16>
    tpu.vector_store %arg19[%c0_52, %c384], %93 {strides = array<i32>} : memref<256x1152xbf16, #tpu.memory_space<vmem>>, vector<256x64xbf16>,
    %c24_53 = arith.constant 24 : index
    %c0_54 = arith.constant 0 : index
    %95 = vector.load %arg18[%c24_53, %c0_54] : memref<304x128xbf16, #tpu.memory_space<vmem>>, vector<256x64xbf16>
    %c0_55 = arith.constant 0 : index
    %c512 = arith.constant 512 : index
    %96 = vector.load %arg19[%c0_55, %c512] : memref<256x1152xbf16, #tpu.memory_space<vmem>>, vector<256x64xbf16>
    tpu.vector_store %arg19[%c0_55, %c512], %95 {strides = array<i32>} : memref<256x1152xbf16, #tpu.memory_space<vmem>>, vector<256x64xbf16>,
    %c25 = arith.constant 25 : index
    %c0_56 = arith.constant 0 : index
    %97 = vector.load %arg18[%c25, %c0_56] : memref<304x128xbf16, #tpu.memory_space<vmem>>, vector<256x64xbf16>
    %c0_i32_57 = arith.constant 0 : i32
    %98 = arith.sitofp %c0_i32_57 : i32 to bf16
    %99 = vector.broadcast %98 : bf16 to vector<256x64xbf16>
    %100 = arith.select %67, %97, %99 : vector<256x64xi1>, vector<256x64xbf16>
    %c0_58 = arith.constant 0 : index
    %c640 = arith.constant 640 : index
    %101 = vector.load %arg19[%c0_58, %c640] : memref<256x1152xbf16, #tpu.memory_space<vmem>>, vector<256x64xbf16>
    tpu.vector_store %arg19[%c0_58, %c640], %100 {strides = array<i32>} : memref<256x1152xbf16, #tpu.memory_space<vmem>>, vector<256x64xbf16>,
    %c39 = arith.constant 39 : index
    %c0_59 = arith.constant 0 : index
    %102 = vector.load %arg18[%c39, %c0_59] : memref<304x128xbf16, #tpu.memory_space<vmem>>, vector<256x64xbf16>
    %c0_i32_60 = arith.constant 0 : i32
    %103 = arith.sitofp %c0_i32_60 : i32 to bf16
    %104 = vector.broadcast %103 : bf16 to vector<256x64xbf16>
    %105 = arith.select %65, %102, %104 : vector<256x64xi1>, vector<256x64xbf16>
    %c0_61 = arith.constant 0 : index
    %c768 = arith.constant 768 : index
    %106 = vector.load %arg19[%c0_61, %c768] : memref<256x1152xbf16, #tpu.memory_space<vmem>>, vector<256x64xbf16>
    tpu.vector_store %arg19[%c0_61, %c768], %105 {strides = array<i32>} : memref<256x1152xbf16, #tpu.memory_space<vmem>>, vector<256x64xbf16>,
    %c40 = arith.constant 40 : index
    %c0_62 = arith.constant 0 : index
    %107 = vector.load %arg18[%c40, %c0_62] : memref<304x128xbf16, #tpu.memory_space<vmem>>, vector<256x64xbf16>
    %c0_63 = arith.constant 0 : index
    %c896 = arith.constant 896 : index
    %108 = vector.load %arg19[%c0_63, %c896] : memref<256x1152xbf16, #tpu.memory_space<vmem>>, vector<256x64xbf16>
    tpu.vector_store %arg19[%c0_63, %c896], %107 {strides = array<i32>} : memref<256x1152xbf16, #tpu.memory_space<vmem>>, vector<256x64xbf16>,
    %c41 = arith.constant 41 : index
    %c0_64 = arith.constant 0 : index
    %109 = vector.load %arg18[%c41, %c0_64] : memref<304x128xbf16, #tpu.memory_space<vmem>>, vector<256x64xbf16>
    %c0_i32_65 = arith.constant 0 : i32
    %110 = arith.sitofp %c0_i32_65 : i32 to bf16
    %111 = vector.broadcast %110 : bf16 to vector<256x64xbf16>
    %112 = arith.select %67, %109, %111 : vector<256x64xi1>, vector<256x64xbf16>
    %c0_66 = arith.constant 0 : index
    %c1024 = arith.constant 1024 : index
    %113 = vector.load %arg19[%c0_66, %c1024] : memref<256x1152xbf16, #tpu.memory_space<vmem>>, vector<256x64xbf16>
    tpu.vector_store %arg19[%c0_66, %c1024], %112 {strides = array<i32>} : memref<256x1152xbf16, #tpu.memory_space<vmem>>, vector<256x64xbf16>,
    %c0_67 = arith.constant 0 : index
    %c0_68 = arith.constant 0 : index
    %114 = vector.load %arg19[%c0_67, %c0_68] : memref<256x1152xbf16, #tpu.memory_space<vmem>>, vector<256x1152xbf16>
    %c0_69 = arith.constant 0 : index
    %c0_70 = arith.constant 0 : index
    %115 = vector.load %arg7[%c0_69, %c0_70] : memref<1152x128xbf16, #tpu.memory_space<vmem>>, vector<1152x128xbf16>
    %cst_71 = arith.constant dense<0.000000e+00> : vector<256x128xf32>
    %116 = tpu.matmul %114, %115, %cst_71 {dimension_numbers = #tpu.dot_dimension_numbers<[1], [0], [0], [1], [0, 0, 1, 1], [], []>} : vector<256x1152xbf16>, vector<1152x128xbf16>, vector<256x128xf32> -> vector<256x128xf32>
    %117 = vector.broadcast %61 : vector<1x128xf32> to vector<256x128xf32>
    %118 = arith.addf %116, %117 : vector<256x128xf32>
    %c0_72 = arith.constant 0 : index
    %c0_73 = arith.constant 0 : index
    %c0_74 = arith.constant 0 : index
    %119 = vector.load %arg2[%c0_72, %c0_73, %c0_74] : memref<1x1x128xf32, #tpu.memory_space<vmem>>, vector<1x1x128xf32>
    %120 = vector.shape_cast %119 : vector<1x1x128xf32> to vector<1x128xf32>
    %121 = vector.broadcast %120 : vector<1x128xf32> to vector<256x128xf32>
    %122 = arith.addf %118, %121 : vector<256x128xf32>
    %c0_75 = arith.constant 0 : index
    %c0_76 = arith.constant 0 : index
    %123 = vector.load %arg9[%c0_75, %c0_76] : memref<1x128xf32, #tpu.memory_space<vmem>>, vector<1x128xf32>
    %c0_77 = arith.constant 0 : index
    %c0_78 = arith.constant 0 : index
    %124 = vector.load %arg10[%c0_77, %c0_78] : memref<1x128xf32, #tpu.memory_space<vmem>>, vector<1x128xf32>
    %c0_79 = arith.constant 0 : index
    %c0_80 = arith.constant 0 : index
    %125 = vector.load %arg11[%c0_79, %c0_80] : memref<128x32xf32, #tpu.memory_space<vmem>>, vector<128x32xf32>
    %c0_81 = arith.constant 0 : index
    %c0_82 = arith.constant 0 : index
    %126 = vector.load %arg12[%c0_81, %c0_82] : memref<32x128xf32, #tpu.memory_space<vmem>>, vector<32x128xf32>
    %cst_83 = arith.constant dense<0.000000e+00> : vector<128xf32>
    %127 = vector.multi_reduction <add>, %122, %cst_83 [0] : vector<256x128xf32> to vector<128xf32>
    %128 = vector.shape_cast %127 : vector<128xf32> to vector<1x128xf32>
    %cst_84 = arith.constant dense<0.000000e+00> : vector<1x32xf32>
    %129 = tpu.matmul %128, %125, %cst_84 {dimension_numbers = #tpu.dot_dimension_numbers<[1], [0], [0], [1], [0, 0, 1, 1], [], []>} : vector<1x128xf32>, vector<128x32xf32>, vector<1x32xf32> -> vector<1x32xf32>
    %cst_85 = arith.constant 1.024000e+03 : f32
    %130 = vector.broadcast %cst_85 : f32 to vector<1x32xf32>
    %131 = arith.divf %129, %130 : vector<1x32xf32>
    %cst_86 = arith.constant dense<0.000000e+00> : vector<1x128xf32>
    %132 = tpu.matmul %131, %126, %cst_86 {dimension_numbers = #tpu.dot_dimension_numbers<[1], [0], [0], [1], [0, 0, 1, 1], [], []>} : vector<1x32xf32>, vector<32x128xf32>, vector<1x128xf32> -> vector<1x128xf32>
    %133 = vector.broadcast %132 : vector<1x128xf32> to vector<256x128xf32>
    %134 = arith.subf %122, %133 : vector<256x128xf32>
    %135 = arith.mulf %134, %134 : vector<256x128xf32>
    %cst_87 = arith.constant dense<0.000000e+00> : vector<128xf32>
    %136 = vector.multi_reduction <add>, %135, %cst_87 [0] : vector<256x128xf32> to vector<128xf32>
    %137 = vector.shape_cast %136 : vector<128xf32> to vector<1x128xf32>
    %cst_88 = arith.constant dense<0.000000e+00> : vector<1x32xf32>
    %138 = tpu.matmul %137, %125, %cst_88 {dimension_numbers = #tpu.dot_dimension_numbers<[1], [0], [0], [1], [0, 0, 1, 1], [], []>} : vector<1x128xf32>, vector<128x32xf32>, vector<1x32xf32> -> vector<1x32xf32>
    %cst_89 = arith.constant 1.024000e+03 : f32
    %139 = vector.broadcast %cst_89 : f32 to vector<1x32xf32>
    %140 = arith.divf %138, %139 : vector<1x32xf32>
    %cst_90 = arith.constant 9.99999974E-6 : f32
    %141 = vector.broadcast %cst_90 : f32 to vector<1x32xf32>
    %142 = arith.addf %140, %141 : vector<1x32xf32>
    %143 = math.rsqrt %142 : vector<1x32xf32>
    %cst_91 = arith.constant dense<0.000000e+00> : vector<1x128xf32>
    %144 = tpu.matmul %143, %126, %cst_91 {dimension_numbers = #tpu.dot_dimension_numbers<[1], [0], [0], [1], [0, 0, 1, 1], [], []>} : vector<1x32xf32>, vector<32x128xf32>, vector<1x128xf32> -> vector<1x128xf32>
    %145 = arith.mulf %144, %123 : vector<1x128xf32>
    %146 = vector.broadcast %145 : vector<1x128xf32> to vector<256x128xf32>
    %147 = arith.mulf %134, %146 : vector<256x128xf32>
    %148 = vector.broadcast %124 : vector<1x128xf32> to vector<256x128xf32>
    %149 = arith.addf %147, %148 : vector<256x128xf32>
    %cst_92 = arith.constant 0.000000e+00 : f32
    %150 = vector.broadcast %cst_92 : f32 to vector<256x128xf32>
    %151 = arith.subf %150, %149 : vector<256x128xf32>
    %152 = math.exp %151 : vector<256x128xf32>
    %cst_93 = arith.constant 1.000000e+00 : f32
    %153 = vector.broadcast %cst_93 : f32 to vector<256x128xf32>
    %154 = arith.addf %153, %152 : vector<256x128xf32>
    %155 = tpu.reciprocal %154 {approx = true} : vector<256x128xf32> -> vector<256x128xf32>
    %156 = arith.mulf %149, %155 : vector<256x128xf32>
    %c0_94 = arith.constant 0 : index
    %c0_95 = arith.constant 0 : index
    %157 = vector.load %arg14[%c0_94, %c0_95] : memref<1x128xf32, #tpu.memory_space<vmem>>, vector<1x128xf32>
    %158 = arith.truncf %156 : vector<256x128xf32> to vector<256x128xbf16>
    %c24_96 = arith.constant 24 : index
    %c0_97 = arith.constant 0 : index
    %159 = vector.load %arg18[%c24_96, %c0_97] : memref<304x128xbf16, #tpu.memory_space<vmem>>, vector<256x128xbf16>
    tpu.vector_store %arg18[%c24_96, %c0_97], %158 {strides = array<i32>} : memref<304x128xbf16, #tpu.memory_space<vmem>>, vector<256x128xbf16>,
    %160 = vector.shape_cast %18 : vector<256x1xi1> to vector<256x1xi1>
    %161 = vector.broadcast %160 : vector<256x1xi1> to vector<256x128xi1>
    %162 = vector.shape_cast %20 : vector<256x1xi1> to vector<256x1xi1>
    %163 = vector.broadcast %162 : vector<256x1xi1> to vector<256x128xi1>
    %c7_98 = arith.constant 7 : index
    %c0_99 = arith.constant 0 : index
    %164 = vector.load %arg18[%c7_98, %c0_99] : memref<304x128xbf16, #tpu.memory_space<vmem>>, vector<256x128xbf16>
    %c0_i32_100 = arith.constant 0 : i32
    %165 = arith.sitofp %c0_i32_100 : i32 to bf16
    %166 = vector.broadcast %165 : bf16 to vector<256x128xbf16>
    %167 = arith.select %161, %164, %166 : vector<256x128xi1>, vector<256x128xbf16>
    %c0_101 = arith.constant 0 : index
    %c0_102 = arith.constant 0 : index
    %168 = vector.load %arg19[%c0_101, %c0_102] : memref<256x1152xbf16, #tpu.memory_space<vmem>>, vector<256x128xbf16>
    tpu.vector_store %arg19[%c0_101, %c0_102], %167 {strides = array<i32>} : memref<256x1152xbf16, #tpu.memory_space<vmem>>, vector<256x128xbf16>,
    %c8_103 = arith.constant 8 : index
    %c0_104 = arith.constant 0 : index
    %169 = vector.load %arg18[%c8_103, %c0_104] : memref<304x128xbf16, #tpu.memory_space<vmem>>, vector<256x128xbf16>
    %c0_105 = arith.constant 0 : index
    %c128_106 = arith.constant 128 : index
    %170 = vector.load %arg19[%c0_105, %c128_106] : memref<256x1152xbf16, #tpu.memory_space<vmem>>, vector<256x128xbf16>
    tpu.vector_store %arg19[%c0_105, %c128_106], %169 {strides = array<i32>} : memref<256x1152xbf16, #tpu.memory_space<vmem>>, vector<256x128xbf16>,
    %c9_107 = arith.constant 9 : index
    %c0_108 = arith.constant 0 : index
    %171 = vector.load %arg18[%c9_107, %c0_108] : memref<304x128xbf16, #tpu.memory_space<vmem>>, vector<256x128xbf16>
    %c0_i32_109 = arith.constant 0 : i32
    %172 = arith.sitofp %c0_i32_109 : i32 to bf16
    %173 = vector.broadcast %172 : bf16 to vector<256x128xbf16>
    %174 = arith.select %163, %171, %173 : vector<256x128xi1>, vector<256x128xbf16>
    %c0_110 = arith.constant 0 : index
    %c256_111 = arith.constant 256 : index
    %175 = vector.load %arg19[%c0_110, %c256_111] : memref<256x1152xbf16, #tpu.memory_space<vmem>>, vector<256x128xbf16>
    tpu.vector_store %arg19[%c0_110, %c256_111], %174 {strides = array<i32>} : memref<256x1152xbf16, #tpu.memory_space<vmem>>, vector<256x128xbf16>,
    %c23_112 = arith.constant 23 : index
    %c0_113 = arith.constant 0 : index
    %176 = vector.load %arg18[%c23_112, %c0_113] : memref<304x128xbf16, #tpu.memory_space<vmem>>, vector<256x128xbf16>
    %c0_i32_114 = arith.constant 0 : i32
    %177 = arith.sitofp %c0_i32_114 : i32 to bf16
    %178 = vector.broadcast %177 : bf16 to vector<256x128xbf16>
    %179 = arith.select %161, %176, %178 : vector<256x128xi1>, vector<256x128xbf16>
    %c0_115 = arith.constant 0 : index
    %c384_116 = arith.constant 384 : index
    %180 = vector.load %arg19[%c0_115, %c384_116] : memref<256x1152xbf16, #tpu.memory_space<vmem>>, vector<256x128xbf16>
    tpu.vector_store %arg19[%c0_115, %c384_116], %179 {strides = array<i32>} : memref<256x1152xbf16, #tpu.memory_space<vmem>>, vector<256x128xbf16>,
    %c24_117 = arith.constant 24 : index
    %c0_118 = arith.constant 0 : index
    %181 = vector.load %arg18[%c24_117, %c0_118] : memref<304x128xbf16, #tpu.memory_space<vmem>>, vector<256x128xbf16>
    %c0_119 = arith.constant 0 : index
    %c512_120 = arith.constant 512 : index
    %182 = vector.load %arg19[%c0_119, %c512_120] : memref<256x1152xbf16, #tpu.memory_space<vmem>>, vector<256x128xbf16>
    tpu.vector_store %arg19[%c0_119, %c512_120], %181 {strides = array<i32>} : memref<256x1152xbf16, #tpu.memory_space<vmem>>, vector<256x128xbf16>,
    %c25_121 = arith.constant 25 : index
    %c0_122 = arith.constant 0 : index
    %183 = vector.load %arg18[%c25_121, %c0_122] : memref<304x128xbf16, #tpu.memory_space<vmem>>, vector<256x128xbf16>
    %c0_i32_123 = arith.constant 0 : i32
    %184 = arith.sitofp %c0_i32_123 : i32 to bf16
    %185 = vector.broadcast %184 : bf16 to vector<256x128xbf16>
    %186 = arith.select %163, %183, %185 : vector<256x128xi1>, vector<256x128xbf16>
    %c0_124 = arith.constant 0 : index
    %c640_125 = arith.constant 640 : index
    %187 = vector.load %arg19[%c0_124, %c640_125] : memref<256x1152xbf16, #tpu.memory_space<vmem>>, vector<256x128xbf16>
    tpu.vector_store %arg19[%c0_124, %c640_125], %186 {strides = array<i32>} : memref<256x1152xbf16, #tpu.memory_space<vmem>>, vector<256x128xbf16>,
    %c39_126 = arith.constant 39 : index
    %c0_127 = arith.constant 0 : index
    %188 = vector.load %arg18[%c39_126, %c0_127] : memref<304x128xbf16, #tpu.memory_space<vmem>>, vector<256x128xbf16>
    %c0_i32_128 = arith.constant 0 : i32
    %189 = arith.sitofp %c0_i32_128 : i32 to bf16
    %190 = vector.broadcast %189 : bf16 to vector<256x128xbf16>
    %191 = arith.select %161, %188, %190 : vector<256x128xi1>, vector<256x128xbf16>
    %c0_129 = arith.constant 0 : index
    %c768_130 = arith.constant 768 : index
    %192 = vector.load %arg19[%c0_129, %c768_130] : memref<256x1152xbf16, #tpu.memory_space<vmem>>, vector<256x128xbf16>
    tpu.vector_store %arg19[%c0_129, %c768_130], %191 {strides = array<i32>} : memref<256x1152xbf16, #tpu.memory_space<vmem>>, vector<256x128xbf16>,
    %c40_131 = arith.constant 40 : index
    %c0_132 = arith.constant 0 : index
    %193 = vector.load %arg18[%c40_131, %c0_132] : memref<304x128xbf16, #tpu.memory_space<vmem>>, vector<256x128xbf16>
    %c0_133 = arith.constant 0 : index
    %c896_134 = arith.constant 896 : index
    %194 = vector.load %arg19[%c0_133, %c896_134] : memref<256x1152xbf16, #tpu.memory_space<vmem>>, vector<256x128xbf16>
    tpu.vector_store %arg19[%c0_133, %c896_134], %193 {strides = array<i32>} : memref<256x1152xbf16, #tpu.memory_space<vmem>>, vector<256x128xbf16>,
    %c41_135 = arith.constant 41 : index
    %c0_136 = arith.constant 0 : index
    %195 = vector.load %arg18[%c41_135, %c0_136] : memref<304x128xbf16, #tpu.memory_space<vmem>>, vector<256x128xbf16>
    %c0_i32_137 = arith.constant 0 : i32
    %196 = arith.sitofp %c0_i32_137 : i32 to bf16
    %197 = vector.broadcast %196 : bf16 to vector<256x128xbf16>
    %198 = arith.select %163, %195, %197 : vector<256x128xi1>, vector<256x128xbf16>
    %c0_138 = arith.constant 0 : index
    %c1024_139 = arith.constant 1024 : index
    %199 = vector.load %arg19[%c0_138, %c1024_139] : memref<256x1152xbf16, #tpu.memory_space<vmem>>, vector<256x128xbf16>
    tpu.vector_store %arg19[%c0_138, %c1024_139], %198 {strides = array<i32>} : memref<256x1152xbf16, #tpu.memory_space<vmem>>, vector<256x128xbf16>,
    %c0_140 = arith.constant 0 : index
    %c0_141 = arith.constant 0 : index
    %200 = vector.load %arg19[%c0_140, %c0_141] : memref<256x1152xbf16, #tpu.memory_space<vmem>>, vector<256x1152xbf16>
    %c0_142 = arith.constant 0 : index
    %c0_143 = arith.constant 0 : index
    %201 = vector.load %arg13[%c0_142, %c0_143] : memref<1152x128xbf16, #tpu.memory_space<vmem>>, vector<1152x128xbf16>
    %cst_144 = arith.constant dense<0.000000e+00> : vector<256x128xf32>
    %202 = tpu.matmul %200, %201, %cst_144 {dimension_numbers = #tpu.dot_dimension_numbers<[1], [0], [0], [1], [0, 0, 1, 1], [], []>} : vector<256x1152xbf16>, vector<1152x128xbf16>, vector<256x128xf32> -> vector<256x128xf32>
    %203 = vector.broadcast %157 : vector<1x128xf32> to vector<256x128xf32>
    %204 = arith.addf %202, %203 : vector<256x128xf32>
    %c0_145 = arith.constant 0 : index
    %c0_146 = arith.constant 0 : index
    %205 = vector.load %arg15[%c0_145, %c0_146] : memref<64x128xbf16, #tpu.memory_space<vmem>>, vector<64x128xbf16>
    %cst_147 = arith.constant dense<0.000000e+00> : vector<256x128xf32>
    %206 = tpu.matmul %25, %205, %cst_147 {dimension_numbers = #tpu.dot_dimension_numbers<[1], [0], [0], [1], [0, 0, 1, 1], [], []>} : vector<256x64xbf16>, vector<64x128xbf16>, vector<256x128xf32> -> vector<256x128xf32>
    %c0_148 = arith.constant 0 : index
    %c0_149 = arith.constant 0 : index
    %207 = vector.load %arg16[%c0_148, %c0_149] : memref<1x128xf32, #tpu.memory_space<vmem>>, vector<1x128xf32>
    %208 = vector.broadcast %207 : vector<1x128xf32> to vector<256x128xf32>
    %209 = arith.addf %206, %208 : vector<256x128xf32>
    %210 = arith.addf %204, %209 : vector<256x128xf32>
    %211 = arith.truncf %210 : vector<256x128xf32> to vector<256x128xbf16>
    %c0_150 = arith.constant 0 : index
    %c0_151 = arith.constant 0 : index
    %c0_152 = arith.constant 0 : index
    %212 = vector.load %arg17[%c0_150, %c0_151, %c0_152] : memref<1x256x128xbf16, #tpu.memory_space<vmem>>, vector<1x256x128xbf16>
    %213 = vector.shape_cast %212 : vector<1x256x128xbf16> to vector<256x128xbf16>
    %214 = vector.shape_cast %211 : vector<256x128xbf16> to vector<1x256x128xbf16>
    tpu.vector_store %arg17[%c0_150, %c0_151, %c0_152], %214 {strides = array<i32>} : memref<1x256x128xbf16, #tpu.memory_space<vmem>>, vector<1x256x128xbf16>,
    return
  }
  func.func @transform_0(%arg0: i32) -> (i32, i32, i32) {
    %c0_i32 = arith.constant 0 : i32
    %c0_i32_0 = arith.constant 0 : i32
    %c0_i32_1 = arith.constant 0 : i32
    return %arg0, %c0_i32, %c0_i32_0 : i32, i32, i32
  }
  func.func @transform_1(%arg0: i32) -> (i32, i32, i32) {
    %c0_i32 = arith.constant 0 : i32
    %c0_i32_0 = arith.constant 0 : i32
    %c0_i32_1 = arith.constant 0 : i32
    return %arg0, %c0_i32, %c0_i32_0 : i32, i32, i32
  }
  func.func @transform_2(%arg0: i32) -> (i32, i32) {
    %c0_i32 = arith.constant 0 : i32
    %c0_i32_0 = arith.constant 0 : i32
    %c0_i32_1 = arith.constant 0 : i32
    return %c0_i32, %c0_i32_0 : i32, i32
  }
  func.func @transform_3(%arg0: i32) -> (i32, i32) {
    %c0_i32 = arith.constant 0 : i32
    %c0_i32_0 = arith.constant 0 : i32
    %c0_i32_1 = arith.constant 0 : i32
    return %c0_i32, %c0_i32_0 : i32, i32
  }
  func.func @transform_4(%arg0: i32) -> (i32, i32) {
    %c0_i32 = arith.constant 0 : i32
    %c0_i32_0 = arith.constant 0 : i32
    %c0_i32_1 = arith.constant 0 : i32
    return %c0_i32, %c0_i32_0 : i32, i32
  }
  func.func @transform_5(%arg0: i32) -> (i32, i32) {
    %c0_i32 = arith.constant 0 : i32
    %c0_i32_0 = arith.constant 0 : i32
    %c0_i32_1 = arith.constant 0 : i32
    return %c0_i32, %c0_i32_0 : i32, i32
  }
  func.func @transform_6(%arg0: i32) -> (i32, i32) {
    %c0_i32 = arith.constant 0 : i32
    %c0_i32_0 = arith.constant 0 : i32
    %c0_i32_1 = arith.constant 0 : i32
    return %c0_i32, %c0_i32_0 : i32, i32
  }
  func.func @transform_7(%arg0: i32) -> (i32, i32) {
    %c0_i32 = arith.constant 0 : i32
    %c0_i32_0 = arith.constant 0 : i32
    %c0_i32_1 = arith.constant 0 : i32
    return %c0_i32, %c0_i32_0 : i32, i32
  }
  func.func @transform_8(%arg0: i32) -> (i32, i32) {
    %c0_i32 = arith.constant 0 : i32
    %c0_i32_0 = arith.constant 0 : i32
    %c0_i32_1 = arith.constant 0 : i32
    return %c0_i32, %c0_i32_0 : i32, i32
  }
  func.func @transform_9(%arg0: i32) -> (i32, i32) {
    %c0_i32 = arith.constant 0 : i32
    %c0_i32_0 = arith.constant 0 : i32
    %c0_i32_1 = arith.constant 0 : i32
    return %c0_i32, %c0_i32_0 : i32, i32
  }
  func.func @transform_10(%arg0: i32) -> (i32, i32) {
    %c0_i32 = arith.constant 0 : i32
    %c0_i32_0 = arith.constant 0 : i32
    %c0_i32_1 = arith.constant 0 : i32
    return %c0_i32, %c0_i32_0 : i32, i32
  }
  func.func @transform_11(%arg0: i32) -> (i32, i32) {
    %c0_i32 = arith.constant 0 : i32
    %c0_i32_0 = arith.constant 0 : i32
    %c0_i32_1 = arith.constant 0 : i32
    return %c0_i32, %c0_i32_0 : i32, i32
  }
  func.func @transform_12(%arg0: i32) -> (i32, i32) {
    %c0_i32 = arith.constant 0 : i32
    %c0_i32_0 = arith.constant 0 : i32
    %c0_i32_1 = arith.constant 0 : i32
    return %c0_i32, %c0_i32_0 : i32, i32
  }
  func.func @transform_13(%arg0: i32) -> (i32, i32) {
    %c0_i32 = arith.constant 0 : i32
    %c0_i32_0 = arith.constant 0 : i32
    %c0_i32_1 = arith.constant 0 : i32
    return %c0_i32, %c0_i32_0 : i32, i32
  }
  func.func @transform_14(%arg0: i32) -> (i32, i32) {
    %c0_i32 = arith.constant 0 : i32
    %c0_i32_0 = arith.constant 0 : i32
    %c0_i32_1 = arith.constant 0 : i32
    return %c0_i32, %c0_i32_0 : i32, i32
  }
  func.func @transform_15(%arg0: i32) -> (i32, i32) {
    %c0_i32 = arith.constant 0 : i32
    %c0_i32_0 = arith.constant 0 : i32
    %c0_i32_1 = arith.constant 0 : i32
    return %c0_i32, %c0_i32_0 : i32, i32
  }
  func.func @transform_16(%arg0: i32) -> (i32, i32, i32) {
    %c0_i32 = arith.constant 0 : i32
    %c0_i32_0 = arith.constant 0 : i32
    %c0_i32_1 = arith.constant 0 : i32
    return %arg0, %c0_i32, %c0_i32_0 : i32, i32, i32
  }
}

</mosaic_0001>

<bundles_post_ra>
// kernel: tpu_custom_call.1
= control target key start
LH: loop header
LB: loop body
LE: loop exit
PB: predicated region body
PF: predicated region fallthrough
CT: control target
= control target key end

     0   :  { %s18761_s0 = inlined_call_operand.vmem [shape: bf16[2,256,64], index: 0, kind: input, shape index: {}]   ;;  %s18762_s1 = inlined_call_operand.vmem [shape: f32[2,1,128], index: 1, kind: input, shape index: {}]   ;;  %s18763_s2 = inlined_call_operand.vmem [shape: f32[1,64], index: 2, kind: input, shape index: {}]   ;;  %s18764_s3 = inlined_call_operand.vmem [shape: f32[1,64], index: 3, kind: input, shape index: {}]   ;;  %s18765_s4 = inlined_call_operand.vmem [shape: f32[64,32], index: 4, kind: input, shape index: {}]   ;;  %s18766_s5 = inlined_call_operand.vmem [shape: f32[32,64], index: 5, kind: input, shape index: {}]   ;;  %s18767_s6 = inlined_call_operand.vmem [shape: bf16[1152,128], index: 6, kind: input, shape index: {}]   ;;  %s18768_s7 = inlined_call_operand.vmem [shape: f32[1,128], index: 7, kind: input, shape index: {}]   ;;  %s18769_s8 = inlined_call_operand.hbm [shape: f32[1,128], index: 8, kind: input, shape index: {}]   ;;  %s18770_s9 = inlined_call_operand.hbm [shape: f32[1,128], index: 9, kind: input, shape index: {}]   ;;  %s18771_s10 = inlined_call_operand.vmem [shape: f32[128,32], index: 10, kind: input, shape index: {}]   ;;  %s18772_s11 = inlined_call_operand.vmem [shape: f32[32,128], index: 11, kind: input, shape index: {}]   ;;  %s18773_s12 = inlined_call_operand.hbm [shape: bf16[1152,128], index: 12, kind: input, shape index: {}]   ;;  %s18774_s13 = inlined_call_operand.vmem [shape: f32[1,128], index: 13, kind: input, shape index: {}]   ;;  %s18775_s14 = inlined_call_operand.vmem [shape: bf16[64,128], index: 14, kind: input, shape index: {}]   ;;  %s18776_s15 = inlined_call_operand.vmem [shape: f32[1,128], index: 15, kind: input, shape index: {}]   ;;  %s18777_s16 = inlined_call_operand.hbm [shape: bf16[2,256,128], index: 16, kind: output, shape index: {}]  }
   0x1   :  { %19015 = sst [smem:[#allocation67_spill]] %s18761_s0 }
   0x2   :  { %19016 = sst [smem:[#allocation68_spill]] %s18776_s15 }
   0x3   :  { %19017 = sst [smem:[#allocation69_spill]] %s18777_s16 }
   0x4   :  { %21 = vsyncpa [#allocation5], 0 }
   0x5   :  { %22 = vsyncpa [#allocation8], 0 }
   0x6   :  { %23 = vsyncpa [#allocation6], 0 }
   0x7   :  { %25 = vsyncpa [#allocation6 + $0x1], 0  ;;  %s13313_s21 = smov 0   ;;  %s13315_s22 = smov 0  }
   0x8   :  { %s13317_s23 = smov 0   ;;  %s13319_s24 = smov 0  }
   0x9 LB: > { %19018 = sst [smem:[#allocation14_spill]] %s13201_s21  ;;  %s13334_s25 = sadd.s32 4294967295, %s13213_s24   ;;  %s13213_s24 = sphi %s13319_s24, %s19464_s24   ;;  %s13209_s23 = sphi %s13317_s23, %s19466_s23   ;;  %s13205_s22 = sphi %s13315_s22, %s19468_s22   ;;  %s13201_s21 = sphi %s13313_s21, %s19467_s21  }
   0xa   : > { %19019 = sst [smem:[#allocation15_spill]] %s13209_s23  ;;  %s10599_s26 = sadd.s32 4294967294, %s13213_s24  }
   0xb   : > { %19020 = sst [smem:[#allocation16_spill]] %s13213_s24  ;;  %s13338_s27 = sadd.s32 1, %s13213_s24  }
   0xc   : > { %19021 = sst [smem:[#allocation17_spill]] %s13338_s27  ;;  %s384_s28 = sadd.s32 1, %s13209_s23 }
   0xd   : > { %s381_s29 = ssub.s32 %s13213_s24, %s13338_s27  ;;  %p394_p0 = scmp.ne.s32.totalorder %s13209_s23, %s13205_s22 }
   0xe   : > { %p382_p1 = scmp.eq.s32.totalorder %s381_s29, 0  ;;  %p395_p2 = scmp.eq.s32.totalorder %s13334_s25, 1 }
   0xf   : > { %p400_p3 = scmp.ne.s32.totalorder %s13205_s22, %s13201_s21  ;;  %p401_p4 = scmp.eq.s32.totalorder %s10599_s26, 1 }
  0x10   : > { %s13349_s30 = scalar_select %p382_p1, %s13209_s23, %s384_s28  }
  0x11   : > { %p13351_p5 = por %p395_p2, %p394_p0  ;;  %p13355_p6 = por %p401_p4, %p400_p3 }
  0x12   : > { %19022 = sst [smem:[#allocation18_spill]] %s13349_s30  ;;  %p10600_p7 = scmp.ge.s32.totalorder %s13213_s24, 1 }
  0x13   : > { %s19023_s0 = scalar_select %p13351_p5, 1, 0 }
  0x14   : > { %s19025_s17 = scalar_select %p13355_p6, 1, 0 }
  0x15   : > { %19024 = sst [smem:[#allocation19_spill]] %s19023_s0  ;;  %p408_p8 = scmp.lt.s32.totalorder %s13213_s24, 3 }
  0x16   : > { %19026 = sst [smem:[#allocation20_spill]] %s19025_s17  ;;  %p18785_p9 = scmp.eq.s32.totalorder %s13334_s25, 0 }
  0x17   : > { %p13362_p10 = pnand %p10600_p7, %p408_p8  ;;  %s13215_s19 = smov [#allocation7]  }
  0x18   : > { %s450_s20 = sshll.u32 %s13215_s19, 4  ;;  %s13216_s26 = smov [#allocation4]   ;;  %s451_s20 = int_to_ptr.vmem [resolvable:$true] %s450_s20 }
  0x19   : > { %s19027_s18 = scalar_select %p13362_p10, 1, 0 }
  0x1a   : > { %p12548_p11 = pneg %p13362_p10  ;;  %s439_s28 = sshll.u32 %s13216_s26, 4  ;;  %s13374_s28 = int_to_ptr.vmem [resolvable:$true] %s439_s28 }
  0x1b   : > { %s13217_s30 = smov [#allocation9]   ;;  %s13059_s19 = scalar_lea.hbm %s18770_s9, 16 }
  0x1c   : > { %p13370_p12 = pnand %p18785_p9, %p12548_p11  ;;  %s466_s23 = sshll.u32 %s13217_s30, 4  ;;  %s13376_s23 = int_to_ptr.vmem [resolvable:$true] %s466_s23 }
  0x1d   : > { %p13060_p13 = scmp.ne.s32.totalorder %s18770_s9, %s13059_s19  ;;  %p13066_p3 = scmp.lt.u32.totalorder %s13059_s19, %s18770_s9 }
  0x1e   : > { %p13386_p0 = pneg %p13370_p12 }
  0x20   : > { %p13062_p1 = pnand %p13386_p0, %p13060_p13 }
  0x22   : > { %p13063_p2 = pneg %p13062_p1 }
  0x24   : > { %p13068_p4 = pnand %p13066_p3, %p13063_p2 }
  0x26   : > { %13071 = shalt.err (!%p13068_p4)
}
  0x27   : > { %s13072_s27 = scalar_lea.vmem %s451_s20, 16  ;;  %s13079_s21 = scalar_lea.vmem %s451_s20, 32 }
  0x28   : > { %p13073_p7 = scmp.ne.s32.totalorder %s451_s20, %s13072_s27  ;;  %p13080_p9 = scmp.lt.s32.totalorder %s451_s20, %s451_s20 }
  0x29   : > { %p13081_p6 = scmp.lt.s32.totalorder %s13079_s21, %s13072_s27 }
  0x2a   : > { %p13075_p8 = pnand %p13073_p7, %p13386_p0 }
  0x2b   : > { %p13082_p5 = por %p13081_p6, %p13080_p9 }
  0x2c   : > { %p13076_p11 = pneg %p13075_p8 }
  0x2e   : > { %p13083_p10 = pnand %p13082_p5, %p13076_p11 }
  0x30   : > { %13086 = shalt.err (!%p13083_p10)
}
  0x31   : > { %12554 = dma.hbm_to_vmem [thread:$0]  (!%p13370_p12), %s18770_s9, 16, %s451_s20, [#allocation8]  }
  0x32   : > { %s13087_s30 = scalar_lea.hbm %s18769_s8, 16 }
  0x33   : > { %p13088_p13 = scmp.ne.s32.totalorder %s18769_s8, %s13087_s30  ;;  %p13094_p5 = scmp.lt.u32.totalorder %s13087_s30, %s18769_s8 }
  0x35   : > { %p13090_p1 = pnand %p13088_p13, %p13386_p0 }
  0x37   : > { %p13091_p6 = pneg %p13090_p1 }
  0x39   : > { %p13096_p9 = pnand %p13094_p5, %p13091_p6 }
  0x3b   : > { %13099 = shalt.err (!%p13096_p9)
}
  0x3c   : > { %s13100_s20 = scalar_lea.vmem %s13374_s28, 16  ;;  %s13107_s15 = scalar_lea.vmem %s13374_s28, 32 }
  0x3d   : > { %p13101_p10 = scmp.ne.s32.totalorder %s13374_s28, %s13100_s20  ;;  %p13108_p4 = scmp.lt.s32.totalorder %s13374_s28, %s13374_s28 }
  0x3e   : > { %p13109_p7 = scmp.lt.s32.totalorder %s13107_s15, %s13100_s20 }
  0x3f   : > { %p13103_p2 = pnand %p13101_p10, %p13386_p0 }
  0x40   : > { %p13110_p8 = por %p13109_p7, %p13108_p4 }
  0x41   : > { %p13104_p3 = pneg %p13103_p2 }
  0x43   : > { %p13111_p11 = pnand %p13110_p8, %p13104_p3 }
  0x45   : > { %13114 = shalt.err (!%p13111_p11)
}
  0x46   : > { %12551 = dma.hbm_to_vmem [thread:$0]  (!%p13370_p12), %s18769_s8, 16, %s13374_s28, [#allocation5]  }
  0x47   : > { %s13115_s19 = scalar_lea.hbm %s18773_s12, 9216 }
  0x48   : > { %p13116_p13 = scmp.ne.s32.totalorder %s18773_s12, %s13115_s19  ;;  %p13122_p5 = scmp.lt.u32.totalorder %s13115_s19, %s18773_s12 }
  0x4a   : > { %p13118_p1 = pnand %p13116_p13, %p13386_p0 }
  0x4c   : > { %p13119_p6 = pneg %p13118_p1 }
  0x4e   : > { %p13124_p9 = pnand %p13122_p5, %p13119_p6 }
  0x50   : > { %13127 = shalt.err (!%p13124_p9)
}
  0x51   : > { %s13128_s28 = scalar_lea.vmem %s13376_s23, 9216  ;;  %p13136_p4 = scmp.lt.s32.totalorder %s13376_s23, %s13376_s23 }
  0x52   : > { %p13129_p10 = scmp.ne.s32.totalorder %s13376_s23, %s13128_s28  ;;  %p13137_p7 = scmp.lt.s32.totalorder %s13128_s28, %s13128_s28 }
  0x54   : > { %p13131_p2 = pnand %p13129_p10, %p13386_p0  ;;  %p13138_p8 = por %p13137_p7, %p13136_p4 }
  0x56   : > { %p13132_p3 = pneg %p13131_p2 }
  0x58   : > { %p13139_p11 = pnand %p13138_p8, %p13132_p3 }
  0x5a   : > { %13142 = shalt.err (!%p13139_p11)
}
  0x5b   : > { %s13218_s15 = smov 64   ;;  %s13219_s0 = smov 4  }
  0x5c   : > { %12557 = dma.hbm_to_vmem [thread:$0]  (!%p13370_p12), %s18773_s12, 9216, %s13376_s23, [#allocation8], %s13218_s15, %s13218_s15, %s13219_s0  }
  0x5d   : > { %p19030_p13 = scmp.ne.s32.totalorder %s19027_s18, 0 }
  0x5f   : > { %505 = sbr.rel (%p19030_p13) target bundleno = 3472 (0xd90), region = 84 }
  0x66   : > { %p19031_p0 = scmp.eq.s32.totalorder %s13334_s25, 0 }
  0x68   : > { %13188 = dma.done.wait (%p19031_p0), [#allocation5], 16   ;;  %p19032_p1 = pmov %p19031_p0 }
  0x69   : > { %p19033_p6 = pmov %p19031_p0 }
  0x6a   : > { %13190 = vsyncadd (%p19032_p1), [#allocation5], 4294967280 }
  0x6b   : > { %13192 = dma.done.wait (%p19033_p6), [#allocation8], 9232   ;;  %p19034_p5 = pmov %p19031_p0 }
  0x6c   : > { %p566_p9 = scmp.lt.s32.totalorder %s13334_s25, 1  ;;  %v18830_v0 = vmov 0.0|0.0   ;;  %vm18871_vm0 = vmmov 0   ;;  %v18820_v1 = vmov 0.0   ;;  %s19035_s16 = sld [smem:[#allocation67_spill]]  ;;  %v1128_v2 = vld [vmem:[%s18765_s4] sm:$0xff] }
  0x6d   : > { %13194 = vsyncadd (%p19034_p5), [#allocation8], 4294958064  ;;  %12326 = vmatprep.subr.bf16.mxu0 %v18830_v0  ;;  %12054 = vmatprep.mubr.msk.f32.mxu0 %vm18871_vm0, %v18820_v1  ;;  %v1129_v3 = vld [vmem:[%s18765_s4 + $0x8] sm:$0xff]  ;;  %v1130_v4 = vld [vmem:[%s18765_s4 + $0x10] sm:$0xff]  ;;  %vm1140_vm1 = vcmask 523264   ;;  %vm18870_vm2 = vcmask 261120  }
  0x6e   : > { %s13464_s23 = scalar_select %p566_p9, %s13334_s25, 1  ;;  %12338 = vmatprep.subr.bf16.mxu1 %v18830_v0  ;;  %12065 = vmatprep.mubr.msk.f32.mxu1 %vm18871_vm0, %v18820_v1  ;;  %v13484_v5 = vpack.c.bf16 %v1129_v3, %v1128_v2  ;;  %v1131_v6 = vld [vmem:[%s18765_s4 + $0x18] sm:$0xff]  ;;  %v1132_v7 = vld [vmem:[%s18765_s4 + $0x20] sm:$0xff]  ;;  %v1133_v8 = vld [vmem:[%s18765_s4 + $0x28] sm:$0xff]  ;;  %vm13224_vm7 = vmmov 1   ;;  %vm2141_vm14 = vcmask 1048064  }
  0x6f   : > { %v13495_v9 = vpack.c.bf16 %v1131_v6, %v1130_v4  ;;  %v1134_v10 = vld [vmem:[%s18765_s4 + $0x30] sm:$0xff]  ;;  %v1135_v11 = vld [vmem:[%s18765_s4 + $0x38] sm:$0xff]  ;;  %v13507_v13 = vpack.c.bf16 %v1133_v8, %v1132_v7  ;;  %vm2304_vm8 = vmpackc.low %vm13224_vm7, %vm13224_vm7  ;;  %s19455_s0 = sld [smem:[#allocation68_spill]]  ;;  %s10906_s29 = sshll.u32 %s13334_s25, 11 }
  0x70   : > { %s10873_s18 = sshll.u32 %s13464_s23, 7  ;;  %12328 = vmatpush3.bf16.msra.mxu0 %v13484_v5  ;;  %v13509_v14 = vpack.c.bf16 %v1135_v11, %v1134_v10  ;;  %s573_s30 = scalar_lea.vmem %s18762_s1, %s13464_s23 }
  0x71   : > { %12329 = vmatprep.subr.bf16.mxu0 %v18830_v0  ;;  %s19457_s23 = sld [smem:[#allocation69_spill]]  ;;  %s13225_s28 = smov [#allocation10]  }
  0x72   : > { %s13473_s19 = scalar_lea.vmem %s19035_s16, %s10873_s18  ;;  %s19456_s18 = sld [smem:[#allocation19_spill]] }
  0x73   : > { %v13504_v12 = vld [vmem:[%s13473_s19] sm:$0xff]   ;;  %v13512_v15 = vld [vmem:[%s13473_s19 + $0x8] sm:$0xff]   ;;  %v13515_v16 = vld [vmem:[%s13473_s19 + $0x10] sm:$0xff]   ;;  %s13147_s15 = sshll.u32 %s13225_s28, 4  ;;  %s13148_s15 = int_to_ptr.vmem [resolvable:$false] %s13147_s15 }
  0x74   : > { %v13518_v17 = vld [vmem:[%s13473_s19 + $0x18] sm:$0xff]   ;;  %v18819_v18 = vunpack.c.l.bf16 %v13504_v12  ;;  %v18817_v19 = vunpack.c.h.bf16 %v13504_v12  ;;  %v13524_v20 = vld [vmem:[%s13473_s19 + $0x20] sm:$0xff]   ;;  %v13527_v21 = vld [vmem:[%s13473_s19 + $0x28] sm:$0xff]   ;;  %v18816_v23 = vunpack.c.l.bf16 %v13512_v15  ;;  %v18815_v24 = vunpack.c.h.bf16 %v13512_v15  ;;  %12331 = vmatpush3.bf16.msra.mxu0 %v13495_v9 }
  0x75   : > { %v13530_v22 = vld [vmem:[%s13473_s19 + $0x30] sm:$0xff]   ;;  %v18812_v25 = vunpack.c.l.bf16 %v13515_v16  ;;  %v18790_v26 = vunpack.c.h.bf16 %v13515_v16  ;;  %v13537_v27 = vld [vmem:[%s13473_s19 + $0x38] sm:$0xff]   ;;  %v13540_v28 = vld [vmem:[%s13473_s19 + $0x40] sm:$0xff]   ;;  %v18791_v30 = vunpack.c.l.bf16 %v13518_v17  ;;  %v18792_v31 = vunpack.c.h.bf16 %v13518_v17  ;;  %12332 = vmatprep.subr.bf16.mxu0 %v18830_v0 }
  0x76   : > { %v13543_v29 = vld [vmem:[%s13473_s19 + $0x48] sm:$0xff]   ;;  %v18811_v32 = vunpack.c.l.bf16 %v13524_v20  ;;  %v18794_v33 = vunpack.c.h.bf16 %v13524_v20  ;;  %v13550_v34 = vld [vmem:[%s13473_s19 + $0x50] sm:$0xff]   ;;  %v13553_v35 = vld [vmem:[%s13473_s19 + $0x58] sm:$0xff]   ;;  %v18793_v37 = vunpack.c.l.bf16 %v13527_v21  ;;  %v18795_v38 = vunpack.c.h.bf16 %v13527_v21 }
  0x77   : > { %v13556_v36 = vld [vmem:[%s13473_s19 + $0x60] sm:$0xff]   ;;  %v18796_v39 = vunpack.c.l.bf16 %v13530_v22  ;;  %v18797_v40 = vunpack.c.h.bf16 %v13530_v22  ;;  %v13564_v41 = vld [vmem:[%s13473_s19 + $0x68] sm:$0xff]   ;;  %v13567_v42 = vld [vmem:[%s13473_s19 + $0x70] sm:$0xff]   ;;  %v18798_v43 = vunpack.c.l.bf16 %v13537_v27  ;;  %v18802_v44 = vunpack.c.h.bf16 %v13537_v27  ;;  %s19458_s27 = smov %s19457_s23  ;;  %s18712_s21 = scalar_lea.hbm %s19457_s23, %s10906_s29 }
  0x78   : > { %19036 = vst [vmem:[#allocation21_spill] sm:$0xff] %v13564_v41  ;;  %19037 = vst [vmem:[#allocation22_spill] sm:$0xff] %v13567_v42  ;;  %v18801_v45 = vunpack.c.l.bf16 %v13540_v28  ;;  %v18799_v46 = vunpack.c.h.bf16 %v13540_v28  ;;  %v13575_v47 = vld [vmem:[%s13473_s19 + $0x78] sm:$0xff]   ;;  %v18800_v48 = vunpack.c.l.bf16 %v13543_v29  ;;  %v18803_v49 = vunpack.c.h.bf16 %v13543_v29  ;;  %12334 = vmatpush3.bf16.msra.mxu0 %v13507_v13  ;;  %p19459_p10 = scmp.ne.s32.totalorder %s19456_s18, 0 }
  0x79   : > { %19038 = vst [vmem:[#allocation23_spill] sm:$0xff] %v13575_v47  ;;  %v18804_v50 = vunpack.c.l.bf16 %v13550_v34  ;;  %v18805_v51 = vunpack.c.h.bf16 %v13550_v34  ;;  %v18809_v52 = vunpack.c.l.bf16 %v13553_v35  ;;  %v18808_v53 = vunpack.c.h.bf16 %v13553_v35  ;;  %12335 = vmatprep.subr.bf16.mxu0 %v18830_v0 }
  0x7a   : > { %v18806_v54 = vunpack.c.l.bf16 %v13556_v36  ;;  %v18807_v55 = vunpack.c.h.bf16 %v13556_v36  ;;  %v18810_v56 = vunpack.c.l.bf16 %v13564_v41  ;;  %v18813_v57 = vunpack.c.h.bf16 %v13564_v41 }
  0x7b   : > { %v18814_v58 = vunpack.c.l.bf16 %v13567_v42  ;;  %v18818_v59 = vunpack.c.h.bf16 %v13567_v42  ;;  %v18822_v60 = vunpack.c.l.bf16 %v13575_v47  ;;  %v18829_v61 = vunpack.c.h.bf16 %v13575_v47 }
  0x7c   : > { %v1141_v62 = vsel %vm1140_vm1, %v18819_v18, 0.0  ;;  %v1142_v63 = vsel %vm1140_vm1, %v18817_v19, 0.0  ;;  %v1144_v3 = vsel %vm1140_vm1, %v18816_v23, 0.0  ;;  %v1146_v4 = vsel %vm1140_vm1, %v18815_v24, 0.0  ;;  %12337 = vmatpush3.bf16.msra.mxu0 %v13509_v14 }
  0x7d   : > { %v1143_v2 = vadd.f32 %v1142_v63, %v1141_v62  ;;  %v1148_v6 = vsel %vm1140_vm1, %v18812_v25, 0.0  ;;  %v1150_v7 = vsel %vm1140_vm1, %v18790_v26, 0.0  ;;  %v1152_v8 = vsel %vm1140_vm1, %v18791_v30, 0.0  ;;  %12356 = vmatprep.subr.bf16.mxu0 %v18830_v0 }
  0x7e   : > { %v1154_v10 = vsel %vm1140_vm1, %v18792_v31, 0.0  ;;  %v1156_v11 = vsel %vm1140_vm1, %v18811_v32, 0.0  ;;  %v1158_v63 = vsel %vm1140_vm1, %v18794_v33, 0.0  ;;  %v1160_v26 = vsel %vm1140_vm1, %v18793_v37, 0.0 }
  0x7f   : > { %v1145_v62 = vadd.f32 %v1144_v3, %v1143_v2  ;;  %v1162_v30 = vsel %vm1140_vm1, %v18795_v38, 0.0  ;;  %v1164_v31 = vsel %vm1140_vm1, %v18796_v39, 0.0  ;;  %v1166_v2 = vsel %vm1140_vm1, %v18797_v40, 0.0 }
  0x80   : > { %v1168_v3 = vsel %vm1140_vm1, %v18798_v43, 0.0  ;;  %v1170_v37 = vsel %vm1140_vm1, %v18802_v44, 0.0  ;;  %v1172_v38 = vsel %vm1140_vm1, %v18801_v45, 0.0  ;;  %v1174_v39 = vsel %vm1140_vm1, %v18799_v46, 0.0  ;;  %v1136_v43 = vld [vmem:[%s18766_s5] sm:$0xff] }
  0x81   : > { %v1147_v33 = vadd.f32 %v1146_v4, %v1145_v62  ;;  %v1176_v40 = vsel %vm1140_vm1, %v18800_v48, 0.0  ;;  %v1178_v4 = vsel %vm1140_vm1, %v18803_v49, 0.0  ;;  %v1180_v62 = vsel %vm1140_vm1, %v18804_v50, 0.0 }
  0x82   : > { %v1182_v46 = vsel %vm1140_vm1, %v18805_v51, 0.0  ;;  %v1184_v48 = vsel %vm1140_vm1, %v18809_v52, 0.0  ;;  %v1186_v44 = vsel %vm1140_vm1, %v18808_v53, 0.0  ;;  %v1188_v49 = vsel %vm1140_vm1, %v18806_v54, 0.0  ;;  %v1137_v51 = vld [vmem:[%s18766_s5 + $0x8] sm:$0xff] }
  0x83   : > { %v1149_v45 = vadd.f32 %v1148_v6, %v1147_v33  ;;  %v1190_v50 = vsel %vm1140_vm1, %v18807_v55, 0.0  ;;  %v1192_v33 = vsel %vm1140_vm1, %v18810_v56, 0.0  ;;  %v1194_v6 = vsel %vm1140_vm1, %v18813_v57, 0.0 }
  0x84   : > { %v1196_v54 = vsel %vm1140_vm1, %v18814_v58, 0.0  ;;  %v1198_v55 = vsel %vm1140_vm1, %v18818_v59, 0.0  ;;  %v1200_v52 = vsel %vm1140_vm1, %v18822_v60, 0.0  ;;  %v1202_v56 = vsel %vm1140_vm1, %v18829_v61, 0.0 }
  0x85   : > { %v1151_v53 = vadd.f32 %v1150_v7, %v1149_v45  ;;  %v12339_v32 = vpack.c.bf16 %v1137_v51, %v1136_v43 }
  0x87   : > { %v1153_v25 = vadd.f32 %v1152_v8, %v1151_v53  ;;  %12340 = vmatpush3.bf16.msra.mxu1 %v12339_v32 }
  0x88   : > { %12341 = vmatprep.subr.bf16.mxu1 %v18830_v0 }
  0x89   : > { %v1155_v57 = vadd.f32 %v1154_v10, %v1153_v25 }
  0x8b   : > { %v1157_v58 = vadd.f32 %v1156_v11, %v1155_v57 }
  0x8d   : > { %v1159_v24 = vadd.f32 %v1158_v63, %v1157_v58  ;;  %v19046_v63 = vunpack.c.h.bf16 %v13515_v16 }
  0x8f   : > { %v1161_v23 = vadd.f32 %v1160_v26, %v1159_v24 }
  0x91   : > { %v1163_v19 = vadd.f32 %v1162_v30, %v1161_v23 }
  0x93   : > { %v1165_v59 = vadd.f32 %v1164_v31, %v1163_v19 }
  0x95   : > { %v1167_v45 = vadd.f32 %v1166_v2, %v1165_v59 }
  0x97   : > { %v1169_v7 = vadd.f32 %v1168_v3, %v1167_v45 }
  0x99   : > { %v1171_v18 = vadd.f32 %v1170_v37, %v1169_v7  ;;  %v19039_v37 = vmov 0.0  }
  0x9b   : > { %v1173_v1 = vadd.f32 %v1172_v38, %v1171_v18  ;;  %v1138_v38 = vld [vmem:[%s18766_s5 + $0x10] sm:$0xff] }
  0x9d   : > { %v1175_v60 = vadd.f32 %v1174_v39, %v1173_v1  ;;  %v1139_v39 = vld [vmem:[%s18766_s5 + $0x18] sm:$0xff] }
  0x9f   : > { %v1177_v42 = vadd.f32 %v1176_v40, %v1175_v60  ;;  %v12342_v40 = vpack.c.bf16 %v1139_v39, %v1138_v38 }
  0xa1   : > { %v1179_v47 = vadd.f32 %v1178_v4, %v1177_v42  ;;  %12343 = vmatpush3.bf16.msra.mxu1 %v12342_v40 }
  0xa2   : > { %12344 = vmatprep.subr.bf16.mxu1 %v18830_v0 }
  0xa3   : > { %v1181_v41 = vadd.f32 %v1180_v62, %v1179_v47 }
  0xa5   : > { %v1183_v61 = vadd.f32 %v1182_v46, %v1181_v41 }
  0xa7   : > { %v1185_v43 = vadd.f32 %v1184_v48, %v1183_v61 }
  0xa9   : > { %v1187_v51 = vadd.f32 %v1186_v44, %v1185_v43  ;;  %v577_v44 = vlaneseq  ;;  %v19048_v43 = vunpack.c.h.bf16 %v13518_v17 }
  0xab   : > { %v1189_v53 = vadd.f32 %v1188_v49, %v1187_v51  ;;  %v13719_v46 = vshrl.u32 %v577_v44, 7 }
  0xad   : > { %v1191_v25 = vadd.f32 %v1190_v50, %v1189_v53  ;;  %v13722_v48 = vsub.s32 0, %v13719_v46 }
  0xaf   : > { %v1193_v8 = vadd.f32 %v1192_v33, %v1191_v25  ;;  %19040 = vst [vmem:[#allocation24_spill] sm:$0xff] %v13722_v48  ;;  %v19047_v33 = vunpack.c.l.bf16 %v13518_v17  ;;  %v19050_v17 = vunpack.c.h.bf16 %v13524_v20 }
  0xb1   : > { %v1195_v10 = vadd.f32 %v1194_v6, %v1193_v8 }
  0xb3   : > { %v1197_v57 = vadd.f32 %v1196_v54, %v1195_v10  ;;  %v19049_v10 = vunpack.c.l.bf16 %v13524_v20  ;;  %v19052_v20 = vunpack.c.h.bf16 %v13527_v21 }
  0xb5   : > { %v1199_v58 = vadd.f32 %v1198_v55, %v1197_v57  ;;  %v19044_v55 = vunpack.c.h.bf16 %v13512_v15 }
  0xb7   : > { %v1201_v24 = vadd.f32 %v1200_v52, %v1199_v58  ;;  %v19043_v52 = vunpack.c.l.bf16 %v13512_v15 }
  0xb9   : > { %v1203_v23 = vadd.f32 %v1202_v56, %v1201_v24 }
  0xbb   : > { %v1204_v19 = vrot.slane %v1203_v23, 4 }
  0xbd   : > { %v1205_v26 = vadd.f32 %v1204_v19, %v1203_v23 }
  0xbf   : > { %v1206_v30 = vrot.slane %v1205_v26, 2 }
  0xc1   : > { %v1207_v31 = vadd.f32 %v1206_v30, %v1205_v26 }
  0xc3   : > { %v1208_v18 = vrot.slane %v1207_v31, 1 }
  0xc5   : > { %v1209_v1 = vadd.f32 %v1208_v18, %v1207_v31  ;;  %v19051_v18 = vunpack.c.l.bf16 %v13527_v21  ;;  %v19054_v21 = vunpack.c.h.bf16 %v13530_v22 }
  0xc7   : > { %12055 = vmatmul.mubr.msk.f32.vlgmr.msra.gmra.mrb[0].mxu0 %vm1140_vm1, %v1209_v1 }
  0xc8   : > { %12358 = vmatpush3.bf16.msra.mxu0 %v12339_v32  ;;  %12095 = vmatprep.mubr.msk.f32.mxu0 %vm18871_vm0, %v19039_v37 }
  0xc9   : > { %12359 = vmatprep.subr.bf16.mxu0 %v18830_v0 }
  0xcc   : > { %12361 = vmatpush3.bf16.msra.mxu0 %v12342_v40 }
 0x19a   : > { %v1279_v41 = vpop.f32.mrb[0].mxu0 }
 0x19b   : > { %v1284_v32 = vmul.f32 0.001953125, %v1279_v41  ;;  %v12056_v42 = vpop.f32.mrb[1].mxu0 }
 0x19d   : > { %12066 = vmatmul.mubr.msk.f32.vlgmr.msra.gmra.mrb[0].mxu1 %vm18870_vm2, %v1284_v32 }
 0x19e   : > { %12346 = vmatpush3.bf16.msra.mxu1 %v13484_v5  ;;  %12084 = vmatprep.mubr.msk.f32.mxu1 %vm18871_vm0, %v19039_v37 }
 0x19f   : > { %12347 = vmatprep.subr.bf16.mxu1 %v18830_v0 }
 0x1a2   : > { %12349 = vmatpush3.bf16.msra.mxu1 %v13495_v9  ;;  %v19041_v9 = vunpack.c.l.bf16 %v13504_v12 }
 0x1a3   : > { %12350 = vmatprep.subr.bf16.mxu1 %v18830_v0 }
 0x1a6   : > { %12352 = vmatpush3.bf16.msra.mxu1 %v13507_v13  ;;  %v19042_v13 = vunpack.c.h.bf16 %v13504_v12  ;;  %v19045_v12 = vunpack.c.l.bf16 %v13515_v16 }
 0x1a7   : > { %12353 = vmatprep.subr.bf16.mxu1 %v18830_v0 }
 0x1aa   : > { %12355 = vmatpush3.bf16.msra.mxu1 %v13509_v14 }
 0x270   : > { %v1355_v47 = vpop.f32.mrb[0].mxu1 }
 0x271   : > { %v12067_v5 = vpop.f32.mrb[1].mxu1  ;;  %v13725_v49 = vrot.slane %v1355_v47, %v13722_v48  ;;  %v19053_v47 = vunpack.c.l.bf16 %v13530_v22  ;;  %v19056_v22 = vunpack.c.h.bf16 %v13537_v27 }
 0x273   : > { %v13730_v50 = vsub.f32 %v19041_v9, %v13725_v49  ;;  %v13735_v14 = vsub.f32 %v19042_v13, %v13725_v49  ;;  %v13740_v54 = vsub.f32 %v19043_v52, %v13725_v49  ;;  %v13745_v56 = vsub.f32 %v19044_v55, %v13725_v49 }
 0x274   : > { %v13754_v61 = vsub.f32 %v19045_v12, %v13725_v49  ;;  %v13761_v15 = vsub.f32 %v19046_v63, %v13725_v49  ;;  %v13770_v6 = vsub.f32 %v19047_v33, %v13725_v49  ;;  %v13778_v51 = vsub.f32 %v19048_v43, %v13725_v49 }
 0x275   : > { %v1395_v59 = vmul.f32 %v13730_v50, %v13730_v50  ;;  %v1396_v60 = vmul.f32 %v13735_v14, %v13735_v14  ;;  %v1397_v11 = vmul.f32 %v13740_v54, %v13740_v54  ;;  %v1398_v2 = vmul.f32 %v13745_v56, %v13745_v56 }
 0x276   : > { %v1399_v45 = vmul.f32 %v13754_v61, %v13754_v61  ;;  %v1400_v53 = vmul.f32 %v13761_v15, %v13761_v15  ;;  %v13786_v57 = vsub.f32 %v19049_v10, %v13725_v49  ;;  %v1401_v58 = vmul.f32 %v13770_v6, %v13770_v6 }
 0x277   : > { %v1427_v3 = vsel %vm1140_vm1, %v1395_v59, 0.0  ;;  %v1428_v4 = vsel %vm1140_vm1, %v1396_v60, 0.0  ;;  %v1430_v16 = vsel %vm1140_vm1, %v1397_v11, 0.0  ;;  %v1432_v25 = vsel %vm1140_vm1, %v1398_v2, 0.0 }
 0x278   : > { %v1429_v62 = vadd.f32 %v1428_v4, %v1427_v3  ;;  %v1434_v24 = vsel %vm1140_vm1, %v1399_v45, 0.0  ;;  %v13794_v19 = vsub.f32 %v19050_v17, %v13725_v49  ;;  %v1402_v26 = vmul.f32 %v13778_v51, %v13778_v51 }
 0x279   : > { %v1436_v30 = vsel %vm1140_vm1, %v1400_v53, 0.0  ;;  %v13802_v1 = vsub.f32 %v19051_v18, %v13725_v49  ;;  %v1403_v38 = vmul.f32 %v13786_v57, %v13786_v57  ;;  %v1438_v39 = vsel %vm1140_vm1, %v1401_v58, 0.0 }
 0x27a   : > { %v1431_v7 = vadd.f32 %v1430_v16, %v1429_v62  ;;  %v13810_v41 = vsub.f32 %v19052_v20, %v13725_v49  ;;  %v1404_v32 = vmul.f32 %v13794_v19, %v13794_v19  ;;  %v1440_v42 = vsel %vm1140_vm1, %v1402_v26, 0.0 }
 0x27b   : > { %v13818_v5 = vsub.f32 %v19053_v47, %v13725_v49  ;;  %v1405_v9 = vmul.f32 %v13802_v1, %v13802_v1  ;;  %v1442_v13 = vsel %vm1140_vm1, %v1403_v38, 0.0  ;;  %v13826_v55 = vsub.f32 %v19054_v21, %v13725_v49 }
 0x27c   : > { %v1433_v8 = vadd.f32 %v1432_v25, %v1431_v7  ;;  %v1406_v59 = vmul.f32 %v13810_v41, %v13810_v41  ;;  %v1444_v60 = vsel %vm1140_vm1, %v1404_v32, 0.0  ;;  %v19055_v11 = vunpack.c.l.bf16 %v13537_v27 }
 0x27d   : > { %v1407_v2 = vmul.f32 %v13818_v5, %v13818_v5  ;;  %v1446_v3 = vsel %vm1140_vm1, %v1405_v9, 0.0  ;;  %v13842_v62 = vsub.f32 %v19056_v22, %v13725_v49  ;;  %v1408_v33 = vmul.f32 %v13826_v55, %v13826_v55 }
 0x27e   : > { %v1435_v23 = vadd.f32 %v1434_v24, %v1433_v8  ;;  %v13834_v63 = vsub.f32 %v19055_v11, %v13725_v49  ;;  %v1448_v45 = vsel %vm1140_vm1, %v1406_v59, 0.0  ;;  %v19057_v7 = vunpack.c.l.bf16 %v13540_v28 }
 0x27f   : > { %v1450_v25 = vsel %vm1140_vm1, %v1407_v2, 0.0  ;;  %v19058_v27 = vunpack.c.h.bf16 %v13540_v28  ;;  %v1410_v58 = vmul.f32 %v13842_v62, %v13842_v62  ;;  %v1452_v24 = vsel %vm1140_vm1, %v1408_v33, 0.0 }
 0x280   : > { %v1437_v31 = vadd.f32 %v1436_v30, %v1435_v23  ;;  %v13850_v43 = vsub.f32 %v19057_v7, %v13725_v49  ;;  %v1409_v53 = vmul.f32 %v13834_v63, %v13834_v63  ;;  %v19059_v17 = vunpack.c.l.bf16 %v13543_v29 }
 0x281   : > { %v13858_v10 = vsub.f32 %v19058_v27, %v13725_v49  ;;  %v19060_v28 = vunpack.c.h.bf16 %v13543_v29  ;;  %v19061_v32 = vunpack.c.l.bf16 %v13550_v34  ;;  %v19062_v29 = vunpack.c.h.bf16 %v13550_v34 }
 0x282   : > { %v1439_v40 = vadd.f32 %v1438_v39, %v1437_v31  ;;  %v13866_v26 = vsub.f32 %v19059_v17, %v13725_v49  ;;  %v1411_v30 = vmul.f32 %v13850_v43, %v13850_v43  ;;  %v1454_v31 = vsel %vm1140_vm1, %v1409_v53, 0.0  ;;  %v19067_v17 = vld [vmem:[#allocation21_spill] sm:$0xff] }
 0x283   : > { %v13874_v38 = vsub.f32 %v19060_v28, %v13725_v49  ;;  %v1412_v39 = vmul.f32 %v13858_v10, %v13858_v10  ;;  %v19064_v34 = vunpack.c.h.bf16 %v13553_v35 }
 0x284   : > { %v1441_v44 = vadd.f32 %v1440_v42, %v1439_v40  ;;  %v1456_v40 = vsel %vm1140_vm1, %v1410_v58, 0.0  ;;  %v13882_v42 = vsub.f32 %v19061_v32, %v13725_v49  ;;  %v1458_v47 = vsel %vm1140_vm1, %v1411_v30, 0.0 }
 0x285   : > { %v1460_v21 = vsel %vm1140_vm1, %v1412_v39, 0.0  ;;  %v19068_v30 = vunpack.c.l.bf16 %v19067_v17 }
 0x286   : > { %v1443_v52 = vadd.f32 %v1442_v13, %v1441_v44  ;;  %v1413_v44 = vmul.f32 %v13866_v26, %v13866_v26  ;;  %v13890_v13 = vsub.f32 %v19062_v29, %v13725_v49  ;;  %v1415_v11 = vmul.f32 %v13882_v42, %v13882_v42 }
 0x288   : > { %v1445_v12 = vadd.f32 %v1444_v60, %v1443_v52  ;;  %v1414_v52 = vmul.f32 %v13874_v38, %v13874_v38  ;;  %v19063_v60 = vunpack.c.l.bf16 %v13553_v35  ;;  %v1462_v2 = vsel %vm1140_vm1, %v1413_v44, 0.0 }
 0x289   : > { %v1416_v22 = vmul.f32 %v13890_v13, %v13890_v13  ;;  %v19066_v35 = vunpack.c.h.bf16 %v13556_v36 }
 0x28a   : > { %v1447_v4 = vadd.f32 %v1446_v3, %v1445_v12  ;;  %v13898_v12 = vsub.f32 %v19063_v60, %v13725_v49  ;;  %v1464_v33 = vsel %vm1140_vm1, %v1414_v52, 0.0 }
 0x28b   : > { %v13922_v27 = vsub.f32 %v19066_v35, %v13725_v49 }
 0x28c   : > { %v1449_v16 = vadd.f32 %v1448_v45, %v1447_v4  ;;  %v13906_v4 = vsub.f32 %v19064_v34, %v13725_v49  ;;  %v1417_v53 = vmul.f32 %v13898_v12, %v13898_v12 }
 0x28e   : > { %v1451_v8 = vadd.f32 %v1450_v25, %v1449_v16  ;;  %v19065_v16 = vunpack.c.l.bf16 %v13556_v36  ;;  %v1466_v25 = vsel %vm1140_vm1, %v1415_v11, 0.0  ;;  %v1418_v58 = vmul.f32 %v13906_v4, %v13906_v4 }
 0x28f   : > { %v1470_v28 = vsel %vm1140_vm1, %v1417_v53, 0.0  ;;  %v19069_v36 = vunpack.c.h.bf16 %v19067_v17 }
 0x290   : > { %v1453_v23 = vadd.f32 %v1452_v24, %v1451_v8  ;;  %v13914_v7 = vsub.f32 %v19065_v16, %v13725_v49  ;;  %v1468_v24 = vsel %vm1140_vm1, %v1416_v22, 0.0  ;;  %v1472_v32 = vsel %vm1140_vm1, %v1418_v58, 0.0  ;;  %v19074_v22 = vld [vmem:[#allocation23_spill] sm:$0xff] }
 0x292   : > { %v1455_v18 = vadd.f32 %v1454_v31, %v1453_v23  ;;  %v13930_v31 = vsub.f32 %v19068_v30, %v13725_v49 }
 0x294   : > { %v1457_v20 = vadd.f32 %v1456_v40, %v1455_v18  ;;  %v1419_v18 = vmul.f32 %v13914_v7, %v13914_v7  ;;  %v13938_v40 = vsub.f32 %v19069_v36, %v13725_v49  ;;  %v1421_v52 = vmul.f32 %v13930_v31, %v13930_v31 }
 0x296   : > { %v1459_v9 = vadd.f32 %v1458_v47, %v1457_v20  ;;  %v1420_v20 = vmul.f32 %v13922_v27, %v13922_v27  ;;  %v19070_v47 = vld [vmem:[#allocation22_spill] sm:$0xff]  ;;  %v1478_v53 = vsel %vm1140_vm1, %v1421_v52, 0.0 }
 0x297   : > { %v19072_v60 = vunpack.c.h.bf16 %v19070_v47 }
 0x298   : > { %v1461_v59 = vadd.f32 %v1460_v21, %v1459_v9  ;;  %v19071_v9 = vunpack.c.l.bf16 %v19070_v47  ;;  %v1474_v21 = vsel %vm1140_vm1, %v1419_v18, 0.0 }
 0x299   : > { %v13954_v11 = vsub.f32 %v19072_v60, %v13725_v49 }
 0x29a   : > { %v1463_v3 = vadd.f32 %v1462_v2, %v1461_v59  ;;  %v13946_v29 = vsub.f32 %v19071_v9, %v13725_v49  ;;  %v1422_v2 = vmul.f32 %v13938_v40, %v13938_v40 }
 0x29b   : > { %19073 = vst [vmem:[#allocation21_spill] sm:$0xff] %v13954_v11  ;;  %v1424_v58 = vmul.f32 %v13954_v11, %v13954_v11 }
 0x29c   : > { %v1465_v45 = vadd.f32 %v1464_v33, %v1463_v3  ;;  %v1476_v3 = vsel %vm1140_vm1, %v1420_v20, 0.0  ;;  %v19075_v33 = vunpack.c.l.bf16 %v19074_v22  ;;  %v1423_v16 = vmul.f32 %v13946_v29, %v13946_v29 }
 0x29e   : > { %v1467_v8 = vadd.f32 %v1466_v25, %v1465_v45  ;;  %v13962_v45 = vsub.f32 %v19075_v33, %v13725_v49  ;;  %v1482_v30 = vsel %vm1140_vm1, %v1423_v16, 0.0  ;;  %v12615_v16 = vld [vmem:[%s18767_s6 + $0x40] sm:$0xff]  }
 0x29f   : > { %11030 = vmatprep.subr.bf16.mxu0 %v12615_v16  ;;  %12422 = vmatprep.subr.bf16.mxu1 %v12615_v16 }
 0x2a0   : > { %v1469_v23 = vadd.f32 %v1468_v24, %v1467_v8  ;;  %19076 = vst [vmem:[#allocation22_spill] sm:$0xff] %v13962_v45  ;;  %v19077_v8 = vunpack.c.h.bf16 %v19074_v22  ;;  %v1480_v24 = vsel %vm1140_vm1, %v1422_v2, 0.0  ;;  %v1425_v17 = vmul.f32 %v13962_v45, %v13962_v45 }
 0x2a2   : > { %v1471_v39 = vadd.f32 %v1470_v28, %v1469_v23  ;;  %v13970_v35 = vsub.f32 %v19077_v8, %v13725_v49  ;;  %v1486_v49 = vsel %vm1140_vm1, %v1425_v17, 0.0  ;;  %v594_v8 = vadd.s32 128, %v13719_v46 }
 0x2a4   : > { %v1473_v44 = vadd.f32 %v1472_v32, %v1471_v39  ;;  %19078 = vst [vmem:[#allocation23_spill] sm:$0xff] %v13970_v35  ;;  %v1426_v28 = vmul.f32 %v13970_v35, %v13970_v35  ;;  %v1484_v39 = vsel %vm1140_vm1, %v1424_v58, 0.0  ;;  %v596_v58 = vadd.s32 144, %v13719_v46 }
 0x2a6   : > { %v1475_v59 = vadd.f32 %v1474_v21, %v1473_v44  ;;  %v1488_v32 = vsel %vm1140_vm1, %v1426_v28, 0.0  ;;  %v740_v28 = vand.u32 15, %v596_v58  ;;  %v14070_v58 = vadd.s32 192, %v13719_v46 }
 0x2a8   : > { %v1477_v34 = vadd.f32 %v1476_v3, %v1475_v59  ;;  %vm14028_vm9 = vcmp.ge.s32.totalorder %v740_v28, 1  ;;  %v14088_v28 = vld [vmem:[%s18767_s6 + $0x60] sm:$0xff]  }
 0x2a9   : > { %vm2321_vm13 = vmpackc.low %vm14028_vm9, %vm14028_vm9 }
 0x2aa   : > { %v1479_v25 = vadd.f32 %v1478_v53, %v1477_v34  ;;  %v12616_v53 = vld [vmem:[%s18767_s6] sm:$0xff]  }
 0x2ac   : > { %v1481_v23 = vadd.f32 %v1480_v24, %v1479_v25  ;;  %v580_v25 = vadd.s32 16, %v13719_v46  ;;  %v598_v24 = vadd.s32 160, %v13719_v46 }
 0x2ae   : > { %v1483_v18 = vadd.f32 %v1482_v30, %v1481_v23  ;;  %v614_v23 = vand.u32 15, %v13719_v46  ;;  %v628_v17 = vand.u32 15, %v580_v25  ;;  %v12617_v30 = vld [vmem:[%s18767_s6 + $0x48] sm:$0xff]  }
 0x2b0   : > { %v1485_v36 = vadd.f32 %v1484_v39, %v1483_v18  ;;  %v726_v18 = vand.u32 15, %v594_v8  ;;  %v14000_v39 = vadd.s32 32, %v13719_v46  ;;  %vm14005_vm3 = vcmp.ge.s32.totalorder %v614_v23, 1  ;;  %v14080_v23 = vld [vmem:[%s18767_s6 + $0x18] sm:$0xff]  }
 0x2b1   : > { %vm14009_vm4 = vcmp.ge.s32.totalorder %v628_v17, 1  ;;  %vm2303_vm5 = vmpackc.low %vm14005_vm3, %vm14005_vm3 }
 0x2b2   : > { %v1487_v20 = vadd.f32 %v1486_v49, %v1485_v36  ;;  %v12618_v36 = vld [vmem:[%s18767_s6 + $0x8] sm:$0xff]   ;;  %vm14019_vm6 = vcmp.ge.s32.totalorder %v726_v18, 1  ;;  %vm2305_vm10 = vmpackc.low %vm14009_vm4, %vm14009_vm4 }
 0x2b3   : > { %vm2319_vm11 = vmpackc.low %vm14019_vm6, %vm14019_vm6 }
 0x2b4   : > { %v1489_v44 = vadd.f32 %v1488_v32, %v1487_v20  ;;  %v14014_v32 = vadd.s32 176, %v13719_v46 }
 0x2b6   : > { %v1490_v47 = vrot.slane %v1489_v44, 4  ;;  %v768_v16 = vand.u32 15, %v14014_v32 }
 0x2b8   : > { %v1491_v9 = vadd.f32 %v1490_v47, %v1489_v44  ;;  %v754_v44 = vand.u32 15, %v598_v24  ;;  %v14075_v24 = vld [vmem:[%s18767_s6 + $0x58] sm:$0xff]   ;;  %vm14406_vm4 = vcmp.ge.s32.totalorder %v768_v16, 1  ;;  %v12625_v16 = vld [vmem:[%s18767_s6 + $0x68] sm:$0xff]  }
 0x2ba   : > { %v1492_v52 = vrot.slane %v1491_v9, 2  ;;  %vm14059_vm12 = vcmp.ge.s32.totalorder %v754_v44, 1  ;;  %v12627_v44 = vld [vmem:[%s18767_s6 + $0x70] sm:$0xff]  }
 0x2bb   : > { %vm2323_vm3 = vmpackc.low %vm14059_vm12, %vm14059_vm12 }
 0x2bc   : > { %v1493_v21 = vadd.f32 %v1492_v52, %v1491_v9  ;;  %v18834_v9 = vmov 0  }
 0x2bd   : > { %1058 = vst [vmem:[#allocation2] sm:$0xff] %v18834_v9  ;;  %1059 = vst [vmem:[#allocation2 + $0x8] sm:$0xf] %v18834_v9  ;;  %v2335_v52 = vsel %vm2303_vm5, 65537, %v18834_v9  ;;  %v14067_v8 = vsel %vm2319_vm11, 65537, %v18834_v9  ;;  %v2353_v20 = vsel %vm2321_vm13, 65537, %v18834_v9 }
 0x2be   : > { %v1494_v59 = vrot.slane %v1493_v21, 1  ;;  %1060 = vst [vmem:[#allocation2 + $0x88] sm:$0xf0] %v18834_v9  ;;  %1061 = vst [vmem:[#allocation2 + $0x90] sm:$0xff] %v18834_v9  ;;  %vm2415_vm11 = vsmask.f32 3328 }
 0x2bf   : > { %2158 = vst.msk [vmem:[#allocation3 + $0x8] sm:$0xff] %vm2141_vm14, %v18834_v9  ;;  %2142 = vst.msk [vmem:[#allocation3] sm:$0xff] %vm2141_vm14, %v18834_v9 }
 0x2c0   : > { %v1495_v60 = vadd.f32 %v1494_v59, %v1493_v21  ;;  %v14033_v59 = vadd.s32 48, %v13719_v46  ;;  %2143 = vst.msk [vmem:[#allocation3 + $0x48] sm:$0xff] %vm2141_vm14, %v18834_v9  ;;  %2144 = vst.msk [vmem:[#allocation3 + $0x90] sm:$0xff] %vm2141_vm14, %v18834_v9 }
 0x2c1   : > { %2145 = vst.msk [vmem:[#allocation3 + $0xd8] sm:$0xff] %vm2141_vm14, %v18834_v9  ;;  %2146 = vst.msk [vmem:[#allocation3 + $0x120] sm:$0xff] %vm2141_vm14, %v18834_v9 }
 0x2c2   : > { %12085 = vmatmul.mubr.msk.f32.vlgmr.msra.gmra.mrb[2].mxu1 %vm1140_vm1, %v1495_v60  ;;  %v12619_v60 = vld [vmem:[%s18767_s6 + $0x50] sm:$0xff]   ;;  %v656_v18 = vand.u32 15, %v14033_v59  ;;  %2147 = vst.msk [vmem:[#allocation3 + $0x168] sm:$0xff] %vm2141_vm14, %v18834_v9  ;;  %2148 = vst.msk [vmem:[#allocation3 + $0x1b0] sm:$0xff] %vm2141_vm14, %v18834_v9  ;;  %v2355_v59 = vsel %vm2323_vm3, 65537, %v18834_v9 }
 0x2c3   : > { %12430 = vmatpush3.bf16.msra.mxu1 %v12616_v53  ;;  %2149 = vst.msk [vmem:[#allocation3 + $0x1f8] sm:$0xff] %vm2141_vm14, %v18834_v9  ;;  %2150 = vst.msk [vmem:[#allocation3 + $0x240] sm:$0xff] %vm2141_vm14, %v18834_v9 }
 0x2c4   : > { %12423 = vmatprep.subr.bf16.mxu1 %v12617_v30  ;;  %2151 = vst.msk [vmem:[#allocation3 + $0x288] sm:$0xff] %vm2141_vm14, %v18834_v9  ;;  %2152 = vst.msk [vmem:[#allocation3 + $0x2d0] sm:$0xff] %vm2141_vm14, %v18834_v9  ;;  %vm14423_vm6 = vcmp.ge.s32.totalorder %v656_v18, 1  ;;  %v12630_v18 = vld [vmem:[%s18767_s6 + $0x38] sm:$0xff]  }
 0x2c5   : > { %2153 = vst.msk [vmem:[#allocation3 + $0x318] sm:$0xff] %vm2141_vm14, %v18834_v9  ;;  %2154 = vst.msk [vmem:[#allocation3 + $0x360] sm:$0xff] %vm2141_vm14, %v18834_v9 }
 0x2c6   : > { %2155 = vst.msk [vmem:[#allocation3 + $0x3a8] sm:$0xff] %vm2141_vm14, %v18834_v9  ;;  %2156 = vst.msk [vmem:[#allocation3 + $0x3f0] sm:$0xff] %vm2141_vm14, %v18834_v9 }
 0x2c7   : > { %12431 = vmatpush3.bf16.msra.mxu1 %v12618_v36  ;;  %2157 = vst.msk [vmem:[#allocation3 + $0x438] sm:$0xff] %vm2141_vm14, %v18834_v9  ;;  %2159 = vst.msk [vmem:[#allocation3 + $0x50] sm:$0xff] %vm2141_vm14, %v18834_v9 }
 0x2c8   : > { %12424 = vmatprep.subr.bf16.mxu1 %v12619_v60  ;;  %2160 = vst.msk [vmem:[#allocation3 + $0x98] sm:$0xff] %vm2141_vm14, %v18834_v9  ;;  %2161 = vst.msk [vmem:[#allocation3 + $0xe0] sm:$0xff] %vm2141_vm14, %v18834_v9 }
 0x2c9   : > { %2162 = vst.msk [vmem:[#allocation3 + $0x128] sm:$0xff] %vm2141_vm14, %v18834_v9  ;;  %2163 = vst.msk [vmem:[#allocation3 + $0x170] sm:$0xff] %vm2141_vm14, %v18834_v9 }
 0x2ca   : > { %2164 = vst.msk [vmem:[#allocation3 + $0x1b8] sm:$0xff] %vm2141_vm14, %v18834_v9  ;;  %2165 = vst.msk [vmem:[#allocation3 + $0x200] sm:$0xff] %vm2141_vm14, %v18834_v9 }
 0x2cb   : > { %2166 = vst.msk [vmem:[#allocation3 + $0x248] sm:$0xff] %vm2141_vm14, %v18834_v9  ;;  %2167 = vst.msk [vmem:[#allocation3 + $0x290] sm:$0xff] %vm2141_vm14, %v18834_v9 }
 0x2cc   : > { %2168 = vst.msk [vmem:[#allocation3 + $0x2d8] sm:$0xff] %vm2141_vm14, %v18834_v9  ;;  %2169 = vst.msk [vmem:[#allocation3 + $0x320] sm:$0xff] %vm2141_vm14, %v18834_v9 }
 0x2cd   : > { %2170 = vst.msk [vmem:[#allocation3 + $0x368] sm:$0xff] %vm2141_vm14, %v18834_v9  ;;  %2171 = vst.msk [vmem:[#allocation3 + $0x3b0] sm:$0xff] %vm2141_vm14, %v18834_v9 }
 0x2ce   : > { %2172 = vst.msk [vmem:[#allocation3 + $0x3f8] sm:$0xff] %vm2141_vm14, %v18834_v9  ;;  %2173 = vst.msk [vmem:[#allocation3 + $0x440] sm:$0xff] %vm2141_vm14, %v18834_v9 }
 0x2cf   : > { %2174 = vst.msk [vmem:[#allocation3 + $0x10] sm:$0xff] %vm2141_vm14, %v18834_v9  ;;  %2175 = vst.msk [vmem:[#allocation3 + $0x58] sm:$0xff] %vm2141_vm14, %v18834_v9 }
 0x2d0   : > { %2176 = vst.msk [vmem:[#allocation3 + $0xa0] sm:$0xff] %vm2141_vm14, %v18834_v9  ;;  %2177 = vst.msk [vmem:[#allocation3 + $0xe8] sm:$0xff] %vm2141_vm14, %v18834_v9 }
 0x2d1   : > { %2178 = vst.msk [vmem:[#allocation3 + $0x130] sm:$0xff] %vm2141_vm14, %v18834_v9  ;;  %2179 = vst.msk [vmem:[#allocation3 + $0x178] sm:$0xff] %vm2141_vm14, %v18834_v9 }
 0x2d2   : > { %2180 = vst.msk [vmem:[#allocation3 + $0x1c0] sm:$0xff] %vm2141_vm14, %v18834_v9  ;;  %2181 = vst.msk [vmem:[#allocation3 + $0x208] sm:$0xff] %vm2141_vm14, %v18834_v9 }
 0x2d3   : > { %2182 = vst.msk [vmem:[#allocation3 + $0x250] sm:$0xff] %vm2141_vm14, %v18834_v9  ;;  %2183 = vst.msk [vmem:[#allocation3 + $0x298] sm:$0xff] %vm2141_vm14, %v18834_v9 }
 0x2d4   : > { %2184 = vst.msk [vmem:[#allocation3 + $0x2e0] sm:$0xff] %vm2141_vm14, %v18834_v9  ;;  %2185 = vst.msk [vmem:[#allocation3 + $0x328] sm:$0xff] %vm2141_vm14, %v18834_v9 }
 0x2d5   : > { %2186 = vst.msk [vmem:[#allocation3 + $0x370] sm:$0xff] %vm2141_vm14, %v18834_v9  ;;  %2187 = vst.msk [vmem:[#allocation3 + $0x3b8] sm:$0xff] %vm2141_vm14, %v18834_v9 }
 0x2d6   : > { %2188 = vst.msk [vmem:[#allocation3 + $0x400] sm:$0xff] %vm2141_vm14, %v18834_v9  ;;  %2189 = vst.msk [vmem:[#allocation3 + $0x448] sm:$0xff] %vm2141_vm14, %v18834_v9 }
 0x2d7   : > { %2190 = vst.msk [vmem:[#allocation3 + $0x18] sm:$0xff] %vm2141_vm14, %v18834_v9  ;;  %2191 = vst.msk [vmem:[#allocation3 + $0x60] sm:$0xff] %vm2141_vm14, %v18834_v9 }
 0x2d8   : > { %2192 = vst.msk [vmem:[#allocation3 + $0xa8] sm:$0xff] %vm2141_vm14, %v18834_v9  ;;  %2193 = vst.msk [vmem:[#allocation3 + $0xf0] sm:$0xff] %vm2141_vm14, %v18834_v9 }
 0x2d9   : > { %2194 = vst.msk [vmem:[#allocation3 + $0x138] sm:$0xff] %vm2141_vm14, %v18834_v9  ;;  %2195 = vst.msk [vmem:[#allocation3 + $0x180] sm:$0xff] %vm2141_vm14, %v18834_v9 }
 0x2da   : > { %2196 = vst.msk [vmem:[#allocation3 + $0x1c8] sm:$0xff] %vm2141_vm14, %v18834_v9  ;;  %2197 = vst.msk [vmem:[#allocation3 + $0x210] sm:$0xff] %vm2141_vm14, %v18834_v9 }
 0x2db   : > { %2198 = vst.msk [vmem:[#allocation3 + $0x258] sm:$0xff] %vm2141_vm14, %v18834_v9  ;;  %2199 = vst.msk [vmem:[#allocation3 + $0x2a0] sm:$0xff] %vm2141_vm14, %v18834_v9 }
 0x2dc   : > { %2200 = vst.msk [vmem:[#allocation3 + $0x2e8] sm:$0xff] %vm2141_vm14, %v18834_v9  ;;  %2201 = vst.msk [vmem:[#allocation3 + $0x330] sm:$0xff] %vm2141_vm14, %v18834_v9 }
 0x2dd   : > { %2202 = vst.msk [vmem:[#allocation3 + $0x378] sm:$0xff] %vm2141_vm14, %v18834_v9  ;;  %2203 = vst.msk [vmem:[#allocation3 + $0x3c0] sm:$0xff] %vm2141_vm14, %v18834_v9 }
 0x2de   : > { %2204 = vst.msk [vmem:[#allocation3 + $0x408] sm:$0xff] %vm2141_vm14, %v18834_v9  ;;  %2205 = vst.msk [vmem:[#allocation3 + $0x450] sm:$0xff] %vm2141_vm14, %v18834_v9 }
 0x2df   : > { %2206 = vst.msk [vmem:[#allocation3 + $0x20] sm:$0xff] %vm2141_vm14, %v18834_v9  ;;  %2207 = vst.msk [vmem:[#allocation3 + $0x68] sm:$0xff] %vm2141_vm14, %v18834_v9 }
 0x2e0   : > { %2208 = vst.msk [vmem:[#allocation3 + $0xb0] sm:$0xff] %vm2141_vm14, %v18834_v9  ;;  %2209 = vst.msk [vmem:[#allocation3 + $0xf8] sm:$0xff] %vm2141_vm14, %v18834_v9 }
 0x2e1   : > { %2210 = vst.msk [vmem:[#allocation3 + $0x140] sm:$0xff] %vm2141_vm14, %v18834_v9  ;;  %2211 = vst.msk [vmem:[#allocation3 + $0x188] sm:$0xff] %vm2141_vm14, %v18834_v9 }
 0x2e2   : > { %2212 = vst.msk [vmem:[#allocation3 + $0x1d0] sm:$0xff] %vm2141_vm14, %v18834_v9  ;;  %2213 = vst.msk [vmem:[#allocation3 + $0x218] sm:$0xff] %vm2141_vm14, %v18834_v9 }
 0x2e3   : > { %2214 = vst.msk [vmem:[#allocation3 + $0x260] sm:$0xff] %vm2141_vm14, %v18834_v9  ;;  %2215 = vst.msk [vmem:[#allocation3 + $0x2a8] sm:$0xff] %vm2141_vm14, %v18834_v9 }
 0x2e4   : > { %2216 = vst.msk [vmem:[#allocation3 + $0x2f0] sm:$0xff] %vm2141_vm14, %v18834_v9  ;;  %2217 = vst.msk [vmem:[#allocation3 + $0x338] sm:$0xff] %vm2141_vm14, %v18834_v9 }
 0x2e5   : > { %2218 = vst.msk [vmem:[#allocation3 + $0x380] sm:$0xff] %vm2141_vm14, %v18834_v9  ;;  %2219 = vst.msk [vmem:[#allocation3 + $0x3c8] sm:$0xff] %vm2141_vm14, %v18834_v9 }
 0x2e6   : > { %2220 = vst.msk [vmem:[#allocation3 + $0x410] sm:$0xff] %vm2141_vm14, %v18834_v9  ;;  %2221 = vst.msk [vmem:[#allocation3 + $0x458] sm:$0xff] %vm2141_vm14, %v18834_v9 }
 0x2e7   : > { %2222 = vst.msk [vmem:[#allocation3 + $0x28] sm:$0xff] %vm2141_vm14, %v18834_v9  ;;  %2223 = vst.msk [vmem:[#allocation3 + $0x70] sm:$0xff] %vm2141_vm14, %v18834_v9 }
 0x2e8   : > { %2224 = vst.msk [vmem:[#allocation3 + $0xb8] sm:$0xff] %vm2141_vm14, %v18834_v9  ;;  %2225 = vst.msk [vmem:[#allocation3 + $0x100] sm:$0xff] %vm2141_vm14, %v18834_v9 }
 0x2e9   : > { %2226 = vst.msk [vmem:[#allocation3 + $0x148] sm:$0xff] %vm2141_vm14, %v18834_v9  ;;  %2227 = vst.msk [vmem:[#allocation3 + $0x190] sm:$0xff] %vm2141_vm14, %v18834_v9 }
 0x2ea   : > { %2228 = vst.msk [vmem:[#allocation3 + $0x1d8] sm:$0xff] %vm2141_vm14, %v18834_v9  ;;  %2229 = vst.msk [vmem:[#allocation3 + $0x220] sm:$0xff] %vm2141_vm14, %v18834_v9 }
 0x2eb   : > { %2230 = vst.msk [vmem:[#allocation3 + $0x268] sm:$0xff] %vm2141_vm14, %v18834_v9  ;;  %2231 = vst.msk [vmem:[#allocation3 + $0x2b0] sm:$0xff] %vm2141_vm14, %v18834_v9 }
 0x2ec   : > { %2232 = vst.msk [vmem:[#allocation3 + $0x2f8] sm:$0xff] %vm2141_vm14, %v18834_v9  ;;  %2233 = vst.msk [vmem:[#allocation3 + $0x340] sm:$0xff] %vm2141_vm14, %v18834_v9 }
 0x2ed   : > { %2234 = vst.msk [vmem:[#allocation3 + $0x388] sm:$0xff] %vm2141_vm14, %v18834_v9  ;;  %2235 = vst.msk [vmem:[#allocation3 + $0x3d0] sm:$0xff] %vm2141_vm14, %v18834_v9 }
 0x2ee   : > { %2236 = vst.msk [vmem:[#allocation3 + $0x418] sm:$0xff] %vm2141_vm14, %v18834_v9  ;;  %2237 = vst.msk [vmem:[#allocation3 + $0x460] sm:$0xff] %vm2141_vm14, %v18834_v9 }
 0x2ef   : > { %2238 = vst.msk [vmem:[#allocation3 + $0x30] sm:$0xff] %vm2141_vm14, %v18834_v9  ;;  %2239 = vst.msk [vmem:[#allocation3 + $0x78] sm:$0xff] %vm2141_vm14, %v18834_v9 }
 0x2f0   : > { %2240 = vst.msk [vmem:[#allocation3 + $0xc0] sm:$0xff] %vm2141_vm14, %v18834_v9  ;;  %2241 = vst.msk [vmem:[#allocation3 + $0x108] sm:$0xff] %vm2141_vm14, %v18834_v9 }
 0x2f1   : > { %2242 = vst.msk [vmem:[#allocation3 + $0x150] sm:$0xff] %vm2141_vm14, %v18834_v9  ;;  %2243 = vst.msk [vmem:[#allocation3 + $0x198] sm:$0xff] %vm2141_vm14, %v18834_v9 }
 0x2f2   : > { %2244 = vst.msk [vmem:[#allocation3 + $0x1e0] sm:$0xff] %vm2141_vm14, %v18834_v9  ;;  %2245 = vst.msk [vmem:[#allocation3 + $0x228] sm:$0xff] %vm2141_vm14, %v18834_v9 }
 0x2f3   : > { %2246 = vst.msk [vmem:[#allocation3 + $0x270] sm:$0xff] %vm2141_vm14, %v18834_v9  ;;  %2247 = vst.msk [vmem:[#allocation3 + $0x2b8] sm:$0xff] %vm2141_vm14, %v18834_v9 }
 0x2f4   : > { %2248 = vst.msk [vmem:[#allocation3 + $0x300] sm:$0xff] %vm2141_vm14, %v18834_v9  ;;  %2249 = vst.msk [vmem:[#allocation3 + $0x348] sm:$0xff] %vm2141_vm14, %v18834_v9 }
 0x2f5   : > { %2250 = vst.msk [vmem:[#allocation3 + $0x390] sm:$0xff] %vm2141_vm14, %v18834_v9  ;;  %2251 = vst.msk [vmem:[#allocation3 + $0x3d8] sm:$0xff] %vm2141_vm14, %v18834_v9 }
 0x2f6   : > { %2252 = vst.msk [vmem:[#allocation3 + $0x420] sm:$0xff] %vm2141_vm14, %v18834_v9  ;;  %2253 = vst.msk [vmem:[#allocation3 + $0x468] sm:$0xff] %vm2141_vm14, %v18834_v9 }
 0x2f7   : > { %2254 = vst.msk [vmem:[#allocation3 + $0x38] sm:$0xff] %vm2141_vm14, %v18834_v9  ;;  %2255 = vst.msk [vmem:[#allocation3 + $0x80] sm:$0xff] %vm2141_vm14, %v18834_v9 }
 0x2f8   : > { %2256 = vst.msk [vmem:[#allocation3 + $0xc8] sm:$0xff] %vm2141_vm14, %v18834_v9  ;;  %2257 = vst.msk [vmem:[#allocation3 + $0x110] sm:$0xff] %vm2141_vm14, %v18834_v9 }
 0x2f9   : > { %2258 = vst.msk [vmem:[#allocation3 + $0x158] sm:$0xff] %vm2141_vm14, %v18834_v9  ;;  %2259 = vst.msk [vmem:[#allocation3 + $0x1a0] sm:$0xff] %vm2141_vm14, %v18834_v9 }
 0x2fa   : > { %2260 = vst.msk [vmem:[#allocation3 + $0x1e8] sm:$0xff] %vm2141_vm14, %v18834_v9  ;;  %2261 = vst.msk [vmem:[#allocation3 + $0x230] sm:$0xff] %vm2141_vm14, %v18834_v9 }
 0x2fb   : > { %2262 = vst.msk [vmem:[#allocation3 + $0x278] sm:$0xff] %vm2141_vm14, %v18834_v9  ;;  %2263 = vst.msk [vmem:[#allocation3 + $0x2c0] sm:$0xff] %vm2141_vm14, %v18834_v9 }
 0x2fc   : > { %2264 = vst.msk [vmem:[#allocation3 + $0x308] sm:$0xff] %vm2141_vm14, %v18834_v9  ;;  %2265 = vst.msk [vmem:[#allocation3 + $0x350] sm:$0xff] %vm2141_vm14, %v18834_v9 }
 0x2fd   : > { %2266 = vst.msk [vmem:[#allocation3 + $0x398] sm:$0xff] %vm2141_vm14, %v18834_v9  ;;  %2267 = vst.msk [vmem:[#allocation3 + $0x3e0] sm:$0xff] %vm2141_vm14, %v18834_v9 }
 0x2fe   : > { %2268 = vst.msk [vmem:[#allocation3 + $0x428] sm:$0xff] %vm2141_vm14, %v18834_v9  ;;  %2269 = vst.msk [vmem:[#allocation3 + $0x470] sm:$0xff] %vm2141_vm14, %v18834_v9 }
 0x2ff   : > { %2270 = vst.msk [vmem:[#allocation3 + $0x40] sm:$0xff] %vm2141_vm14, %v18834_v9  ;;  %2271 = vst.msk [vmem:[#allocation3 + $0x88] sm:$0xff] %vm2141_vm14, %v18834_v9 }
 0x300   : > { %2272 = vst.msk [vmem:[#allocation3 + $0xd0] sm:$0xff] %vm2141_vm14, %v18834_v9  ;;  %2273 = vst.msk [vmem:[#allocation3 + $0x118] sm:$0xff] %vm2141_vm14, %v18834_v9 }
 0x301   : > { %2274 = vst.msk [vmem:[#allocation3 + $0x160] sm:$0xff] %vm2141_vm14, %v18834_v9  ;;  %2275 = vst.msk [vmem:[#allocation3 + $0x1a8] sm:$0xff] %vm2141_vm14, %v18834_v9 }
 0x302   : > { %2276 = vst.msk [vmem:[#allocation3 + $0x1f0] sm:$0xff] %vm2141_vm14, %v18834_v9  ;;  %2277 = vst.msk [vmem:[#allocation3 + $0x238] sm:$0xff] %vm2141_vm14, %v18834_v9 }
 0x303   : > { %2278 = vst.msk [vmem:[#allocation3 + $0x280] sm:$0xff] %vm2141_vm14, %v18834_v9  ;;  %2279 = vst.msk [vmem:[#allocation3 + $0x2c8] sm:$0xff] %vm2141_vm14, %v18834_v9 }
 0x304   : > { %2280 = vst.msk [vmem:[#allocation3 + $0x310] sm:$0xff] %vm2141_vm14, %v18834_v9  ;;  %2281 = vst.msk [vmem:[#allocation3 + $0x358] sm:$0xff] %vm2141_vm14, %v18834_v9 }
 0x305   : > { %2282 = vst.msk [vmem:[#allocation3 + $0x3a0] sm:$0xff] %vm2141_vm14, %v18834_v9  ;;  %2283 = vst.msk [vmem:[#allocation3 + $0x3e8] sm:$0xff] %vm2141_vm14, %v18834_v9 }
 0x306   : > { %2284 = vst.msk [vmem:[#allocation3 + $0x430] sm:$0xff] %vm2141_vm14, %v18834_v9  ;;  %2285 = vst.msk [vmem:[#allocation3 + $0x478] sm:$0xff] %vm2141_vm14, %v18834_v9 }
 0x307   : > { %vm2309_vm9 = vmpackc.low %vm14423_vm6, %vm14423_vm6 }
 0x395   : > { %v1565_v2 = vpop.f32.mrb[2].mxu1 }
 0x396   : > { %v1569_v3 = vmul.f32 0.001953125, %v1565_v2  ;;  %v12086_v34 = vpop.f32.mrb[3].mxu1  ;;  %v14042_v2 = vsel %vm2304_vm8, 65537, %v18834_v9  ;;  %vm2325_vm8 = vmpackc.low %vm14406_vm4, %vm14406_vm4 }
 0x397   : > { %19087 = vst [vmem:[#allocation25_spill] sm:$0xff] %v14042_v2  ;;  %v12620_v34 = vld [vmem:[%s18767_s6 + $0x10] sm:$0xff]   ;;  %v10625_v21 = vcombine.low %v14067_v8, %v14042_v2 }
 0x398   : > { %v1570_v22 = vadd.f32 1e-05, %v1569_v3  ;;  %v642_v3 = vand.u32 15, %v14000_v39  ;;  %12432 = vmatpush3.bf16.msra.mxu1 %v12620_v34  ;;  %v10626_v39 = vcombine.low %v2353_v20, %v14042_v2 }
 0x399   : > { %12425 = vmatprep.subr.bf16.mxu1 %v14075_v24 }
 0x39a   : > { %12779 = vrsqrt.f32 %v1570_v22  ;;  %v2337_v22 = vsel %vm2305_vm10, 65537, %v18834_v9  ;;  %vm14388_vm15 = vcmp.ge.s32.totalorder %v642_v3, 1  ;;  %v782_v3 = vand.u32 15, %v14070_v58  ;;  %v2286_v58 = vld [vmem:[#allocation2] sm:$0xf8] }
 0x39b   : > { %vm2307_vm5 = vmpackc.low %vm14388_vm15, %vm14388_vm15 }
 0x39c   : > { %12433 = vmatpush3.bf16.msra.mxu1 %v14080_v23  ;;  %v2339_v25 = vsel %vm2307_vm5, 65537, %v18834_v9  ;;  %vm14455_vm10 = vcmp.ge.s32.totalorder %v782_v3, 1 }
 0x39d   : > { %12426 = vmatprep.subr.bf16.mxu1 %v14088_v28  ;;  %v10619_v3 = vcombine.low %v2339_v25, %v14042_v2  ;;  %vm2327_vm12 = vmpackc.low %vm14455_vm10, %vm14455_vm10  ;;  %v12629_v25 = vld [vmem:[%s18767_s6 + $0x78] sm:$0xff]  }
 0x3a4   : > { %v12780_v33 = vpop.eup %12779 }
 0x3a5   : > { %12096 = vmatmul.mubr.msk.f32.vlgmr.msra.gmra.mrb[2].mxu0 %vm18870_vm2, %v12780_v33  ;;  %v14050_v33 = vcombine.low %v2335_v52, %v14042_v2 }
 0x3a6   : > { %11031 = vmatpush3.bf16.msra.mxu0 %v12616_v53  ;;  %v14057_v53 = vcombine.low %v2337_v22, %v14042_v2 }
 0x3a7   : > { %11032 = vmatprep.subr.bf16.mxu0 %v12617_v30  ;;  %v2417_v17 = vshrl.u32 %v14050_v33, 16  ;;  %v2420_v30 = vshll.u32 %v14050_v33, 16  ;;  %v14428_v33 = vadd.s32 64, %v13719_v46 }
 0x3a8   : > { %v2428_v49 = vshll.u32 %v14057_v53, 16 }
 0x3a9   : > { %v2419_v47 = vrot.slane %v2417_v17, 4  ;;  %v2422_v52 = vrot.slane %v2420_v30, 5  ;;  %v2491_v17 = vshll.u32 %v10625_v21, 16  ;;  %v2497_v30 = vshrl.u32 %v10626_v39, 16 }
 0x3aa   : > { %11033 = vmatpush3.bf16.msra.mxu0 %v12618_v36  ;;  %v2425_v36 = vshrl.u32 %v14057_v53, 16  ;;  %v2430_v8 = vrot.slane %v2428_v49, 5  ;;  %v2500_v49 = vshll.u32 %v10626_v39, 16  ;;  %v670_v20 = vand.u32 15, %v14428_v33 }
 0x3ab   : > { %11034 = vmatprep.subr.bf16.mxu0 %v12619_v60  ;;  %v14416_v22 = vor.u32 %v2422_v52, %v2419_v47  ;;  %v2357_v39 = vsel %vm2325_vm8, 65537, %v18834_v9  ;;  %v2341_v33 = vsel %vm2309_vm9, 65537, %v18834_v9  ;;  %v12628_v60 = vld [vmem:[%s18767_s6 + $0x30] sm:$0xff]  }
 0x3ac   : > { %v2427_v53 = vrot.slane %v2425_v36, 4  ;;  %v10628_v32 = vcombine.low %v2357_v39, %v14042_v2  ;;  %vm14522_vm13 = vcmp.ge.s32.totalorder %v670_v20, 1 }
 0x3ad   : > { %19094 = vst [vmem:[#allocation26_spill] sm:$0xff] %v14416_v22  ;;  %vm18877_vm7 = vcmp.ne.s16.totalorder %v14416_v22, 0  ;;  %vm2311_vm14 = vmpackc.low %vm14522_vm13, %vm14522_vm13 }
 0x3ae   : > { %11035 = vmatpush3.bf16.msra.mxu0 %v12620_v34  ;;  %v12624_v34 = vld [vmem:[%s18767_s6 + $0x20] sm:$0xff]   ;;  %v2576_v36 = vsel %vm18877_vm7, %v2286_v58, 0  ;;  %v14468_v47 = vor.u32 %v2430_v8, %v2427_v53  ;;  %v2499_v8 = vrot.slane %v2497_v30, 4  ;;  %v2434_v58 = vshrl.u32 %v10619_v3, 16 }
 0x3af   : > { %11036 = vmatprep.subr.bf16.mxu0 %v14075_v24  ;;  %v10627_v24 = vcombine.low %v2355_v59, %v14042_v2  ;;  %12434 = vmatpush3.bf16.msra.mxu1 %v12624_v34  ;;  %v2493_v59 = vrot.slane %v2491_v17, 5  ;;  %v2598_v53 = vshll.u32 %v2576_v36, 16  ;;  %v10620_v17 = vcombine.low %v2341_v33, %v14042_v2 }
 0x3b0   : > { %12427 = vmatprep.subr.bf16.mxu1 %v12625_v16  ;;  %v2436_v0 = vrot.slane %v2434_v58, 4  ;;  %v2515_v39 = vshrl.u32 %v10628_v32, 16  ;;  %v2518_v33 = vshll.u32 %v10628_v32, 16 }
 0x3b1   : > { %v2506_v52 = vshrl.u32 %v10627_v24, 16 }
 0x3b2   : > { %11037 = vmatpush3.bf16.msra.mxu0 %v14080_v23  ;;  %v2488_v23 = vshrl.u32 %v10625_v21, 16  ;;  %v2509_v21 = vshll.u32 %v10627_v24, 16  ;;  %v2502_v24 = vrot.slane %v2500_v49, 5  ;;  %v1126_v49 = vld [vmem:[%s18763_s2] sm:$0x1] }
 0x3b3   : > { %11038 = vmatprep.subr.bf16.mxu0 %v14088_v28  ;;  %v12626_v28 = vld [vmem:[%s18767_s6 + $0x28] sm:$0xff]   ;;  %v2508_v30 = vrot.slane %v2506_v52, 4  ;;  %v2443_v52 = vshrl.u32 %v10620_v17, 16 }
 0x3b4   : > { %12435 = vmatpush3.bf16.msra.mxu1 %v12626_v28 }
 0x3b5   : > { %12428 = vmatprep.subr.bf16.mxu1 %v12627_v44 }
 0x3b6   : > { %11039 = vmatpush3.bf16.msra.mxu0 %v12624_v34  ;;  %v2490_v34 = vrot.slane %v2488_v23, 4  ;;  %v2437_v23 = vshll.u32 %v10619_v3, 16 }
 0x3b7   : > { %11040 = vmatprep.subr.bf16.mxu0 %v12625_v16  ;;  %v2595_v16 = vshrl.u32 %v2576_v36, 16  ;;  %v2511_v36 = vrot.slane %v2509_v21, 5  ;;  %v2446_v21 = vshll.u32 %v10620_v17, 16  ;;  %v12631_v17 = vld [vmem:[%s18767_s6 + $0xc0] sm:$0xff]  }
 0x3b8   : > { %v14503_v3 = vor.u32 %v2493_v59, %v2490_v34  ;;  %12436 = vmatpush3.bf16.msra.mxu1 %v12628_v60  ;;  %v2503_v34 = vor.u32 %v2502_v24, %v2499_v8  ;;  %v2517_v59 = vrot.slane %v2515_v39, 4  ;;  %v19112_v39 = vld [vmem:[#allocation22_spill] sm:$0xff] }
 0x3b9   : > { %v14505_v37 = vrot.slane %v2595_v16, 3  ;;  %v14513_v16 = vld [vmem:[#allocation2] sm:$0xf0]  ;;  %12429 = vmatprep.subr.bf16.mxu1 %v12629_v25 }
 0x3ba   : > { %11041 = vmatpush3.bf16.msra.mxu0 %v12626_v28  ;;  %v2359_v28 = vsel %vm2327_vm12, 65537, %v18834_v9  ;;  %19099 = vst [vmem:[#allocation27_spill] sm:$0xff] %v14503_v3  ;;  %v14511_v9 = vrot.slane %v2598_v53, 4  ;;  %19102 = vst [vmem:[#allocation30_spill] sm:$0xff] %v14513_v16  ;;  %v2448_v53 = vrot.slane %v2446_v21, 5  ;;  %v14543_v20 = vsel %vm2415_vm11, %v14503_v3, %v2503_v34 }
 0x3bb   : > { %11042 = vmatprep.subr.bf16.mxu0 %v12627_v44  ;;  %v2439_v44 = vrot.slane %v2437_v23, 5  ;;  %19100 = vst [vmem:[#allocation28_spill] sm:$0xff] %v14505_v37  ;;  %v10629_v58 = vcombine.low %v2359_v28, %v14042_v2  ;;  %v2520_v23 = vrot.slane %v2518_v33, 5  ;;  %v2445_v2 = vrot.slane %v2443_v52, 4  ;;  %19106 = vst [vmem:[#allocation32_spill] sm:$0xff] %v14543_v20 }
 0x3bc   : > { %19101 = vst [vmem:[#allocation29_spill] sm:$0xff] %v14511_v9  ;;  %12437 = vmatpush3.bf16.msra.mxu1 %v12630_v18 }
 0x3bd   : > { %v14518_v28 = vor.u32 %v2439_v44, %v2436_v0  ;;  %v14520_v11 = vor.u32 %v2520_v23, %v2517_v59  ;;  %v2524_v8 = vshrl.u32 %v10629_v58, 16  ;;  %v14537_v0 = vsel %vm2415_vm11, %v14416_v22, %v14468_v47  ;;  %11142 = vmatprep.subr.bf16.mxu1 %v12631_v17  ;;  %v19113_v59 = vld [vmem:[#allocation23_spill] sm:$0xff] }
 0x3be   : > { %11043 = vmatpush3.bf16.msra.mxu0 %v12628_v60  ;;  %v2512_v60 = vor.u32 %v2511_v36, %v2508_v30  ;;  %19105 = vst [vmem:[#allocation31_spill] sm:$0xff] %v14537_v0  ;;  %v14557_v33 = vor.u32 %v2448_v53, %v2445_v2 }
 0x3bf   : > { %11044 = vmatprep.subr.bf16.mxu0 %v12629_v25  ;;  %v14528_v25 = vadd.s32 208, %v13719_v46  ;;  %v14551_v36 = vsel %vm2415_vm11, %v14468_v47, %v14518_v28  ;;  %v14559_v52 = vrot.slane %v2524_v8, 4 }
 0x3c0   : > { %v14546_v30 = vsel %vm2415_vm11, %v2503_v34, %v2512_v60  ;;  %19108 = vst [vmem:[#allocation34_spill] sm:$0xff] %v14551_v36  ;;  %v14555_v44 = vsel %vm2415_vm11, %v2512_v60, %v14520_v11 }
 0x3c1   : > { %19107 = vst [vmem:[#allocation33_spill] sm:$0xff] %v14546_v30  ;;  %19109 = vst [vmem:[#allocation35_spill] sm:$0xff] %v14555_v44 }
 0x3c2   : > { %11045 = vmatpush3.bf16.msra.mxu0 %v12630_v18  ;;  %v19110_v18 = vmov 0  }
 0x3c3   : > { %v14565_v34 = vsel %vm2311_vm14, 65537, %v19110_v18  ;;  %vm1994_vm14 = vcmask 523268  }
 0x478   : > { %v1641_v35 = vpop.f32.mrb[2].mxu0 }
 0x479   : > { %v1645_v45 = vmul.f32 %v1641_v35, %v1126_v49  ;;  %v12097_v32 = vpop.f32.mrb[3].mxu0  ;;  %v2527_v49 = vshll.u32 %v10629_v58, 16 }
 0x47b   : > { %v1649_v35 = vrot.slane %v1645_v45, %v13722_v48  ;;  %v14562_v58 = vrot.slane %v2527_v49, 5  ;;  %v19111_v45 = vld [vmem:[#allocation21_spill] sm:$0xff] }
 0x47d   : > { %v1650_v21 = vmul.f32 %v1649_v35, %v13730_v50  ;;  %v1651_v47 = vmul.f32 %v1649_v35, %v13735_v14  ;;  %v1652_v23 = vmul.f32 %v1649_v35, %v13740_v54  ;;  %v1653_v32 = vmul.f32 %v1649_v35, %v13745_v56 }
 0x47e   : > { %v1654_v2 = vmul.f32 %v1649_v35, %v13754_v61  ;;  %v1655_v17 = vmul.f32 %v1649_v35, %v13761_v15  ;;  %v1656_v60 = vmul.f32 %v1649_v35, %v13770_v6  ;;  %v1657_v50 = vmul.f32 %v1649_v35, %v13778_v51  ;;  %v14587_v51 = vld [vmem:[%s18764_s3] ss:$0 sm:$0xff] }
 0x47f   : > { %v1658_v53 = vmul.f32 %v1649_v35, %v13786_v57  ;;  %v1659_v8 = vmul.f32 %v1649_v35, %v13794_v19  ;;  %v1660_v24 = vmul.f32 %v1649_v35, %v13802_v1  ;;  %v1661_v14 = vmul.f32 %v1649_v35, %v13810_v41 }
 0x480   : > { %v1662_v54 = vmul.f32 %v1649_v35, %v13818_v5  ;;  %v1663_v56 = vmul.f32 %v1649_v35, %v13826_v55  ;;  %v1664_v61 = vmul.f32 %v1649_v35, %v13834_v63  ;;  %v1665_v15 = vmul.f32 %v1649_v35, %v13842_v62 }
 0x481   : > { %v1666_v6 = vmul.f32 %v1649_v35, %v13850_v43  ;;  %v1667_v57 = vmul.f32 %v1649_v35, %v13858_v10  ;;  %v1668_v19 = vmul.f32 %v1649_v35, %v13866_v26  ;;  %v1669_v1 = vmul.f32 %v1649_v35, %v13874_v38 }
 0x482   : > { %v1670_v41 = vmul.f32 %v1649_v35, %v13882_v42  ;;  %v1671_v5 = vmul.f32 %v1649_v35, %v13890_v13  ;;  %v1672_v55 = vmul.f32 %v1649_v35, %v13898_v12  ;;  %v1673_v63 = vmul.f32 %v1649_v35, %v13906_v4 }
 0x483   : > { %v1674_v62 = vmul.f32 %v1649_v35, %v13914_v7  ;;  %v1675_v43 = vmul.f32 %v1649_v35, %v13922_v27  ;;  %v1676_v49 = vmul.f32 %v1649_v35, %v13930_v31  ;;  %v1677_v10 = vmul.f32 %v1649_v35, %v13938_v40 }
 0x484   : > { %v1678_v26 = vmul.f32 %v1649_v35, %v13946_v29  ;;  %v1679_v38 = vmul.f32 %v1649_v35, %v19111_v45  ;;  %v1680_v42 = vmul.f32 %v1649_v35, %v19112_v39  ;;  %v1681_v13 = vmul.f32 %v1649_v35, %v19113_v59 }
 0x485   : > { %v14605_v12 = vadd.f32 %v14587_v51, %v1650_v21  ;;  %v14608_v4 = vadd.f32 %v14587_v51, %v1651_v47  ;;  %v14611_v7 = vadd.f32 %v14587_v51, %v1652_v23  ;;  %v14614_v27 = vadd.f32 %v14587_v51, %v1653_v32 }
 0x486   : > { %v14617_v31 = vadd.f32 %v14587_v51, %v1654_v2  ;;  %v14620_v40 = vadd.f32 %v14587_v51, %v1655_v17  ;;  %v14623_v29 = vadd.f32 %v14587_v51, %v1656_v60  ;;  %v14626_v35 = vadd.f32 %v14587_v51, %v1657_v50 }
 0x487   : > { %v14629_v39 = vadd.f32 %v14587_v51, %v1658_v53  ;;  %v14632_v45 = vadd.f32 %v14587_v51, %v1659_v8  ;;  %v14635_v21 = vadd.f32 %v14587_v51, %v1660_v24  ;;  %v14638_v59 = vadd.f32 %v14587_v51, %v1661_v14 }
 0x488   : > { %v14641_v47 = vadd.f32 %v14587_v51, %v1662_v54  ;;  %v14644_v23 = vadd.f32 %v14587_v51, %v1663_v56  ;;  %v14647_v32 = vadd.f32 %v14587_v51, %v1664_v61  ;;  %v14650_v2 = vadd.f32 %v14587_v51, %v1665_v15 }
 0x489   : > { %19114 = vst [vmem:[#allocation21_spill] sm:$0xff] %v14635_v21  ;;  %19115 = vst [vmem:[#allocation22_spill] sm:$0xff] %v14638_v59  ;;  %v14653_v17 = vadd.f32 %v14587_v51, %v1666_v6  ;;  %v14656_v60 = vadd.f32 %v14587_v51, %v1667_v57  ;;  %v14659_v50 = vadd.f32 %v14587_v51, %v1668_v19  ;;  %v1731_v48 = vsub.f32 0.0, %v14638_v59 }
 0x48a   : > { %19116 = vst [vmem:[#allocation23_spill] sm:$0xff] %v14641_v47  ;;  %19117 = vst [vmem:[#allocation36_spill] sm:$0xff] %v14644_v23  ;;  %v14662_v53 = vadd.f32 %v14587_v51, %v1669_v1  ;;  %v14665_v8 = vadd.f32 %v14587_v51, %v1670_v41  ;;  %v14668_v24 = vadd.f32 %v14587_v51, %v1671_v5  ;;  %v1720_v41 = vsub.f32 0.0, %v14605_v12 }
 0x48b   : > { %19118 = vst [vmem:[#allocation37_spill] sm:$0xff] %v14647_v32  ;;  %19119 = vst [vmem:[#allocation38_spill] sm:$0xff] %v14650_v2  ;;  %v14671_v14 = vadd.f32 %v14587_v51, %v1672_v55  ;;  %v14674_v54 = vadd.f32 %v14587_v51, %v1673_v63  ;;  %v14677_v56 = vadd.f32 %v14587_v51, %v1674_v62  ;;  %v1721_v5 = vsub.f32 0.0, %v14608_v4 }
 0x48c   : > { %19120 = vst [vmem:[#allocation39_spill] sm:$0xff] %v14653_v17  ;;  %19121 = vst [vmem:[#allocation40_spill] sm:$0xff] %v14656_v60  ;;  %v14680_v61 = vadd.f32 %v14587_v51, %v1675_v43  ;;  %v14683_v15 = vadd.f32 %v14587_v51, %v1676_v49  ;;  %v14686_v6 = vadd.f32 %v14587_v51, %v1677_v10  ;;  %v1722_v55 = vsub.f32 0.0, %v14611_v7 }
 0x48d   : > { %19122 = vst [vmem:[#allocation41_spill] sm:$0xff] %v14659_v50  ;;  %19123 = vst [vmem:[#allocation42_spill] sm:$0xff] %v14662_v53  ;;  %v14689_v57 = vadd.f32 %v14587_v51, %v1678_v26  ;;  %v14692_v19 = vadd.f32 %v14587_v51, %v1679_v38  ;;  %v14695_v1 = vadd.f32 %v14587_v51, %v1680_v42  ;;  %v1723_v63 = vsub.f32 0.0, %v14614_v27 }
 0x48e   : > { %19124 = vst [vmem:[#allocation43_spill] sm:$0xff] %v14665_v8  ;;  %19125 = vst [vmem:[#allocation44_spill] sm:$0xff] %v14668_v24  ;;  %v1724_v62 = vsub.f32 0.0, %v14617_v31  ;;  %v1725_v43 = vsub.f32 0.0, %v14620_v40  ;;  %v1726_v49 = vsub.f32 0.0, %v14623_v29  ;;  %v1727_v10 = vsub.f32 0.0, %v14626_v35 }
 0x48f   : > { %19126 = vst [vmem:[#allocation45_spill] sm:$0xff] %v14680_v61  ;;  %19127 = vst [vmem:[#allocation46_spill] sm:$0xff] %v14689_v57  ;;  %v1728_v26 = vsub.f32 0.0, %v14629_v39  ;;  %v1729_v38 = vsub.f32 0.0, %v14632_v45  ;;  %v1730_v42 = vsub.f32 0.0, %v14635_v21  ;;  %v1732_v22 = vsub.f32 0.0, %v14641_v47 }
 0x490   : > { %19128 = vst [vmem:[#allocation47_spill] sm:$0xff] %v14692_v19  ;;  %19129 = vst [vmem:[#allocation48_spill] sm:$0xff] %v14695_v1  ;;  %v1733_v37 = vsub.f32 0.0, %v14644_v23  ;;  %v1734_v9 = vsub.f32 0.0, %v14647_v32  ;;  %v1735_v44 = vsub.f32 0.0, %v14650_v2  ;;  %v1736_v30 = vsub.f32 0.0, %v14653_v17 }
 0x491   : > { %v1737_v20 = vsub.f32 0.0, %v14656_v60  ;;  %v1738_v16 = vsub.f32 0.0, %v14659_v50  ;;  %v1739_v36 = vsub.f32 0.0, %v14662_v53  ;;  %v1740_v3 = vsub.f32 0.0, %v14665_v8 }
 0x492   : > { %v1741_v59 = vsub.f32 0.0, %v14668_v24  ;;  %v14720_v47 = vadd.f32 %v14587_v51, %v1681_v13  ;;  %v1752_v23 = vmul.f32 1.442695, %v1720_v41  ;;  %v1754_v21 = vmul.f32 1.442695, %v1721_v5 }
 0x493   : > { %v1756_v32 = vmul.f32 1.442695, %v1722_v55  ;;  %v1742_v2 = vsub.f32 0.0, %v14671_v14  ;;  %v1743_v17 = vsub.f32 0.0, %v14674_v54  ;;  %v1744_v60 = vsub.f32 0.0, %v14677_v56 }
 0x494   : > { %19130 = vst [vmem:[#allocation49_spill] sm:$0xff] %v14720_v47  ;;  %v1758_v0 = vmul.f32 1.442695, %v1723_v63  ;;  %v1745_v50 = vsub.f32 0.0, %v14680_v61  ;;  %v1746_v53 = vsub.f32 0.0, %v14683_v15  ;;  %12781 = vpow2.f32 %v1752_v23 }
 0x495   : > { %v1760_v8 = vmul.f32 1.442695, %v1724_v62  ;;  %v1747_v24 = vsub.f32 0.0, %v14686_v6  ;;  %v1748_v51 = vsub.f32 0.0, %v14689_v57  ;;  %12783 = vpow2.f32 %v1754_v21 }
 0x496   : > { %v1762_v13 = vmul.f32 1.442695, %v1725_v43  ;;  %v1749_v41 = vsub.f32 0.0, %v14692_v19  ;;  %v1750_v5 = vsub.f32 0.0, %v14695_v1  ;;  %12785 = vpow2.f32 %v1756_v32 }
 0x497   : > { %v1764_v55 = vmul.f32 1.442695, %v1726_v49  ;;  %v1751_v63 = vsub.f32 0.0, %v14720_v47  ;;  %12787 = vpow2.f32 %v1758_v0  ;;  %v1766_v61 = vmul.f32 1.442695, %v1727_v10 }
 0x498   : > { %v14735_v23 = vsel %vm2415_vm11, %v14518_v28, %v14557_v33  ;;  %12789 = vpow2.f32 %v1760_v8  ;;  %v1768_v62 = vmul.f32 1.442695, %v1728_v26  ;;  %v1770_v57 = vmul.f32 1.442695, %v1729_v38 }
 0x499   : > { %19131 = vst [vmem:[#allocation50_spill] sm:$0xff] %v14735_v23  ;;  %v14739_v21 = vor.u32 %v14562_v58, %v14559_v52  ;;  %12791 = vpow2.f32 %v1762_v13  ;;  %v1772_v43 = vmul.f32 1.442695, %v1730_v42  ;;  %v1774_v32 = vmul.f32 1.442695, %v1731_v48  ;;  %v19132_v48 = vld [vmem:[#allocation25_spill] sm:$0xff] }
 0x49a   : > { %v1776_v49 = vmul.f32 1.442695, %v1732_v22  ;;  %12793 = vpow2.f32 %v1764_v55  ;;  %v1778_v47 = vmul.f32 1.442695, %v1733_v37  ;;  %v1780_v0 = vmul.f32 1.442695, %v1734_v9 }
 0x49b   : > { %v1782_v10 = vmul.f32 1.442695, %v1735_v44  ;;  %12795 = vpow2.f32 %v1766_v61  ;;  %v1784_v1 = vmul.f32 1.442695, %v1736_v30  ;;  %v1786_v19 = vmul.f32 1.442695, %v1737_v20 }
 0x49c   : > { %v1788_v28 = vmul.f32 1.442695, %v1738_v16  ;;  %12797 = vpow2.f32 %v1768_v62  ;;  %v1790_v8 = vmul.f32 1.442695, %v1739_v36  ;;  %v1792_v26 = vmul.f32 1.442695, %v1740_v3 }
 0x49d   : > { %v14741_v38 = vmul.f32 1.442695, %v1741_v59  ;;  %12799 = vpow2.f32 %v1770_v57  ;;  %v14743_v52 = vmul.f32 1.442695, %v1742_v2  ;;  %v14745_v58 = vmul.f32 1.442695, %v1743_v17 }
 0x49e   : > { %v10621_v22 = vcombine.low %v14565_v34, %v19132_v48  ;;  %v12643_v37 = vld [vmem:[%s18767_s6 + $0x140] sm:$0xff]   ;;  %v12782_v9 = vpop.eup %12781  ;;  %12801 = vpow2.f32 %v1772_v43  ;;  %v14752_v16 = vmul.f32 1.442695, %v1744_v60  ;;  %v19133_v3 = vand.u32 15, %v14528_v25 }
 0x49f   : > { %v588_v20 = vadd.s32 80, %v13719_v46  ;;  %v12784_v30 = vpop.eup %12783  ;;  %12803 = vpow2.f32 %v1774_v32  ;;  %v14757_v36 = vmul.f32 1.442695, %v1745_v50  ;;  %11254 = vmatprep.subr.bf16.mxu0 %v12643_v37  ;;  %v14759_v2 = vmul.f32 1.442695, %v1746_v53 }
 0x4a0   : > { %vm1020_vm15 = vcmp.ge.s32.totalorder %v19133_v3, 1  ;;  %v2452_v44 = vshrl.u32 %v10621_v22, 16  ;;  %v2455_v59 = vshll.u32 %v10621_v22, 16  ;;  %v12786_v34 = vpop.eup %12785  ;;  %12805 = vpow2.f32 %v1776_v49 }
 0x4a1   : > { %vm2329_vm3 = vmpackc.low %vm1020_vm15, %vm1020_vm15  ;;  %v684_v60 = vand.u32 15, %v588_v20  ;;  %v12788_v61 = vpop.eup %12787  ;;  %12807 = vpow2.f32 %v1778_v47  ;;  %v14762_v25 = vmul.f32 1.442695, %v1747_v24  ;;  %v14764_v57 = vmul.f32 1.442695, %v1748_v51 }
 0x4a2   : > { %v2361_v17 = vsel %vm2329_vm3, 65537, %v19110_v18  ;;  %v2454_v42 = vrot.slane %v2452_v44, 4  ;;  %v12790_v50 = vpop.eup %12789  ;;  %12809 = vpow2.f32 %v1780_v0  ;;  %v2457_v13 = vrot.slane %v2455_v59, 5 }
 0x4a3   : > { %v10630_v55 = vcombine.low %v2361_v17, %v19132_v48  ;;  %vm14767_vm4 = vcmp.ge.s32.totalorder %v684_v60, 1  ;;  %v12792_v53 = vpop.eup %12791  ;;  %12811 = vpow2.f32 %v1782_v10  ;;  %v14771_v43 = vmul.f32 1.442695, %v1749_v41 }
 0x4a4   : > { %v14773_v32 = vmul.f32 1.442695, %v1750_v5  ;;  %v14775_v47 = vmul.f32 1.442695, %v1751_v63  ;;  %vm2313_vm5 = vmpackc.low %vm14767_vm4, %vm14767_vm4  ;;  %v12794_v24 = vpop.eup %12793  ;;  %12813 = vpow2.f32 %v1784_v1  ;;  %v606_v0 = vadd.s32 224, %v13719_v46 }
 0x4a5   : > { %v2533_v51 = vshrl.u32 %v10630_v55, 16  ;;  %v2536_v49 = vshll.u32 %v10630_v55, 16  ;;  %v12796_v22 = vpop.eup %12795  ;;  %12815 = vpow2.f32 %v1786_v19  ;;  %v14781_v37 = vadd.f32 1.0, %v12782_v9 }
 0x4a6   : > { %v14786_v41 = vsel %vm2415_vm11, %v14520_v11, %v14739_v21  ;;  %v2345_v5 = vsel %vm2313_vm5, 65537, %v19110_v18  ;;  %v12798_v63 = vpop.eup %12797  ;;  %12817 = vpow2.f32 %v1788_v28  ;;  %v14789_v10 = vadd.f32 1.0, %v12784_v30 }
 0x4a7   : > { %19136 = vst [vmem:[#allocation25_spill] sm:$0xff] %v14786_v41  ;;  %v14791_v1 = vadd.f32 1.0, %v12786_v34  ;;  %v14793_v3 = vor.u32 %v2457_v13, %v2454_v42  ;;  %v12800_v20 = vpop.eup %12799  ;;  %12819 = vpow2.f32 %v1790_v8  ;;  %v2535_v19 = vrot.slane %v2533_v51, 4 }
 0x4a8   : > { %v2538_v9 = vrot.slane %v2536_v49, 5  ;;  %v10622_v44 = vcombine.low %v2345_v5, %v19132_v48  ;;  %v12802_v59 = vpop.eup %12801  ;;  %12821 = vpow2.f32 %v1792_v26  ;;  %v14796_v11 = vadd.f32 1.0, %v12788_v61 }
 0x4a9   : > { %v14798_v17 = vadd.f32 1.0, %v12790_v50  ;;  %v810_v18 = vand.u32 15, %v606_v0  ;;  %v12804_v28 = vpop.eup %12803  ;;  %12823 = vpow2.f32 %v14741_v38  ;;  %v14801_v30 = vadd.f32 1.0, %v12792_v53 }
 0x4aa   : > { %v2461_v34 = vshrl.u32 %v10622_v44, 16  ;;  %v590_v60 = vadd.s32 96, %v13719_v46  ;;  %v12806_v8 = vpop.eup %12805  ;;  %12825 = vpow2.f32 %v14743_v52  ;;  %v14805_v42 = vadd.f32 1.0, %v12794_v24 }
 0x4ab   : > { %v2464_v13 = vshll.u32 %v10622_v44, 16  ;;  %vm14807_vm6 = vcmp.ge.s32.totalorder %v810_v18, 1  ;;  %v12808_v61 = vpop.eup %12807  ;;  %12827 = vpow2.f32 %v14745_v58  ;;  %v14812_v50 = vadd.f32 1.0, %v12796_v22 }
 0x4ac   : > { %v14817_v38 = vsel %vm2415_vm11, %v14557_v33, %v14793_v3  ;;  %v14819_v55 = vor.u32 %v2538_v9, %v2535_v19  ;;  %vm2331_vm8 = vmpackc.low %vm14807_vm6, %vm14807_vm6  ;;  %v12810_v52 = vpop.eup %12809  ;;  %12829 = vpow2.f32 %v14752_v16  ;;  %v14825_v62 = vadd.f32 1.0, %v12798_v63  ;;  %v14830_v33 = vld [vmem:[#allocation2] sm:$0xff] }
 0x4ad   : > { %19139 = vst [vmem:[#allocation51_spill] sm:$0xff] %v14817_v38  ;;  %v2463_v53 = vrot.slane %v2461_v34, 4  ;;  %v2466_v58 = vrot.slane %v2464_v13, 5  ;;  %v12812_v24 = vpop.eup %12811  ;;  %12831 = vpow2.f32 %v14757_v36  ;;  %v14828_v51 = vadd.f32 1.0, %v12800_v20 }
 0x4ae   : > { %v2363_v49 = vsel %vm2331_vm8, 65537, %v14830_v33  ;;  %v698_v0 = vand.u32 15, %v590_v60  ;;  %v12814_v22 = vpop.eup %12813  ;;  %12833 = vpow2.f32 %v14759_v2  ;;  %v14834_v5 = vadd.f32 1.0, %v12802_v59 }
 0x4af   : > { %v14836_v16 = vadd.f32 1.0, %v12804_v28  ;;  %v10631_v63 = vcombine.low %v2363_v49, %v19132_v48  ;;  %v12816_v19 = vpop.eup %12815  ;;  %12835 = vpow2.f32 %v14762_v25  ;;  %v14840_v36 = vadd.f32 1.0, %v12806_v8 }
 0x4b0   : > { %v14845_v20 = vsel %vm2415_vm11, %v14739_v21, %v14819_v55  ;;  %vm14847_vm9 = vcmp.ge.s32.totalorder %v698_v0, 1  ;;  %v12818_v2 = vpop.eup %12817  ;;  %12837 = vpow2.f32 %v14764_v57  ;;  %v14852_v44 = vor.u32 %v2466_v58, %v2463_v53 }
 0x4b1   : > { %19140 = vst [vmem:[#allocation52_spill] sm:$0xff] %v14845_v20  ;;  %v2542_v59 = vshrl.u32 %v10631_v63, 16  ;;  %vm2315_vm10 = vmpackc.low %vm14847_vm9, %vm14847_vm9  ;;  %v608_v25 = vadd.s32 240, %v13719_v46  ;;  %v12820_v18 = vpop.eup %12819  ;;  %12839 = vpow2.f32 %v14771_v43  ;;  %v14859_v21 = vadd.f32 1.0, %v12808_v61 }
 0x4b2   : > { %v14861_v28 = vadd.f32 1.0, %v12810_v52  ;;  %v2545_v34 = vshll.u32 %v10631_v63, 16  ;;  %v12822_v60 = vpop.eup %12821  ;;  %12841 = vpow2.f32 %v14773_v32  ;;  %v14864_v57 = vadd.f32 1.0, %v12812_v24 }
 0x4b3   : > { %v14866_v8 = vadd.f32 1.0, %v12814_v22  ;;  %v2347_v13 = vsel %vm2315_vm10, 65537, %v14830_v33  ;;  %v12824_v26 = vpop.eup %12823  ;;  %12843 = vpow2.f32 %v14775_v47  ;;  %v2544_v53 = vrot.slane %v2542_v59, 4 }
 0x4b4   : > { %v2547_v58 = vrot.slane %v2545_v34, 5  ;;  %v10623_v43 = vcombine.low %v2347_v13, %v19132_v48  ;;  %v12826_v61 = vpop.eup %12825  ;;  %v14871_v52 = vadd.f32 1.0, %v12816_v19  ;;  %12845 = vrcp.f32 %v14781_v37 }
 0x4b5   : > { %v14877_v32 = vsel %vm2415_vm11, %v14793_v3, %v14852_v44  ;;  %v824_v24 = vand.u32 15, %v608_v25  ;;  %v12828_v49 = vpop.eup %12827  ;;  %v14879_v0 = vadd.f32 1.0, %v12818_v2  ;;  %12847 = vrcp.f32 %v14789_v10 }
 0x4b6   : > { %19143 = vst [vmem:[#allocation53_spill] sm:$0xff] %v14877_v32  ;;  %v2470_v47 = vshrl.u32 %v10623_v43, 16  ;;  %v592_v22 = vadd.s32 112, %v13719_v46  ;;  %v12830_v63 = vpop.eup %12829  ;;  %v14883_v9 = vadd.f32 1.0, %v12820_v18  ;;  %12849 = vrcp.f32 %v14791_v1 }
 0x4b7   : > { %v2473_v37 = vshll.u32 %v10623_v43, 16  ;;  %vm14886_vm12 = vcmp.ge.s32.totalorder %v824_v24, 1  ;;  %v12832_v3 = vpop.eup %12831  ;;  %v14890_v59 = vadd.f32 1.0, %v12822_v60  ;;  %12851 = vrcp.f32 %v14796_v11 }
 0x4b8   : > { %v14893_v2 = vor.u32 %v2547_v58, %v2544_v53  ;;  %v2472_v10 = vrot.slane %v2470_v47, 4  ;;  %vm2333_vm13 = vmpackc.low %vm14886_vm12, %vm14886_vm12  ;;  %v12834_v25 = vpop.eup %12833  ;;  %v14898_v18 = vadd.f32 1.0, %v12824_v26  ;;  %v14900_v1 = vadd.f32 1.0, %v12826_v61 }
 0x4b9   : > { %12853 = vrcp.f32 %v14798_v17  ;;  %v2475_v34 = vrot.slane %v2473_v37, 5  ;;  %v12836_v13 = vpop.eup %12835  ;;  %v14903_v60 = vadd.f32 1.0, %v12828_v49  ;;  %v2365_v11 = vsel %vm2333_vm13, 65537, %v14830_v33 }
 0x4ba   : > { %12855 = vrcp.f32 %v14801_v30  ;;  %v712_v53 = vand.u32 15, %v592_v22  ;;  %v12838_v58 = vpop.eup %12837  ;;  %v14907_v43 = vadd.f32 1.0, %v12830_v63  ;;  %v10632_v61 = vcombine.low %v2365_v11, %v19132_v48 }
 0x4bb   : > { %12857 = vrcp.f32 %v14805_v42  ;;  %v14910_v26 = vor.u32 %v2475_v34, %v2472_v10  ;;  %v12840_v24 = vpop.eup %12839  ;;  %v14913_v17 = vadd.f32 1.0, %v12832_v3  ;;  %v14919_v30 = vsel %vm2415_vm11, %v14819_v55, %v14893_v2 }
 0x4bc   : > { %12859 = vrcp.f32 %v14812_v50  ;;  %19146 = vst [vmem:[#allocation54_spill] sm:$0xff] %v14919_v30  ;;  %vm14921_vm15 = vcmp.ge.s32.totalorder %v712_v53, 1  ;;  %v12842_v42 = vpop.eup %12841  ;;  %v14925_v47 = vadd.f32 1.0, %v12834_v25  ;;  %v14927_v22 = vadd.f32 1.0, %v12836_v13 }
 0x4bd   : > { %12861 = vrcp.f32 %v14825_v62  ;;  %v2551_v63 = vshrl.u32 %v10632_v61, 16  ;;  %vm2317_vm3 = vmpackc.low %vm14921_vm15, %vm14921_vm15  ;;  %v12844_v50 = vpop.eup %12843  ;;  %v14933_v37 = vadd.f32 1.0, %v12838_v58  ;;  %v2554_v55 = vshll.u32 %v10632_v61, 16 }
 0x4be   : > { %12863 = vrcp.f32 %v14828_v51  ;;  %v14937_v19 = vadd.s32 8, %v13719_v46  ;;  %v12846_v3 = vpop.eup %12845  ;;  %vm1945_vm4 = vcmask 1043456   ;;  %v14939_v10 = vadd.f32 1.0, %v12840_v24 }
 0x4bf   : > { %12865 = vrcp.f32 %v14834_v5  ;;  %v14945_v62 = vsel %vm2415_vm11, %v14852_v44, %v14910_v26  ;;  %v2349_v25 = vsel %vm2317_vm3, 65537, %v14830_v33  ;;  %v12848_v34 = vpop.eup %12847  ;;  %v14948_v13 = vadd.f32 1.0, %v12842_v42 }
 0x4c0   : > { %19149 = vst [vmem:[#allocation55_spill] sm:$0xff] %v14945_v62  ;;  %12867 = vrcp.f32 %v14836_v16  ;;  %v1880_v51 = vmul.f32 %v12846_v3, %v14605_v12  ;;  %v10624_v11 = vcombine.low %v2349_v25, %v19132_v48  ;;  %v12850_v53 = vpop.eup %12849  ;;  %v14953_v58 = vadd.f32 1.0, %v12844_v50 }
 0x4c1   : > { %12869 = vrcp.f32 %v14840_v36  ;;  %v1881_v5 = vmul.f32 %v12848_v34, %v14608_v4  ;;  %v2553_v44 = vrot.slane %v2551_v63, 4  ;;  %v12852_v61 = vpop.eup %12851  ;;  %v1882_v33 = vmul.f32 %v12850_v53, %v14611_v7 }
 0x4c2   : > { %12871 = vrcp.f32 %v14859_v21  ;;  %v2556_v24 = vrot.slane %v2554_v55, 5  ;;  %v2479_v49 = vshrl.u32 %v10624_v11, 16  ;;  %v1883_v12 = vmul.f32 %v12852_v61, %v14614_v27 }
 0x4c3   : > { %v12854_v16 = vpop.eup %12853  ;;  %12873 = vrcp.f32 %v14861_v28  ;;  %v1913_v42 = vpack.c.bf16 %v1881_v5, %v1880_v51  ;;  %v2482_v50 = vshll.u32 %v10624_v11, 16  ;;  %v14964_v63 = vadd.s32 24, %v13719_v46 }
 0x4c4   : > { %v12856_v3 = vpop.eup %12855  ;;  %12875 = vrcp.f32 %v14864_v57  ;;  %v1884_v4 = vmul.f32 %v12854_v16, %v14617_v31  ;;  %v2481_v36 = vrot.slane %v2479_v49, 4  ;;  %v1914_v28 = vpack.c.bf16 %v1883_v12, %v1882_v33 }
 0x4c5   : > { %v12858_v21 = vpop.eup %12857  ;;  %12877 = vrcp.f32 %v14866_v8  ;;  %v1885_v7 = vmul.f32 %v12856_v3, %v14620_v40  ;;  %v1946_v55 = vrot.slane %v1913_v42, 4  ;;  %v14970_v34 = vor.u32 %v2556_v24, %v2553_v44  ;;  %v19152_v24 = vld [vmem:[#allocation21_spill] sm:$0xff] }
 0x4c6   : > { %v12860_v25 = vpop.eup %12859  ;;  %12879 = vrcp.f32 %v14871_v52  ;;  %v1886_v27 = vmul.f32 %v12858_v21, %v14623_v29  ;;  %v2484_v57 = vrot.slane %v2482_v50, 5  ;;  %v1947_v8 = vrot.slane %v1914_v28, 4 }
 0x4c7   : > { %19150 = vst [vmem:[#allocation56_spill] sm:$0xff] %v14970_v34  ;;  %v12862_v31 = vpop.eup %12861  ;;  %12881 = vrcp.f32 %v14879_v0  ;;  %v1887_v51 = vmul.f32 %v12860_v25, %v14626_v35  ;;  %v1915_v11 = vpack.c.bf16 %v1885_v7, %v1884_v4  ;;  %1995 = vst.msk [vmem:[#allocation2 + $0x8] sm:$0xf0] %vm1994_vm14, %v1946_v55  ;;  %v621_v29 = vand.u32 15, %v14937_v19  ;;  %v19151_v35 = vld [vmem:[#allocation31_spill] sm:$0xff] }
 0x4c8   : > { %v12864_v40 = vpop.eup %12863  ;;  %12883 = vrcp.f32 %v14883_v9  ;;  %v1888_v53 = vmul.f32 %v12862_v31, %v14629_v39  ;;  %v2485_v52 = vor.u32 %v2484_v57, %v2481_v36  ;;  %vm18878_vm5 = vcmp.ne.s16.totalorder %v19151_v35, 0 }
 0x4c9   : > { %v12866_v5 = vpop.eup %12865  ;;  %12885 = vrcp.f32 %v14890_v59  ;;  %v1889_v44 = vmul.f32 %v12864_v40, %v14632_v45  ;;  %v1916_v0 = vpack.c.bf16 %v1887_v51, %v1886_v27  ;;  %v1949_v61 = vrot.slane %v1915_v11, 4  ;;  %v19154_v45 = vld [vmem:[#allocation22_spill] sm:$0xff] }
 0x4ca   : > { %v12868_v33 = vpop.eup %12867  ;;  %12887 = vrcp.f32 %v14898_v18  ;;  %v1890_v49 = vmul.f32 %v12866_v5, %v19152_v24  ;;  %v1948_v9 = vsel %vm1945_vm4, %v1946_v55, %v1947_v8  ;;  %v14987_v39 = vsel %vm2415_vm11, %v14893_v2, %v14970_v34  ;;  %v19155_v18 = vld [vmem:[#allocation23_spill] sm:$0xff]  ;;  %v19161_v51 = vld [vmem:[#allocation38_spill] sm:$0xff] }
 0x4cb   : > { %19153 = vst [vmem:[#allocation21_spill] sm:$0xff] %v14987_v39  ;;  %v12870_v16 = vpop.eup %12869  ;;  %12889 = vrcp.f32 %v14900_v1  ;;  %v1891_v59 = vmul.f32 %v12868_v33, %v19154_v45  ;;  %v1917_v12 = vpack.c.bf16 %v1889_v44, %v1888_v53  ;;  %v1951_v42 = vrot.slane %v1916_v0, 4  ;;  %1996 = vst.msk [vmem:[#allocation2 + $0x10] sm:$0xff] %vm1140_vm1, %v1948_v9  ;;  %v19157_v1 = vld [vmem:[#allocation36_spill] sm:$0xff]  ;;  %v19162_v53 = vld [vmem:[#allocation34_spill] sm:$0xff] }
 0x4cc   : > { %v12872_v50 = vpop.eup %12871  ;;  %12891 = vrcp.f32 %v14903_v60  ;;  %v1892_v3 = vmul.f32 %v12870_v16, %v19155_v18  ;;  %v1950_v4 = vsel %vm1945_vm4, %v1947_v8, %v1949_v61  ;;  %v14997_v2 = vsel %vm2415_vm11, %v14910_v26, %v2485_v52  ;;  %v19158_v60 = vld [vmem:[#allocation37_spill] sm:$0xff]  ;;  %v19159_v26 = vld [vmem:[#allocation27_spill] sm:$0xff]  ;;  %v19168_v18 = vld [vmem:[#allocation42_spill] sm:$0xff] }
 0x4cd   : > { %19156 = vst [vmem:[#allocation22_spill] sm:$0xff] %v14997_v2  ;;  %v12874_v36 = vpop.eup %12873  ;;  %12893 = vrcp.f32 %v14907_v43  ;;  %v1893_v21 = vmul.f32 %v12872_v50, %v19157_v1  ;;  %v1918_v7 = vpack.c.bf16 %v1891_v59, %v1890_v49  ;;  %v1953_v55 = vrot.slane %v1917_v12, 4  ;;  %1997 = vst.msk [vmem:[#allocation2 + $0x18] sm:$0xff] %vm1140_vm1, %v1950_v4  ;;  %v19163_v5 = vld [vmem:[#allocation39_spill] sm:$0xff]  ;;  %v19165_v16 = vld [vmem:[#allocation41_spill] sm:$0xff] }
 0x4ce   : > { %v12876_v28 = vpop.eup %12875  ;;  %12895 = vrcp.f32 %v14913_v17  ;;  %v1894_v25 = vmul.f32 %v12874_v36, %v19158_v60  ;;  %v15004_v27 = vld [vmem:[#allocation2 + $0x8] sm:$0xff]  ;;  %v1952_v57 = vsel %vm1945_vm4, %v1949_v61, %v1951_v42  ;;  %v15009_v31 = vsel %vm2415_vm11, %v2485_v52, %v19159_v26  ;;  %v19164_v61 = vld [vmem:[#allocation40_spill] sm:$0xff] }
 0x4cf   : > { %19160 = vst [vmem:[#allocation23_spill] sm:$0xff] %v15009_v31  ;;  %v12878_v43 = vpop.eup %12877  ;;  %12897 = vrcp.f32 %v14925_v47  ;;  %v1895_v11 = vmul.f32 %v12876_v28, %v19161_v51  ;;  %v1919_v8 = vpack.c.bf16 %v1893_v21, %v1892_v3  ;;  %v1954_v40 = vsel %vm1945_vm4, %v1951_v42, %v1953_v55  ;;  %1998 = vst.msk [vmem:[#allocation2 + $0x20] sm:$0xff] %vm1140_vm1, %v1952_v57  ;;  %v19166_v59 = vld [vmem:[#allocation30_spill] sm:$0xff]  ;;  %v19169_v1 = vld [vmem:[#allocation43_spill] sm:$0xff] }
 0x4d0   : > { %vm18905_vm6 = vcmp.ne.s16.totalorder %v19162_v53, 0  ;;  %v12880_v17 = vpop.eup %12879  ;;  %12899 = vrcp.f32 %v14927_v22  ;;  %v1896_v44 = vmul.f32 %v12878_v43, %v19163_v5  ;;  %v1955_v0 = vrot.slane %v1918_v7, 4  ;;  %1999 = vst.msk [vmem:[#allocation2 + $0x28] sm:$0xff] %vm1140_vm1, %v1954_v40  ;;  %v19170_v28 = vld [vmem:[#allocation44_spill] sm:$0xff] }
 0x4d1   : > { %v2813_v52 = vrot.slane %v15004_v27, 4  ;;  %v12882_v47 = vpop.eup %12881  ;;  %12901 = vrcp.f32 %v14933_v37  ;;  %v1897_v33 = vmul.f32 %v12880_v17, %v19164_v61  ;;  %v1920_v24 = vpack.c.bf16 %v1895_v11, %v1894_v25  ;;  %v19171_v43 = vld [vmem:[#allocation32_spill] sm:$0xff] }
 0x4d2   : > { %v1957_v49 = vrot.slane %v1919_v8, 4  ;;  %v12884_v9 = vpop.eup %12883  ;;  %12903 = vrcp.f32 %v14939_v10  ;;  %v1898_v45 = vmul.f32 %v12882_v47, %v19165_v16  ;;  %v1956_v22 = vsel %vm1945_vm4, %v1953_v55, %v1955_v0  ;;  %v15033_v10 = vld [vmem:[#allocation2 + $0x10] sm:$0xff]  ;;  %v19172_v47 = vld [vmem:[#allocation33_spill] sm:$0xff] }
 0x4d3   : > { %v19167_v12 = vrot.slane %v19166_v59, 4  ;;  %v12886_v50 = vpop.eup %12885  ;;  %12905 = vrcp.f32 %v14948_v13  ;;  %v1899_v37 = vmul.f32 %v12884_v9, %v19168_v18  ;;  %v1921_v3 = vpack.c.bf16 %v1897_v33, %v1896_v44  ;;  %2000 = vst.msk [vmem:[#allocation2 + $0x30] sm:$0xff] %vm1140_vm1, %v1956_v22  ;;  %v19173_v16 = vld [vmem:[#allocation45_spill] sm:$0xff] }
 0x4d4   : > { %v1958_v4 = vsel %vm1945_vm4, %v1955_v0, %v1957_v49  ;;  %vm2593_vm8 = vsmask.f32 4352  ;;  %v12888_v36 = vpop.eup %12887  ;;  %12907 = vrcp.f32 %v14953_v58  ;;  %v1900_v21 = vmul.f32 %v12886_v50, %v19169_v1  ;;  %v15051_v61 = vld [vmem:[#allocation2 + $0x18] sm:$0xff] }
 0x4d5   : > { %v2814_v42 = vsel %vm1945_vm4, %v19167_v12, %v2813_v52  ;;  %v1959_v7 = vrot.slane %v1920_v24, 4  ;;  %2001 = vst.msk [vmem:[#allocation2 + $0x38] sm:$0xff] %vm1140_vm1, %v1958_v4  ;;  %v2577_v13 = vsel %vm18878_vm5, %v15004_v27, 0  ;;  %v12890_v55 = vpop.eup %12889  ;;  %v1901_v60 = vmul.f32 %v12888_v36, %v19170_v28  ;;  %v19176_v28 = vld [vmem:[#allocation29_spill] sm:$0xff] }
 0x4d6   : > { %2861 = vst.msk [vmem:[#allocation3 + $0x8] sm:$0xff] %vm1140_vm1, %v2814_v42  ;;  %v1922_v25 = vpack.c.bf16 %v1899_v37, %v1898_v45  ;;  %v1961_v57 = vrot.slane %v1921_v3, 4  ;;  %v2603_v26 = vshrl.u32 %v2577_v13, 16  ;;  %vm18887_vm9 = vcmp.ne.s16.totalorder %v19171_v43, 0  ;;  %v12892_v58 = vpop.eup %12891  ;;  %v19174_v3 = vld [vmem:[#allocation35_spill] sm:$0xff] }
 0x4d7   : > { %vm18882_vm10 = vcmp.ne.s16.totalorder %v14735_v23, 0  ;;  %v1902_v51 = vmul.f32 %v12890_v55, %v14671_v14  ;;  %v1960_v11 = vsel %vm1945_vm4, %v1957_v49, %v1959_v7  ;;  %v2606_v8 = vshll.u32 %v2577_v13, 16  ;;  %v12894_v17 = vpop.eup %12893  ;;  %v19175_v13 = vld [vmem:[#allocation46_spill] sm:$0xff] }
 0x4d8   : > { %v2815_v40 = vrot.slane %v15033_v10, 4  ;;  %v1903_v27 = vmul.f32 %v12892_v58, %v14674_v54  ;;  %v1923_v5 = vpack.c.bf16 %v1901_v60, %v1900_v21  ;;  %v1962_v44 = vsel %vm1945_vm4, %v1959_v7, %v1961_v57  ;;  %2002 = vst.msk [vmem:[#allocation2 + $0x40] sm:$0xff] %vm1140_vm1, %v1960_v11  ;;  %v12896_v33 = vpop.eup %12895  ;;  %v19177_v60 = vld [vmem:[#allocation28_spill] sm:$0xff]  ;;  %v19179_v11 = vld [vmem:[#allocation47_spill] sm:$0xff] }
 0x4d9   : > { %v1963_v0 = vrot.slane %v1922_v25, 4  ;;  %vm18875_vm12 = vcmp.ne.s16.totalorder %v19172_v47, 0  ;;  %v1904_v14 = vmul.f32 %v12894_v17, %v14677_v56  ;;  %2003 = vst.msk [vmem:[#allocation2 + $0x48] sm:$0xff] %vm1140_vm1, %v1962_v44  ;;  %v2605_v24 = vrot.slane %v2603_v26, 3  ;;  %v12898_v54 = vpop.eup %12897  ;;  %v19180_v44 = vld [vmem:[#allocation48_spill] sm:$0xff] }
 0x4da   : > { %v2608_v49 = vrot.slane %v2606_v8, 4  ;;  %v2816_v9 = vsel %vm1945_vm4, %v2813_v52, %v2815_v40  ;;  %v1905_v45 = vmul.f32 %v12896_v33, %v19173_v16  ;;  %v1924_v22 = vpack.c.bf16 %v1903_v27, %v1902_v51  ;;  %v12900_v42 = vpop.eup %12899 }
 0x4db   : > { %v1964_v59 = vsel %vm1945_vm4, %v1961_v57, %v1963_v0  ;;  %v1965_v12 = vrot.slane %v1923_v5, 4  ;;  %2862 = vst.msk [vmem:[#allocation3 + $0x50] sm:$0xff] %vm1140_vm1, %v2816_v9  ;;  %vm2011_vm13 = vcmask 519168   ;;  %v1906_v50 = vmul.f32 %v12898_v54, %v14683_v15  ;;  %v12902_v4 = vpop.eup %12901 }
 0x4dc   : > { %2004 = vst.msk [vmem:[#allocation2 + $0x50] sm:$0xff] %vm1140_vm1, %v1964_v59  ;;  %v2609_v18 = vor.u32 %v2608_v49, %v2605_v24  ;;  %v2578_v52 = vsel %vm18905_vm6, %v15033_v10, 0  ;;  %v2817_v37 = vrot.slane %v15051_v61, 4  ;;  %vm18873_vm14 = vcmp.ne.s16.totalorder %v19174_v3, 0  ;;  %v12904_v15 = vpop.eup %12903  ;;  %v19181_v49 = vld [vmem:[#allocation49_spill] sm:$0xff] }
 0x4dd   : > { %v4438_v56 = vld [vmem:[#allocation3 + $0x8] sm:$0xff]  ;;  %v1907_v36 = vmul.f32 %v12900_v42, %v14686_v6  ;;  %v1925_v1 = vpack.c.bf16 %v1905_v45, %v1904_v14  ;;  %v1966_v21 = vsel %vm1945_vm4, %v1963_v0, %v1965_v12  ;;  %v1967_v7 = vrot.slane %v1924_v22, 4  ;;  %v12906_v51 = vpop.eup %12905 }
 0x4de   : > { %5195 = vmatprep.mubr.bf16.mxu0 %v4438_v56  ;;  %v1908_v55 = vmul.f32 %v12902_v4, %v19175_v13  ;;  %2005 = vst.msk [vmem:[#allocation2 + $0x58] sm:$0xff] %vm1140_vm1, %v1966_v21  ;;  %v19178_v25 = vor.u32 %v19176_v28, %v19177_v60  ;;  %v2612_v26 = vshrl.u32 %v2578_v52, 16  ;;  %v2615_v58 = vshll.u32 %v2578_v52, 16  ;;  %v12908_v5 = vpop.eup %12907  ;;  %v12644_v13 = vld [vmem:[%s18767_s6 + $0x100] sm:$0xff]  }
 0x4df   : > { %v1909_v6 = vmul.f32 %v12904_v15, %v19179_v11  ;;  %v1926_v8 = vpack.c.bf16 %v1907_v36, %v1906_v50  ;;  %v1968_v17 = vsel %vm1945_vm4, %v1965_v12, %v1967_v7  ;;  %v1969_v27 = vrot.slane %v1925_v1, 4 }
 0x4e0   : > { %v2610_v57 = vsel %vm2593_vm8, %v19178_v25, %v2609_v18  ;;  %vm18874_vm15 = vcmp.ne.s16.totalorder %v14786_v41, 0  ;;  %v1910_v0 = vmul.f32 %v12906_v51, %v19180_v44  ;;  %2006 = vst.msk [vmem:[#allocation2 + $0x60] sm:$0xff] %vm1140_vm1, %v1968_v17  ;;  %v2614_v33 = vrot.slane %v2612_v26, 3  ;;  %v15085_v22 = vld [vmem:[#allocation2 + $0x48] sm:$0xff] }
 0x4e1   : > { %2762 = vst.msk [vmem:[#allocation3] sm:$0xff] %vm1140_vm1, %v2610_v57  ;;  %v2617_v14 = vrot.slane %v2615_v58, 4  ;;  %v2818_v24 = vsel %vm1945_vm4, %v2815_v40, %v2817_v37  ;;  %v1911_v9 = vmul.f32 %v12908_v5, %v19181_v49  ;;  %v1927_v54 = vpack.c.bf16 %v1909_v6, %v1908_v55  ;;  %v12647_v26 = vld [vmem:[%s18767_s6 + $0x148] sm:$0xff]  }
 0x4e2   : > { %v1970_v16 = vsel %vm1945_vm4, %v1967_v7, %v1969_v27  ;;  %v1971_v45 = vrot.slane %v1926_v8, 4  ;;  %2863 = vst.msk [vmem:[#allocation3 + $0x98] sm:$0xff] %vm1140_vm1, %v2818_v24  ;;  %v2829_v59 = vrot.slane %v15085_v22, 4  ;;  %v2585_v12 = vsel %vm18887_vm9, %v15085_v22, 0  ;;  %v4447_v17 = vld [vmem:[#allocation3 + $0x50] sm:$0xff] }
 0x4e3   : > { %2007 = vst.msk [vmem:[#allocation2 + $0x68] sm:$0xff] %vm1140_vm1, %v1970_v16  ;;  %v15093_v42 = vor.u32 %v2617_v14, %v2614_v33  ;;  %v2579_v40 = vsel %vm18882_vm10, %v15051_v61, 0  ;;  %vm18881_vm3 = vcmp.ne.s16.totalorder %v14817_v38, 0  ;;  %v1928_v50 = vpack.c.bf16 %v1911_v9, %v1910_v0  ;;  %v2788_v4 = vld [vmem:[#allocation2 + $0x50] sm:$0xff]  ;;  %v15124_v33 = vld [vmem:[#allocation2 + $0x20] sm:$0xff] }
 0x4e4   : > { %v1972_v56 = vsel %vm1945_vm4, %v1969_v27, %v1971_v45  ;;  %v1973_v52 = vrot.slane %v1927_v54, 4  ;;  %v2675_v36 = vshrl.u32 %v2585_v12, 16  ;;  %v2831_v1 = vrot.slane %v2788_v4, 4  ;;  %v12648_v54 = vld [vmem:[%s18767_s6 + $0x108] sm:$0xff]  }
 0x4e5   : > { %2008 = vst.msk [vmem:[#allocation2 + $0x70] sm:$0xff] %vm1140_vm1, %v1972_v56  ;;  %v2586_v21 = vsel %vm18875_vm12, %v2788_v4, 0  ;;  %v2678_v7 = vshll.u32 %v2585_v12, 16  ;;  %v2619_v15 = vsel %vm2593_vm8, %v2609_v18, %v15093_v42  ;;  %vm18876_vm2 = vcmp.ne.s16.totalorder %v14845_v20, 0  ;;  %v2789_v57 = vld [vmem:[#allocation2 + $0x58] sm:$0xff] }
 0x4e6   : > { %v1974_v55 = vsel %vm1945_vm4, %v1971_v45, %v1973_v52  ;;  %v1975_v28 = vrot.slane %v1928_v50, 4  ;;  %v2677_v60 = vrot.slane %v2675_v36, 3  ;;  %v2684_v25 = vshrl.u32 %v2586_v21, 16  ;;  %2763 = vst.msk [vmem:[#allocation3 + $0x48] sm:$0xff] %vm1140_vm1, %v2619_v15 }
 0x4e7   : > { %2009 = vst.msk [vmem:[#allocation2 + $0x78] sm:$0xff] %vm1140_vm1, %v1974_v55  ;;  %v2832_v18 = vsel %vm1945_vm4, %v2829_v59, %v2831_v1  ;;  %v2680_v51 = vrot.slane %v2678_v7, 4  ;;  %v2687_v11 = vshll.u32 %v2586_v21, 16  ;;  %v2833_v6 = vrot.slane %v2789_v57, 4  ;;  %v2790_v44 = vld [vmem:[#allocation2 + $0x60] sm:$0xff] }
 0x4e8   : > { %v4437_v58 = vld [vmem:[#allocation3] sm:$0xff]  ;;  %vm18886_vm0 = vcmp.ne.s16.totalorder %v14877_v32, 0  ;;  %v1976_v8 = vsel %vm1945_vm4, %v1973_v52, %v1975_v28  ;;  %2012 = vst.msk [vmem:[#allocation2 + $0x88] sm:$0xf] %vm2011_vm13, %v1975_v28  ;;  %v2686_v27 = vrot.slane %v2684_v25, 3  ;;  %v2587_v5 = vsel %vm18873_vm14, %v2789_v57, 0 }
 0x4e9   : > { %2870 = vst.msk [vmem:[#allocation3 + $0x290] sm:$0xff] %vm1140_vm1, %v2832_v18  ;;  %5196 = vmatmul.mubr.bf16.vlgmr.msra.gmra.mrb[4].mxu0 %v4437_v58  ;;  %v2621_v0 = vshrl.u32 %v2579_v40, 16  ;;  %2010 = vst.msk [vmem:[#allocation2 + $0x80] sm:$0xff] %vm1140_vm1, %v1976_v8  ;;  %v15127_v14 = vor.u32 %v2680_v51, %v2677_v60  ;;  %v2689_v24 = vrot.slane %v2687_v11, 4  ;;  %v2834_v49 = vsel %vm1945_vm4, %v2831_v1, %v2833_v6  ;;  %v12649_v52 = vld [vmem:[%s18767_s6 + $0x150] sm:$0xff]   ;;  %v15152_v57 = vld [vmem:[#allocation2 + $0x28] sm:$0xff] }
 0x4ea   : > { %5203 = vmatprep.mubr.bf16.mxu0 %v4447_v17  ;;  %v2693_v9 = vshrl.u32 %v2587_v5, 16  ;;  %11255 = vmatpush3.bf16.msra.mxu0 %v12644_v13  ;;  %2871 = vst.msk [vmem:[#allocation3 + $0x2d8] sm:$0xff] %vm1140_vm1, %v2834_v49  ;;  %v2696_v16 = vshll.u32 %v2587_v5, 16  ;;  %v2835_v45 = vrot.slane %v2790_v44, 4  ;;  %v2624_v50 = vshll.u32 %v2579_v40, 16  ;;  %v15134_v56 = vld [vmem:[#allocation2 + $0x68] sm:$0xff] }
 0x4eb   : > { %v2623_v12 = vrot.slane %v2621_v0, 3  ;;  %vm18894_vm13 = vcmp.ne.s16.totalorder %v14919_v30, 0  ;;  %11256 = vmatprep.subr.bf16.mxu0 %v12647_v26  ;;  %v2690_v4 = vor.u32 %v2689_v24, %v2686_v27  ;;  %v2819_v1 = vrot.slane %v15124_v33, 4  ;;  %v12651_v26 = vld [vmem:[%s18767_s6 + $0x110] sm:$0xff]   ;;  %v12653_v11 = vld [vmem:[%s18767_s6 + $0x158] sm:$0xff]  }
 0x4ec   : > { %v2695_v36 = vrot.slane %v2693_v9, 3  ;;  %v2588_v21 = vsel %vm18874_vm15, %v2790_v44, 0  ;;  %v2698_v7 = vrot.slane %v2696_v16, 4  ;;  %v2836_v15 = vsel %vm1945_vm4, %v2833_v6, %v2835_v45  ;;  %v15167_v0 = vld [vmem:[#allocation2 + $0x70] sm:$0xff] }
 0x4ed   : > { %v2626_v40 = vrot.slane %v2624_v50, 4  ;;  %v2702_v13 = vshrl.u32 %v2588_v21, 16  ;;  %vm18883_vm14 = vcmp.ne.s16.totalorder %v14945_v62, 0  ;;  %v2691_v55 = vsel %vm2593_vm8, %v15127_v14, %v2690_v4  ;;  %2872 = vst.msk [vmem:[#allocation3 + $0x320] sm:$0xff] %vm1140_vm1, %v2836_v15  ;;  %v4446_v8 = vld [vmem:[#allocation3 + $0x48] sm:$0xff]  ;;  %v4456_v24 = vld [vmem:[#allocation3 + $0x98] sm:$0xff] }
 0x4ee   : > { %v2820_v28 = vsel %vm1945_vm4, %v2817_v37, %v2819_v1  ;;  %v2705_v60 = vshll.u32 %v2588_v21, 16  ;;  %v2837_v25 = vrot.slane %v15134_v56, 4  ;;  %11257 = vmatpush3.bf16.msra.mxu0 %v12648_v54  ;;  %2771 = vst.msk [vmem:[#allocation3 + $0x288] sm:$0xff] %vm1140_vm1, %v2691_v55  ;;  %v2699_v18 = vor.u32 %v2698_v7, %v2695_v36  ;;  %v15190_v15 = vld [vmem:[#allocation2 + $0x78] sm:$0xff] }
 0x4ef   : > { %v2627_v58 = vor.u32 %v2626_v40, %v2623_v12  ;;  %2864 = vst.msk [vmem:[#allocation3 + $0xe0] sm:$0xff] %vm1140_vm1, %v2820_v28  ;;  %v2704_v51 = vrot.slane %v2702_v13, 3  ;;  %v2580_v37 = vsel %vm18881_vm3, %v15124_v33, 0  ;;  %vm18880_vm15 = vcmp.ne.s16.totalorder %v14987_v39, 0  ;;  %11258 = vmatprep.subr.bf16.mxu0 %v12649_v52  ;;  %v12655_v40 = vld [vmem:[%s18767_s6 + $0x160] sm:$0xff]  }
 0x4f0   : > { %v4519_v6 = vld [vmem:[#allocation3 + $0x290] sm:$0xff]  ;;  %v2707_v17 = vrot.slane %v2705_v60, 4  ;;  %v2838_v27 = vsel %vm1945_vm4, %v2835_v45, %v2837_v25  ;;  %v2630_v5 = vshrl.u32 %v2580_v37, 16  ;;  %v2633_v44 = vshll.u32 %v2580_v37, 16  ;;  %v12632_v13 = vld [vmem:[%s18767_s6 + $0x80] sm:$0xff]  }
 0x4f1   : > { %5267 = vmatprep.mubr.bf16.mxu1 %v4519_v6  ;;  %5204 = vmatmul.mubr.bf16.gmra.mrb[8].mxu0 %v4446_v8  ;;  %v2700_v49 = vsel %vm2593_vm8, %v2690_v4, %v2699_v18  ;;  %v2628_v9 = vsel %vm2593_vm8, %v15093_v42, %v2627_v58  ;;  %2873 = vst.msk [vmem:[#allocation3 + $0x368] sm:$0xff] %vm1140_vm1, %v2838_v27  ;;  %v2821_v54 = vrot.slane %v15152_v57, 4  ;;  %v2589_v16 = vsel %vm18876_vm2, %v15134_v56, 0  ;;  %v15180_v42 = vld [vmem:[#allocation2 + $0x30] sm:$0xff]  ;;  %v12654_v4 = vld [vmem:[%s18767_s6 + $0x118] sm:$0xff]  }
 0x4f2   : > { %vm18884_vm12 = vcmp.ne.s16.totalorder %v14997_v2, 0  ;;  %5211 = vmatprep.mubr.bf16.mxu0 %v4456_v24  ;;  %2772 = vst.msk [vmem:[#allocation3 + $0x2d0] sm:$0xff] %vm1140_vm1, %v2700_v49  ;;  %2764 = vst.msk [vmem:[#allocation3 + $0x90] sm:$0xff] %vm1140_vm1, %v2628_v9  ;;  %v2708_v45 = vor.u32 %v2707_v17, %v2704_v51  ;;  %v2632_v12 = vrot.slane %v2630_v5, 3  ;;  %v2635_v50 = vrot.slane %v2633_v44, 4  ;;  %11259 = vmatpush3.bf16.msra.mxu0 %v12651_v26  ;;  %v12633_v26 = vld [vmem:[%s18767_s6 + $0xc8] sm:$0xff]  }
 0x4f3   : > { %v2711_v52 = vshrl.u32 %v2589_v16, 16  ;;  %v2822_v56 = vsel %vm1945_vm4, %v2819_v1, %v2821_v54  ;;  %v2714_v36 = vshll.u32 %v2589_v16, 16  ;;  %v2839_v21 = vrot.slane %v15167_v0, 4  ;;  %11260 = vmatprep.subr.bf16.mxu0 %v12653_v11 }
 0x4f4   : > { %v2581_v7 = vsel %vm18886_vm0, %v15152_v57, 0  ;;  %v2709_v1 = vsel %vm2593_vm8, %v2699_v18, %v2708_v45  ;;  %v2636_v55 = vor.u32 %v2635_v50, %v2632_v12  ;;  %2865 = vst.msk [vmem:[#allocation3 + $0x128] sm:$0xff] %vm1140_vm1, %v2822_v56  ;;  %vm18879_vm2 = vcmp.ne.s16.totalorder %v14970_v34, 0  ;;  %v15207_v18 = vld [vmem:[#allocation2 + $0x38] sm:$0xff]  ;;  %v12635_v56 = vld [vmem:[%s18767_s6 + $0xd0] sm:$0xff]  }
 0x4f5   : > { %v2713_v28 = vrot.slane %v2711_v52, 3  ;;  %v2639_v60 = vshrl.u32 %v2581_v7, 16  ;;  %2773 = vst.msk [vmem:[#allocation3 + $0x318] sm:$0xff] %vm1140_vm1, %v2709_v1  ;;  %v2716_v51 = vrot.slane %v2714_v36, 4  ;;  %v2840_v37 = vsel %vm1945_vm4, %v2837_v25, %v2839_v21  ;;  %v4518_v8 = vld [vmem:[#allocation3 + $0x288] sm:$0xff]  ;;  %v4528_v25 = vld [vmem:[#allocation3 + $0x2d8] sm:$0xff] }
 0x4f6   : > { %v2642_v11 = vshll.u32 %v2581_v7, 16  ;;  %v2823_v6 = vrot.slane %v15180_v42, 4  ;;  %v2637_v17 = vsel %vm2593_vm8, %v2627_v58, %v2636_v55  ;;  %2874 = vst.msk [vmem:[#allocation3 + $0x3b0] sm:$0xff] %vm1140_vm1, %v2840_v37  ;;  %v2590_v5 = vsel %vm18894_vm13, %v15167_v0, 0  ;;  %11261 = vmatpush3.bf16.msra.mxu0 %v12654_v4  ;;  %5268 = vmatmul.mubr.bf16.vlgmr.msra.gmra.mrb[4].mxu1 %v4518_v8  ;;  %v12657_v58 = vld [vmem:[%s18767_s6 + $0x120] sm:$0xff]   ;;  %v12634_v0 = vld [vmem:[%s18767_s6 + $0x88] sm:$0xff]  }
 0x4f7   : > { %v2641_v27 = vrot.slane %v2639_v60, 3  ;;  %v2841_v44 = vrot.slane %v15190_v15, 4  ;;  %2765 = vst.msk [vmem:[#allocation3 + $0xd8] sm:$0xff] %vm1140_vm1, %v2637_v17  ;;  %v2717_v24 = vor.u32 %v2716_v51, %v2713_v28  ;;  %v2720_v16 = vshrl.u32 %v2590_v5, 16  ;;  %11262 = vmatprep.subr.bf16.mxu0 %v12655_v40  ;;  %11143 = vmatpush3.bf16.msra.mxu1 %v12632_v13  ;;  %v12659_v4 = vld [vmem:[%s18767_s6 + $0x168] sm:$0xff]   ;;  %v4465_v28 = vld [vmem:[#allocation3 + $0xe0] sm:$0xff] }
 0x4f8   : > { %v2644_v49 = vrot.slane %v2642_v11, 4  ;;  %v2824_v9 = vsel %vm1945_vm4, %v2821_v54, %v2823_v6  ;;  %5275 = vmatprep.mubr.bf16.mxu1 %v4528_v25  ;;  %v2723_v12 = vshll.u32 %v2590_v5, 16  ;;  %v2582_v54 = vsel %vm18883_vm14, %v15180_v42, 0  ;;  %11144 = vmatprep.subr.bf16.mxu1 %v12633_v26  ;;  %v2794_v1 = vld [vmem:[#allocation2 + $0x80] sm:$0xf]  ;;  %v12660_v5 = vld [vmem:[%s18767_s6 + $0x128] sm:$0xff]  }
 0x4f9   : > { %2866 = vst.msk [vmem:[#allocation3 + $0x170] sm:$0xff] %vm1140_vm1, %v2824_v9  ;;  %v2842_v50 = vsel %vm1945_vm4, %v2839_v21, %v2841_v44  ;;  %v2825_v52 = vrot.slane %v15207_v18, 4  ;;  %v4455_v36 = vld [vmem:[#allocation3 + $0x90] sm:$0xff]  ;;  %v2718_v7 = vsel %vm2593_vm8, %v2708_v45, %v2717_v24  ;;  %v2722_v21 = vrot.slane %v2720_v16, 3  ;;  %v2302_v16 = vld [vmem:[#allocation2 + $0x80] sm:$0xf] }
 0x4fa   : > { %v2645_v40 = vor.u32 %v2644_v49, %v2641_v27  ;;  %2875 = vst.msk [vmem:[#allocation3 + $0x3f8] sm:$0xff] %vm1140_vm1, %v2842_v50  ;;  %v2648_v13 = vshrl.u32 %v2582_v54, 16  ;;  %5212 = vmatmul.mubr.bf16.gmra.mrb[12].mxu0 %v4455_v36  ;;  %2774 = vst.msk [vmem:[#allocation3 + $0x360] sm:$0xff] %vm1140_vm1, %v2718_v7  ;;  %v2725_v60 = vrot.slane %v2723_v12, 4  ;;  %v2651_v51 = vshll.u32 %v2582_v54, 16  ;;  %v15248_v27 = vld [vmem:[#allocation2 + $0x40] sm:$0xff] }
 0x4fb   : > { %v2826_v26 = vsel %vm1945_vm4, %v2823_v6, %v2825_v52  ;;  %v2591_v45 = vsel %vm18880_vm15, %v15190_v15, 0  ;;  %5219 = vmatprep.mubr.bf16.mxu0 %v4465_v28  ;;  %11263 = vmatpush3.bf16.msra.mxu0 %v12657_v58  ;;  %v12636_v6 = vld [vmem:[%s18767_s6 + $0x90] sm:$0xff]   ;;  %v2843_v49 = vrot.slane %v2794_v1, 4  ;;  %v2583_v9 = vsel %vm18884_vm12, %v15207_v18, 0  ;;  %v12637_v58 = vld [vmem:[%s18767_s6 + $0xd8] sm:$0xff]   ;;  %v4527_v7 = vld [vmem:[#allocation3 + $0x2d0] sm:$0xff] }
 0x4fc   : > { %v2646_v37 = vsel %vm2593_vm8, %v2636_v55, %v2645_v40  ;;  %v2650_v11 = vrot.slane %v2648_v13, 3  ;;  %2867 = vst.msk [vmem:[#allocation3 + $0x1b8] sm:$0xff] %vm1140_vm1, %v2826_v26  ;;  %v2729_v8 = vshrl.u32 %v2591_v45, 16  ;;  %v2732_v17 = vshll.u32 %v2591_v45, 16  ;;  %11145 = vmatpush3.bf16.msra.mxu1 %v12634_v0  ;;  %11264 = vmatprep.subr.bf16.mxu0 %v12659_v4  ;;  %v12661_v36 = vld [vmem:[%s18767_s6 + $0x170] sm:$0xff]   ;;  %v4537_v28 = vld [vmem:[#allocation3 + $0x320] sm:$0xff] }
 0x4fd   : > { %2766 = vst.msk [vmem:[#allocation3 + $0x120] sm:$0xff] %vm1140_vm1, %v2646_v37  ;;  %v2726_v55 = vor.u32 %v2725_v60, %v2722_v21  ;;  %v2653_v25 = vrot.slane %v2651_v51, 4  ;;  %11146 = vmatprep.subr.bf16.mxu1 %v12635_v56  ;;  %v2657_v50 = vshrl.u32 %v2583_v9, 16  ;;  %v2660_v54 = vshll.u32 %v2583_v9, 16  ;;  %v3367_v1 = vld [vmem:[#allocation2 + $0x8] sm:$0xf8] }
 0x4fe   : > { %v2731_v0 = vrot.slane %v2729_v8, 3  ;;  %v2734_v12 = vrot.slane %v2732_v17, 4  ;;  %v2844_v4 = vsel %vm1945_vm4, %v2841_v44, %v2843_v49  ;;  %v2827_v56 = vrot.slane %v15248_v27, 4  ;;  %5276 = vmatmul.mubr.bf16.gmra.mrb[8].mxu1 %v4527_v7  ;;  %v12662_v15 = vld [vmem:[%s18767_s6 + $0x130] sm:$0xff]   ;;  %v12638_v44 = vld [vmem:[%s18767_s6 + $0x98] sm:$0xff]  }
 0x4ff   : > { %v2727_v21 = vsel %vm2593_vm8, %v2717_v24, %v2726_v55  ;;  %v2654_v13 = vor.u32 %v2653_v25, %v2650_v11  ;;  %2876 = vst.msk [vmem:[#allocation3 + $0x440] sm:$0xff] %vm1140_vm1, %v2844_v4  ;;  %v2659_v51 = vrot.slane %v2657_v50, 3  ;;  %v2662_v26 = vrot.slane %v2660_v54, 4  ;;  %11265 = vmatpush3.bf16.msra.mxu0 %v12660_v5  ;;  %5283 = vmatprep.mubr.bf16.mxu1 %v4537_v28  ;;  %v12663_v17 = vld [vmem:[%s18767_s6 + $0x178] sm:$0xff]   ;;  %v4464_v5 = vld [vmem:[#allocation3 + $0xd8] sm:$0xff]  ;;  %v12641_v28 = vld [vmem:[%s18767_s6 + $0xe8] sm:$0xff]  }
 0x500   : > { %2775 = vst.msk [vmem:[#allocation3 + $0x3a8] sm:$0xff] %vm1140_vm1, %v2727_v21  ;;  %v2735_v60 = vor.u32 %v2734_v12, %v2731_v0  ;;  %v2592_v24 = vsel %vm18879_vm2, %v2302_v16, 0  ;;  %11147 = vmatpush3.bf16.msra.mxu1 %v12636_v6  ;;  %v2828_v37 = vsel %vm1945_vm4, %v2825_v52, %v2827_v56  ;;  %v12639_v6 = vld [vmem:[%s18767_s6 + $0xe0] sm:$0xff]   ;;  %v3384_v49 = vsel %vm18877_vm7, %v3367_v1, 0  ;;  %11266 = vmatprep.subr.bf16.mxu0 %v12661_v36 }
 0x501   : > { %v2655_v45 = vsel %vm2593_vm8, %v2645_v40, %v2654_v13  ;;  %v2738_v11 = vshrl.u32 %v2592_v24, 16  ;;  %v2741_v8 = vshll.u32 %v2592_v24, 16  ;;  %11148 = vmatprep.subr.bf16.mxu1 %v12637_v58  ;;  %v15295_v25 = vor.u32 %v2662_v26, %v2659_v51  ;;  %2868 = vst.msk [vmem:[#allocation3 + $0x200] sm:$0xff] %vm1140_vm1, %v2828_v37  ;;  %v19182_v52 = vld [vmem:[#allocation26_spill] sm:$0xff] }
 0x502   : > { %2767 = vst.msk [vmem:[#allocation3 + $0x168] sm:$0xff] %vm1140_vm1, %v2655_v45  ;;  %v2736_v40 = vsel %vm2593_vm8, %v2726_v55, %v2735_v60  ;;  %v3385_v9 = vsel %vm18878_vm5, %v15033_v10, 0  ;;  %5220 = vmatmul.mubr.bf16.gmra.mrb[16].mxu0 %v4464_v5  ;;  %v4474_v16 = vld [vmem:[#allocation3 + $0x128] sm:$0xff]  ;;  %v3402_v12 = vshrl.u32 %v3384_v49, 16  ;;  %v3405_v55 = vshll.u32 %v3384_v49, 16  ;;  %v12664_v10 = vld [vmem:[%s18767_s6 + $0x138] sm:$0xff]  }
 0x503   : > { %2776 = vst.msk [vmem:[#allocation3 + $0x3f0] sm:$0xff] %vm1140_vm1, %v2736_v40  ;;  %v2740_v58 = vrot.slane %v2738_v11, 3  ;;  %v2743_v0 = vrot.slane %v2741_v8, 4  ;;  %5227 = vmatprep.mubr.bf16.mxu0 %v4474_v16  ;;  %v2664_v50 = vsel %vm2593_vm8, %v2654_v13, %v15295_v25  ;;  %v3410_v54 = vshrl.u32 %v3385_v9, 16  ;;  %11267 = vmatpush3.bf16.msra.mxu0 %v12662_v15  ;;  %v12640_v36 = vld [vmem:[%s18767_s6 + $0xa0] sm:$0xff]   ;;  %v4536_v45 = vld [vmem:[#allocation3 + $0x318] sm:$0xff] }
 0x504   : > { %v3413_v7 = vshll.u32 %v3385_v9, 16  ;;  %vm18885_vm7 = vcmp.ne.s16.totalorder %v15009_v31, 0  ;;  %11149 = vmatpush3.bf16.msra.mxu1 %v12638_v44  ;;  %2768 = vst.msk [vmem:[#allocation3 + $0x1b0] sm:$0xff] %vm1140_vm1, %v2664_v50  ;;  %v3404_v4 = vrot.slane %v3402_v12, 3  ;;  %v3407_v1 = vrot.slane %v3405_v55, 4  ;;  %11268 = vmatprep.subr.bf16.mxu0 %v12663_v17  ;;  %v15323_v44 = vld [vmem:[%s18767_s6 + $0x200] sm:$0xff]  }
 0x505   : > { %v2744_v21 = vor.u32 %v2743_v0, %v2740_v58  ;;  %v2584_v13 = vsel %vm18885_vm7, %v15248_v27, 0  ;;  %11150 = vmatprep.subr.bf16.mxu1 %v12639_v6  ;;  %v3412_v51 = vrot.slane %v3410_v54, 3  ;;  %v2830_v8 = vsel %vm1945_vm4, %v2827_v56, %v2829_v59  ;;  %v4546_v5 = vld [vmem:[#allocation3 + $0x368] sm:$0xff]  ;;  %v12645_v9 = vld [vmem:[%s18767_s6 + $0xf0] sm:$0xff]  }
 0x506   : > { %v3415_v26 = vrot.slane %v3413_v7, 4  ;;  %v2666_v24 = vshrl.u32 %v2584_v13, 16  ;;  %v2669_v15 = vshll.u32 %v2584_v13, 16  ;;  %v3408_v11 = vor.u32 %v3407_v1, %v3404_v4  ;;  %5284 = vmatmul.mubr.bf16.gmra.mrb[12].mxu1 %v4536_v45  ;;  %2869 = vst.msk [vmem:[#allocation3 + $0x248] sm:$0xff] %vm1140_vm1, %v2830_v8  ;;  %v12646_v1 = vld [vmem:[%s18767_s6 + $0xb0] sm:$0xff]   ;;  %v12650_v13 = vld [vmem:[%s18767_s6 + $0xf8] sm:$0xff]  }
 0x507   : > { %v2745_v37 = vsel %vm2593_vm8, %v2735_v60, %v2744_v21  ;;  %v635_v17 = vand.u32 15, %v14964_v63  ;;  %vm15338_vm5 = vcmp.lt.s32.totalorder %v621_v29, 15  ;;  %11269 = vmatpush3.bf16.msra.mxu0 %v12664_v10  ;;  %5291 = vmatprep.mubr.bf16.mxu1 %v4546_v5  ;;  %v12642_v63 = vld [vmem:[%s18767_s6 + $0xa8] sm:$0xff]   ;;  %v3386_v19 = vsel %vm18905_vm6, %v15051_v61, 0  ;;  %v4473_v60 = vld [vmem:[#allocation3 + $0x120] sm:$0xff]  ;;  %v15367_v61 = vld [vmem:[#allocation2] sm:$0xff] }
 0x508   : > { %2777 = vst.msk [vmem:[#allocation3 + $0x438] sm:$0xff] %vm1140_vm1, %v2745_v37  ;;  %v15333_v6 = vor.u32 %v3415_v26, %v3412_v51  ;;  %v2668_v40 = vrot.slane %v2666_v24, 3  ;;  %v2671_v49 = vrot.slane %v2669_v15, 4  ;;  %11151 = vmatpush3.bf16.msra.mxu1 %v12640_v36  ;;  %vm2895_vm15 = vmpackc.low %vm15338_vm5, %vm15338_vm5  ;;  %v583_v29 = vadd.s32 40, %v13719_v46  ;;  %12098 = vmatprep.subr.bf16.mxu0 %v15323_v44  ;;  %v15387_v45 = vld [vmem:[#allocation2 + $0x8] sm:$0xf0] }
 0x509   : > { %vm15345_vm2 = vcmp.lt.s32.totalorder %v635_v17, 15  ;;  %v3387_v56 = vsel %vm18882_vm10, %v15124_v33, 0  ;;  %11152 = vmatprep.subr.bf16.mxu1 %v12641_v28  ;;  %v2927_v0 = vsel %vm2895_vm15, 65537, %v15367_v61  ;;  %v3419_v12 = vshrl.u32 %v3386_v19, 16  ;;  %v4483_v33 = vld [vmem:[#allocation3 + $0x170] sm:$0xff]  ;;  %v4545_v37 = vld [vmem:[#allocation3 + $0x360] sm:$0xff] }
 0x50a   : > { %v3417_v16 = vsel %vm2593_vm8, %v3408_v11, %v15333_v6  ;;  %v2672_v58 = vor.u32 %v2671_v49, %v2668_v40  ;;  %vm2897_vm5 = vmpackc.low %vm15345_vm2, %vm15345_vm2  ;;  %5228 = vmatmul.mubr.bf16.gmra.mrb[20].mxu0 %v4473_v60  ;;  %v10633_v50 = vcombine.low %v19132_v48, %v2927_v0  ;;  %v3422_v54 = vshll.u32 %v3386_v19, 16  ;;  %v15391_v5 = vld [vmem:[#allocation2 + $0x10] sm:$0xff]  ;;  %v4555_v49 = vld [vmem:[#allocation3 + $0x3b0] sm:$0xff] }
 0x50b   : > { %3569 = vst.msk [vmem:[#allocation3 + $0x18] sm:$0xff] %vm1140_vm1, %v3417_v16  ;;  %v2929_v55 = vsel %vm2897_vm5, 65537, %v15367_v61  ;;  %v649_v7 = vand.u32 15, %v583_v29  ;;  %5235 = vmatprep.mubr.bf16.mxu0 %v4483_v33  ;;  %v3421_v21 = vrot.slane %v3419_v12, 3  ;;  %v3428_v24 = vshrl.u32 %v3387_v56, 16  ;;  %v12652_v29 = vld [vmem:[%s18767_s6 + $0xb8] sm:$0xff]  }
 0x50c   : > { %v2673_v10 = vsel %vm2593_vm8, %v15295_v25, %v2672_v58  ;;  %v10634_v36 = vcombine.low %v19132_v48, %v2929_v55  ;;  %v2682_v4 = vsel %vm2593_vm8, %v2672_v58, %v15127_v14  ;;  %11153 = vmatpush3.bf16.msra.mxu1 %v12642_v63  ;;  %v3007_v28 = vshrl.u32 %v10633_v50, 16  ;;  %v2877_v60 = vld [vmem:[#allocation2] sm:$0xf0] }
 0x50d   : > { %2769 = vst.msk [vmem:[#allocation3 + $0x1f8] sm:$0xff] %vm1140_vm1, %v2673_v10  ;;  %v3010_v51 = vshll.u32 %v10633_v50, 16  ;;  %v3424_v25 = vrot.slane %v3422_v54, 4  ;;  %2770 = vst.msk [vmem:[#allocation3 + $0x240] sm:$0xff] %vm1140_vm1, %v2682_v4  ;;  %vm1031_vm2 = vcmp.lt.s32.totalorder %v649_v7, 15  ;;  %11154 = vmatprep.subr.bf16.mxu1 %v12645_v9  ;;  %v3431_v15 = vshll.u32 %v3387_v56, 16 }
 0x50e   : > { %v3015_v26 = vshrl.u32 %v10634_v36, 16  ;;  %v3018_v14 = vshll.u32 %v10634_v36, 16  ;;  %vm2899_vm15 = vmpackc.low %vm1031_vm2, %vm1031_vm2  ;;  %v3009_v11 = vrot.slane %v3007_v28, 3  ;;  %5292 = vmatmul.mubr.bf16.gmra.mrb[16].mxu1 %v4545_v37  ;;  %v3430_v19 = vrot.slane %v3428_v24, 3  ;;  %v12656_v56 = vld [vmem:[%s18767_s6 + $0x1c0] sm:$0xff]   ;;  %v4492_v10 = vld [vmem:[#allocation3 + $0x1b8] sm:$0xff] }
 0x50f   : > { %v3012_v8 = vrot.slane %v3010_v51, 4  ;;  %v15389_v17 = vor.u32 %v3424_v25, %v3421_v21  ;;  %v2931_v40 = vsel %vm2899_vm15, 65537, %v15367_v61  ;;  %5299 = vmatprep.mubr.bf16.mxu1 %v4555_v49  ;;  %v3433_v58 = vrot.slane %v3431_v15, 4  ;;  %v4482_v12 = vld [vmem:[#allocation3 + $0x168] sm:$0xff]  ;;  %v3684_v54 = vld [vmem:[#allocation2 + $0x8] sm:$0xf0] }
 0x510   : > { %v3017_v22 = vrot.slane %v3015_v26, 3  ;;  %v3020_v63 = vrot.slane %v3018_v14, 4  ;;  %v10635_v59 = vcombine.low %v19132_v48, %v2931_v40  ;;  %11155 = vmatpush3.bf16.msra.mxu1 %v12646_v1  ;;  %v3619_v0 = vrot.slane %v15387_v45, 4  ;;  %v2878_v36 = vld [vmem:[#allocation2 + $0x8] sm:$0xff] }
 0x511   : > { %v15401_v9 = vor.u32 %v3012_v8, %v3009_v11  ;;  %v3426_v16 = vsel %vm2593_vm8, %v15333_v6, %v15389_v17  ;;  %11156 = vmatprep.subr.bf16.mxu1 %v12650_v13  ;;  %v3620_v7 = vrot.slane %v15391_v5, 4  ;;  %v15410_v21 = vor.u32 %v3433_v58, %v3430_v19  ;;  %v4554_v11 = vld [vmem:[#allocation3 + $0x3a8] sm:$0xff]  ;;  %v4563_v45 = vld [vmem:[#allocation3 + $0x3f0] sm:$0xff] }
 0x512   : > { %v3021_v33 = vor.u32 %v3020_v63, %v3017_v22  ;;  %3570 = vst.msk [vmem:[#allocation3 + $0x60] sm:$0xff] %vm1140_vm1, %v3426_v16  ;;  %v3024_v55 = vshrl.u32 %v10635_v59, 16  ;;  %v3027_v50 = vshll.u32 %v10635_v59, 16  ;;  %5236 = vmatmul.mubr.bf16.gmra.mrb[24].mxu0 %v4482_v12  ;;  %v585_v6 = vadd.s32 56, %v13719_v46  ;;  %v4564_v63 = vld [vmem:[#allocation3 + $0x3f8] sm:$0xff]  ;;  %v4491_v12 = vld [vmem:[#allocation3 + $0x1b0] sm:$0xff] }
 0x513   : > { %19187 = vst [vmem:[#allocation36_spill] sm:$0xff] %v15401_v9  ;;  %vm3149_vm5 = vcmp.ne.s16.totalorder %v15401_v9, 0  ;;  %v15416_v4 = vsel %vm18881_vm3, %v15152_v57, 0  ;;  %5243 = vmatprep.mubr.bf16.mxu0 %v4492_v10 }
 0x514   : > { %v15420_v1 = vsel %vm2593_vm8, %v15401_v9, %v3021_v33  ;;  %v3166_v13 = vsel %vm3149_vm5, %v2877_v60, 0  ;;  %v3026_v28 = vrot.slane %v3024_v55, 3  ;;  %v3029_v51 = vrot.slane %v3027_v50, 4  ;;  %11157 = vmatpush3.bf16.msra.mxu1 %v12652_v29 }
 0x515   : > { %19188 = vst [vmem:[#allocation37_spill] sm:$0xff] %v15420_v1  ;;  %vm3150_vm2 = vcmp.ne.s16.totalorder %v15420_v1, 0  ;;  %v3184_v25 = vshrl.u32 %v3166_v13, 16  ;;  %v3187_v26 = vshll.u32 %v3166_v13, 16  ;;  %v3701_v14 = vsel %vm3149_vm5, %v3684_v54, 0  ;;  %11366 = vmatprep.subr.bf16.mxu1 %v12656_v56 }
 0x516   : > { %v3167_v57 = vsel %vm3150_vm2, %v2878_v36, 0  ;;  %v15429_v24 = vor.u32 %v3029_v51, %v3026_v28  ;;  %v3702_v15 = vsel %vm3150_vm2, %v15391_v5, 0  ;;  %v3719_v37 = vshrl.u32 %v3701_v14, 16  ;;  %5300 = vmatmul.mubr.bf16.gmra.mrb[20].mxu1 %v4554_v11  ;;  %v15442_v36 = vld [vmem:[#allocation2 + $0x18] sm:$0xff] }
 0x517   : > { %v3186_v8 = vrot.slane %v3184_v25, 4  ;;  %v3189_v40 = vrot.slane %v3187_v26, 5  ;;  %v3192_v49 = vshrl.u32 %v3167_v57, 16  ;;  %v3195_v22 = vshll.u32 %v3167_v57, 16  ;;  %5307 = vmatprep.mubr.bf16.mxu1 %v4564_v63 }
 0x518   : > { %v15436_v59 = vsel %vm2593_vm8, %v3021_v33, %v15429_v24  ;;  %v3721_v19 = vrot.slane %v3719_v37, 4  ;;  %v3722_v29 = vshll.u32 %v3701_v14, 16  ;;  %v3727_v56 = vshrl.u32 %v3702_v15, 16  ;;  %v4501_v33 = vld [vmem:[#allocation3 + $0x200] sm:$0xff] }
 0x519   : > { %19189 = vst [vmem:[#allocation27_spill] sm:$0xff] %v15436_v59  ;;  %v3190_v60 = vor.u32 %v3189_v40, %v3186_v8  ;;  %v3194_v16 = vrot.slane %v3192_v49, 4  ;;  %v3197_v58 = vrot.slane %v3195_v22, 5  ;;  %vm3151_vm15 = vcmp.ne.s16.totalorder %v15436_v59, 0 }
 0x51a   : > { %v3168_v55 = vsel %vm3151_vm15, %v15391_v5, 0  ;;  %v3724_v50 = vrot.slane %v3722_v29, 5  ;;  %v3729_v54 = vrot.slane %v3727_v56, 4  ;;  %v3730_v10 = vshll.u32 %v3702_v15, 16  ;;  %5244 = vmatmul.mubr.bf16.gmra.mrb[28].mxu0 %v4491_v12  ;;  %v4573_v29 = vld [vmem:[#allocation3 + $0x440] sm:$0xff] }
 0x51b   : > { %v3198_v13 = vor.u32 %v3197_v58, %v3194_v16  ;;  %v3201_v28 = vshrl.u32 %v3168_v55, 16  ;;  %v3204_v51 = vshll.u32 %v3168_v55, 16  ;;  %v3435_v25 = vsel %vm2593_vm8, %v15389_v17, %v15410_v21  ;;  %5251 = vmatprep.mubr.bf16.mxu0 %v4501_v33 }
 0x51c   : > { %v3725_v26 = vor.u32 %v3724_v50, %v3721_v19  ;;  %v3732_v14 = vrot.slane %v3730_v10, 5  ;;  %3571 = vst.msk [vmem:[#allocation3 + $0xa8] sm:$0xff] %vm1140_vm1, %v3435_v25  ;;  %v3621_v57 = vsel %vm1945_vm4, %v3619_v0, %v3620_v7  ;;  %v663_v15 = vand.u32 15, %v585_v6  ;;  %v4500_v10 = vld [vmem:[#allocation3 + $0x1f8] sm:$0xff]  ;;  %v4510_v25 = vld [vmem:[#allocation3 + $0x248] sm:$0xff] }
 0x51d   : > { %v3199_v37 = vsel %vm2415_vm11, %v3190_v60, %v3198_v13  ;;  %v3203_v11 = vrot.slane %v3201_v28, 4  ;;  %v3206_v8 = vrot.slane %v3204_v51, 5  ;;  %3668 = vst.msk [vmem:[#allocation3 + $0x20] sm:$0xff] %vm1140_vm1, %v3621_v57  ;;  %v3703_v17 = vsel %vm3151_vm15, %v15442_v36, 0 }
 0x51e   : > { %3351 = vst.msk [vmem:[#allocation3 + $0x10] sm:$0xff] %vm1140_vm1, %v3199_v37  ;;  %v3733_v40 = vor.u32 %v3732_v14, %v3729_v54  ;;  %vm1033_vm3 = vcmp.lt.s32.totalorder %v663_v15, 15  ;;  %v3736_v49 = vshrl.u32 %v3703_v17, 16  ;;  %v3739_v22 = vshll.u32 %v3703_v17, 16  ;;  %5308 = vmatmul.mubr.bf16.gmra.mrb[24].mxu1 %v4563_v45  ;;  %v15470_v54 = vld [vmem:[#allocation2 + $0x20] sm:$0xff] }
 0x51f   : > { %v15459_v63 = vor.u32 %v3206_v8, %v3203_v11  ;;  %vm2901_vm10 = vmpackc.low %vm1033_vm3, %vm1033_vm3  ;;  %v3437_v0 = vshrl.u32 %v15416_v4, 16  ;;  %v3440_v6 = vshll.u32 %v15416_v4, 16  ;;  %v3622_v19 = vrot.slane %v15442_v36, 4  ;;  %5315 = vmatprep.mubr.bf16.mxu1 %v4573_v29  ;;  %v15486_v8 = vld [vmem:[#allocation2 + $0x28] sm:$0xff] }
 0x520   : > { %v3734_v56 = vsel %vm2415_vm11, %v3725_v26, %v3733_v40  ;;  %v2933_v60 = vsel %vm2901_vm10, 65537, %v15367_v61  ;;  %v3738_v16 = vrot.slane %v3736_v49, 4  ;;  %v3741_v58 = vrot.slane %v3739_v22, 5 }
 0x521   : > { %v3208_v12 = vsel %vm2415_vm11, %v3198_v13, %v15459_v63  ;;  %3886 = vst.msk [vmem:[#allocation3 + $0x28] sm:$0xff] %vm1140_vm1, %v3734_v56  ;;  %v10636_v55 = vcombine.low %v19132_v48, %v2933_v60  ;;  %v3439_v50 = vrot.slane %v3437_v0, 3  ;;  %v3442_v4 = vrot.slane %v3440_v6, 4  ;;  %v4572_v6 = vld [vmem:[#allocation3 + $0x438] sm:$0xff] }
 0x522   : > { %3352 = vst.msk [vmem:[#allocation3 + $0x58] sm:$0xff] %vm1140_vm1, %v3208_v12  ;;  %v15473_v33 = vor.u32 %v3741_v58, %v3738_v16  ;;  %v3623_v28 = vsel %vm1945_vm4, %v3620_v7, %v3622_v19  ;;  %v587_v51 = vadd.s32 72, %v13719_v46  ;;  %v3389_v13 = vsel %vm18886_vm0, %v15180_v42, 0  ;;  %5252 = vmatmul.mubr.bf16.gmra.mrb[32].mxu0 %v4500_v10  ;;  %v4440_v16 = vld [vmem:[#allocation3 + $0x18] sm:$0xff] }
 0x523   : > { %v3033_v26 = vshrl.u32 %v10636_v55, 16  ;;  %v3036_v14 = vshll.u32 %v10636_v55, 16  ;;  %v3443_v57 = vor.u32 %v3442_v4, %v3439_v50  ;;  %3669 = vst.msk [vmem:[#allocation3 + $0x68] sm:$0xff] %vm1140_vm1, %v3623_v28  ;;  %v3446_v15 = vshrl.u32 %v3389_v13, 16  ;;  %5259 = vmatprep.mubr.bf16.mxu0 %v4510_v25  ;;  %v4509_v28 = vld [vmem:[#allocation3 + $0x240] sm:$0xff] }
 0x524   : > { %v3743_v5 = vsel %vm2415_vm11, %v3733_v40, %v15473_v33  ;;  %v677_v37 = vand.u32 15, %v587_v51  ;;  %v3449_v7 = vshll.u32 %v3389_v13, 16  ;;  %v3624_v11 = vrot.slane %v15470_v54, 4 }
 0x525   : > { %v3035_v17 = vrot.slane %v3033_v26, 3  ;;  %v3038_v42 = vrot.slane %v3036_v14, 4  ;;  %3887 = vst.msk [vmem:[#allocation3 + $0x70] sm:$0xff] %vm1140_vm1, %v3743_v5  ;;  %v3444_v49 = vsel %vm2593_vm8, %v15410_v21, %v3443_v57  ;;  %v3448_v22 = vrot.slane %v3446_v15, 3 }
 0x526   : > { %3572 = vst.msk [vmem:[#allocation3 + $0xf0] sm:$0xff] %vm1140_vm1, %v3444_v49  ;;  %vm1035_vm10 = vcmp.lt.s32.totalorder %v677_v37, 15  ;;  %v3451_v45 = vrot.slane %v3449_v7, 4  ;;  %v3625_v40 = vsel %vm1945_vm4, %v3622_v19, %v3624_v11  ;;  %v589_v0 = vadd.s32 88, %v13719_v46  ;;  %5316 = vmatmul.mubr.bf16.gmra.mrb[28].mxu1 %v4572_v6 }
 0x527   : > { %v3039_v29 = vor.u32 %v3038_v42, %v3035_v17  ;;  %vm2903_vm3 = vmpackc.low %vm1035_vm10, %vm1035_vm10  ;;  %3670 = vst.msk [vmem:[#allocation3 + $0xb0] sm:$0xff] %vm1140_vm1, %v3625_v40  ;;  %v3390_v56 = vsel %vm18883_vm14, %v15207_v18, 0  ;;  %v3626_v21 = vrot.slane %v15486_v8, 4  ;;  %v15500_v60 = vadd.s32 104, %v13719_v46  ;;  %5356 = vmatprep.mubr.bf16.mxu1 %v4440_v16  ;;  %v12665_v40 = vld [vmem:[%s18767_s6 + $0x1c8] sm:$0xff]  }
 0x528   : > { %v2935_v19 = vsel %vm2903_vm3, 65537, %v15367_v61  ;;  %v3452_v58 = vor.u32 %v3451_v45, %v3448_v22  ;;  %v691_v12 = vand.u32 15, %v589_v0  ;;  %v3455_v55 = vshrl.u32 %v3390_v56, 16  ;;  %v15532_v45 = vld [vmem:[#allocation2 + $0x30] sm:$0xff] }
 0x529   : > { %v15505_v50 = vsel %vm2593_vm8, %v15429_v24, %v3039_v29  ;;  %v10637_v4 = vcombine.low %v19132_v48, %v2935_v19  ;;  %v3458_v18 = vshll.u32 %v3390_v56, 16  ;;  %v3627_v10 = vsel %vm1945_vm4, %v3624_v11, %v3626_v21  ;;  %v4442_v24 = vld [vmem:[#allocation3 + $0x28] sm:$0xff]  ;;  %v4439_v19 = vld [vmem:[#allocation3 + $0x10] sm:$0xff] }
 0x52a   : > { %19190 = vst [vmem:[#allocation38_spill] sm:$0xff] %v15505_v50  ;;  %vm3152_vm10 = vcmp.ne.s16.totalorder %v15505_v50, 0  ;;  %v3453_v51 = vsel %vm2593_vm8, %v3443_v57, %v3452_v58  ;;  %vm15513_vm3 = vcmp.lt.s32.totalorder %v691_v12, 15  ;;  %v3457_v25 = vrot.slane %v3455_v55, 3  ;;  %3671 = vst.msk [vmem:[#allocation3 + $0xf8] sm:$0xff] %vm1140_vm1, %v3627_v10  ;;  %5260 = vmatmul.mubr.bf16.gmra.mrb[36].mxu0 %v4509_v28 }
 0x52b   : > { %v3169_v26 = vsel %vm3152_vm10, %v15442_v36, 0  ;;  %v3042_v14 = vshrl.u32 %v10637_v4, 16  ;;  %v3045_v15 = vshll.u32 %v10637_v4, 16  ;;  %v3704_v5 = vsel %vm3152_vm10, %v15470_v54, 0  ;;  %3573 = vst.msk [vmem:[#allocation3 + $0x138] sm:$0xff] %vm1140_vm1, %v3453_v51  ;;  %vm2905_vm14 = vmpackc.low %vm15513_vm3, %vm15513_vm3  ;;  %5517 = vmatprep.mubr.bf16.mxu0 %v4442_v24  ;;  %v12658_v36 = vld [vmem:[%s18767_s6 + $0x180] sm:$0xff]  }
 0x52c   : > { %v3210_v57 = vshrl.u32 %v3169_v26, 16  ;;  %v3213_v37 = vshll.u32 %v3169_v26, 16  ;;  %v3745_v7 = vshrl.u32 %v3704_v5, 16  ;;  %v3748_v11 = vshll.u32 %v3704_v5, 16  ;;  %v4441_v5 = vld [vmem:[#allocation3 + $0x20] sm:$0xff] }
 0x52d   : > { %v3044_v17 = vrot.slane %v3042_v14, 3  ;;  %v3047_v42 = vrot.slane %v3045_v15, 4  ;;  %v2937_v49 = vsel %vm2905_vm14, 65537, %v15367_v61  ;;  %v3460_v22 = vrot.slane %v3458_v18, 4  ;;  %v4449_v18 = vld [vmem:[#allocation3 + $0x60] sm:$0xff] }
 0x52e   : > { %v3212_v0 = vrot.slane %v3210_v57, 4  ;;  %v3215_v6 = vrot.slane %v3213_v37, 5  ;;  %v3747_v56 = vrot.slane %v3745_v7, 4  ;;  %v3750_v16 = vrot.slane %v3748_v11, 5  ;;  %5357 = vmatmul.mubr.bf16.vlgmr.msra.gmra.mrb[32].mxu1 %v4439_v19 }
 0x52f   : > { %v3048_v12 = vor.u32 %v3047_v42, %v3044_v17  ;;  %v10638_v55 = vcombine.low %v19132_v48, %v2937_v49  ;;  %v15538_v4 = vor.u32 %v3460_v22, %v3457_v25  ;;  %v705_v10 = vand.u32 15, %v15500_v60  ;;  %11367 = vmatpush3.bf16.msra.mxu1 %v12658_v36  ;;  %5364 = vmatprep.mubr.bf16.mxu1 %v4449_v18  ;;  %v12666_v25 = vld [vmem:[%s18767_s6 + $0x188] sm:$0xff]   ;;  %v12678_v18 = vld [vmem:[%s18767_s6 + $0x210] sm:$0xff]  }
 0x530   : > { %v15541_v28 = vor.u32 %v3215_v6, %v3212_v0  ;;  %v15543_v51 = vor.u32 %v3750_v16, %v3747_v56  ;;  %v3391_v13 = vsel %vm18884_vm12, %v15248_v27, 0  ;;  %v3628_v24 = vrot.slane %v15532_v45, 4  ;;  %v12675_v27 = vld [vmem:[%s18767_s6 + $0x208] sm:$0xff]   ;;  %11368 = vmatprep.subr.bf16.mxu1 %v12665_v40  ;;  %v12668_v40 = vld [vmem:[%s18767_s6 + $0x190] sm:$0xff]  }
 0x531   : > { %v15553_v60 = vsel %vm2593_vm8, %v3039_v29, %v3048_v12  ;;  %v3051_v26 = vshrl.u32 %v10638_v55, 16  ;;  %v3054_v14 = vshll.u32 %v10638_v55, 16  ;;  %v3462_v15 = vsel %vm2593_vm8, %v3452_v58, %v15538_v4  ;;  %v12667_v58 = vld [vmem:[%s18767_s6 + $0x1d0] sm:$0xff]  }
 0x532   : > { %19193 = vst [vmem:[#allocation39_spill] sm:$0xff] %v15553_v60  ;;  %v3217_v57 = vsel %vm2415_vm11, %v15459_v63, %v15541_v28  ;;  %vm3153_vm14 = vcmp.ne.s16.totalorder %v15553_v60, 0  ;;  %v3752_v29 = vsel %vm2415_vm11, %v15473_v33, %v15543_v51  ;;  %3574 = vst.msk [vmem:[#allocation3 + $0x180] sm:$0xff] %vm1140_vm1, %v3462_v15  ;;  %vm15571_vm3 = vcmp.lt.s32.totalorder %v705_v10, 15  ;;  %5518 = vmatmul.mubr.bf16.vlgmr.msra.gmra.mrb[40].mxu0 %v4441_v5  ;;  %v4451_v63 = vld [vmem:[#allocation3 + $0x70] sm:$0xff]  ;;  %v4458_v5 = vld [vmem:[#allocation3 + $0xa8] sm:$0xff] }
 0x533   : > { %3353 = vst.msk [vmem:[#allocation3 + $0xa0] sm:$0xff] %vm1140_vm1, %v3217_v57  ;;  %v3170_v7 = vsel %vm3153_vm14, %v15470_v54, 0  ;;  %3888 = vst.msk [vmem:[#allocation3 + $0xb8] sm:$0xff] %vm1140_vm1, %v3752_v29  ;;  %v3053_v33 = vrot.slane %v3051_v26, 3  ;;  %v3056_v11 = vrot.slane %v3054_v14, 4  ;;  %v3705_v36 = vsel %vm3153_vm14, %v15486_v8, 0  ;;  %5525 = vmatprep.mubr.bf16.mxu0 %v4451_v63  ;;  %12099 = vmatpush3.bf16.msra.mxu0 %v15323_v44 }
 0x534   : > { %vm2907_vm12 = vmpackc.low %vm15571_vm3, %vm15571_vm3  ;;  %v3219_v17 = vshrl.u32 %v3170_v7, 16  ;;  %v3222_v42 = vshll.u32 %v3170_v7, 16  ;;  %v3754_v49 = vshrl.u32 %v3705_v36, 16  ;;  %v3757_v22 = vshll.u32 %v3705_v36, 16  ;;  %11369 = vmatpush3.bf16.msra.mxu1 %v12666_v25  ;;  %12100 = vmatprep.subr.bf16.mxu0 %v12675_v27  ;;  %v12669_v44 = vld [vmem:[%s18767_s6 + $0x1d8] sm:$0xff]   ;;  %v4448_v25 = vld [vmem:[#allocation3 + $0x58] sm:$0xff] }
 0x535   : > { %v15587_v54 = vor.u32 %v3056_v11, %v3053_v33  ;;  %v2939_v0 = vsel %vm2907_vm12, 65537, %v15367_v61  ;;  %v3464_v6 = vshrl.u32 %v3391_v13, 16  ;;  %v3467_v56 = vshll.u32 %v3391_v13, 16  ;;  %11370 = vmatprep.subr.bf16.mxu1 %v12667_v58  ;;  %v12670_v33 = vld [vmem:[%s18767_s6 + $0x198] sm:$0xff]  }
 0x536   : > { %v3221_v16 = vrot.slane %v3219_v17, 4  ;;  %v3224_v19 = vrot.slane %v3222_v42, 5  ;;  %v3756_v55 = vrot.slane %v3754_v49, 4  ;;  %v3759_v10 = vrot.slane %v3757_v22, 5  ;;  %5365 = vmatmul.mubr.bf16.gmra.mrb[36].mxu1 %v4448_v25  ;;  %v15630_v42 = vld [vmem:[#allocation2 + $0x48] sm:$0xff]  ;;  %v12671_v49 = vld [vmem:[%s18767_s6 + $0x1e0] sm:$0xff]  }
 0x537   : > { %v15601_v26 = vsel %vm2593_vm8, %v3048_v12, %v15587_v54  ;;  %v10639_v13 = vcombine.low %v19132_v48, %v2939_v0  ;;  %v3466_v14 = vrot.slane %v3464_v6, 3  ;;  %v3469_v15 = vrot.slane %v3467_v56, 4  ;;  %12101 = vmatpush3.bf16.msra.mxu0 %v12675_v27  ;;  %5372 = vmatprep.mubr.bf16.mxu1 %v4458_v5  ;;  %v4450_v27 = vld [vmem:[#allocation3 + $0x68] sm:$0xff] }
 0x538   : > { %19196 = vst [vmem:[#allocation40_spill] sm:$0xff] %v15601_v26  ;;  %v3225_v57 = vor.u32 %v3224_v19, %v3221_v16  ;;  %vm18906_vm12 = vcmp.ne.s16.totalorder %v15601_v26, 0  ;;  %v15605_v29 = vor.u32 %v3759_v10, %v3756_v55  ;;  %v3629_v58 = vsel %vm1945_vm4, %v3626_v21, %v3628_v24  ;;  %11371 = vmatpush3.bf16.msra.mxu1 %v12668_v40  ;;  %v12681_v21 = vld [vmem:[%s18767_s6 + $0x218] sm:$0xff]   ;;  %v12673_v5 = vld [vmem:[%s18767_s6 + $0x1a0] sm:$0xff]  }
 0x539   : > { %v3171_v12 = vsel %vm18906_vm12, %v15486_v8, 0  ;;  %v3060_v37 = vshrl.u32 %v10639_v13, 16  ;;  %v3063_v63 = vshll.u32 %v10639_v13, 16  ;;  %v3706_v7 = vsel %vm18906_vm12, %v15532_v45, 0  ;;  %3672 = vst.msk [vmem:[#allocation3 + $0x140] sm:$0xff] %vm1140_vm1, %v3629_v58  ;;  %11372 = vmatprep.subr.bf16.mxu1 %v12669_v44  ;;  %12102 = vmatprep.subr.bf16.mxu0 %v12678_v18  ;;  %v15640_v55 = vld [vmem:[#allocation2 + $0x38] sm:$0xff] }
 0x53a   : > { %v3226_v8 = vsel %vm2415_vm11, %v15541_v28, %v3225_v57  ;;  %v3228_v11 = vshrl.u32 %v3171_v12, 16  ;;  %v3231_v36 = vshll.u32 %v3171_v12, 16  ;;  %v3761_v17 = vsel %vm2415_vm11, %v15543_v51, %v15605_v29  ;;  %5526 = vmatmul.mubr.bf16.gmra.mrb[44].mxu0 %v4450_v27  ;;  %v4460_v22 = vld [vmem:[#allocation3 + $0xb8] sm:$0xff]  ;;  %v12674_v12 = vld [vmem:[%s18767_s6 + $0x1e8] sm:$0xff]  }
 0x53b   : > { %3354 = vst.msk [vmem:[#allocation3 + $0xe8] sm:$0xff] %vm1140_vm1, %v3226_v8  ;;  %3889 = vst.msk [vmem:[#allocation3 + $0x100] sm:$0xff] %vm1140_vm1, %v3761_v17  ;;  %v3062_v28 = vrot.slane %v3060_v37, 3  ;;  %v3065_v40 = vrot.slane %v3063_v63, 4  ;;  %v3763_v0 = vshrl.u32 %v3706_v7, 16  ;;  %v3766_v6 = vshll.u32 %v3706_v7, 16  ;;  %5533 = vmatprep.mubr.bf16.mxu0 %v4460_v22  ;;  %12103 = vmatpush3.bf16.msra.mxu0 %v12678_v18 }
 0x53c   : > { %v3230_v51 = vrot.slane %v3228_v11, 4  ;;  %v3233_v56 = vrot.slane %v3231_v36, 5  ;;  %v15637_v16 = vor.u32 %v3469_v15, %v3466_v14  ;;  %v593_v19 = vadd.s32 120, %v13719_v46  ;;  %11373 = vmatpush3.bf16.msra.mxu1 %v12670_v33  ;;  %12104 = vmatprep.subr.bf16.mxu0 %v12681_v21  ;;  %v12683_v37 = vld [vmem:[%s18767_s6 + $0x220] sm:$0xff]   ;;  %v4457_v63 = vld [vmem:[#allocation3 + $0xa0] sm:$0xff]  ;;  %v4467_v8 = vld [vmem:[#allocation3 + $0xf0] sm:$0xff] }
 0x53d   : > { %v15642_v10 = vor.u32 %v3065_v40, %v3062_v28  ;;  %v3765_v44 = vrot.slane %v3763_v0, 4  ;;  %v3768_v25 = vrot.slane %v3766_v6, 5  ;;  %v3392_v13 = vsel %vm18885_vm7, %v15630_v42, 0  ;;  %11374 = vmatprep.subr.bf16.mxu1 %v12671_v49  ;;  %v12676_v22 = vld [vmem:[%s18767_s6 + $0x1a8] sm:$0xff]  }
 0x53e   : > { %v15650_v14 = vor.u32 %v3233_v56, %v3230_v51  ;;  %v3471_v18 = vsel %vm2593_vm8, %v15538_v4, %v15637_v16  ;;  %v719_v15 = vand.u32 15, %v593_v19  ;;  %v3473_v58 = vshrl.u32 %v3392_v13, 16  ;;  %5373 = vmatmul.mubr.bf16.gmra.mrb[40].mxu1 %v4457_v63  ;;  %v12684_v28 = vld [vmem:[%s18767_s6 + $0x228] sm:$0xff]   ;;  %v12677_v56 = vld [vmem:[%s18767_s6 + $0x1f0] sm:$0xff]  }
 0x53f   : > { %v15664_v7 = vsel %vm2593_vm8, %v15587_v54, %v15642_v10  ;;  %v15666_v33 = vor.u32 %v3768_v25, %v3765_v44  ;;  %3575 = vst.msk [vmem:[#allocation3 + $0x1c8] sm:$0xff] %vm1140_vm1, %v3471_v18  ;;  %v3476_v4 = vshll.u32 %v3392_v13, 16  ;;  %v3630_v27 = vrot.slane %v15640_v55, 4  ;;  %12105 = vmatpush3.bf16.msra.mxu0 %v12681_v21  ;;  %5380 = vmatprep.mubr.bf16.mxu1 %v4467_v8  ;;  %v4459_v40 = vld [vmem:[#allocation3 + $0xb0] sm:$0xff]  ;;  %v15709_v18 = vld [vmem:[#allocation2 + $0x40] sm:$0xff] }
 0x540   : > { %19197 = vst [vmem:[#allocation41_spill] sm:$0xff] %v15664_v7  ;;  %v3235_v11 = vsel %vm2415_vm11, %v3225_v57, %v15650_v14  ;;  %vm18907_vm3 = vcmp.ne.s16.totalorder %v15664_v7, 0  ;;  %vm15673_vm7 = vcmp.lt.s32.totalorder %v719_v15, 15  ;;  %v3475_v54 = vrot.slane %v3473_v58, 3  ;;  %11375 = vmatpush3.bf16.msra.mxu1 %v12673_v5  ;;  %12106 = vmatprep.subr.bf16.mxu0 %v12683_v37  ;;  %v15711_v15 = vld [vmem:[#allocation2 + $0x50] sm:$0xff] }
 0x541   : > { %3355 = vst.msk [vmem:[#allocation3 + $0x130] sm:$0xff] %vm1140_vm1, %v3235_v11  ;;  %v3172_v17 = vsel %vm18907_vm3, %v15532_v45, 0  ;;  %v3770_v49 = vsel %vm2415_vm11, %v15605_v29, %v15666_v33  ;;  %vm2909_vm0 = vmpackc.low %vm15673_vm7, %vm15673_vm7  ;;  %v3707_v57 = vsel %vm18907_vm3, %v15640_v55, 0  ;;  %v3478_v21 = vrot.slane %v3476_v4, 4  ;;  %11376 = vmatprep.subr.bf16.mxu1 %v12674_v12 }
 0x542   : > { %v3237_v29 = vshrl.u32 %v3172_v17, 16  ;;  %v3240_v0 = vshll.u32 %v3172_v17, 16  ;;  %3890 = vst.msk [vmem:[#allocation3 + $0x148] sm:$0xff] %vm1140_vm1, %v3770_v49  ;;  %v2941_v6 = vsel %vm2909_vm0, 65537, %v15367_v61  ;;  %v3772_v51 = vshrl.u32 %v3707_v57, 16  ;;  %5534 = vmatmul.mubr.bf16.gmra.mrb[48].mxu0 %v4459_v40  ;;  %v4469_v19 = vld [vmem:[#allocation3 + $0x100] sm:$0xff] }
 0x543   : > { %v10640_v44 = vcombine.low %v19132_v48, %v2941_v6  ;;  %v3775_v25 = vshll.u32 %v3707_v57, 16  ;;  %v15702_v13 = vor.u32 %v3478_v21, %v3475_v54  ;;  %v3631_v5 = vsel %vm1945_vm4, %v3628_v24, %v3630_v27  ;;  %5541 = vmatprep.mubr.bf16.mxu0 %v4469_v19  ;;  %12107 = vmatpush3.bf16.msra.mxu0 %v12683_v37  ;;  %v12679_v24 = vld [vmem:[%s18767_s6 + $0x1b0] sm:$0xff]   ;;  %v4466_v21 = vld [vmem:[#allocation3 + $0xe8] sm:$0xff]  ;;  %v15736_v6 = vld [vmem:[#allocation2 + $0x58] sm:$0xff] }
 0x544   : > { %v3239_v58 = vrot.slane %v3237_v29, 4  ;;  %v3242_v12 = vrot.slane %v3240_v0, 5  ;;  %v3774_v63 = vrot.slane %v3772_v51, 4  ;;  %3673 = vst.msk [vmem:[#allocation3 + $0x188] sm:$0xff] %vm1140_vm1, %v3631_v5  ;;  %v595_v4 = vadd.s32 136, %v13719_v46  ;;  %11377 = vmatpush3.bf16.msra.mxu1 %v12676_v22  ;;  %12108 = vmatprep.subr.bf16.mxu0 %v12684_v28  ;;  %v12685_v57 = vld [vmem:[%s18767_s6 + $0x230] sm:$0xff]  }
 0x545   : > { %v3069_v8 = vshrl.u32 %v10640_v44, 16  ;;  %v3072_v11 = vshll.u32 %v10640_v44, 16  ;;  %v3777_v36 = vrot.slane %v3775_v25, 5  ;;  %v3480_v45 = vsel %vm2593_vm8, %v15637_v16, %v15702_v13  ;;  %11378 = vmatprep.subr.bf16.mxu1 %v12677_v56  ;;  %v12680_v16 = vld [vmem:[%s18767_s6 + $0x1f8] sm:$0xff]   ;;  %v4476_v51 = vld [vmem:[#allocation3 + $0x138] sm:$0xff] }
 0x546   : > { %v15721_v54 = vor.u32 %v3242_v12, %v3239_v58  ;;  %3576 = vst.msk [vmem:[#allocation3 + $0x210] sm:$0xff] %vm1140_vm1, %v3480_v45  ;;  %v733_v17 = vand.u32 15, %v595_v4  ;;  %v3393_v37 = vsel %vm18887_vm9, %v15711_v15, 0  ;;  %v3632_v49 = vrot.slane %v15709_v18, 4  ;;  %5381 = vmatmul.mubr.bf16.gmra.mrb[44].mxu1 %v4466_v21 }
 0x547   : > { %v3071_v22 = vrot.slane %v3069_v8, 3  ;;  %v3074_v40 = vrot.slane %v3072_v11, 4  ;;  %v15734_v29 = vor.u32 %v3777_v36, %v3774_v63  ;;  %v3482_v0 = vshrl.u32 %v3393_v37, 16  ;;  %12109 = vmatpush3.bf16.msra.mxu0 %v12684_v28  ;;  %5388 = vmatprep.mubr.bf16.mxu1 %v4476_v51  ;;  %v12686_v28 = vld [vmem:[%s18767_s6 + $0x238] sm:$0xff]   ;;  %v4468_v63 = vld [vmem:[#allocation3 + $0xf8] sm:$0xff] }
 0x548   : > { %v3244_v56 = vsel %vm2415_vm11, %v15650_v14, %v15721_v54  ;;  %vm15741_vm0 = vcmp.lt.s32.totalorder %v733_v17, 15  ;;  %v3485_v44 = vshll.u32 %v3393_v37, 16  ;;  %v3633_v25 = vsel %vm1945_vm4, %v3630_v27, %v3632_v49  ;;  %11379 = vmatpush3.bf16.msra.mxu1 %v12679_v24  ;;  %v12682_v27 = vld [vmem:[%s18767_s6 + $0x1b8] sm:$0xff]   ;;  %12110 = vmatprep.subr.bf16.mxu0 %v12685_v57 }
 0x549   : > { %3356 = vst.msk [vmem:[#allocation3 + $0x178] sm:$0xff] %vm1140_vm1, %v3244_v56  ;;  %v15749_v5 = vor.u32 %v3074_v40, %v3071_v22  ;;  %v3779_v58 = vsel %vm2415_vm11, %v15666_v33, %v15734_v29  ;;  %vm2911_vm7 = vmpackc.low %vm15741_vm0, %vm15741_vm0  ;;  %v3484_v14 = vrot.slane %v3482_v0, 3  ;;  %v597_v12 = vadd.s32 152, %v13719_v46  ;;  %11380 = vmatprep.subr.bf16.mxu1 %v12680_v16  ;;  %v4478_v36 = vld [vmem:[#allocation3 + $0x148] sm:$0xff] }
 0x54a   : > { %3674 = vst.msk [vmem:[#allocation3 + $0x1d0] sm:$0xff] %vm1140_vm1, %v3633_v25  ;;  %3891 = vst.msk [vmem:[#allocation3 + $0x190] sm:$0xff] %vm1140_vm1, %v3779_v58  ;;  %v2943_v33 = vsel %vm2911_vm7, 65537, %v15367_v61  ;;  %v3487_v4 = vrot.slane %v3485_v44, 4  ;;  %vm19202_vm0 = vcmp.ne.s16.totalorder %v19172_v47, 0  ;;  %v3634_v11 = vrot.slane %v15630_v42, 4  ;;  %5542 = vmatmul.mubr.bf16.gmra.mrb[52].mxu0 %v4468_v63 }
 0x54b   : > { %v3394_v8 = vsel %vm19202_vm0, %v15736_v6, 0  ;;  %v15774_v45 = vsel %vm2593_vm8, %v15642_v10, %v15749_v5  ;;  %v10641_v24 = vcombine.low %v19132_v48, %v2943_v33  ;;  %v747_v17 = vand.u32 15, %v597_v12  ;;  %5549 = vmatprep.mubr.bf16.mxu0 %v4478_v36  ;;  %12111 = vmatpush3.bf16.msra.mxu0 %v12685_v57  ;;  %v4475_v57 = vld [vmem:[#allocation3 + $0x130] sm:$0xff]  ;;  %v4485_v12 = vld [vmem:[#allocation3 + $0x180] sm:$0xff] }
 0x54c   : > { %19203 = vst [vmem:[#allocation30_spill] sm:$0xff] %v15774_v45  ;;  %v3491_v37 = vshrl.u32 %v3394_v8, 16  ;;  %vm18889_vm7 = vcmp.ne.s16.totalorder %v15774_v45, 0  ;;  %v3488_v21 = vor.u32 %v3487_v4, %v3484_v14  ;;  %v3494_v22 = vshll.u32 %v3394_v8, 16  ;;  %11381 = vmatpush3.bf16.msra.mxu1 %v12682_v27  ;;  %12112 = vmatprep.subr.bf16.mxu0 %v12686_v28  ;;  %v15792_v8 = vld [vmem:[#allocation2 + $0x60] sm:$0xff] }
 0x54d   : > { %v3635_v16 = vsel %vm1945_vm4, %v3632_v49, %v3634_v11  ;;  %v3173_v40 = vsel %vm18889_vm7, %v15640_v55, 0  ;;  %v3078_v10 = vshrl.u32 %v10641_v24, 16  ;;  %v3081_v0 = vshll.u32 %v10641_v24, 16 }
 0x54e   : > { %v3708_v51 = vsel %vm18889_vm7, %v15709_v18, 0  ;;  %3675 = vst.msk [vmem:[#allocation3 + $0x218] sm:$0xff] %vm1140_vm1, %v3635_v16  ;;  %v3246_v56 = vshrl.u32 %v3173_v40, 16  ;;  %v3249_v19 = vshll.u32 %v3173_v40, 16  ;;  %v19204_v49 = vmov 0.0|0.0   ;;  %5389 = vmatmul.mubr.bf16.gmra.mrb[48].mxu1 %v4475_v57 }
 0x54f   : > { %v3781_v44 = vshrl.u32 %v3708_v51, 16  ;;  %v3784_v25 = vshll.u32 %v3708_v51, 16  ;;  %12362 = vmatprep.subr.bf16.mxu1 %v19204_v49  ;;  %v3080_v58 = vrot.slane %v3078_v10, 3  ;;  %v3083_v14 = vrot.slane %v3081_v0, 4  ;;  %12113 = vmatpush3.bf16.msra.mxu0 %v12686_v28 }
 0x550   : > { %v3489_v55 = vsel %vm2593_vm8, %v15702_v13, %v3488_v21  ;;  %vm1045_vm0 = vcmp.lt.s32.totalorder %v747_v17, 15  ;;  %v3248_v63 = vrot.slane %v3246_v56, 4  ;;  %v3251_v33 = vrot.slane %v3249_v19, 5  ;;  %5396 = vmatprep.mubr.bf16.mxu1 %v4485_v12  ;;  %v4477_v13 = vld [vmem:[#allocation3 + $0x140] sm:$0xff] }
 0x551   : > { %v3783_v4 = vrot.slane %v3781_v44, 4  ;;  %v3786_v27 = vrot.slane %v3784_v25, 5  ;;  %3577 = vst.msk [vmem:[#allocation3 + $0x258] sm:$0xff] %vm1140_vm1, %v3489_v55  ;;  %vm2913_vm9 = vmpackc.low %vm1045_vm0, %vm1045_vm0  ;;  %v3084_v36 = vor.u32 %v3083_v14, %v3080_v58  ;;  %v3493_v16 = vrot.slane %v3491_v37, 3  ;;  %v4487_v56 = vld [vmem:[#allocation3 + $0x190] sm:$0xff] }
 0x552   : > { %v2945_v24 = vsel %vm2913_vm9, 65537, %v15367_v61  ;;  %v3496_v40 = vrot.slane %v3494_v22, 4  ;;  %v3252_v17 = vor.u32 %v3251_v33, %v3248_v63  ;;  %v599_v51 = vadd.s32 168, %v13719_v46  ;;  %5550 = vmatmul.mubr.bf16.gmra.mrb[56].mxu0 %v4477_v13  ;;  %v4484_v63 = vld [vmem:[#allocation3 + $0x178] sm:$0xff] }
 0x553   : > { %v15795_v10 = vor.u32 %v3786_v27, %v3783_v4  ;;  %v10642_v0 = vcombine.low %v19132_v48, %v2945_v24  ;;  %v15801_v19 = vsel %vm2593_vm8, %v15749_v5, %v3084_v36  ;;  %vm19206_vm9 = vcmp.ne.s16.totalorder %v19174_v3, 0  ;;  %5557 = vmatprep.mubr.bf16.mxu0 %v4487_v56  ;;  %v4494_v24 = vld [vmem:[#allocation3 + $0x1c8] sm:$0xff]  ;;  %v15826_v56 = vld [vmem:[#allocation2 + $0x68] sm:$0xff] }
 0x554   : > { %19205 = vst [vmem:[#allocation42_spill] sm:$0xff] %v15801_v19  ;;  %v15803_v28 = vor.u32 %v3496_v40, %v3493_v16  ;;  %v3395_v61 = vsel %vm19206_vm9, %v15792_v8, 0  ;;  %v3636_v37 = vrot.slane %v15711_v15, 4  ;;  %v3253_v22 = vsel %vm2415_vm11, %v15721_v54, %v3252_v17 }
 0x555   : > { %vm18888_vm0 = vcmp.ne.s16.totalorder %v15801_v19, 0  ;;  %v3788_v44 = vsel %vm2415_vm11, %v15734_v29, %v15795_v10  ;;  %v3087_v5 = vshrl.u32 %v10642_v0, 16  ;;  %3357 = vst.msk [vmem:[#allocation3 + $0x1c0] sm:$0xff] %vm1140_vm1, %v3253_v22  ;;  %v3090_v57 = vshll.u32 %v10642_v0, 16 }
 0x556   : > { %v3174_v25 = vsel %vm18888_vm0, %v15709_v18, 0  ;;  %3892 = vst.msk [vmem:[#allocation3 + $0x1d8] sm:$0xff] %vm1140_vm1, %v3788_v44  ;;  %v3709_v54 = vsel %vm18888_vm0, %v15630_v42, 0  ;;  %v3498_v58 = vsel %vm2593_vm8, %v3488_v21, %v15803_v28  ;;  %v761_v18 = vand.u32 15, %v599_v51  ;;  %5397 = vmatmul.mubr.bf16.gmra.mrb[52].mxu1 %v4484_v63 }
 0x557   : > { %v3255_v14 = vshrl.u32 %v3174_v25, 16  ;;  %v3258_v55 = vshll.u32 %v3174_v25, 16  ;;  %v3089_v29 = vrot.slane %v3087_v5, 3  ;;  %v3790_v12 = vshrl.u32 %v3709_v54, 16  ;;  %3578 = vst.msk [vmem:[#allocation3 + $0x2a0] sm:$0xff] %vm1140_vm1, %v3498_v58  ;;  %5404 = vmatprep.mubr.bf16.mxu1 %v4494_v24  ;;  %v4486_v5 = vld [vmem:[#allocation3 + $0x188] sm:$0xff] }
 0x558   : > { %v3092_v33 = vrot.slane %v3090_v57, 4  ;;  %v3793_v4 = vshll.u32 %v3709_v54, 16  ;;  %v3500_v27 = vshrl.u32 %v3395_v61, 16  ;;  %v3503_v0 = vshll.u32 %v3395_v61, 16 }
 0x559   : > { %v3257_v16 = vrot.slane %v3255_v14, 4  ;;  %v3260_v40 = vrot.slane %v3258_v55, 5  ;;  %v3792_v13 = vrot.slane %v3790_v12, 4  ;;  %vm1047_vm9 = vcmp.lt.s32.totalorder %v761_v18, 15  ;;  %v15840_v14 = vld [vmem:[#allocation2] sm:$0xff] }
 0x55a   : > { %v15828_v21 = vor.u32 %v3092_v33, %v3089_v29  ;;  %v3795_v22 = vrot.slane %v3793_v4, 5  ;;  %v3502_v44 = vrot.slane %v3500_v27, 3  ;;  %vm2915_vm0 = vmpackc.low %vm1047_vm9, %vm1047_vm9  ;;  %v3505_v57 = vrot.slane %v3503_v0, 4  ;;  %5558 = vmatmul.mubr.bf16.gmra.mrb[60].mxu0 %v4486_v5 }
 0x55b   : > { %v3261_v25 = vor.u32 %v3260_v40, %v3257_v16  ;;  %v3637_v51 = vsel %vm1945_vm4, %v3634_v11, %v3636_v37  ;;  %v601_v61 = vadd.s32 184, %v13719_v46  ;;  %v2947_v55 = vsel %vm2915_vm0, 65537, %v15840_v14 }
 0x55c   : > { %v15838_v54 = vsel %vm2593_vm8, %v3084_v36, %v15828_v21  ;;  %v3796_v58 = vor.u32 %v3795_v22, %v3792_v13  ;;  %3676 = vst.msk [vmem:[#allocation3 + $0x260] sm:$0xff] %vm1140_vm1, %v3637_v51  ;;  %vm19208_vm9 = vcmp.ne.s16.totalorder %v14786_v41, 0  ;;  %v10643_v63 = vcombine.low %v19132_v48, %v2947_v55  ;;  %v4493_v13 = vld [vmem:[#allocation3 + $0x1c0] sm:$0xff] }
 0x55d   : > { %19207 = vst [vmem:[#allocation43_spill] sm:$0xff] %v15838_v54  ;;  %v3396_v29 = vsel %vm19208_vm9, %v15826_v56, 0  ;;  %v3262_v11 = vsel %vm2415_vm11, %v3252_v17, %v3261_v25  ;;  %v4496_v12 = vld [vmem:[#allocation3 + $0x1d8] sm:$0xff]  ;;  %vm18891_vm7 = vcmp.ne.s16.totalorder %v15838_v54, 0  ;;  %v15850_v36 = vor.u32 %v3505_v57, %v3502_v44 }
 0x55e   : > { %3358 = vst.msk [vmem:[#allocation3 + $0x208] sm:$0xff] %vm1140_vm1, %v3262_v11  ;;  %5565 = vmatprep.mubr.bf16.mxu0 %v4496_v12  ;;  %v3175_v33 = vsel %vm18891_vm7, %v15630_v42, 0  ;;  %v3797_v4 = vsel %vm2415_vm11, %v15795_v10, %v3796_v58  ;;  %v3710_v17 = vsel %vm18891_vm7, %v15711_v15, 0  ;;  %v775_v18 = vand.u32 15, %v601_v61  ;;  %5405 = vmatmul.mubr.bf16.gmra.mrb[56].mxu1 %v4493_v13  ;;  %v4503_v10 = vld [vmem:[#allocation3 + $0x210] sm:$0xff] }
 0x55f   : > { %v3264_v27 = vshrl.u32 %v3175_v33, 16  ;;  %v3267_v24 = vshll.u32 %v3175_v33, 16  ;;  %3893 = vst.msk [vmem:[#allocation3 + $0x220] sm:$0xff] %vm1140_vm1, %v3797_v4  ;;  %v3096_v16 = vshrl.u32 %v10643_v63, 16  ;;  %v3099_v40 = vshll.u32 %v10643_v63, 16  ;;  %5412 = vmatprep.mubr.bf16.mxu1 %v4503_v10  ;;  %v4495_v63 = vld [vmem:[#allocation3 + $0x1d0] sm:$0xff] }
 0x560   : > { %v3799_v0 = vshrl.u32 %v3710_v17, 16  ;;  %v3802_v22 = vshll.u32 %v3710_v17, 16  ;;  %v3507_v42 = vsel %vm2593_vm8, %v15803_v28, %v15850_v36  ;;  %vm1049_vm0 = vcmp.lt.s32.totalorder %v775_v18, 15 }
 0x561   : > { %v3266_v44 = vrot.slane %v3264_v27, 4  ;;  %v3269_v5 = vrot.slane %v3267_v24, 5  ;;  %v3098_v57 = vrot.slane %v3096_v16, 3  ;;  %v3101_v51 = vrot.slane %v3099_v40, 4  ;;  %3579 = vst.msk [vmem:[#allocation3 + $0x2e8] sm:$0xff] %vm1140_vm1, %v3507_v42  ;;  %vm2917_vm9 = vmpackc.low %vm1049_vm0, %vm1049_vm0 }
 0x562   : > { %v3801_v61 = vrot.slane %v3799_v0, 4  ;;  %v3804_v55 = vrot.slane %v3802_v22, 5  ;;  %v2949_v11 = vsel %vm2917_vm9, 65537, %v15840_v14  ;;  %v3509_v12 = vshrl.u32 %v3396_v29, 16  ;;  %5566 = vmatmul.mubr.bf16.gmra.mrb[64].mxu0 %v4495_v63 }
 0x563   : > { %v3270_v33 = vor.u32 %v3269_v5, %v3266_v44  ;;  %v3102_v4 = vor.u32 %v3101_v51, %v3098_v57  ;;  %v10644_v28 = vcombine.low %v19132_v48, %v2949_v11  ;;  %v3512_v17 = vshll.u32 %v3396_v29, 16  ;;  %v15883_v44 = vld [vmem:[#allocation2 + $0x70] sm:$0xff] }
 0x564   : > { %v3805_v18 = vor.u32 %v3804_v55, %v3801_v61  ;;  %v3511_v27 = vrot.slane %v3509_v12, 3  ;;  %v3638_v24 = vrot.slane %v15736_v6, 4  ;;  %v603_v16 = vadd.s32 200, %v13719_v46  ;;  %v4512_v12 = vld [vmem:[#allocation3 + $0x258] sm:$0xff] }
 0x565   : > { %v3271_v40 = vsel %vm2415_vm11, %v3261_v25, %v3270_v33  ;;  %v15873_v13 = vsel %vm2593_vm8, %v15828_v21, %v3102_v4  ;;  %v3105_v0 = vshrl.u32 %v10644_v28, 16  ;;  %v3108_v22 = vshll.u32 %v10644_v28, 16  ;;  %v4502_v51 = vld [vmem:[#allocation3 + $0x208] sm:$0xff] }
 0x566   : > { %19209 = vst [vmem:[#allocation44_spill] sm:$0xff] %v15873_v13  ;;  %3359 = vst.msk [vmem:[#allocation3 + $0x250] sm:$0xff] %vm1140_vm1, %v3271_v40  ;;  %v4505_v42 = vld [vmem:[#allocation3 + $0x220] sm:$0xff]  ;;  %vm18890_vm0 = vcmp.ne.s16.totalorder %v15873_v13, 0  ;;  %v3806_v29 = vsel %vm2415_vm11, %v3796_v58, %v3805_v18  ;;  %v3514_v10 = vrot.slane %v3512_v17, 4  ;;  %v3639_v25 = vsel %vm1945_vm4, %v3636_v37, %v3638_v24  ;;  %5413 = vmatmul.mubr.bf16.gmra.mrb[60].mxu1 %v4502_v51 }
 0x567   : > { %5573 = vmatprep.mubr.bf16.mxu0 %v4505_v42  ;;  %v3176_v21 = vsel %vm18890_vm0, %v15711_v15, 0  ;;  %3894 = vst.msk [vmem:[#allocation3 + $0x268] sm:$0xff] %vm1140_vm1, %v3806_v29  ;;  %v3107_v5 = vrot.slane %v3105_v0, 3  ;;  %v3110_v57 = vrot.slane %v3108_v22, 4  ;;  %v3711_v58 = vsel %vm18890_vm0, %v15736_v6, 0  ;;  %3677 = vst.msk [vmem:[#allocation3 + $0x2a8] sm:$0xff] %vm1140_vm1, %v3639_v25  ;;  %5420 = vmatprep.mubr.bf16.mxu1 %v4512_v12 }
 0x568   : > { %v3273_v61 = vshrl.u32 %v3176_v21, 16  ;;  %v3276_v37 = vshll.u32 %v3176_v21, 16  ;;  %v3808_v55 = vshrl.u32 %v3711_v58, 16  ;;  %v3811_v11 = vshll.u32 %v3711_v58, 16  ;;  %v4504_v29 = vld [vmem:[#allocation3 + $0x218] sm:$0xff] }
 0x569   : > { %v15893_v63 = vor.u32 %v3110_v57, %v3107_v5  ;;  %v15895_v15 = vor.u32 %v3514_v10, %v3511_v27  ;;  %v789_v28 = vand.u32 15, %v603_v16  ;;  %vm19210_vm9 = vcmp.ne.s16.totalorder %v14845_v20, 0 }
 0x56a   : > { %v3397_v17 = vsel %vm19210_vm9, %v15883_v44, 0  ;;  %v3275_v40 = vrot.slane %v3273_v61, 4  ;;  %v3278_v0 = vrot.slane %v3276_v37, 5  ;;  %v3810_v22 = vrot.slane %v3808_v55, 4  ;;  %5574 = vmatmul.mubr.bf16.gmra.mrb[68].mxu0 %v4504_v29 }
 0x56b   : > { %v3813_v42 = vrot.slane %v3811_v11, 5  ;;  %v15902_v25 = vsel %vm2593_vm8, %v3102_v4, %v15893_v63  ;;  %v3516_v27 = vsel %vm2593_vm8, %v15850_v36, %v15895_v15  ;;  %vm1051_vm0 = vcmp.lt.s32.totalorder %v789_v28, 15 }
 0x56c   : > { %19211 = vst [vmem:[#allocation45_spill] sm:$0xff] %v15902_v25  ;;  %v3518_v16 = vshrl.u32 %v3397_v17, 16  ;;  %v3279_v10 = vor.u32 %v3278_v0, %v3275_v40  ;;  %vm3160_vm9 = vcmp.ne.s16.totalorder %v15902_v25, 0  ;;  %3580 = vst.msk [vmem:[#allocation3 + $0x330] sm:$0xff] %vm1140_vm1, %v3516_v27  ;;  %v3521_v5 = vshll.u32 %v3397_v17, 16  ;;  %v15923_v27 = vld [vmem:[#allocation2 + $0x78] sm:$0xff] }
 0x56d   : > { %v3814_v21 = vor.u32 %v3813_v42, %v3810_v22  ;;  %vm2919_vm7 = vmpackc.low %vm1051_vm0, %vm1051_vm0  ;;  %v3177_v4 = vsel %vm3160_vm9, %v15736_v6, 0  ;;  %v3712_v36 = vsel %vm3160_vm9, %v15792_v8, 0  ;;  %v4511_v0 = vld [vmem:[#allocation3 + $0x250] sm:$0xff]  ;;  %v605_v29 = vadd.s32 216, %v13719_v46 }
 0x56e   : > { %v2951_v57 = vsel %vm2919_vm7, 65537, %v15840_v14  ;;  %v3520_v58 = vrot.slane %v3518_v16, 3  ;;  %v3280_v51 = vsel %vm2415_vm11, %v3270_v33, %v3279_v10  ;;  %v4514_v61 = vld [vmem:[#allocation3 + $0x268] sm:$0xff]  ;;  %v3282_v37 = vshrl.u32 %v3177_v4, 16  ;;  %5421 = vmatmul.mubr.bf16.gmra.mrb[64].mxu1 %v4511_v0 }
 0x56f   : > { %v3285_v55 = vshll.u32 %v3177_v4, 16  ;;  %v3815_v11 = vsel %vm2415_vm11, %v3805_v18, %v3814_v21  ;;  %3360 = vst.msk [vmem:[#allocation3 + $0x298] sm:$0xff] %vm1140_vm1, %v3280_v51  ;;  %5581 = vmatprep.mubr.bf16.mxu0 %v4514_v61  ;;  %v10645_v12 = vcombine.low %v19132_v48, %v2951_v57  ;;  %v3817_v28 = vshrl.u32 %v3712_v36, 16  ;;  %v4521_v18 = vld [vmem:[#allocation3 + $0x2a0] sm:$0xff] }
 0x570   : > { %3895 = vst.msk [vmem:[#allocation3 + $0x2b0] sm:$0xff] %vm1140_vm1, %v3815_v11  ;;  %v3820_v17 = vshll.u32 %v3712_v36, 16  ;;  %v3523_v40 = vrot.slane %v3521_v5, 4  ;;  %v3284_v22 = vrot.slane %v3282_v37, 4  ;;  %v3640_v33 = vrot.slane %v15792_v8, 4  ;;  %5428 = vmatprep.mubr.bf16.mxu1 %v4521_v18 }
 0x571   : > { %v3287_v42 = vrot.slane %v3285_v55, 5  ;;  %v3114_v16 = vshrl.u32 %v10645_v12, 16  ;;  %v3117_v4 = vshll.u32 %v10645_v12, 16  ;;  %v3819_v51 = vrot.slane %v3817_v28, 4  ;;  %v4513_v55 = vld [vmem:[#allocation3 + $0x260] sm:$0xff]  ;;  %v15938_v28 = vld [vmem:[#allocation2 + $0x80] sm:$0xff] }
 0x572   : > { %v3822_v61 = vrot.slane %v3820_v17, 5  ;;  %v15927_v36 = vor.u32 %v3523_v40, %v3520_v58  ;;  %v3641_v5 = vsel %vm1945_vm4, %v3638_v24, %v3640_v33  ;;  %v803_v37 = vand.u32 15, %v605_v29  ;;  %5582 = vmatmul.mubr.bf16.gmra.mrb[72].mxu0 %v4513_v55  ;;  %v4530_v55 = vld [vmem:[#allocation3 + $0x2e8] sm:$0xff] }
 0x573   : > { %v15925_v57 = vor.u32 %v3287_v42, %v3284_v22  ;;  %v3116_v11 = vrot.slane %v3114_v16, 3  ;;  %v3119_v49 = vrot.slane %v3117_v4, 4  ;;  %3678 = vst.msk [vmem:[#allocation3 + $0x2f0] sm:$0xff] %vm1140_vm1, %v3641_v5  ;;  %v3398_v12 = vsel %vm18894_vm13, %v15923_v27, 0 }
 0x574   : > { %v15932_v20 = vor.u32 %v3822_v61, %v3819_v51  ;;  %v3525_v24 = vsel %vm2593_vm8, %v15895_v15, %v15927_v36  ;;  %vm1053_vm7 = vcmp.lt.s32.totalorder %v803_v37, 15  ;;  %v3527_v58 = vshrl.u32 %v3398_v12, 16 }
 0x575   : > { %v3289_v6 = vsel %vm2415_vm11, %v3279_v10, %v15925_v57  ;;  %v3120_v17 = vor.u32 %v3119_v49, %v3116_v11  ;;  %3581 = vst.msk [vmem:[#allocation3 + $0x378] sm:$0xff] %vm1140_vm1, %v3525_v24  ;;  %vm2921_vm0 = vmpackc.low %vm1053_vm7, %vm1053_vm7  ;;  %v3530_v0 = vshll.u32 %v3398_v12, 16  ;;  %v18895_v22 = vrot.slane %v15826_v56, 4 }
 0x576   : > { %3361 = vst.msk [vmem:[#allocation3 + $0x2e0] sm:$0xff] %vm1140_vm1, %v3289_v6  ;;  %v3824_v40 = vsel %vm2415_vm11, %v3814_v21, %v15932_v20  ;;  %v2953_v10 = vsel %vm2921_vm0, 65537, %v15840_v14  ;;  %v3529_v15 = vrot.slane %v3527_v58, 3  ;;  %v607_v29 = vadd.s32 232, %v13719_v46  ;;  %v4520_v51 = vld [vmem:[#allocation3 + $0x298] sm:$0xff] }
 0x577   : > { %v4523_v42 = vld [vmem:[#allocation3 + $0x2b0] sm:$0xff]  ;;  %3896 = vst.msk [vmem:[#allocation3 + $0x2f8] sm:$0xff] %vm1140_vm1, %v3824_v40  ;;  %vm19212_vm13 = vcmp.ne.s16.totalorder %v14987_v39, 0  ;;  %v15958_v21 = vsel %vm2593_vm8, %v15893_v63, %v3120_v17  ;;  %v10646_v18 = vcombine.low %v19132_v48, %v2953_v10  ;;  %v3532_v16 = vrot.slane %v3530_v0, 4  ;;  %5429 = vmatmul.mubr.bf16.gmra.mrb[68].mxu1 %v4520_v51  ;;  %v4522_v0 = vld [vmem:[#allocation3 + $0x2a8] sm:$0xff] }
 0x578   : > { %v3399_v49 = vsel %vm19212_vm13, %v15938_v28, 0  ;;  %5589 = vmatprep.mubr.bf16.mxu0 %v4523_v42  ;;  %19213 = vst [vmem:[#allocation46_spill] sm:$0xff] %v15958_v21  ;;  %v3643_v4 = vsel %vm1945_vm4, %v3640_v33, %v18895_v22  ;;  %vm18901_vm7 = vcmp.ne.s16.totalorder %v15958_v21, 0  ;;  %v817_v61 = vand.u32 15, %v607_v29  ;;  %5436 = vmatprep.mubr.bf16.mxu1 %v4530_v55 }
 0x579   : > { %3679 = vst.msk [vmem:[#allocation3 + $0x338] sm:$0xff] %vm1140_vm1, %v3643_v4  ;;  %v3536_v5 = vshrl.u32 %v3399_v49, 16  ;;  %v3539_v37 = vshll.u32 %v3399_v49, 16  ;;  %v3178_v63 = vsel %vm18901_vm7, %v15792_v8, 0  ;;  %v3123_v11 = vshrl.u32 %v10646_v18, 16 }
 0x57a   : > { %v3126_v12 = vshll.u32 %v10646_v18, 16  ;;  %v3713_v33 = vsel %vm18901_vm7, %v15826_v56, 0  ;;  %v3291_v6 = vshrl.u32 %v3178_v63, 16  ;;  %v3294_v24 = vshll.u32 %v3178_v63, 16  ;;  %5590 = vmatmul.mubr.bf16.gmra.mrb[76].mxu0 %v4522_v0  ;;  %v3383_v18 = vld [vmem:[#allocation2 + $0x88] sm:$0xf] }
 0x57b   : > { %v3826_v58 = vshrl.u32 %v3713_v33, 16  ;;  %v3829_v40 = vshll.u32 %v3713_v33, 16  ;;  %v3125_v42 = vrot.slane %v3123_v11, 3  ;;  %v3533_v29 = vor.u32 %v3532_v16, %v3529_v15 }
 0x57c   : > { %v3128_v10 = vrot.slane %v3126_v12, 4  ;;  %vm1055_vm13 = vcmp.lt.s32.totalorder %v817_v61, 15  ;;  %v3293_v49 = vrot.slane %v3291_v6, 4  ;;  %v3296_v4 = vrot.slane %v3294_v24, 5 }
 0x57d   : > { %v3828_v8 = vrot.slane %v3826_v58, 4  ;;  %v3831_v51 = vrot.slane %v3829_v40, 5  ;;  %vm2923_vm0 = vmpackc.low %vm1055_vm13, %vm1055_vm13  ;;  %v3534_v55 = vsel %vm2593_vm8, %v15927_v36, %v3533_v29  ;;  %v3538_v33 = vrot.slane %v3536_v5, 3  ;;  %v4529_v5 = vld [vmem:[#allocation3 + $0x2e0] sm:$0xff] }
 0x57e   : > { %v4532_v22 = vld [vmem:[#allocation3 + $0x2f8] sm:$0xff]  ;;  %v3129_v39 = vor.u32 %v3128_v10, %v3125_v42  ;;  %v2955_v63 = vsel %vm2923_vm0, 65537, %v15840_v14  ;;  %v3297_v30 = vor.u32 %v3296_v4, %v3293_v49  ;;  %3582 = vst.msk [vmem:[#allocation3 + $0x3c0] sm:$0xff] %vm1140_vm1, %v3534_v55  ;;  %v3541_v16 = vrot.slane %v3539_v37, 4  ;;  %v4531_v49 = vld [vmem:[#allocation3 + $0x2f0] sm:$0xff] }
 0x57f   : > { %5597 = vmatprep.mubr.bf16.mxu0 %v4532_v22  ;;  %v15975_v11 = vor.u32 %v3831_v51, %v3828_v8  ;;  %v10647_v15 = vcombine.low %v19132_v48, %v2955_v63  ;;  %v3644_v12 = vrot.slane %v15883_v44, 4  ;;  %v609_v6 = vadd.s32 248, %v13719_v46  ;;  %5437 = vmatmul.mubr.bf16.gmra.mrb[72].mxu1 %v4529_v5  ;;  %v4120_v63 = vld [vmem:[#allocation2 + $0x10] sm:$0xf0] }
 0x580   : > { %v15980_v61 = vsel %vm2593_vm8, %v3120_v17, %v3129_v39  ;;  %vm19215_vm13 = vcmp.ne.s16.totalorder %v14970_v34, 0  ;;  %v3298_v22 = vsel %vm2415_vm11, %v15925_v57, %v3297_v30  ;;  %v4539_v17 = vld [vmem:[#allocation3 + $0x330] sm:$0xff]  ;;  %v16000_v40 = vor.u32 %v3541_v16, %v3538_v33 }
 0x581   : > { %19214 = vst [vmem:[#allocation29_spill] sm:$0xff] %v15980_v61  ;;  %v3400_v36 = vsel %vm19215_vm13, %v3383_v18, 0  ;;  %vm18900_vm0 = vcmp.ne.s16.totalorder %v15980_v61, 0  ;;  %v3833_v37 = vsel %vm2415_vm11, %v15932_v20, %v15975_v11  ;;  %v3132_v24 = vshrl.u32 %v10647_v15, 16  ;;  %3362 = vst.msk [vmem:[#allocation3 + $0x328] sm:$0xff] %vm1140_vm1, %v3298_v22  ;;  %5444 = vmatprep.mubr.bf16.mxu1 %v4539_v17 }
 0x582   : > { %v3179_v46 = vsel %vm18900_vm0, %v15826_v56, 0  ;;  %3897 = vst.msk [vmem:[#allocation3 + $0x340] sm:$0xff] %vm1140_vm1, %v3833_v37  ;;  %v3135_v58 = vshll.u32 %v10647_v15, 16  ;;  %v3714_v57 = vsel %vm18900_vm0, %v15883_v44, 0  ;;  %v3543_v51 = vsel %vm2593_vm8, %v3533_v29, %v16000_v40  ;;  %5598 = vmatmul.mubr.bf16.gmra.mrb[80].mxu0 %v4531_v49 }
 0x583   : > { %v3300_v20 = vshrl.u32 %v3179_v46, 16  ;;  %v3303_v0 = vshll.u32 %v3179_v46, 16  ;;  %v3134_v42 = vrot.slane %v3132_v24, 3  ;;  %v3835_v10 = vshrl.u32 %v3714_v57, 16  ;;  %3583 = vst.msk [vmem:[#allocation3 + $0x408] sm:$0xff] %vm1140_vm1, %v3543_v51 }
 0x584   : > { %v3137_v4 = vrot.slane %v3135_v58, 4  ;;  %v3838_v8 = vshll.u32 %v3714_v57, 16  ;;  %v19216_v18 = vrot.slane %v15826_v56, 4  ;;  %v831_v5 = vand.u32 15, %v609_v6 }
 0x585   : > { %v3302_v15 = vrot.slane %v3300_v20, 4  ;;  %v3305_v33 = vrot.slane %v3303_v0, 5  ;;  %v3837_v16 = vrot.slane %v3835_v10, 4  ;;  %v3545_v24 = vshrl.u32 %v3400_v36, 16 }
 0x586   : > { %v3645_v55 = vsel %vm1945_vm4, %v19216_v18, %v3644_v12  ;;  %v16009_v22 = vor.u32 %v3137_v4, %v3134_v42  ;;  %v3840_v37 = vrot.slane %v3838_v8, 5  ;;  %v3548_v17 = vshll.u32 %v3400_v36, 16  ;;  %v16020_v4 = vld [vmem:[#allocation2 + $0x18] sm:$0xff]  ;;  %v4548_v8 = vld [vmem:[#allocation3 + $0x378] sm:$0xff] }
 0x587   : > { %3680 = vst.msk [vmem:[#allocation3 + $0x380] sm:$0xff] %vm1140_vm1, %v3645_v55  ;;  %v3306_v29 = vor.u32 %v3305_v33, %v3302_v15  ;;  %vm1057_vm13 = vcmp.lt.s32.totalorder %v831_v5, 15  ;;  %v3646_v56 = vrot.slane %v15923_v27, 4  ;;  %v4154_v46 = vrot.slane %v4120_v63, 4  ;;  %v4540_v15 = vld [vmem:[#allocation3 + $0x338] sm:$0xff] }
 0x588   : > { %v16014_v58 = vsel %vm2593_vm8, %v3129_v39, %v16009_v22  ;;  %v3841_v57 = vor.u32 %v3840_v37, %v3837_v16  ;;  %vm2925_vm0 = vmpackc.low %vm1057_vm13, %vm1057_vm13  ;;  %v3547_v20 = vrot.slane %v3545_v24, 3  ;;  %v3550_v0 = vrot.slane %v3548_v17, 4  ;;  %v4538_v10 = vld [vmem:[#allocation3 + $0x328] sm:$0xff] }
 0x589   : > { %19217 = vst [vmem:[#allocation28_spill] sm:$0xff] %v16014_v58  ;;  %v3307_v6 = vsel %vm2415_vm11, %v3297_v30, %v3306_v29  ;;  %v4541_v42 = vld [vmem:[#allocation3 + $0x340] sm:$0xff]  ;;  %vm3163_vm7 = vcmp.ne.s16.totalorder %v16014_v58, 0  ;;  %v2957_v36 = vsel %vm2925_vm0, 65537, %v15840_v14  ;;  %v3647_v49 = vsel %vm1945_vm4, %v3644_v12, %v3646_v56  ;;  %5445 = vmatmul.mubr.bf16.gmra.mrb[76].mxu1 %v4538_v10 }
 0x58a   : > { %3363 = vst.msk [vmem:[#allocation3 + $0x370] sm:$0xff] %vm1140_vm1, %v3307_v6  ;;  %5605 = vmatprep.mubr.bf16.mxu0 %v4541_v42  ;;  %v3180_v39 = vsel %vm3163_vm7, %v15883_v44, 0  ;;  %v3842_v30 = vsel %vm2415_vm11, %v15975_v11, %v3841_v57  ;;  %v10648_v51 = vcombine.low %v19132_v48, %v2957_v36  ;;  %v3715_v14 = vsel %vm3163_vm7, %v15923_v27, 0  ;;  %3681 = vst.msk [vmem:[#allocation3 + $0x3c8] sm:$0xff] %vm1140_vm1, %v3647_v49  ;;  %v3902_v48 = vld [vmem:[#allocation2 + $0x10] sm:$0xf8] }
 0x58b   : > { %5452 = vmatprep.mubr.bf16.mxu1 %v4548_v8  ;;  %v3309_v12 = vshrl.u32 %v3180_v39, 16  ;;  %v3312_v18 = vshll.u32 %v3180_v39, 16  ;;  %3898 = vst.msk [vmem:[#allocation3 + $0x388] sm:$0xff] %vm1140_vm1, %v3842_v30  ;;  %v3844_v55 = vshrl.u32 %v3715_v14, 16  ;;  %v3847_v63 = vshll.u32 %v3715_v14, 16  ;;  %5606 = vmatmul.mubr.bf16.gmra.mrb[84].mxu0 %v4540_v15 }
 0x58c   : > { %v3141_v44 = vshrl.u32 %v10648_v51, 16  ;;  %v3144_v33 = vshll.u32 %v10648_v51, 16  ;;  %v3551_v16 = vor.u32 %v3550_v0, %v3547_v20  ;;  %v18903_v11 = vrot.slane %v16020_v4, 4  ;;  %v3700_v8 = vld [vmem:[#allocation2 + $0x88] sm:$0x1f] }
 0x58d   : > { %v3311_v5 = vrot.slane %v3309_v12, 4  ;;  %v3314_v37 = vrot.slane %v3312_v18, 5  ;;  %v3846_v24 = vrot.slane %v3844_v55, 4  ;;  %v3849_v17 = vrot.slane %v3847_v63, 5 }
 0x58e   : > { %v3143_v10 = vrot.slane %v3141_v44, 3  ;;  %v3146_v6 = vrot.slane %v3144_v33, 4  ;;  %v3552_v42 = vsel %vm2593_vm8, %v16000_v40, %v3551_v16  ;;  %v4156_v36 = vsel %vm1945_vm4, %v4154_v46, %v18903_v11  ;;  %v2893_v40 = vld [vmem:[#allocation2 + $0x80] sm:$0x1f]  ;;  %v4557_v44 = vld [vmem:[#allocation3 + $0x3c0] sm:$0xff] }
 0x58f   : > { %v16040_v49 = vor.u32 %v3314_v37, %v3311_v5  ;;  %v16042_v20 = vor.u32 %v3849_v17, %v3846_v24  ;;  %3584 = vst.msk [vmem:[#allocation3 + $0x450] sm:$0xff] %vm1140_vm1, %v3552_v42  ;;  %4203 = vst.msk [vmem:[#allocation3 + $0x38] sm:$0xff] %vm1140_vm1, %v4156_v36  ;;  %v18902_v0 = vrot.slane %v15938_v28, 4  ;;  %vm19218_vm0 = vcmp.ne.s16.totalorder %v19182_v52, 0  ;;  %v4549_v5 = vld [vmem:[#allocation3 + $0x380] sm:$0xff] }
 0x590   : > { %v3919_v39 = vsel %vm19218_vm0, %v3902_v48, 0  ;;  %v16049_v30 = vor.u32 %v3146_v6, %v3143_v10  ;;  %vm19220_vm13 = vcmp.ne.s16.totalorder %v19151_v35, 0 }
 0x591   : > { %v16054_v46 = vsel %vm19220_vm13, %v16020_v4, 0  ;;  %v3937_v51 = vshrl.u32 %v3919_v39, 16  ;;  %v3940_v14 = vshll.u32 %v3919_v39, 16  ;;  %v4547_v12 = vld [vmem:[#allocation3 + $0x370] sm:$0xff]  ;;  %v3316_v18 = vsel %vm2415_vm11, %v3306_v29, %v16040_v49 }
 0x592   : > { %19219 = vst [vmem:[#allocation47_spill] sm:$0xff] %v16049_v30  ;;  %v3851_v55 = vsel %vm2415_vm11, %v3841_v57, %v16042_v20  ;;  %v3649_v63 = vsel %vm1945_vm4, %v3646_v56, %v18902_v0  ;;  %v3945_v15 = vshrl.u32 %v16054_v46, 16  ;;  %5453 = vmatmul.mubr.bf16.gmra.mrb[80].mxu1 %v4547_v12  ;;  %3364 = vst.msk [vmem:[#allocation3 + $0x3b8] sm:$0xff] %vm1140_vm1, %v3316_v18  ;;  %v4550_v33 = vld [vmem:[#allocation3 + $0x388] sm:$0xff]  ;;  %vm3165_vm0 = vcmp.ne.s16.totalorder %v16049_v30, 0 }
 0x593   : > { %v16068_v16 = vsel %vm2593_vm8, %v16009_v22, %v16049_v30  ;;  %3899 = vst.msk [vmem:[#allocation3 + $0x3d0] sm:$0xff] %vm1140_vm1, %v3851_v55  ;;  %3682 = vst.msk [vmem:[#allocation3 + $0x410] sm:$0xff] %vm1140_vm1, %v3649_v63  ;;  %v16073_v29 = vrot.slane %v3937_v51, 3  ;;  %v16075_v56 = vrot.slane %v3940_v14, 4  ;;  %5460 = vmatprep.mubr.bf16.mxu1 %v4557_v44  ;;  %5613 = vmatprep.mubr.bf16.mxu0 %v4550_v33  ;;  %v3182_v57 = vsel %vm3165_vm0, %v2893_v40, 0  ;;  %v16088_v40 = vld [vmem:[#allocation2 + $0x20] sm:$0xff] }
 0x594   : > { %19221 = vst [vmem:[#allocation48_spill] sm:$0xff] %v16068_v16  ;;  %vm3164_vm13 = vcmp.ne.s16.totalorder %v16068_v16, 0  ;;  %v3717_v22 = vsel %vm3165_vm0, %v3700_v8, 0  ;;  %v3947_v48 = vrot.slane %v3945_v15, 3  ;;  %v3327_v24 = vshrl.u32 %v3182_v57, 16  ;;  %5614 = vmatmul.mubr.bf16.gmra.mrb[88].mxu0 %v4549_v5 }
 0x595   : > { %v3181_v37 = vsel %vm3164_vm13, %v15923_v27, 0  ;;  %v3330_v17 = vshll.u32 %v3182_v57, 16  ;;  %v3716_v10 = vsel %vm3164_vm13, %v15938_v28, 0  ;;  %v3862_v14 = vshrl.u32 %v3717_v22, 16  ;;  %v3601_v18 = vld [vmem:[#allocation2 + $0x88] sm:$0xf] }
 0x596   : > { %v3318_v6 = vshrl.u32 %v3181_v37, 16  ;;  %v3321_v42 = vshll.u32 %v3181_v37, 16  ;;  %v3853_v36 = vshrl.u32 %v3716_v10, 16  ;;  %v3856_v39 = vshll.u32 %v3716_v10, 16  ;;  %v4219_v44 = vld [vmem:[#allocation2 + $0x10] sm:$0xf0] }
 0x597   : > { %v3329_v8 = vrot.slane %v3327_v24, 4  ;;  %v3332_v51 = vrot.slane %v3330_v17, 5  ;;  %v3865_v12 = vshll.u32 %v3717_v22, 16  ;;  %v3864_v57 = vrot.slane %v3862_v14, 4  ;;  %v4566_v17 = vld [vmem:[#allocation3 + $0x408] sm:$0xff] }
 0x598   : > { %v3320_v55 = vrot.slane %v3318_v6, 4  ;;  %v3323_v27 = vrot.slane %v3321_v42, 5  ;;  %v3855_v63 = vrot.slane %v3853_v36, 4  ;;  %v3858_v15 = vrot.slane %v3856_v39, 5 }
 0x599   : > { %v3333_v33 = vor.u32 %v3332_v51, %v3329_v8  ;;  %v3867_v0 = vrot.slane %v3865_v12, 5  ;;  %v3943_v5 = vor.u32 %v16075_v56, %v16073_v29  ;;  %v4556_v37 = vld [vmem:[#allocation3 + $0x3b8] sm:$0xff]  ;;  %v3948_v24 = vshll.u32 %v16054_v46, 16 }
 0x59a   : > { %v3324_v10 = vor.u32 %v3323_v27, %v3320_v55  ;;  %v4559_v11 = vld [vmem:[#allocation3 + $0x3d0] sm:$0xff]  ;;  %v3859_v35 = vor.u32 %v3858_v15, %v3855_v63  ;;  %v4157_v22 = vrot.slane %v16088_v40, 4  ;;  %5461 = vmatmul.mubr.bf16.gmra.mrb[84].mxu1 %v4556_v37  ;;  %v3650_v42 = vrot.slane %v3601_v18, 4 }
 0x59b   : > { %5621 = vmatprep.mubr.bf16.mxu0 %v4559_v11  ;;  %v3868_v6 = vor.u32 %v3867_v0, %v3864_v57  ;;  %v3921_v36 = vsel %vm18905_vm6, %v16088_v40, 0  ;;  %v4236_v29 = vsel %vm3149_vm5, %v4219_v44, 0  ;;  %5468 = vmatprep.mubr.bf16.mxu1 %v4566_v17  ;;  %v3950_v8 = vrot.slane %v3948_v24, 4  ;;  %v4558_v11 = vld [vmem:[#allocation3 + $0x3c8] sm:$0xff] }
 0x59c   : > { %v3325_v56 = vsel %vm2415_vm11, %v16040_v49, %v3324_v10  ;;  %v3334_v46 = vsel %vm2415_vm11, %v3324_v10, %v3333_v33  ;;  %v3860_v39 = vsel %vm2415_vm11, %v16042_v20, %v3859_v35  ;;  %v19222_v51 = vrot.slane %v16020_v4, 4  ;;  %v16114_v20 = vld [vmem:[#allocation2 + $0x28] sm:$0xff]  ;;  %5622 = vmatmul.mubr.bf16.gmra.mrb[92].mxu0 %v4558_v11 }
 0x59d   : > { %3365 = vst.msk [vmem:[#allocation3 + $0x400] sm:$0xff] %vm1140_vm1, %v3325_v56  ;;  %3366 = vst.msk [vmem:[#allocation3 + $0x448] sm:$0xff] %vm1140_vm1, %v3334_v46  ;;  %v3869_v0 = vsel %vm2415_vm11, %v3859_v35, %v3868_v6  ;;  %v19223_v49 = vrot.slane %v15938_v28, 4  ;;  %v3954_v18 = vshrl.u32 %v3921_v36, 16  ;;  %v3951_v55 = vor.u32 %v3950_v8, %v3947_v48 }
 0x59e   : > { %3900 = vst.msk [vmem:[#allocation3 + $0x418] sm:$0xff] %vm1140_vm1, %v3860_v39  ;;  %v4158_v14 = vsel %vm1945_vm4, %v19222_v51, %v4157_v22  ;;  %3901 = vst.msk [vmem:[#allocation3 + $0x460] sm:$0xff] %vm1140_vm1, %v3869_v0  ;;  %v3957_v35 = vshll.u32 %v3921_v36, 16  ;;  %v4237_v27 = vsel %vm3150_vm2, %v16020_v4, 0  ;;  %v4254_v63 = vshrl.u32 %v4236_v29, 16  ;;  %v4124_v0 = vld [vmem:[#allocation2 + $0x30] sm:$0xff] }
 0x59f   : > { %v3651_v12 = vsel %vm1945_vm4, %v19223_v49, %v3650_v42  ;;  %4204 = vst.msk [vmem:[#allocation3 + $0x80] sm:$0xff] %vm1140_vm1, %v4158_v14  ;;  %v3956_v15 = vrot.slane %v3954_v18, 3  ;;  %v4257_v44 = vshll.u32 %v4236_v29, 16  ;;  %v4262_v33 = vshrl.u32 %v4237_v27, 16  ;;  %v4575_v18 = vld [vmem:[#allocation3 + $0x450] sm:$0xff] }
 0x5a0   : > { %3683 = vst.msk [vmem:[#allocation3 + $0x458] sm:$0xff] %vm1140_vm1, %v3651_v12  ;;  %v4265_v57 = vshll.u32 %v4237_v27, 16  ;;  %v3952_v37 = vsel %vm2593_vm8, %v3943_v5, %v3951_v55  ;;  %v3959_v10 = vrot.slane %v3957_v35, 4  ;;  %v4256_v24 = vrot.slane %v4254_v63, 4  ;;  %v4567_v35 = vld [vmem:[#allocation3 + $0x410] sm:$0xff] }
 0x5a1   : > { %v4159_v48 = vrot.slane %v16114_v20, 4  ;;  %4104 = vst.msk [vmem:[#allocation3 + $0x30] sm:$0xff] %vm1140_vm1, %v3952_v37  ;;  %v4259_v17 = vrot.slane %v4257_v44, 5  ;;  %v4264_v6 = vrot.slane %v4262_v33, 4  ;;  %v4238_v4 = vsel %vm3151_vm15, %v16088_v40, 0 }
 0x5a2   : > { %v4267_v42 = vrot.slane %v4265_v57, 5  ;;  %v3960_v36 = vor.u32 %v3959_v10, %v3956_v15  ;;  %v4271_v56 = vshrl.u32 %v4238_v4, 16  ;;  %v4274_v46 = vshll.u32 %v4238_v4, 16 }
 0x5a3   : > { %v4160_v29 = vsel %vm1945_vm4, %v4157_v22, %v4159_v48  ;;  %v4260_v39 = vor.u32 %v4259_v17, %v4256_v24  ;;  %vm19224_vm6 = vcmp.ne.s16.totalorder %v14735_v23, 0  ;;  %v4239_v11 = vsel %vm3152_vm10, %v16114_v20, 0 }
 0x5a4   : > { %v4268_v5 = vor.u32 %v4267_v42, %v4264_v6  ;;  %4205 = vst.msk [vmem:[#allocation3 + $0xc8] sm:$0xff] %vm1140_vm1, %v4160_v29  ;;  %v3922_v8 = vsel %vm19224_vm6, %v16114_v20, 0  ;;  %v4565_v51 = vld [vmem:[#allocation3 + $0x400] sm:$0xff]  ;;  %v3961_v14 = vsel %vm2593_vm8, %v3951_v55, %v3960_v36  ;;  %v4273_v22 = vrot.slane %v4271_v56, 4 }
 0x5a5   : > { %v4568_v40 = vld [vmem:[#allocation3 + $0x418] sm:$0xff]  ;;  %v4276_v49 = vrot.slane %v4274_v46, 5  ;;  %v3963_v12 = vshrl.u32 %v3922_v8, 16  ;;  %5469 = vmatmul.mubr.bf16.gmra.mrb[88].mxu1 %v4565_v51  ;;  %4105 = vst.msk [vmem:[#allocation3 + $0x78] sm:$0xff] %vm1140_vm1, %v3961_v14  ;;  %v3966_v63 = vshll.u32 %v3922_v8, 16  ;;  %v4280_v15 = vshrl.u32 %v4239_v11, 16 }
 0x5a6   : > { %5629 = vmatprep.mubr.bf16.mxu0 %v4568_v40  ;;  %v4269_v27 = vsel %vm2415_vm11, %v4260_v39, %v4268_v5  ;;  %v4283_v44 = vshll.u32 %v4239_v11, 16  ;;  %5476 = vmatprep.mubr.bf16.mxu1 %v4575_v18  ;;  %v4577_v20 = vld [vmem:[#allocation3 + $0x460] sm:$0xff]  ;;  %v4161_v57 = vrot.slane %v4124_v0, 4  ;;  %v4240_v37 = vsel %vm3153_vm14, %v4124_v0, 0 }
 0x5a7   : > { %5630 = vmatmul.mubr.bf16.gmra.mrb[96].mxu0 %v4567_v35  ;;  %4421 = vst.msk [vmem:[#allocation3 + $0x40] sm:$0xff] %vm1140_vm1, %v4269_v27  ;;  %v4277_v55 = vor.u32 %v4276_v49, %v4273_v22  ;;  %v3965_v33 = vrot.slane %v3963_v12, 3  ;;  %v3968_v10 = vrot.slane %v3966_v63, 4  ;;  %v4282_v24 = vrot.slane %v4280_v15, 4  ;;  %v16142_v42 = vld [vmem:[#allocation2 + $0x38] sm:$0xff]  ;;  %v16154_v22 = vld [vmem:[#allocation2 + $0x40] sm:$0xff] }
 0x5a8   : > { %5637 = vmatprep.mubr.bf16.mxu0 %v4577_v20  ;;  %v4285_v17 = vrot.slane %v4283_v44, 5  ;;  %v4289_v6 = vshrl.u32 %v4240_v37, 16  ;;  %v4162_v29 = vsel %vm1945_vm4, %v4159_v48, %v4161_v57  ;;  %v4292_v56 = vshll.u32 %v4240_v37, 16  ;;  %v16156_v49 = vld [vmem:[#allocation2 + $0x48] sm:$0xff]  ;;  %v4574_v27 = vld [vmem:[#allocation3 + $0x448] sm:$0xff]  ;;  %v4576_v37 = vld [vmem:[#allocation3 + $0x458] sm:$0xff] }
 0x5a9   : > { %v4278_v4 = vsel %vm2415_vm11, %v4268_v5, %v4277_v55  ;;  %vm19225_vm6 = vcmp.ne.s16.totalorder %v14817_v38, 0  ;;  %v3969_v39 = vor.u32 %v3968_v10, %v3965_v33  ;;  %4206 = vst.msk [vmem:[#allocation3 + $0x110] sm:$0xff] %vm1140_vm1, %v4162_v29  ;;  %v4241_v5 = vsel %vm18906_vm12, %v16142_v42, 0  ;;  %v4444_v33 = vld [vmem:[#allocation3 + $0x38] sm:$0xff] }
 0x5aa   : > { %v3923_v46 = vsel %vm19225_vm6, %v4124_v0, 0  ;;  %4422 = vst.msk [vmem:[#allocation3 + $0x88] sm:$0xff] %vm1140_vm1, %v4278_v4  ;;  %v4286_v8 = vor.u32 %v4285_v17, %v4282_v24  ;;  %v4291_v11 = vrot.slane %v4289_v6, 4  ;;  %v4294_v40 = vrot.slane %v4292_v56, 5 }
 0x5ab   : > { %v3972_v51 = vshrl.u32 %v3923_v46, 16  ;;  %v3975_v14 = vshll.u32 %v3923_v46, 16  ;;  %v4163_v48 = vrot.slane %v16142_v42, 4  ;;  %v3970_v0 = vsel %vm2593_vm8, %v3960_v36, %v3969_v39 }
 0x5ac   : > { %v4287_v12 = vsel %vm2415_vm11, %v4277_v55, %v4286_v8  ;;  %v4298_v35 = vshrl.u32 %v4241_v5, 16  ;;  %4106 = vst.msk [vmem:[#allocation3 + $0xc0] sm:$0xff] %vm1140_vm1, %v3970_v0  ;;  %v4295_v63 = vor.u32 %v4294_v40, %v4291_v11  ;;  %v4301_v44 = vshll.u32 %v4241_v5, 16 }
 0x5ad   : > { %v3974_v18 = vrot.slane %v3972_v51, 3  ;;  %4423 = vst.msk [vmem:[#allocation3 + $0xd0] sm:$0xff] %vm1140_vm1, %v4287_v12  ;;  %v3977_v15 = vrot.slane %v3975_v14, 4  ;;  %v4164_v20 = vsel %vm1945_vm4, %v4161_v57, %v4163_v48  ;;  %5477 = vmatmul.mubr.bf16.gmra.mrb[92].mxu1 %v4574_v27  ;;  %v4242_v36 = vsel %vm18907_vm3, %v16154_v22, 0  ;;  %v16179_v27 = vld [vmem:[#allocation2 + $0x58] sm:$0xff] }
 0x5ae   : > { %v4300_v10 = vrot.slane %v4298_v35, 4  ;;  %4207 = vst.msk [vmem:[#allocation3 + $0x158] sm:$0xff] %vm1140_vm1, %v4164_v20  ;;  %vm19226_vm6 = vcmp.ne.s16.totalorder %v14877_v32, 0  ;;  %vm19227_vm12 = vcmp.ne.s16.totalorder %v15774_v45, 0  ;;  %5678 = vmatprep.mubr.bf16.mxu1 %v4444_v33  ;;  %v4445_v57 = vld [vmem:[#allocation3 + $0x40] sm:$0xff]  ;;  %v4296_v17 = vsel %vm2415_vm11, %v4286_v8, %v4295_v63 }
 0x5af   : > { %v3924_v55 = vsel %vm19226_vm6, %v16142_v42, 0  ;;  %v4243_v24 = vsel %vm19227_vm12, %v16156_v49, 0  ;;  %5638 = vmatmul.mubr.bf16.gmra.mrb[100].mxu0 %v4576_v37  ;;  %v3978_v6 = vor.u32 %v3977_v15, %v3974_v18  ;;  %v4303_v4 = vrot.slane %v4301_v44, 5  ;;  %4424 = vst.msk [vmem:[#allocation3 + $0x118] sm:$0xff] %vm1140_vm1, %v4296_v17  ;;  %v16175_v42 = vld [vmem:[#allocation2 + $0x50] sm:$0xff] }
 0x5b0   : > { %v4307_v29 = vshrl.u32 %v4242_v36, 16  ;;  %12114 = vmatprep.mubr.bf16.mxu0 %v4445_v57  ;;  %v4310_v56 = vshll.u32 %v4242_v36, 16  ;;  %v3981_v46 = vshrl.u32 %v3924_v55, 16  ;;  %v3984_v11 = vshll.u32 %v3924_v55, 16  ;;  %v4443_v55 = vld [vmem:[#allocation3 + $0x30] sm:$0xff] }
 0x5b1   : > { %v4316_v51 = vshrl.u32 %v4243_v24, 16  ;;  %v3979_v40 = vsel %vm2593_vm8, %v3969_v39, %v3978_v6  ;;  %v4304_v14 = vor.u32 %v4303_v4, %v4300_v10  ;;  %v4319_v0 = vshll.u32 %v4243_v24, 16  ;;  %v16194_v4 = vld [vmem:[#allocation2 + $0x60] sm:$0xff] }
 0x5b2   : > { %v4309_v5 = vrot.slane %v4307_v29, 4  ;;  %4107 = vst.msk [vmem:[#allocation3 + $0x108] sm:$0xff] %vm1140_vm1, %v3979_v40  ;;  %v4312_v8 = vrot.slane %v4310_v56, 5  ;;  %v3983_v12 = vrot.slane %v3981_v46, 3  ;;  %v3986_v18 = vrot.slane %v3984_v11, 4  ;;  %v4453_v29 = vld [vmem:[#allocation3 + $0x80] sm:$0xff] }
 0x5b3   : > { %v4318_v35 = vrot.slane %v4316_v51, 4  ;;  %v4305_v15 = vsel %vm2415_vm11, %v4295_v63, %v4304_v14  ;;  %v4321_v44 = vrot.slane %v4319_v0, 5  ;;  %v4165_v20 = vrot.slane %v16154_v22, 4  ;;  %v4454_v56 = vld [vmem:[#allocation3 + $0x88] sm:$0xff] }
 0x5b4   : > { %vm19228_vm12 = vcmp.ne.s16.totalorder %v15801_v19, 0  ;;  %4425 = vst.msk [vmem:[#allocation3 + $0x160] sm:$0xff] %vm1140_vm1, %v4305_v15  ;;  %v4313_v33 = vor.u32 %v4312_v8, %v4309_v5  ;;  %v3987_v37 = vor.u32 %v3986_v18, %v3983_v12  ;;  %vm19229_vm6 = vcmp.ne.s16.totalorder %v14945_v62, 0 }
 0x5b5   : > { %v4244_v39 = vsel %vm19228_vm12, %v16175_v42, 0  ;;  %v4322_v24 = vor.u32 %v4321_v44, %v4318_v35  ;;  %v4166_v57 = vsel %vm1945_vm4, %v4163_v48, %v4165_v20  ;;  %v3925_v63 = vsel %vm19229_vm6, %v16154_v22, 0  ;;  %5679 = vmatmul.mubr.bf16.vlgmr.msra.gmra.mrb[96].mxu1 %v4443_v55  ;;  %v4463_v22 = vld [vmem:[#allocation3 + $0xd0] sm:$0xff] }
 0x5b6   : > { %v4325_v10 = vshrl.u32 %v4244_v39, 16  ;;  %v4328_v36 = vshll.u32 %v4244_v39, 16  ;;  %vm19230_vm3 = vcmp.ne.s16.totalorder %v15838_v54, 0  ;;  %v4314_v46 = vsel %vm2415_vm11, %v4304_v14, %v4313_v33  ;;  %4208 = vst.msk [vmem:[#allocation3 + $0x1a0] sm:$0xff] %vm1140_vm1, %v4166_v57  ;;  %5686 = vmatprep.mubr.bf16.mxu1 %v4453_v29  ;;  %v16207_v35 = vld [vmem:[#allocation2 + $0x68] sm:$0xff] }
 0x5b7   : > { %v4245_v17 = vsel %vm19230_vm3, %v16179_v27, 0  ;;  %v3988_v11 = vsel %vm2593_vm8, %v3978_v6, %v3987_v37  ;;  %12115 = vmatmul.mubr.bf16.vlgmr.msra.gmra.mrb[104].mxu0 %v4454_v56  ;;  %4426 = vst.msk [vmem:[#allocation3 + $0x1a8] sm:$0xff] %vm1140_vm1, %v4314_v46  ;;  %v4323_v40 = vsel %vm2415_vm11, %v4313_v33, %v4322_v24  ;;  %v3990_v5 = vshrl.u32 %v3925_v63, 16 }
 0x5b8   : > { %v4327_v48 = vrot.slane %v4325_v10, 4  ;;  %v4330_v51 = vrot.slane %v4328_v36, 5  ;;  %4108 = vst.msk [vmem:[#allocation3 + $0x150] sm:$0xff] %vm1140_vm1, %v3988_v11  ;;  %v3993_v0 = vshll.u32 %v3925_v63, 16  ;;  %v4334_v8 = vshrl.u32 %v4245_v17, 16  ;;  %12118 = vmatprep.mubr.bf16.mxu0 %v4463_v22  ;;  %4427 = vst.msk [vmem:[#allocation3 + $0x1f0] sm:$0xff] %vm1140_vm1, %v4323_v40 }
 0x5b9   : > { %v4337_v14 = vshll.u32 %v4245_v17, 16  ;;  %v4167_v12 = vrot.slane %v16156_v49, 4  ;;  %vm19231_vm3 = vcmp.ne.s16.totalorder %v15873_v13, 0  ;;  %v3992_v15 = vrot.slane %v3990_v5, 3 }
 0x5ba   : > { %v4331_v6 = vor.u32 %v4330_v51, %v4327_v48  ;;  %v4246_v18 = vsel %vm19231_vm3, %v16194_v4, 0  ;;  %v3995_v44 = vrot.slane %v3993_v0, 4  ;;  %v4336_v39 = vrot.slane %v4334_v8, 4  ;;  %v4452_v51 = vld [vmem:[#allocation3 + $0x78] sm:$0xff]  ;;  %v4462_v8 = vld [vmem:[#allocation3 + $0xc8] sm:$0xff] }
 0x5bb   : > { %v4343_v33 = vshrl.u32 %v4246_v18, 16  ;;  %v4339_v36 = vrot.slane %v4337_v14, 5  ;;  %v4168_v55 = vsel %vm1945_vm4, %v4165_v20, %v4167_v12  ;;  %v4346_v57 = vshll.u32 %v4246_v18, 16  ;;  %v16219_v20 = vld [vmem:[#allocation2 + $0x70] sm:$0xff] }
 0x5bc   : > { %v4332_v10 = vsel %vm2415_vm11, %v4322_v24, %v4331_v6  ;;  %v3996_v63 = vor.u32 %v3995_v44, %v3992_v15  ;;  %4209 = vst.msk [vmem:[#allocation3 + $0x1e8] sm:$0xff] %vm1140_vm1, %v4168_v55  ;;  %vm19232_vm12 = vcmp.ne.s16.totalorder %v14997_v2, 0  ;;  %v4247_v56 = vsel %vm3160_vm9, %v16207_v35, 0 }
 0x5bd   : > { %4428 = vst.msk [vmem:[#allocation3 + $0x238] sm:$0xff] %vm1140_vm1, %v4332_v10  ;;  %v4345_v17 = vrot.slane %v4343_v33, 4  ;;  %v3926_v29 = vsel %vm19232_vm12, %v16156_v49, 0  ;;  %v4340_v46 = vor.u32 %v4339_v36, %v4336_v39  ;;  %v4348_v24 = vrot.slane %v4346_v57, 5  ;;  %5687 = vmatmul.mubr.bf16.gmra.mrb[100].mxu1 %v4452_v51  ;;  %v4472_v49 = vld [vmem:[#allocation3 + $0x118] sm:$0xff]  ;;  %v16225_v39 = vld [vmem:[#allocation2 + $0x78] sm:$0xff] }
 0x5be   : > { %v3999_v11 = vshrl.u32 %v3926_v29, 16  ;;  %v4002_v48 = vshll.u32 %v3926_v29, 16  ;;  %v3997_v22 = vsel %vm2593_vm8, %v3987_v37, %v3996_v63  ;;  %v4352_v40 = vshrl.u32 %v4247_v56, 16  ;;  %5694 = vmatprep.mubr.bf16.mxu1 %v4462_v8  ;;  %v4481_v33 = vld [vmem:[#allocation3 + $0x160] sm:$0xff] }
 0x5bf   : > { %v4355_v5 = vshll.u32 %v4247_v56, 16  ;;  %v4169_v0 = vrot.slane %v16175_v42, 4  ;;  %4109 = vst.msk [vmem:[#allocation3 + $0x198] sm:$0xff] %vm1140_vm1, %v3997_v22  ;;  %v4341_v14 = vsel %vm2415_vm11, %v4331_v6, %v4340_v46  ;;  %v4349_v18 = vor.u32 %v4348_v24, %v4345_v17  ;;  %12119 = vmatmul.mubr.bf16.gmra.mrb[108].mxu0 %v4472_v49  ;;  %v11046_v56 = vpop.f32.mrb[4].mxu0 }
 0x5c0   : > { %v4001_v15 = vrot.slane %v3999_v11, 3  ;;  %v4004_v44 = vrot.slane %v4002_v48, 4  ;;  %4429 = vst.msk [vmem:[#allocation3 + $0x280] sm:$0xff] %vm1140_vm1, %v4341_v14  ;;  %v4354_v37 = vrot.slane %v4352_v40, 4  ;;  %vm19233_vm6 = vcmp.ne.s16.totalorder %v15958_v21, 0  ;;  %12122 = vmatprep.mubr.bf16.mxu0 %v4481_v33 }
 0x5c1   : > { %v4357_v10 = vrot.slane %v4355_v5, 5  ;;  %v4170_v36 = vsel %vm1945_vm4, %v4167_v12, %v4169_v0  ;;  %v4248_v55 = vsel %vm19233_vm6, %v16219_v20, 0  ;;  %v4350_v6 = vsel %vm2415_vm11, %v4340_v46, %v4349_v18  ;;  %v11047_v46 = vpop.f32.mrb[5].mxu0 }
 0x5c2   : > { %v4005_v57 = vor.u32 %v4004_v44, %v4001_v15  ;;  %4210 = vst.msk [vmem:[#allocation3 + $0x230] sm:$0xff] %vm1140_vm1, %v4170_v36  ;;  %v4361_v17 = vshrl.u32 %v4248_v55, 16  ;;  %v4364_v29 = vshll.u32 %v4248_v55, 16  ;;  %4430 = vst.msk [vmem:[#allocation3 + $0x2c8] sm:$0xff] %vm1140_vm1, %v4350_v6  ;;  %vm19234_vm3 = vcmp.ne.s16.totalorder %v15009_v31, 0  ;;  %v11049_v49 = vpop.f32.mrb[6].mxu0 }
 0x5c3   : > { %v4358_v24 = vor.u32 %v4357_v10, %v4354_v37  ;;  %v3927_v12 = vsel %vm19234_vm3, %v16175_v42, 0  ;;  %vm19235_vm12 = vcmp.ne.s16.totalorder %v15980_v61, 0  ;;  %v4171_v48 = vrot.slane %v16179_v27, 4  ;;  %v11050_v44 = vpop.f32.mrb[7].mxu0  ;;  %v4461_v36 = vld [vmem:[#allocation3 + $0xc0] sm:$0xff] }
 0x5c4   : > { %v4249_v11 = vsel %vm19235_vm12, %v16225_v39, 0  ;;  %v4006_v51 = vsel %vm2593_vm8, %v3996_v63, %v4005_v57  ;;  %v4363_v22 = vrot.slane %v4361_v17, 4  ;;  %v4366_v40 = vrot.slane %v4364_v29, 5  ;;  %v4471_v29 = vld [vmem:[#allocation3 + $0x110] sm:$0xff] }
 0x5c5   : > { %v4008_v5 = vshrl.u32 %v3927_v12, 16  ;;  %v16243_v8 = vadd.f32 %v11047_v46, %v11046_v56  ;;  %4110 = vst.msk [vmem:[#allocation3 + $0x1e0] sm:$0xff] %vm1140_vm1, %v4006_v51  ;;  %v4359_v14 = vsel %vm2415_vm11, %v4349_v18, %v4358_v24  ;;  %v4011_v42 = vshll.u32 %v3927_v12, 16  ;;  %v16254_v18 = vld [vmem:[#allocation2 + $0x88] sm:$0xff]  ;;  %5695 = vmatmul.mubr.bf16.gmra.mrb[104].mxu1 %v4461_v36  ;;  %v4490_v56 = vld [vmem:[#allocation3 + $0x1a8] sm:$0xff] }
 0x5c6   : > { %v4370_v15 = vshrl.u32 %v4249_v11, 16  ;;  %4431 = vst.msk [vmem:[#allocation3 + $0x310] sm:$0xff] %vm1140_vm1, %v4359_v14  ;;  %v4367_v33 = vor.u32 %v4366_v40, %v4363_v22  ;;  %v4373_v10 = vshll.u32 %v4249_v11, 16  ;;  %v4172_v63 = vsel %vm1945_vm4, %v4169_v0, %v4171_v48  ;;  %5702 = vmatprep.mubr.bf16.mxu1 %v4471_v29  ;;  %v4499_v51 = vld [vmem:[#allocation3 + $0x1f0] sm:$0xff]  ;;  %v4235_v36 = vld [vmem:[#allocation2 + $0x90] sm:$0x1f] }
 0x5c7   : > { %v4010_v37 = vrot.slane %v4008_v5, 3  ;;  %v16251_v55 = vadd.f32 %v11050_v44, %v11049_v49  ;;  %v4013_v6 = vrot.slane %v4011_v42, 4  ;;  %4211 = vst.msk [vmem:[#allocation3 + $0x278] sm:$0xff] %vm1140_vm1, %v4172_v63  ;;  %v4250_v11 = vsel %vm3163_vm7, %v15938_v28, 0  ;;  %12123 = vmatmul.mubr.bf16.gmra.mrb[112].mxu0 %v4490_v56  ;;  %v11052_v42 = vpop.f32.mrb[8].mxu0  ;;  %v4488_v16 = vld [vmem:[#allocation3 + $0x198] sm:$0xff] }
 0x5c8   : > { %v4372_v17 = vrot.slane %v4370_v15, 4  ;;  %v4368_v12 = vsel %vm2415_vm11, %v4358_v24, %v4367_v33  ;;  %v4375_v46 = vrot.slane %v4373_v10, 5  ;;  %vm19236_vm6 = vcmp.ne.s16.totalorder %v19171_v43, 0  ;;  %12126 = vmatprep.mubr.bf16.mxu0 %v4499_v51  ;;  %v11053_v29 = vpop.f32.mrb[9].mxu0 }
 0x5c9   : > { %v3928_v0 = vsel %vm19236_vm6, %v16179_v27, 0  ;;  %4432 = vst.msk [vmem:[#allocation3 + $0x358] sm:$0xff] %vm1140_vm1, %v4368_v12  ;;  %v4014_v22 = vor.u32 %v4013_v6, %v4010_v37  ;;  %v4379_v40 = vshrl.u32 %v4250_v11, 16  ;;  %v4382_v5 = vshll.u32 %v4250_v11, 16 }
 0x5ca   : > { %v4376_v49 = vor.u32 %v4375_v46, %v4372_v17  ;;  %v4017_v24 = vshrl.u32 %v3928_v0, 16  ;;  %v4020_v14 = vshll.u32 %v3928_v0, 16  ;;  %v4251_v28 = vsel %vm3164_vm13, %v16254_v18, 0  ;;  %v11055_v46 = vpop.f32.mrb[10].mxu0 }
 0x5cb   : > { %v4015_v15 = vsel %vm2593_vm8, %v4005_v57, %v4014_v22  ;;  %v4381_v44 = vrot.slane %v4379_v40, 4  ;;  %v4384_v10 = vrot.slane %v4382_v5, 5  ;;  %v4388_v63 = vshrl.u32 %v4251_v28, 16  ;;  %v11056_v51 = vpop.f32.mrb[11].mxu0 }
 0x5cc   : > { %4111 = vst.msk [vmem:[#allocation3 + $0x228] sm:$0xff] %vm1140_vm1, %v4015_v15  ;;  %v4377_v37 = vsel %vm2415_vm11, %v4367_v33, %v4376_v49  ;;  %v4019_v6 = vrot.slane %v4017_v24, 3  ;;  %v4022_v17 = vrot.slane %v4020_v14, 4  ;;  %v4391_v56 = vshll.u32 %v4251_v28, 16  ;;  %v4470_v24 = vld [vmem:[#allocation3 + $0x108] sm:$0xff] }
 0x5cd   : > { %v16270_v12 = vadd.f32 %v11053_v29, %v11052_v42  ;;  %4433 = vst.msk [vmem:[#allocation3 + $0x3a0] sm:$0xff] %vm1140_vm1, %v4377_v37  ;;  %v4385_v11 = vor.u32 %v4384_v10, %v4381_v44  ;;  %v4390_v0 = vrot.slane %v4388_v63, 4  ;;  %v4173_v57 = vrot.slane %v16194_v4, 4  ;;  %5703 = vmatmul.mubr.bf16.gmra.mrb[108].mxu1 %v4470_v24  ;;  %v4480_v10 = vld [vmem:[#allocation3 + $0x158] sm:$0xff] }
 0x5ce   : > { %v4023_v40 = vor.u32 %v4022_v17, %v4019_v6  ;;  %v4393_v5 = vrot.slane %v4391_v56, 5  ;;  %v4252_v15 = vsel %vm3165_vm0, %v4235_v36, 0  ;;  %vm19237_vm3 = vcmp.ne.s16.totalorder %v19172_v47, 0  ;;  %v4508_v63 = vld [vmem:[#allocation3 + $0x238] sm:$0xff]  ;;  %5710 = vmatprep.mubr.bf16.mxu1 %v4480_v10  ;;  %v11100_v6 = vpop.f32.mrb[4].mxu1  ;;  %v11058_v10 = vpop.f32.mrb[12].mxu0 }
 0x5cf   : > { %v3929_v33 = vsel %vm19237_vm3, %v16194_v4, 0  ;;  %v16279_v14 = vadd.f32 %v11056_v51, %v11055_v46  ;;  %v4386_v28 = vsel %vm2415_vm11, %v4376_v49, %v4385_v11  ;;  %v4174_v42 = vsel %vm1945_vm4, %v4171_v48, %v4173_v57  ;;  %12127 = vmatmul.mubr.bf16.gmra.mrb[116].mxu0 %v4508_v63  ;;  %v4517_v49 = vld [vmem:[#allocation3 + $0x280] sm:$0xff] }
 0x5d0   : > { %v4397_v44 = vshrl.u32 %v4252_v15, 16  ;;  %4434 = vst.msk [vmem:[#allocation3 + $0x3e8] sm:$0xff] %vm1140_vm1, %v4386_v28  ;;  %v4024_v36 = vsel %vm2593_vm8, %v4014_v22, %v4023_v40  ;;  %v4394_v29 = vor.u32 %v4393_v5, %v4390_v0  ;;  %4212 = vst.msk [vmem:[#allocation3 + $0x2c0] sm:$0xff] %vm1140_vm1, %v4174_v42  ;;  %v4400_v4 = vshll.u32 %v4252_v15, 16  ;;  %v11101_v22 = vpop.f32.mrb[5].mxu1  ;;  %12130 = vmatprep.mubr.bf16.mxu0 %v4517_v49 }
 0x5d1   : > { %v4026_v37 = vshrl.u32 %v3929_v33, 16  ;;  %4112 = vst.msk [vmem:[#allocation3 + $0x270] sm:$0xff] %vm1140_vm1, %v4024_v36  ;;  %v4029_v48 = vshll.u32 %v3929_v33, 16  ;;  %v4175_v17 = vrot.slane %v16207_v35, 4  ;;  %vm19238_vm12 = vcmp.ne.s16.totalorder %v19174_v3, 0  ;;  %v11103_v24 = vpop.f32.mrb[6].mxu1 }
 0x5d2   : > { %v4399_v27 = vrot.slane %v4397_v44, 4  ;;  %v3930_v56 = vsel %vm19238_vm12, %v16207_v35, 0  ;;  %v4395_v46 = vsel %vm2415_vm11, %v4385_v11, %v4394_v29  ;;  %v4402_v0 = vrot.slane %v4400_v4, 5  ;;  %v11104_v44 = vpop.f32.mrb[7].mxu1 }
 0x5d3   : > { %v4028_v51 = vrot.slane %v4026_v37, 3  ;;  %v4035_v5 = vshrl.u32 %v3930_v56, 16  ;;  %v16294_v15 = vadd.f32 %v11101_v22, %v11100_v6  ;;  %4435 = vst.msk [vmem:[#allocation3 + $0x430] sm:$0xff] %vm1140_vm1, %v4395_v46  ;;  %v4031_v28 = vrot.slane %v4029_v48, 4  ;;  %v11059_v37 = vpop.f32.mrb[13].mxu0 }
 0x5d4   : > { %v4176_v33 = vsel %vm1945_vm4, %v4173_v57, %v4175_v17  ;;  %v4038_v42 = vshll.u32 %v3930_v56, 16  ;;  %v4403_v63 = vor.u32 %v4402_v0, %v4399_v27  ;;  %v4177_v11 = vrot.slane %v16219_v20, 4  ;;  %v4134_v57 = vld [vmem:[#allocation2 + $0x80] sm:$0xff]  ;;  %v11061_v22 = vpop.f32.mrb[14].mxu0 }
 0x5d5   : > { %4213 = vst.msk [vmem:[#allocation3 + $0x308] sm:$0xff] %vm1140_vm1, %v4176_v33  ;;  %v4037_v35 = vrot.slane %v4035_v5, 3  ;;  %vm19239_vm6 = vcmp.ne.s16.totalorder %v14786_v41, 0  ;;  %v16303_v4 = vadd.f32 %v11104_v44, %v11103_v24  ;;  %v4032_v6 = vor.u32 %v4031_v28, %v4028_v51  ;;  %v4479_v5 = vld [vmem:[#allocation3 + $0x150] sm:$0xff]  ;;  %v11062_v33 = vpop.f32.mrb[15].mxu0 }
 0x5d6   : > { %v3931_v36 = vsel %vm19239_vm6, %v16219_v20, 0  ;;  %v4040_v49 = vrot.slane %v4038_v42, 4  ;;  %v16305_v56 = vadd.f32 %v11059_v37, %v11058_v10  ;;  %v4404_v27 = vsel %vm2415_vm11, %v4394_v29, %v4403_v63  ;;  %5711 = vmatmul.mubr.bf16.gmra.mrb[112].mxu1 %v4479_v5  ;;  %v4489_v42 = vld [vmem:[#allocation3 + $0x1a0] sm:$0xff]  ;;  %v4526_v29 = vld [vmem:[#allocation3 + $0x2c8] sm:$0xff] }
 0x5d7   : > { %v4044_v48 = vshrl.u32 %v3931_v36, 16  ;;  %v4178_v46 = vsel %vm1945_vm4, %v4175_v17, %v4177_v11  ;;  %v4047_v0 = vshll.u32 %v3931_v36, 16  ;;  %4436 = vst.msk [vmem:[#allocation3 + $0x478] sm:$0xff] %vm1140_vm1, %v4404_v27  ;;  %v4033_v20 = vsel %vm2593_vm8, %v4023_v40, %v4032_v6  ;;  %v19240_v10 = vld [vmem:[#allocation52_spill] sm:$0xff]  ;;  %5718 = vmatprep.mubr.bf16.mxu1 %v4489_v42  ;;  %v11106_v40 = vpop.f32.mrb[8].mxu1  ;;  %12131 = vmatmul.mubr.bf16.gmra.mrb[120].mxu0 %v4526_v29 }
 0x5d8   : > { %v4041_v24 = vor.u32 %v4040_v49, %v4037_v35  ;;  %4214 = vst.msk [vmem:[#allocation3 + $0x350] sm:$0xff] %vm1140_vm1, %v4178_v46  ;;  %v4179_v28 = vrot.slane %v16225_v39, 4  ;;  %v16313_v44 = vadd.f32 %v11062_v33, %v11061_v22  ;;  %4113 = vst.msk [vmem:[#allocation3 + $0x2b8] sm:$0xff] %vm1140_vm1, %v4033_v20  ;;  %vm19241_vm3 = vcmp.ne.s16.totalorder %v19240_v10, 0  ;;  %v4535_v35 = vld [vmem:[#allocation3 + $0x310] sm:$0xff]  ;;  %v11107_v27 = vpop.f32.mrb[9].mxu1 }
 0x5d9   : > { %v4046_v51 = vrot.slane %v4044_v48, 3  ;;  %v4049_v17 = vrot.slane %v4047_v0, 4  ;;  %v3932_v63 = vsel %vm19241_vm3, %v16225_v39, 0  ;;  %v4181_v36 = vrot.slane %v4134_v57, 4  ;;  %12134 = vmatprep.mubr.bf16.mxu0 %v4535_v35  ;;  %v4136_v0 = vld [vmem:[#allocation2 + $0x90] sm:$0xf] }
 0x5da   : > { %v4042_v37 = vsel %vm2593_vm8, %v4032_v6, %v4041_v24  ;;  %v4180_v49 = vsel %vm1945_vm4, %v4177_v11, %v4179_v28  ;;  %v4053_v48 = vshrl.u32 %v3932_v63, 16  ;;  %v4056_v22 = vshll.u32 %v3932_v63, 16  ;;  %v11109_v33 = vpop.f32.mrb[10].mxu1  ;;  %v19242_v11 = vld [vmem:[#allocation54_spill] sm:$0xff]  ;;  %v3918_v29 = vld [vmem:[#allocation2 + $0x90] sm:$0xf] }
 0x5db   : > { %4114 = vst.msk [vmem:[#allocation3 + $0x300] sm:$0xff] %vm1140_vm1, %v4042_v37  ;;  %v4050_v46 = vor.u32 %v4049_v17, %v4046_v51  ;;  %4215 = vst.msk [vmem:[#allocation3 + $0x398] sm:$0xff] %vm1140_vm1, %v4180_v49  ;;  %v4182_v39 = vsel %vm1945_vm4, %v4179_v28, %v4181_v36  ;;  %v16324_v5 = vadd.f32 %v11107_v27, %v11106_v40  ;;  %vm19243_vm12 = vcmp.ne.s16.totalorder %v19242_v11, 0  ;;  %v11110_v63 = vpop.f32.mrb[11].mxu1  ;;  %v11064_v35 = vpop.f32.mrb[16].mxu0 }
 0x5dc   : > { %v4055_v20 = vrot.slane %v4053_v48, 3  ;;  %v4058_v42 = vrot.slane %v4056_v22, 4  ;;  %4216 = vst.msk [vmem:[#allocation3 + $0x3e0] sm:$0xff] %vm1140_vm1, %v4182_v39  ;;  %v3933_v6 = vsel %vm19243_vm12, %v4134_v57, 0  ;;  %v4183_v28 = vrot.slane %v16254_v18, 4  ;;  %v11065_v40 = vpop.f32.mrb[17].mxu0 }
 0x5dd   : > { %v4051_v51 = vsel %vm2593_vm8, %v4041_v24, %v4050_v46  ;;  %v4062_v17 = vshrl.u32 %v3933_v6, 16  ;;  %v4065_v37 = vshll.u32 %v3933_v6, 16  ;;  %v16331_v49 = vadd.f32 %v11110_v63, %v11109_v33  ;;  %v11067_v27 = vpop.f32.mrb[18].mxu0  ;;  %v19244_v33 = vld [vmem:[#allocation21_spill] sm:$0xff] }
 0x5de   : > { %4115 = vst.msk [vmem:[#allocation3 + $0x348] sm:$0xff] %vm1140_vm1, %v4051_v51  ;;  %v4059_v48 = vor.u32 %v4058_v42, %v4055_v20  ;;  %v16334_v22 = vadd.f32 %v11065_v40, %v11064_v35  ;;  %v4184_v30 = vsel %vm1945_vm4, %v4181_v36, %v4183_v28  ;;  %v11068_v58 = vpop.f32.mrb[19].mxu0  ;;  %vm19245_vm6 = vcmp.ne.s16.totalorder %v19244_v33, 0  ;;  %5719 = vmatmul.mubr.bf16.gmra.mrb[116].mxu1 %v4488_v16  ;;  %v4498_v42 = vld [vmem:[#allocation3 + $0x1e8] sm:$0xff]  ;;  %v4544_v51 = vld [vmem:[#allocation3 + $0x358] sm:$0xff] }
 0x5df   : > { %v4064_v39 = vrot.slane %v4062_v17, 3  ;;  %v4067_v57 = vrot.slane %v4065_v37, 4  ;;  %4217 = vst.msk [vmem:[#allocation3 + $0x428] sm:$0xff] %vm1140_vm1, %v4184_v30  ;;  %v3934_v6 = vsel %vm19245_vm6, %v16254_v18, 0  ;;  %v4185_v63 = vrot.slane %v4136_v0, 4  ;;  %5726 = vmatprep.mubr.bf16.mxu1 %v4498_v42  ;;  %12135 = vmatmul.mubr.bf16.gmra.mrb[124].mxu0 %v4544_v51  ;;  %v4553_v30 = vld [vmem:[#allocation3 + $0x3a0] sm:$0xff] }
 0x5e0   : > { %v4060_v24 = vsel %vm2593_vm8, %v4050_v46, %v4059_v48  ;;  %vm19246_vm3 = vcmp.ne.s16.totalorder %v14970_v34, 0  ;;  %v16344_v35 = vadd.f32 %v11068_v58, %v11067_v27  ;;  %v4071_v17 = vshrl.u32 %v3934_v6, 16  ;;  %v11112_v46 = vpop.f32.mrb[12].mxu1  ;;  %12138 = vmatprep.mubr.bf16.mxu0 %v4553_v30  ;;  %v11070_v42 = vpop.f32.mrb[20].mxu0  ;;  %v4524_v10 = vld [vmem:[#allocation3 + $0x2b8] sm:$0xff] }
 0x5e1   : > { %v3935_v20 = vsel %vm19246_vm3, %v3918_v29, 0  ;;  %4116 = vst.msk [vmem:[#allocation3 + $0x390] sm:$0xff] %vm1140_vm1, %v4060_v24  ;;  %v4068_v36 = vor.u32 %v4067_v57, %v4064_v39  ;;  %v4074_v37 = vshll.u32 %v3934_v6, 16  ;;  %v4186_v18 = vsel %vm1945_vm4, %v4183_v28, %v4185_v63  ;;  %v11113_v34 = vpop.f32.mrb[13].mxu1  ;;  %v11071_v63 = vpop.f32.mrb[21].mxu0 }
 0x5e2   : > { %v4080_v0 = vshrl.u32 %v3935_v20, 16  ;;  %v4083_v40 = vshll.u32 %v3935_v20, 16  ;;  %v4073_v58 = vrot.slane %v4071_v17, 3  ;;  %4218 = vst.msk [vmem:[#allocation3 + $0x470] sm:$0xff] %vm1140_vm1, %v4186_v18  ;;  %v16350_v29 = vadd.f32 %v11113_v34, %v11112_v46  ;;  %v11115_v27 = vpop.f32.mrb[14].mxu1  ;;  %v4497_v17 = vld [vmem:[#allocation3 + $0x1e0] sm:$0xff] }
 0x5e3   : > { %v4069_v16 = vsel %vm2593_vm8, %v4059_v48, %v4068_v36  ;;  %v4076_v39 = vrot.slane %v4074_v37, 4  ;;  %v11116_v6 = vpop.f32.mrb[15].mxu1  ;;  %v16355_v30 = vadd.f32 %v11071_v63, %v11070_v42  ;;  %v11073_v48 = vpop.f32.mrb[22].mxu0  ;;  %v4507_v37 = vld [vmem:[#allocation3 + $0x230] sm:$0xff]  ;;  %v4533_v3 = vld [vmem:[#allocation3 + $0x300] sm:$0xff]  ;;  %v4552_v45 = vld [vmem:[#allocation3 + $0x398] sm:$0xff] }
 0x5e4   : > { %4117 = vst.msk [vmem:[#allocation3 + $0x3d8] sm:$0xff] %vm1140_vm1, %v4069_v16  ;;  %v4082_v57 = vrot.slane %v4080_v0, 3  ;;  %v4085_v24 = vrot.slane %v4083_v40, 4  ;;  %v16353_v28 = vadd.f32 %v11116_v6, %v11115_v27  ;;  %v11074_v18 = vpop.f32.mrb[23].mxu0  ;;  %v4562_v40 = vld [vmem:[#allocation3 + $0x3e8] sm:$0xff]  ;;  %v11118_v16 = vpop.f32.mrb[16].mxu1 }
 0x5e5   : > { %v4077_v20 = vor.u32 %v4076_v39, %v4073_v58  ;;  %v16359_v0 = vadd.f32 %v11074_v18, %v11073_v48  ;;  %v4571_v58 = vld [vmem:[#allocation3 + $0x430] sm:$0xff]  ;;  %v11119_v27 = vpop.f32.mrb[17].mxu1  ;;  %vm19249_vm12 = vmmov 0   ;;  %vm19261_vm6 = vcmask 261120  }
 0x5e6   : > { %v4086_v51 = vor.u32 %v4085_v24, %v4082_v57  ;;  %5727 = vmatmul.mubr.bf16.gmra.mrb[120].mxu1 %v4497_v17  ;;  %v16363_v39 = vadd.f32 %v11119_v27, %v11118_v16  ;;  %v11076_v24 = vpop.f32.mrb[24].mxu0  ;;  %v4516_v17 = vld [vmem:[#allocation3 + $0x278] sm:$0xff]  ;;  %vm19274_vm3 = vmmov %vm19261_vm6 }
 0x5e7   : > { %v4078_v34 = vsel %vm2593_vm8, %v4068_v36, %v4077_v20  ;;  %5734 = vmatprep.mubr.bf16.mxu1 %v4507_v37  ;;  %12139 = vmatmul.mubr.bf16.gmra.mrb[128].mxu0 %v4562_v40  ;;  %v11121_v36 = vpop.f32.mrb[18].mxu1  ;;  %v11077_v42 = vpop.f32.mrb[25].mxu0 }
 0x5e8   : > { %v4087_v46 = vsel %vm2593_vm8, %v4077_v20, %v4086_v51  ;;  %4118 = vst.msk [vmem:[#allocation3 + $0x420] sm:$0xff] %vm1140_vm1, %v4078_v34  ;;  %12142 = vmatprep.mubr.bf16.mxu0 %v4571_v58  ;;  %v11122_v57 = vpop.f32.mrb[19].mxu1  ;;  %v16367_v63 = vadd.f32 %v11077_v42, %v11076_v24  ;;  %v11079_v20 = vpop.f32.mrb[26].mxu0  ;;  %v4506_v51 = vld [vmem:[#allocation3 + $0x228] sm:$0xff]  ;;  %v4580_v34 = vld [vmem:[#allocation3 + $0x478] sm:$0xff] }
 0x5e9   : > { %4119 = vst.msk [vmem:[#allocation3 + $0x468] sm:$0xff] %vm1140_vm1, %v4087_v46  ;;  %v16365_v6 = vadd.f32 %v11122_v57, %v11121_v36  ;;  %v11080_v48 = vpop.f32.mrb[27].mxu0  ;;  %v11124_v46 = vpop.f32.mrb[20].mxu1 }
 0x5ea   : > { %v16369_v18 = vadd.f32 %v11080_v48, %v11079_v20  ;;  %v11125_v37 = vpop.f32.mrb[21].mxu1  ;;  %v4525_v20 = vld [vmem:[#allocation3 + $0x2c0] sm:$0xff] }
 0x5eb   : > { %v16371_v40 = vadd.f32 %v11125_v37, %v11124_v46  ;;  %v11127_v16 = vpop.f32.mrb[22].mxu1 }
 0x5ec   : > { %v11128_v58 = vpop.f32.mrb[23].mxu1 }
 0x5ed   : > { %v11082_v27 = vpop.f32.mrb[28].mxu0  ;;  %v16373_v36 = vadd.f32 %v11128_v58, %v11127_v16 }
 0x5ee   : > { %5735 = vmatmul.mubr.bf16.gmra.mrb[124].mxu1 %v4506_v51  ;;  %v11083_v57 = vpop.f32.mrb[29].mxu0  ;;  %v4515_v51 = vld [vmem:[#allocation3 + $0x270] sm:$0xff] }
 0x5ef   : > { %5742 = vmatprep.mubr.bf16.mxu1 %v4516_v17  ;;  %12143 = vmatmul.mubr.bf16.gmra.mrb[132].mxu0 %v4580_v34  ;;  %v16375_v24 = vadd.f32 %v11083_v57, %v11082_v27  ;;  %v11085_v42 = vpop.f32.mrb[30].mxu0 }
 0x5f0   : > { %v11086_v33 = vpop.f32.mrb[31].mxu0 }
 0x5f1   : > { %v16377_v48 = vadd.f32 %v11086_v33, %v11085_v42  ;;  %v11130_v17 = vpop.f32.mrb[24].mxu1 }
 0x5f2   : > { %v11131_v34 = vpop.f32.mrb[25].mxu1 }
 0x5f3   : > { %v16379_v46 = vadd.f32 %v11131_v34, %v11130_v17  ;;  %v11133_v37 = vpop.f32.mrb[26].mxu1 }
 0x5f4   : > { %v11134_v11 = vpop.f32.mrb[27].mxu1 }
 0x5f5   : > { %v11088_v61 = vpop.f32.mrb[32].mxu0  ;;  %v16381_v16 = vadd.f32 %v11134_v11, %v11133_v37 }
 0x5f6   : > { %5743 = vmatmul.mubr.bf16.gmra.mrb[128].mxu1 %v4515_v51  ;;  %v11089_v58 = vpop.f32.mrb[33].mxu0  ;;  %v4534_v51 = vld [vmem:[#allocation3 + $0x308] sm:$0xff] }
 0x5f7   : > { %5750 = vmatprep.mubr.bf16.mxu1 %v4525_v20  ;;  %v16383_v27 = vadd.f32 %v11089_v58, %v11088_v61  ;;  %v11091_v57 = vpop.f32.mrb[34].mxu0 }
 0x5f8   : > { %v11092_v21 = vpop.f32.mrb[35].mxu0 }
 0x5f9   : > { %v16385_v33 = vadd.f32 %v11092_v21, %v11091_v57  ;;  %v11136_v42 = vpop.f32.mrb[28].mxu1  ;;  %v16396_v21 = vld [vmem:[%s18768_s7] ss:$0 sm:$0xff] }
 0x5fa   : > { %v11137_v20 = vpop.f32.mrb[29].mxu1  ;;  %v5201_v47 = vadd.f32 %v16251_v55, %v16396_v21 }
 0x5fb   : > { %v16387_v17 = vadd.f32 %v11137_v20, %v11136_v42  ;;  %v11139_v34 = vpop.f32.mrb[30].mxu1 }
 0x5fc   : > { %v11140_v41 = vpop.f32.mrb[31].mxu1 }
 0x5fd   : > { %v11094_v25 = vpop.f32.mrb[36].mxu0  ;;  %v16389_v11 = vadd.f32 %v11140_v41, %v11139_v34  ;;  %v5198_v41 = vadd.f32 %v16243_v8, %v16396_v21 }
 0x5fe   : > { %5751 = vmatmul.mubr.bf16.gmra.mrb[132].mxu1 %v4524_v10  ;;  %v11095_v37 = vpop.f32.mrb[37].mxu0  ;;  %v4543_v10 = vld [vmem:[#allocation3 + $0x350] sm:$0xff] }
 0x5ff   : > { %5758 = vmatprep.mubr.bf16.mxu1 %v4534_v51  ;;  %v16391_v61 = vadd.f32 %v11095_v37, %v11094_v25  ;;  %v11097_v58 = vpop.f32.mrb[38].mxu0 }
 0x600   : > { %v11098_v13 = vpop.f32.mrb[39].mxu0 }
 0x601   : > { %v16398_v57 = vadd.f32 %v11098_v13, %v11097_v58  ;;  %v11158_v51 = vpop.f32.mrb[32].mxu1  ;;  %v4542_v13 = vld [vmem:[#allocation3 + $0x348] sm:$0xff] }
 0x602   : > { %v11159_v42 = vpop.f32.mrb[33].mxu1 }
 0x603   : > { %v11160_v25 = vadd.f32 %v11159_v42, %v11158_v51  ;;  %v11161_v20 = vpop.f32.mrb[34].mxu1 }
 0x604   : > { %v11162_v34 = vpop.f32.mrb[35].mxu1 }
 0x605   : > { %v11270_v37 = vpop.f32.mrb[40].mxu0  ;;  %v11163_v54 = vadd.f32 %v11162_v34, %v11161_v20  ;;  %v5359_v43 = vadd.f32 %v11160_v25, %v5198_v41  ;;  %v5206_v41 = vadd.f32 %v16270_v12, %v16396_v21 }
 0x606   : > { %5759 = vmatmul.mubr.bf16.gmra.mrb[136].mxu1 %v4533_v3  ;;  %v11271_v19 = vpop.f32.mrb[41].mxu0 }
 0x607   : > { %5766 = vmatprep.mubr.bf16.mxu1 %v4543_v10  ;;  %v11272_v3 = vadd.f32 %v11271_v19, %v11270_v37  ;;  %v11273_v31 = vpop.f32.mrb[42].mxu0  ;;  %v5362_v58 = vadd.f32 %v11163_v54, %v5201_v47 }
 0x608   : > { %v11274_v10 = vpop.f32.mrb[43].mxu0 }
 0x609   : > { %v16404_v2 = vadd.f32 %v11272_v3, %v5359_v43  ;;  %v11275_v8 = vadd.f32 %v11274_v10, %v11273_v31  ;;  %v11164_v51 = vpop.f32.mrb[36].mxu1  ;;  %v5209_v43 = vadd.f32 %v16279_v14, %v16396_v21 }
 0x60a   : > { %v11165_v42 = vpop.f32.mrb[37].mxu1 }
 0x60b   : > { %v16406_v7 = vadd.f32 %v11275_v8, %v5362_v58  ;;  %v11166_v62 = vadd.f32 %v11165_v42, %v11164_v51  ;;  %v11167_v55 = vpop.f32.mrb[38].mxu1 }
 0x60c   : > { %v11168_v19 = vpop.f32.mrb[39].mxu1 }
 0x60d   : > { %v11276_v25 = vpop.f32.mrb[44].mxu0  ;;  %v11169_v20 = vadd.f32 %v11168_v19, %v11167_v55  ;;  %v5367_v47 = vadd.f32 %v11166_v62, %v5206_v41  ;;  %v5214_v62 = vadd.f32 %v16305_v56, %v16396_v21 }
 0x60e   : > { %5767 = vmatmul.mubr.bf16.gmra.mrb[140].mxu1 %v4542_v13  ;;  %v11277_v54 = vpop.f32.mrb[45].mxu0  ;;  %v4561_v13 = vld [vmem:[#allocation3 + $0x3e0] sm:$0xff] }
 0x60f   : > { %5774 = vmatprep.mubr.bf16.mxu1 %v4552_v45  ;;  %v11278_v34 = vadd.f32 %v11277_v54, %v11276_v25  ;;  %v11279_v31 = vpop.f32.mrb[46].mxu0  ;;  %v4551_v45 = vld [vmem:[#allocation3 + $0x390] sm:$0xff]  ;;  %v5370_v37 = vadd.f32 %v11169_v20, %v5209_v43  ;;  %v5217_v25 = vadd.f32 %v16313_v44, %v16396_v21  ;;  %v6009_v54 = vld [vmem:[%s18771_s10] sm:$0xff] }
 0x610   : > { %v11280_v3 = vpop.f32.mrb[47].mxu0  ;;  %v6010_v43 = vld [vmem:[%s18771_s10 + $0x8] sm:$0xff] }
 0x611   : > { %v16412_v58 = vadd.f32 %v11278_v34, %v5367_v47  ;;  %v11281_v10 = vadd.f32 %v11280_v3, %v11279_v31  ;;  %v11170_v12 = vpop.f32.mrb[40].mxu1  ;;  %v16426_v31 = vpack.c.bf16 %v6010_v43, %v6009_v54 }
 0x612   : > { %v11171_v8 = vpop.f32.mrb[41].mxu1 }
 0x613   : > { %v16414_v51 = vadd.f32 %v11281_v10, %v5370_v37  ;;  %v11172_v42 = vadd.f32 %v11171_v8, %v11170_v12  ;;  %v11173_v14 = vpop.f32.mrb[42].mxu1  ;;  %v4560_v37 = vld [vmem:[#allocation3 + $0x3d8] sm:$0xff]  ;;  %12364 = vmatpush3.bf16.msra.mxu1 %v16426_v31 }
 0x614   : > { %v11174_v55 = vpop.f32.mrb[43].mxu1 }
 0x615   : > { %v11282_v41 = vpop.f32.mrb[48].mxu0  ;;  %v5375_v19 = vadd.f32 %v11172_v42, %v5214_v62  ;;  %v11175_v20 = vadd.f32 %v11174_v55, %v11173_v14  ;;  %v19247_v42 = vmov 0.0|0.0   ;;  %v5222_v14 = vadd.f32 %v16334_v22, %v16396_v21 }
 0x616   : > { %5775 = vmatmul.mubr.bf16.gmra.mrb[144].mxu1 %v4551_v45  ;;  %v11283_v47 = vpop.f32.mrb[49].mxu0  ;;  %12365 = vmatprep.subr.bf16.mxu1 %v19247_v42 }
 0x617   : > { %5782 = vmatprep.mubr.bf16.mxu1 %v4561_v13  ;;  %v11284_v34 = vadd.f32 %v11283_v47, %v11282_v41  ;;  %v11285_v56 = vpop.f32.mrb[50].mxu0  ;;  %v5378_v45 = vadd.f32 %v11175_v20, %v5217_v25  ;;  %v4570_v13 = vld [vmem:[#allocation3 + $0x428] sm:$0xff] }
 0x618   : > { %v11286_v3 = vpop.f32.mrb[51].mxu0 }
 0x619   : > { %v16428_v44 = vadd.f32 %v11284_v34, %v5375_v19  ;;  %v11287_v10 = vadd.f32 %v11286_v3, %v11285_v56  ;;  %v11176_v12 = vpop.f32.mrb[44].mxu1  ;;  %v5225_v19 = vadd.f32 %v16344_v35, %v16396_v21  ;;  %v5230_v35 = vadd.f32 %v16355_v30, %v16396_v21 }
 0x61a   : > { %v11177_v8 = vpop.f32.mrb[45].mxu1 }
 0x61b   : > { %v16431_v62 = vadd.f32 %v11287_v10, %v5378_v45  ;;  %v11178_v55 = vadd.f32 %v11177_v8, %v11176_v12  ;;  %v11179_v41 = vpop.f32.mrb[46].mxu1  ;;  %v4569_v45 = vld [vmem:[#allocation3 + $0x420] sm:$0xff] }
 0x61c   : > { %v11180_v25 = vpop.f32.mrb[47].mxu1 }
 0x61d   : > { %v11288_v20 = vpop.f32.mrb[52].mxu0  ;;  %v5383_v47 = vadd.f32 %v11178_v55, %v5222_v14  ;;  %v11181_v54 = vadd.f32 %v11180_v25, %v11179_v41 }
 0x61e   : > { %5783 = vmatmul.mubr.bf16.gmra.mrb[148].mxu1 %v4560_v37  ;;  %v11289_v43 = vpop.f32.mrb[53].mxu0 }
 0x61f   : > { %5790 = vmatprep.mubr.bf16.mxu1 %v4570_v13  ;;  %v11290_v34 = vadd.f32 %v11289_v43, %v11288_v20  ;;  %v11291_v56 = vpop.f32.mrb[54].mxu0  ;;  %v5386_v37 = vadd.f32 %v11181_v54, %v5225_v19  ;;  %v4579_v13 = vld [vmem:[#allocation3 + $0x470] sm:$0xff]  ;;  %v5233_v19 = vadd.f32 %v16359_v0, %v16396_v21  ;;  %v5238_v0 = vadd.f32 %v16367_v63, %v16396_v21 }
 0x620   : > { %v11292_v3 = vpop.f32.mrb[55].mxu0 }
 0x621   : > { %v16438_v10 = vadd.f32 %v11290_v34, %v5383_v47  ;;  %v11293_v22 = vadd.f32 %v11292_v3, %v11291_v56  ;;  %v11182_v12 = vpop.f32.mrb[48].mxu1 }
 0x622   : > { %v11183_v8 = vpop.f32.mrb[49].mxu1 }
 0x623   : > { %v16440_v26 = vadd.f32 %v11293_v22, %v5386_v37  ;;  %v11184_v14 = vadd.f32 %v11183_v8, %v11182_v12  ;;  %v11185_v55 = vpop.f32.mrb[50].mxu1  ;;  %v19248_v22 = vmov 0.0  }
 0x624   : > { %v11186_v41 = vpop.f32.mrb[51].mxu1 }
 0x625   : > { %v11294_v25 = vpop.f32.mrb[56].mxu0  ;;  %v5391_v20 = vadd.f32 %v11184_v14, %v5230_v35  ;;  %v11187_v54 = vadd.f32 %v11186_v41, %v11185_v55 }
 0x626   : > { %5791 = vmatmul.mubr.bf16.gmra.mrb[152].mxu1 %v4569_v45  ;;  %v11295_v47 = vpop.f32.mrb[57].mxu0  ;;  %v4578_v45 = vld [vmem:[#allocation3 + $0x468] sm:$0xff] }
 0x627   : > { %5798 = vmatprep.mubr.bf16.mxu1 %v4579_v13  ;;  %v11296_v43 = vadd.f32 %v11295_v47, %v11294_v25  ;;  %v11297_v34 = vpop.f32.mrb[58].mxu0  ;;  %v5394_v56 = vadd.f32 %v11187_v54, %v5233_v19  ;;  %v6011_v47 = vld [vmem:[%s18771_s10 + $0x10] sm:$0xff] }
 0x628   : > { %v11298_v3 = vpop.f32.mrb[59].mxu0 }
 0x629   : > { %v16446_v37 = vadd.f32 %v11296_v43, %v5391_v20  ;;  %v11299_v13 = vadd.f32 %v11298_v3, %v11297_v34  ;;  %v11188_v30 = vpop.f32.mrb[52].mxu1  ;;  %v5241_v20 = vadd.f32 %v16369_v18, %v16396_v21  ;;  %v6012_v43 = vld [vmem:[%s18771_s10 + $0x18] sm:$0xff] }
 0x62a   : > { %v11189_v12 = vpop.f32.mrb[53].mxu1 }
 0x62b   : > { %v16450_v8 = vadd.f32 %v11299_v13, %v5394_v56  ;;  %v11190_v35 = vadd.f32 %v11189_v12, %v11188_v30  ;;  %v11191_v14 = vpop.f32.mrb[54].mxu1  ;;  %v16462_v56 = vpack.c.bf16 %v6012_v43, %v6011_v47 }
 0x62c   : > { %v11192_v55 = vpop.f32.mrb[55].mxu1 }
 0x62d   : > { %v11300_v41 = vpop.f32.mrb[60].mxu0  ;;  %v5399_v25 = vadd.f32 %v11190_v35, %v5238_v0  ;;  %v11193_v19 = vadd.f32 %v11192_v55, %v11191_v14  ;;  %12367 = vmatpush3.bf16.msra.mxu1 %v16462_v56  ;;  %v5246_v35 = vadd.f32 %v16375_v24, %v16396_v21 }
 0x62e   : > { %5799 = vmatmul.mubr.bf16.gmra.mrb[156].mxu1 %v4578_v45  ;;  %v11301_v54 = vpop.f32.mrb[61].mxu0  ;;  %12368 = vmatprep.subr.bf16.mxu1 %v19247_v42 }
 0x62f   : > { %12178 = vmatprep.mubr.msk.f32.mxu1 %vm19249_vm12, %v19248_v22  ;;  %v11302_v34 = vadd.f32 %v11301_v54, %v11300_v41  ;;  %v11303_v63 = vpop.f32.mrb[62].mxu0  ;;  %v5402_v45 = vadd.f32 %v11193_v19, %v5241_v20 }
 0x630   : > { %v11304_v3 = vpop.f32.mrb[63].mxu0 }
 0x631   : > { %v16464_v13 = vadd.f32 %v11302_v34, %v5399_v25  ;;  %v11305_v30 = vadd.f32 %v11304_v3, %v11303_v63  ;;  %v11194_v18 = vpop.f32.mrb[56].mxu1  ;;  %v5249_v25 = vadd.f32 %v16377_v48, %v16396_v21 }
 0x632   : > { %v11195_v12 = vpop.f32.mrb[57].mxu1 }
 0x633   : > { %v16468_v0 = vadd.f32 %v11305_v30, %v5402_v45  ;;  %v11196_v14 = vadd.f32 %v11195_v12, %v11194_v18  ;;  %v11197_v55 = vpop.f32.mrb[58].mxu1  ;;  %v5254_v18 = vadd.f32 %v16383_v27, %v16396_v21 }
 0x634   : > { %v11198_v41 = vpop.f32.mrb[59].mxu1 }
 0x635   : > { %v11306_v54 = vpop.f32.mrb[64].mxu0  ;;  %v5407_v20 = vadd.f32 %v11196_v14, %v5246_v35  ;;  %v11199_v19 = vadd.f32 %v11198_v41, %v11197_v55  ;;  %v5257_v41 = vadd.f32 %v16385_v33, %v16396_v21 }
 0x636   : > { %v11307_v47 = vpop.f32.mrb[65].mxu0 }
 0x637   : > { %v11308_v43 = vadd.f32 %v11307_v47, %v11306_v54  ;;  %v11309_v34 = vpop.f32.mrb[66].mxu0  ;;  %v5410_v63 = vadd.f32 %v11199_v19, %v5249_v25  ;;  %v6014_v19 = vld [vmem:[%s18771_s10 + $0x28] sm:$0xff] }
 0x638   : > { %v11310_v3 = vpop.f32.mrb[67].mxu0 }
 0x639   : > { %v16474_v32 = vadd.f32 %v11308_v43, %v5407_v20  ;;  %v11311_v45 = vadd.f32 %v11310_v3, %v11309_v34  ;;  %v11200_v30 = vpop.f32.mrb[60].mxu1  ;;  %v6013_v20 = vld [vmem:[%s18771_s10 + $0x20] sm:$0xff] }
 0x63a   : > { %v11201_v60 = vpop.f32.mrb[61].mxu1 }
 0x63b   : > { %v16476_v24 = vadd.f32 %v11311_v45, %v5410_v63  ;;  %v11202_v12 = vadd.f32 %v11201_v60, %v11200_v30  ;;  %v11203_v35 = vpop.f32.mrb[62].mxu1  ;;  %v16488_v60 = vpack.c.bf16 %v6014_v19, %v6013_v20 }
 0x63c   : > { %v11204_v14 = vpop.f32.mrb[63].mxu1 }
 0x63d   : > { %v11312_v48 = vpop.f32.mrb[68].mxu0  ;;  %v5415_v55 = vadd.f32 %v11202_v12, %v5254_v18  ;;  %v11205_v54 = vadd.f32 %v11204_v14, %v11203_v35  ;;  %19250 = vst [vmem:[#allocation49_spill] sm:$0xff] %v16488_v60  ;;  %12370 = vmatpush3.bf16.msra.mxu1 %v16488_v60  ;;  %v5262_v18 = vadd.f32 %v16391_v61, %v16396_v21 }
 0x63e   : > { %v11313_v25 = vpop.f32.mrb[69].mxu0  ;;  %12371 = vmatprep.subr.bf16.mxu1 %v19247_v42 }
 0x63f   : > { %v11314_v47 = vadd.f32 %v11313_v25, %v11312_v48  ;;  %v11315_v27 = vpop.f32.mrb[70].mxu0  ;;  %v5418_v43 = vadd.f32 %v11205_v54, %v5257_v41 }
 0x640   : > { %v11316_v34 = vpop.f32.mrb[71].mxu0 }
 0x641   : > { %v16490_v63 = vadd.f32 %v11314_v47, %v5415_v55  ;;  %v11317_v3 = vadd.f32 %v11316_v34, %v11315_v27  ;;  %v11206_v33 = vpop.f32.mrb[64].mxu1  ;;  %v5265_v55 = vadd.f32 %v16398_v57, %v16396_v21 }
 0x642   : > { %v11207_v45 = vpop.f32.mrb[65].mxu1 }
 0x643   : > { %v16494_v30 = vadd.f32 %v11317_v3, %v5418_v43  ;;  %v11208_v12 = vadd.f32 %v11207_v45, %v11206_v33  ;;  %v11209_v35 = vpop.f32.mrb[66].mxu1  ;;  %v5270_v33 = vadd.f32 %v16294_v15, %v16396_v21 }
 0x644   : > { %v11210_v14 = vpop.f32.mrb[67].mxu1 }
 0x645   : > { %v11318_v48 = vpop.f32.mrb[72].mxu0  ;;  %v5423_v41 = vadd.f32 %v11208_v12, %v5262_v18  ;;  %v11211_v54 = vadd.f32 %v11210_v14, %v11209_v35  ;;  %v5273_v14 = vadd.f32 %v16303_v4, %v16396_v21 }
 0x646   : > { %v11319_v25 = vpop.f32.mrb[73].mxu0 }
 0x647   : > { %v11320_v20 = vadd.f32 %v11319_v25, %v11318_v48  ;;  %v11321_v19 = vpop.f32.mrb[74].mxu0  ;;  %v5426_v47 = vadd.f32 %v11211_v54, %v5265_v55  ;;  %v6016_v54 = vld [vmem:[%s18771_s10 + $0x38] sm:$0xff] }
 0x648   : > { %v11322_v27 = vpop.f32.mrb[75].mxu0 }
 0x649   : > { %v16500_v34 = vadd.f32 %v11320_v20, %v5423_v41  ;;  %v11323_v43 = vadd.f32 %v11322_v27, %v11321_v19  ;;  %v6015_v41 = vld [vmem:[%s18771_s10 + $0x30] sm:$0xff] }
 0x64a   : > { %v11212_v3 = vpop.f32.mrb[68].mxu1 }
 0x64b   : > { %v11213_v38 = vpop.f32.mrb[69].mxu1  ;;  %v16502_v61 = vadd.f32 %v11323_v43, %v5426_v47 }
 0x64c   : > { %v11214_v45 = vadd.f32 %v11213_v38, %v11212_v3  ;;  %v11215_v18 = vpop.f32.mrb[70].mxu1  ;;  %v16514_v38 = vpack.c.bf16 %v6016_v54, %v6015_v41 }
 0x64d   : > { %v11216_v12 = vpop.f32.mrb[71].mxu1  ;;  %v11324_v57 = vpop.f32.mrb[76].mxu0 }
 0x64e   : > { %v5431_v35 = vadd.f32 %v11214_v45, %v5270_v33  ;;  %v11217_v48 = vadd.f32 %v11216_v12, %v11215_v18  ;;  %v11325_v55 = vpop.f32.mrb[77].mxu0  ;;  %19251 = vst [vmem:[#allocation57_spill] sm:$0xff] %v16514_v38  ;;  %12373 = vmatpush3.bf16.msra.mxu1 %v16514_v38  ;;  %v5278_v33 = vadd.f32 %v16324_v5, %v16396_v21 }
 0x64f   : > { %v11326_v25 = vadd.f32 %v11325_v55, %v11324_v57  ;;  %v11327_v15 = vpop.f32.mrb[78].mxu0  ;;  %12374 = vmatprep.subr.bf16.mxu1 %v19247_v42 }
 0x650   : > { %v5434_v20 = vadd.f32 %v11217_v48, %v5273_v14  ;;  %v11328_v19 = vpop.f32.mrb[79].mxu0 }
 0x651   : > { %v16516_v47 = vadd.f32 %v11326_v25, %v5431_v35  ;;  %v11329_v27 = vadd.f32 %v11328_v19, %v11327_v15  ;;  %v5281_v35 = vadd.f32 %v16331_v49, %v16396_v21 }
 0x652   : > { %v11218_v4 = vpop.f32.mrb[72].mxu1 }
 0x653   : > { %v11219_v43 = vpop.f32.mrb[73].mxu1  ;;  %v16520_v3 = vadd.f32 %v11329_v27, %v5434_v20 }
 0x654   : > { %v11220_v45 = vadd.f32 %v11219_v43, %v11218_v4  ;;  %v11221_v18 = vpop.f32.mrb[74].mxu1  ;;  %v5286_v4 = vadd.f32 %v16350_v29, %v16396_v21 }
 0x655   : > { %v11222_v12 = vpop.f32.mrb[75].mxu1  ;;  %v11330_v57 = vpop.f32.mrb[80].mxu0 }
 0x656   : > { %v5439_v14 = vadd.f32 %v11220_v45, %v5278_v33  ;;  %v11223_v48 = vadd.f32 %v11222_v12, %v11221_v18  ;;  %v11331_v55 = vpop.f32.mrb[81].mxu0  ;;  %v5289_v12 = vadd.f32 %v16353_v28, %v16396_v21 }
 0x657   : > { %v11332_v41 = vadd.f32 %v11331_v55, %v11330_v57  ;;  %v11333_v54 = vpop.f32.mrb[82].mxu0 }
 0x658   : > { %v5442_v25 = vadd.f32 %v11223_v48, %v5281_v35  ;;  %v11334_v15 = vpop.f32.mrb[83].mxu0  ;;  %v6018_v48 = vld [vmem:[%s18771_s10 + $0x48] sm:$0xff] }
 0x659   : > { %v16526_v19 = vadd.f32 %v11332_v41, %v5439_v14  ;;  %v11335_v20 = vadd.f32 %v11334_v15, %v11333_v54  ;;  %v6017_v14 = vld [vmem:[%s18771_s10 + $0x40] sm:$0xff] }
 0x65b   : > { %v16528_v5 = vadd.f32 %v11335_v20, %v5442_v25 }
 0x65c   : > { %v11224_v27 = vpop.f32.mrb[76].mxu1 }
 0x65d   : > { %v11225_v50 = vpop.f32.mrb[77].mxu1 }
 0x65e   : > { %v11226_v43 = vadd.f32 %v11225_v50, %v11224_v27  ;;  %v11227_v33 = vpop.f32.mrb[78].mxu1  ;;  %v11336_v49 = vpop.f32.mrb[84].mxu0  ;;  %v16540_v50 = vpack.c.bf16 %v6018_v48, %v6017_v14 }
 0x65f   : > { %v11228_v45 = vpop.f32.mrb[79].mxu1  ;;  %v11337_v35 = vpop.f32.mrb[85].mxu0 }
 0x660   : > { %v5447_v18 = vadd.f32 %v11226_v43, %v5286_v4  ;;  %v11229_v57 = vadd.f32 %v11228_v45, %v11227_v33  ;;  %v11338_v55 = vadd.f32 %v11337_v35, %v11336_v49  ;;  %v11339_v29 = vpop.f32.mrb[86].mxu0  ;;  %19252 = vst [vmem:[#allocation58_spill] sm:$0xff] %v16540_v50  ;;  %12376 = vmatpush3.bf16.msra.mxu1 %v16540_v50 }
 0x661   : > { %v11340_v54 = vpop.f32.mrb[87].mxu0  ;;  %12377 = vmatprep.subr.bf16.mxu1 %v19247_v42  ;;  %v5294_v4 = vadd.f32 %v16363_v39, %v16396_v21 }
 0x662   : > { %v5450_v41 = vadd.f32 %v11229_v57, %v5289_v12  ;;  %v16542_v25 = vadd.f32 %v11338_v55, %v5447_v18  ;;  %v11341_v15 = vadd.f32 %v11340_v54, %v11339_v29  ;;  %v5297_v18 = vadd.f32 %v16365_v6, %v16396_v21 }
 0x664   : > { %v16546_v27 = vadd.f32 %v11341_v15, %v5450_v41 }
 0x665   : > { %v11230_v28 = vpop.f32.mrb[80].mxu1 }
 0x666   : > { %v11231_v20 = vpop.f32.mrb[81].mxu1 }
 0x667   : > { %v11232_v43 = vadd.f32 %v11231_v20, %v11230_v28  ;;  %v11233_v33 = vpop.f32.mrb[82].mxu1  ;;  %v11342_v49 = vpop.f32.mrb[88].mxu0  ;;  %v5302_v28 = vadd.f32 %v16371_v40, %v16396_v21 }
 0x668   : > { %v11234_v45 = vpop.f32.mrb[83].mxu1  ;;  %v11343_v35 = vpop.f32.mrb[89].mxu0 }
 0x669   : > { %v5455_v12 = vadd.f32 %v11232_v43, %v5294_v4  ;;  %v11235_v57 = vadd.f32 %v11234_v45, %v11233_v33  ;;  %v11344_v14 = vadd.f32 %v11343_v35, %v11342_v49  ;;  %v11345_v48 = vpop.f32.mrb[90].mxu0  ;;  %v5305_v45 = vadd.f32 %v16373_v36, %v16396_v21 }
 0x66a   : > { %v11346_v29 = vpop.f32.mrb[91].mxu0 }
 0x66b   : > { %v5458_v55 = vadd.f32 %v11235_v57, %v5297_v18  ;;  %v16552_v54 = vadd.f32 %v11344_v14, %v5455_v12  ;;  %v11347_v41 = vadd.f32 %v11346_v29, %v11345_v48  ;;  %v6019_v12 = vld [vmem:[%s18771_s10 + $0x50] sm:$0xff]  ;;  %v6020_v57 = vld [vmem:[%s18771_s10 + $0x58] sm:$0xff] }
 0x66d   : > { %v11236_v15 = vpop.f32.mrb[84].mxu1  ;;  %v16554_v39 = vadd.f32 %v11347_v41, %v5458_v55 }
 0x66e   : > { %v11237_v23 = vpop.f32.mrb[85].mxu1 }
 0x66f   : > { %v11238_v20 = vadd.f32 %v11237_v23, %v11236_v15  ;;  %v11239_v4 = vpop.f32.mrb[86].mxu1  ;;  %v11348_v6 = vpop.f32.mrb[92].mxu0  ;;  %v16566_v23 = vpack.c.bf16 %v6020_v57, %v6019_v12  ;;  %v5313_v12 = vadd.f32 %v16381_v16, %v16396_v21  ;;  %v6021_v16 = vld [vmem:[%s18771_s10 + $0x60] sm:$0xff] }
 0x670   : > { %v11240_v43 = vpop.f32.mrb[87].mxu1  ;;  %v11349_v18 = vpop.f32.mrb[93].mxu0 }
 0x671   : > { %v5463_v33 = vadd.f32 %v11238_v20, %v5302_v28  ;;  %v11241_v49 = vadd.f32 %v11240_v43, %v11239_v4  ;;  %v11350_v35 = vadd.f32 %v11349_v18, %v11348_v6  ;;  %v11351_v40 = vpop.f32.mrb[94].mxu0  ;;  %19253 = vst [vmem:[#allocation59_spill] sm:$0xff] %v16566_v23  ;;  %12379 = vmatpush3.bf16.msra.mxu1 %v16566_v23 }
 0x672   : > { %v11352_v48 = vpop.f32.mrb[95].mxu0  ;;  %12380 = vmatprep.subr.bf16.mxu1 %v19247_v42  ;;  %v5310_v20 = vadd.f32 %v16379_v46, %v16396_v21 }
 0x673   : > { %v5466_v14 = vadd.f32 %v11241_v49, %v5305_v45  ;;  %v16568_v55 = vadd.f32 %v11350_v35, %v5463_v33  ;;  %v11353_v29 = vadd.f32 %v11352_v48, %v11351_v40 }
 0x675   : > { %v16572_v36 = vadd.f32 %v11353_v29, %v5466_v14 }
 0x678   : > { %v11242_v41 = vpop.f32.mrb[88].mxu1 }
 0x679   : > { %v11243_v15 = vpop.f32.mrb[89].mxu1 }
 0x67a   : > { %v11354_v28 = vpop.f32.mrb[96].mxu0  ;;  %v11244_v4 = vadd.f32 %v11243_v15, %v11242_v41  ;;  %v11245_v43 = vpop.f32.mrb[90].mxu1  ;;  %v5318_v15 = vadd.f32 %v16387_v17, %v16396_v21  ;;  %v5321_v17 = vadd.f32 %v16389_v11, %v16396_v21 }
 0x67b   : > { %v11355_v6 = vpop.f32.mrb[97].mxu0  ;;  %v11246_v45 = vpop.f32.mrb[91].mxu1 }
 0x67c   : > { %v11356_v49 = vadd.f32 %v11355_v6, %v11354_v28  ;;  %v11357_v33 = vpop.f32.mrb[98].mxu0  ;;  %v5471_v18 = vadd.f32 %v11244_v4, %v5310_v20  ;;  %v11247_v57 = vadd.f32 %v11246_v45, %v11245_v43  ;;  %v6022_v4 = vld [vmem:[%s18771_s10 + $0x68] sm:$0xff] }
 0x67d   : > { %v11358_v35 = vpop.f32.mrb[99].mxu0 }
 0x67e   : > { %v11359_v40 = vadd.f32 %v11358_v35, %v11357_v33  ;;  %v5474_v14 = vadd.f32 %v11247_v57, %v5313_v12  ;;  %v16578_v48 = vadd.f32 %v11356_v49, %v5471_v18  ;;  %v16590_v33 = vpack.c.bf16 %v6022_v4, %v6021_v16 }
 0x680   : > { %v11248_v29 = vpop.f32.mrb[92].mxu1  ;;  %v16580_v59 = vadd.f32 %v11359_v40, %v5474_v14  ;;  %19254 = vst [vmem:[#allocation60_spill] sm:$0xff] %v16590_v33  ;;  %12382 = vmatpush3.bf16.msra.mxu1 %v16590_v33 }
 0x681   : > { %v11249_v46 = vpop.f32.mrb[93].mxu1  ;;  %12383 = vmatprep.subr.bf16.mxu1 %v19247_v42 }
 0x682   : > { %v11360_v41 = vpop.f32.mrb[100].mxu0  ;;  %v11250_v28 = vadd.f32 %v11249_v46, %v11248_v29  ;;  %v11251_v6 = vpop.f32.mrb[94].mxu1 }
 0x683   : > { %v11361_v20 = vpop.f32.mrb[101].mxu0  ;;  %v11252_v43 = vpop.f32.mrb[95].mxu1 }
 0x684   : > { %v11362_v45 = vadd.f32 %v11361_v20, %v11360_v41  ;;  %v11363_v49 = vpop.f32.mrb[102].mxu0  ;;  %v5479_v18 = vadd.f32 %v11250_v28, %v5318_v15  ;;  %v11253_v12 = vadd.f32 %v11252_v43, %v11251_v6 }
 0x685   : > { %v11364_v57 = vpop.f32.mrb[103].mxu0 }
 0x686   : > { %v11365_v35 = vadd.f32 %v11364_v57, %v11363_v49  ;;  %v5482_v40 = vadd.f32 %v11253_v12, %v5321_v17  ;;  %v16595_v14 = vadd.f32 %v11362_v45, %v5479_v18 }
 0x688   : > { %v11382_v29 = vpop.f32.mrb[96].mxu1  ;;  %v16598_v46 = vadd.f32 %v11365_v35, %v5482_v40 }
 0x689   : > { %v11383_v41 = vpop.f32.mrb[97].mxu1 }
 0x68a   : > { %v12116_v20 = vpop.f32.mrb[104].mxu0  ;;  %v11384_v16 = vadd.f32 %v11383_v41, %v11382_v29  ;;  %v11385_v15 = vpop.f32.mrb[98].mxu1 }
 0x68b   : > { %v5841_v28 = vpop.f32.mrb[105].mxu0  ;;  %v11386_v4 = vpop.f32.mrb[99].mxu1 }
 0x68c   : > { %v12117_v11 = vpop.f32.mrb[106].mxu0  ;;  %v11387_v21 = vadd.f32 %v11386_v4, %v11385_v15  ;;  %v5681_v6 = vadd.f32 %v11384_v16, %v16404_v2  ;;  %v6023_v2 = vld [vmem:[%s18771_s10 + $0x70] sm:$0xff] }
 0x68d   : > { %v5844_v43 = vpop.f32.mrb[107].mxu0 }
 0x68e   : > { %v5842_v49 = vadd.f32 %v5841_v28, %v5681_v6  ;;  %v5684_v45 = vadd.f32 %v11387_v21, %v16406_v7  ;;  %v6024_v7 = vld [vmem:[%s18771_s10 + $0x78] sm:$0xff] }
 0x68f   : > { %v16609_v16 = vpack.c.bf16 %v6024_v7, %v6023_v2 }
 0x690   : > { %v11388_v18 = vpop.f32.mrb[100].mxu1  ;;  %v5845_v17 = vadd.f32 %v5844_v43, %v5684_v45 }
 0x691   : > { %v11389_v12 = vpop.f32.mrb[101].mxu1  ;;  %19255 = vst [vmem:[#allocation61_spill] sm:$0xff] %v16609_v16  ;;  %12385 = vmatpush3.bf16.msra.mxu1 %v16609_v16 }
 0x692   : > { %v12120_v57 = vpop.f32.mrb[108].mxu0  ;;  %v11390_v35 = vadd.f32 %v11389_v12, %v11388_v18  ;;  %v11391_v40 = vpop.f32.mrb[102].mxu1  ;;  %12386 = vmatprep.subr.bf16.mxu1 %v19247_v42 }
 0x693   : > { %v5857_v53 = vpop.f32.mrb[109].mxu0  ;;  %v11392_v1 = vpop.f32.mrb[103].mxu1 }
 0x694   : > { %v12121_v29 = vpop.f32.mrb[110].mxu0  ;;  %v11393_v41 = vadd.f32 %v11392_v1, %v11391_v40  ;;  %v5689_v9 = vadd.f32 %v11390_v35, %v16412_v58 }
 0x695   : > { %v5860_v52 = vpop.f32.mrb[111].mxu0 }
 0x696   : > { %v5850_v15 = vadd.f32 %v12116_v20, %v5689_v9  ;;  %v5692_v28 = vadd.f32 %v11393_v41, %v16414_v51 }
 0x698   : > { %v11394_v4 = vpop.f32.mrb[104].mxu1  ;;  %v5853_v1 = vadd.f32 %v12117_v11, %v5692_v28 }
 0x699   : > { %v11395_v58 = vpop.f32.mrb[105].mxu1 }
 0x69a   : > { %v12124_v21 = vpop.f32.mrb[112].mxu0  ;;  %v11396_v6 = vadd.f32 %v11395_v58, %v11394_v4  ;;  %v11397_v43 = vpop.f32.mrb[106].mxu1 }
 0x69b   : > { %v5873_v45 = vpop.f32.mrb[113].mxu0  ;;  %v11398_v18 = vpop.f32.mrb[107].mxu1 }
 0x69c   : > { %v12125_v12 = vpop.f32.mrb[114].mxu0  ;;  %v11399_v35 = vadd.f32 %v11398_v18, %v11397_v43  ;;  %v5697_v40 = vadd.f32 %v11396_v6, %v16428_v44 }
 0x69d   : > { %v5876_v9 = vpop.f32.mrb[115].mxu0 }
 0x69e   : > { %v5858_v20 = vadd.f32 %v5857_v53, %v5697_v40  ;;  %v5700_v51 = vadd.f32 %v11399_v35, %v16431_v62  ;;  %v16626_v35 = vld [vmem:[%s573_s30] ss:$0 sm:$0xff] }
 0x6a0   : > { %v11400_v41 = vpop.f32.mrb[108].mxu1  ;;  %v5861_v2 = vadd.f32 %v5860_v52, %v5700_v51 }
 0x6a1   : > { %v11401_v11 = vpop.f32.mrb[109].mxu1 }
 0x6a2   : > { %v16616_v7 = vpop.f32.mrb[116].mxu0  ;;  %v11402_v28 = vadd.f32 %v11401_v11, %v11400_v41  ;;  %v11403_v16 = vpop.f32.mrb[110].mxu1  ;;  %v16631_v41 = vadd.f32 %v16626_v35, %v5845_v17 }
 0x6a3   : > { %v5889_v4 = vpop.f32.mrb[117].mxu0  ;;  %v11404_v58 = vpop.f32.mrb[111].mxu1 }
 0x6a4   : > { %v16618_v33 = vpop.f32.mrb[118].mxu0  ;;  %v5705_v43 = vadd.f32 %v11402_v28, %v16438_v10  ;;  %v11405_v18 = vadd.f32 %v11404_v58, %v11403_v16  ;;  %19256 = vst [vmem:[#allocation62_spill] sm:$0xff] %v16631_v41 }
 0x6a5   : > { %v5892_v44 = vpop.f32.mrb[119].mxu0 }
 0x6a6   : > { %v5866_v53 = vadd.f32 %v12120_v57, %v5705_v43  ;;  %v5708_v52 = vadd.f32 %v11405_v18, %v16440_v26  ;;  %v16638_v57 = vadd.f32 %v16626_v35, %v5842_v49 }
 0x6a8   : > { %v5869_v62 = vadd.f32 %v12121_v29, %v5708_v52  ;;  %19257 = vst [vmem:[#allocation63_spill] sm:$0xff] %v16638_v57  ;;  %v6029_v18 = vadd.f32 %v16631_v41, %v16638_v57 }
 0x6a9   : > { %v11406_v6 = vpop.f32.mrb[112].mxu1 }
 0x6aa   : > { %v11407_v40 = vpop.f32.mrb[113].mxu1  ;;  %v16628_v51 = vpop.f32.mrb[120].mxu0 }
 0x6ab   : > { %v11408_v10 = vadd.f32 %v11407_v40, %v11406_v6  ;;  %v11409_v16 = vpop.f32.mrb[114].mxu1  ;;  %v16633_v11 = vpop.f32.mrb[121].mxu0  ;;  %v16647_v6 = vadd.f32 %v16626_v35, %v5850_v15 }
 0x6ac   : > { %v11410_v28 = vpop.f32.mrb[115].mxu1  ;;  %v16635_v58 = vpop.f32.mrb[122].mxu0 }
 0x6ad   : > { %v5713_v26 = vadd.f32 %v11408_v10, %v16446_v37  ;;  %v11411_v29 = vadd.f32 %v11410_v28, %v11409_v16  ;;  %v16641_v43 = vpop.f32.mrb[123].mxu0  ;;  %19258 = vst [vmem:[#allocation64_spill] sm:$0xff] %v16647_v6  ;;  %v6030_v49 = vadd.f32 %v6029_v18, %v16647_v6 }
 0x6af   : > { %v5874_v17 = vadd.f32 %v5873_v45, %v5713_v26  ;;  %v5716_v52 = vadd.f32 %v11411_v29, %v16450_v8  ;;  %v16657_v45 = vadd.f32 %v16626_v35, %v5853_v1  ;;  %v16663_v26 = vadd.f32 %v16626_v35, %v5858_v20 }
 0x6b1   : > { %v5877_v40 = vadd.f32 %v5876_v9, %v5716_v52  ;;  %v11412_v23 = vpop.f32.mrb[116].mxu1  ;;  %19259 = vst [vmem:[#allocation65_spill] sm:$0xff] %v16657_v45  ;;  %19260 = vst [vmem:[#allocation66_spill] sm:$0xff] %v16663_v26  ;;  %v6031_v29 = vadd.f32 %v6030_v49, %v16657_v45  ;;  %v16681_v49 = vadd.f32 %v16626_v35, %v5866_v53 }
 0x6b2   : > { %v11413_v50 = vpop.f32.mrb[117].mxu1  ;;  %v16649_v38 = vpop.f32.mrb[124].mxu0 }
 0x6b3   : > { %v11414_v37 = vadd.f32 %v11413_v50, %v11412_v23  ;;  %v11415_v10 = vpop.f32.mrb[118].mxu1  ;;  %v16652_v16 = vpop.f32.mrb[125].mxu0  ;;  %v6032_v1 = vadd.f32 %v6031_v29, %v16663_v26 }
 0x6b4   : > { %v11416_v28 = vpop.f32.mrb[119].mxu1  ;;  %v16654_v60 = vpop.f32.mrb[126].mxu0 }
 0x6b5   : > { %v5721_v8 = vadd.f32 %v11414_v37, %v16464_v13  ;;  %v11417_v15 = vadd.f32 %v11416_v28, %v11415_v10  ;;  %v16660_v9 = vpop.f32.mrb[127].mxu0  ;;  %v16671_v13 = vadd.f32 %v16626_v35, %v5861_v2 }
 0x6b7   : > { %v5882_v50 = vadd.f32 %v12124_v21, %v5721_v8  ;;  %v5724_v23 = vadd.f32 %v11417_v15, %v16468_v0  ;;  %v6033_v8 = vadd.f32 %v6032_v1, %v16671_v13 }
 0x6b9   : > { %v5885_v18 = vadd.f32 %v12125_v12, %v5724_v23  ;;  %v11418_v52 = vpop.f32.mrb[120].mxu1  ;;  %v6034_v26 = vadd.f32 %v6033_v8, %v16681_v49 }
 0x6ba   : > { %v11419_v6 = vpop.f32.mrb[121].mxu1  ;;  %v16667_v41 = vpop.f32.mrb[128].mxu0 }
 0x6bb   : > { %v11420_v37 = vadd.f32 %v11419_v6, %v11418_v52  ;;  %v11421_v10 = vpop.f32.mrb[122].mxu1  ;;  %v16673_v28 = vpop.f32.mrb[129].mxu0 }
 0x6bc   : > { %v11422_v20 = vpop.f32.mrb[123].mxu1  ;;  %v16675_v57 = vpop.f32.mrb[130].mxu0 }
 0x6bd   : > { %v5729_v21 = vadd.f32 %v11420_v37, %v16474_v32  ;;  %v11423_v0 = vadd.f32 %v11422_v20, %v11421_v10  ;;  %v16678_v12 = vpop.f32.mrb[131].mxu0  ;;  %v16689_v32 = vadd.f32 %v16626_v35, %v5869_v62 }
 0x6bf   : > { %v5890_v15 = vadd.f32 %v5889_v4, %v5729_v21  ;;  %v5732_v2 = vadd.f32 %v11423_v0, %v16476_v24  ;;  %v16696_v4 = vadd.f32 %v16626_v35, %v5874_v17  ;;  %v6035_v21 = vadd.f32 %v6034_v26, %v16689_v32 }
 0x6c1   : > { %v5893_v6 = vadd.f32 %v5892_v44, %v5732_v2  ;;  %v11424_v29 = vpop.f32.mrb[124].mxu1  ;;  %v6036_v8 = vadd.f32 %v6035_v21, %v16696_v4  ;;  %v16706_v2 = vadd.f32 %v16626_v35, %v5877_v40  ;;  %v16716_v40 = vadd.f32 %v16626_v35, %v5885_v18 }
 0x6c2   : > { %v11425_v23 = vpop.f32.mrb[125].mxu1  ;;  %v16685_v52 = vpop.f32.mrb[132].mxu0 }
 0x6c3   : > { %v11426_v37 = vadd.f32 %v11425_v23, %v11424_v29  ;;  %v11427_v10 = vpop.f32.mrb[126].mxu1  ;;  %v16691_v20 = vpop.f32.mrb[133].mxu0  ;;  %v6037_v26 = vadd.f32 %v6036_v8, %v16706_v2  ;;  %v16727_v18 = vadd.f32 %v16626_v35, %v5893_v6 }
 0x6c4   : > { %v11428_v53 = vpop.f32.mrb[127].mxu1  ;;  %v16693_v45 = vpop.f32.mrb[134].mxu0 }
 0x6c5   : > { %v5737_v24 = vadd.f32 %v11426_v37, %v16490_v63  ;;  %v11429_v44 = vadd.f32 %v11428_v53, %v11427_v10  ;;  %v16699_v1 = vpop.f32.mrb[135].mxu0  ;;  %v16710_v63 = vadd.f32 %v16626_v35, %v5882_v50  ;;  %v16721_v50 = vadd.f32 %v16626_v35, %v5890_v15 }
 0x6c7   : > { %v5898_v62 = vadd.f32 %v16616_v7, %v5737_v24  ;;  %v5740_v0 = vadd.f32 %v11429_v44, %v16494_v30  ;;  %v6038_v24 = vadd.f32 %v6037_v26, %v16710_v63 }
 0x6c9   : > { %v5901_v29 = vadd.f32 %v16618_v33, %v5740_v0  ;;  %v11430_v17 = vpop.f32.mrb[128].mxu1  ;;  %v6039_v8 = vadd.f32 %v6038_v24, %v16716_v40  ;;  %v16731_v15 = vadd.f32 %v16626_v35, %v5898_v62 }
 0x6ca   : > { %v11431_v23 = vpop.f32.mrb[129].mxu1 }
 0x6cb   : > { %v11432_v37 = vadd.f32 %v11431_v23, %v11430_v17  ;;  %v11433_v10 = vpop.f32.mrb[130].mxu1  ;;  %v16739_v6 = vadd.f32 %v16626_v35, %v5901_v29 }
 0x6cc   : > { %v11434_v53 = vpop.f32.mrb[131].mxu1 }
 0x6cd   : > { %v5745_v7 = vadd.f32 %v11432_v37, %v16500_v34  ;;  %v11435_v30 = vadd.f32 %v11434_v53, %v11433_v10  ;;  %v6040_v10 = vadd.f32 %v6039_v8, %v16721_v50 }
 0x6cf   : > { %v5906_v33 = vadd.f32 %v16633_v11, %v5745_v7  ;;  %v5748_v44 = vadd.f32 %v11435_v30, %v16502_v61  ;;  %v6041_v26 = vadd.f32 %v6040_v10, %v16727_v18 }
 0x6d1   : > { %v5909_v21 = vadd.f32 %v16641_v43, %v5748_v44  ;;  %v11436_v0 = vpop.f32.mrb[132].mxu1  ;;  %v6042_v44 = vadd.f32 %v6041_v26, %v16731_v15  ;;  %v16742_v62 = vadd.f32 %v16626_v35, %v5906_v33 }
 0x6d2   : > { %v11437_v17 = vpop.f32.mrb[133].mxu1 }
 0x6d3   : > { %v11438_v34 = vadd.f32 %v11437_v17, %v11436_v0  ;;  %v11439_v23 = vpop.f32.mrb[134].mxu1  ;;  %v6043_v8 = vadd.f32 %v6042_v44, %v16739_v6  ;;  %v16750_v29 = vadd.f32 %v16626_v35, %v5909_v21 }
 0x6d4   : > { %v11440_v37 = vpop.f32.mrb[135].mxu1 }
 0x6d5   : > { %v5753_v11 = vadd.f32 %v11438_v34, %v16516_v47  ;;  %v11441_v61 = vadd.f32 %v11440_v37, %v11439_v23  ;;  %v6044_v23 = vadd.f32 %v6043_v8, %v16742_v62 }
 0x6d7   : > { %v5914_v43 = vadd.f32 %v16628_v51, %v5753_v11  ;;  %v5756_v53 = vadd.f32 %v11441_v61, %v16520_v3  ;;  %v6045_v26 = vadd.f32 %v6044_v23, %v16750_v29 }
 0x6d9   : > { %v5917_v7 = vadd.f32 %v16635_v58, %v5756_v53  ;;  %v11442_v30 = vpop.f32.mrb[136].mxu1  ;;  %v16754_v33 = vadd.f32 %v16626_v35, %v5914_v43 }
 0x6da   : > { %v11443_v24 = vpop.f32.mrb[137].mxu1 }
 0x6db   : > { %v11444_v47 = vadd.f32 %v11443_v24, %v11442_v30  ;;  %v11445_v0 = vpop.f32.mrb[138].mxu1  ;;  %v6046_v30 = vadd.f32 %v6045_v26, %v16754_v33  ;;  %v16760_v21 = vadd.f32 %v16626_v35, %v5917_v7 }
 0x6dc   : > { %v11446_v17 = vpop.f32.mrb[139].mxu1 }
 0x6dd   : > { %v5761_v51 = vadd.f32 %v11444_v47, %v16526_v19  ;;  %v11447_v3 = vadd.f32 %v11446_v17, %v11445_v0  ;;  %v6047_v17 = vadd.f32 %v6046_v30, %v16760_v21 }
 0x6df   : > { %v5922_v58 = vadd.f32 %v16652_v16, %v5761_v51  ;;  %v5764_v34 = vadd.f32 %v11447_v3, %v16528_v5 }
 0x6e1   : > { %v5925_v37 = vadd.f32 %v16660_v9, %v5764_v34  ;;  %v11448_v10 = vpop.f32.mrb[140].mxu1  ;;  %v16765_v43 = vadd.f32 %v16626_v35, %v5922_v58 }
 0x6e2   : > { %v11449_v11 = vpop.f32.mrb[141].mxu1 }
 0x6e3   : > { %v11450_v19 = vadd.f32 %v11449_v11, %v11448_v10  ;;  %v11451_v61 = vpop.f32.mrb[142].mxu1  ;;  %v6048_v8 = vadd.f32 %v6047_v17, %v16765_v43  ;;  %v16771_v7 = vadd.f32 %v16626_v35, %v5925_v37 }
 0x6e4   : > { %v11452_v53 = vpop.f32.mrb[143].mxu1 }
 0x6e5   : > { %v5769_v16 = vadd.f32 %v11450_v19, %v16542_v25  ;;  %v11453_v5 = vadd.f32 %v11452_v53, %v11451_v61  ;;  %v6049_v23 = vadd.f32 %v6048_v8, %v16771_v7 }
 0x6e7   : > { %v5930_v9 = vadd.f32 %v16649_v38, %v5769_v16  ;;  %v5772_v24 = vadd.f32 %v11453_v5, %v16546_v27 }
 0x6e9   : > { %v5933_v44 = vadd.f32 %v16654_v60, %v5772_v24  ;;  %v11454_v47 = vpop.f32.mrb[144].mxu1  ;;  %v16775_v58 = vadd.f32 %v16626_v35, %v5930_v9 }
 0x6ea   : > { %v11455_v0 = vpop.f32.mrb[145].mxu1 }
 0x6eb   : > { %v11456_v25 = vadd.f32 %v11455_v0, %v11454_v47  ;;  %v11457_v51 = vpop.f32.mrb[146].mxu1  ;;  %v6050_v61 = vadd.f32 %v6049_v23, %v16775_v58  ;;  %v16783_v37 = vadd.f32 %v16626_v35, %v5933_v44 }
 0x6ec   : > { %v11458_v3 = vpop.f32.mrb[147].mxu1 }
 0x6ed   : > { %v5777_v38 = vadd.f32 %v11456_v25, %v16552_v54  ;;  %v11459_v27 = vadd.f32 %v11458_v3, %v11457_v51  ;;  %v6051_v5 = vadd.f32 %v6050_v61, %v16783_v37 }
 0x6ef   : > { %v5938_v60 = vadd.f32 %v16673_v28, %v5777_v38  ;;  %v5780_v34 = vadd.f32 %v11459_v27, %v16554_v39 }
 0x6f1   : > { %v5941_v10 = vadd.f32 %v16678_v12, %v5780_v34  ;;  %v11460_v11 = vpop.f32.mrb[148].mxu1  ;;  %v16786_v16 = vadd.f32 %v16626_v35, %v5938_v60 }
 0x6f2   : > { %v11461_v19 = vpop.f32.mrb[149].mxu1 }
 0x6f3   : > { %v11462_v54 = vadd.f32 %v11461_v19, %v11460_v11  ;;  %v11463_v53 = vpop.f32.mrb[150].mxu1  ;;  %v6052_v9 = vadd.f32 %v6051_v5, %v16786_v16  ;;  %v16794_v24 = vadd.f32 %v16626_v35, %v5941_v10 }
 0x6f4   : > { %v11464_v26 = vpop.f32.mrb[151].mxu1 }
 0x6f5   : > { %v5785_v28 = vadd.f32 %v11462_v54, %v16568_v55  ;;  %v11465_v39 = vadd.f32 %v11464_v26, %v11463_v53  ;;  %v6053_v3 = vadd.f32 %v6052_v9, %v16794_v24 }
 0x6f7   : > { %v5946_v12 = vadd.f32 %v16667_v41, %v5785_v28  ;;  %v5788_v30 = vadd.f32 %v11465_v39, %v16572_v36 }
 0x6f9   : > { %v5949_v44 = vadd.f32 %v16675_v57, %v5788_v30  ;;  %v11466_v47 = vpop.f32.mrb[152].mxu1  ;;  %v16798_v17 = vadd.f32 %v16626_v35, %v5946_v12 }
 0x6fa   : > { %v11467_v0 = vpop.f32.mrb[153].mxu1 }
 0x6fb   : > { %v11468_v55 = vadd.f32 %v11467_v0, %v11466_v47  ;;  %v11469_v25 = vpop.f32.mrb[154].mxu1  ;;  %v6054_v8 = vadd.f32 %v6053_v3, %v16798_v17  ;;  %v16804_v38 = vadd.f32 %v16626_v35, %v5949_v44  ;;  %v6026_v0 = vld [vmem:[%s18772_s11 + $0x8] sm:$0xff] }
 0x6fc   : > { %v11470_v51 = vpop.f32.mrb[155].mxu1 }
 0x6fd   : > { %v5793_v41 = vadd.f32 %v11468_v55, %v16578_v48  ;;  %v11471_v36 = vadd.f32 %v11470_v51, %v11469_v25  ;;  %v6055_v11 = vadd.f32 %v6054_v8, %v16804_v38  ;;  %v6028_v51 = vld [vmem:[%s18772_s11 + $0x18] sm:$0xff] }
 0x6ff   : > { %v5954_v57 = vadd.f32 %v16691_v20, %v5793_v41  ;;  %v5796_v27 = vadd.f32 %v11471_v36, %v16580_v59 }
 0x701   : > { %v16809_v60 = vadd.f32 %v16626_v35, %v5954_v57  ;;  %v5957_v34 = vadd.f32 %v16699_v1, %v5796_v27  ;;  %v11472_v23 = vpop.f32.mrb[156].mxu1  ;;  %v19262_v57 = vld [vmem:[#allocation49_spill] sm:$0xff] }
 0x702   : > { %v11473_v10 = vpop.f32.mrb[157].mxu1  ;;  %v19263_v27 = vld [vmem:[#allocation57_spill] sm:$0xff] }
 0x703   : > { %v11474_v48 = vadd.f32 %v11473_v10, %v11472_v23  ;;  %v11475_v19 = vpop.f32.mrb[158].mxu1  ;;  %v6056_v54 = vadd.f32 %v6055_v11, %v16809_v60  ;;  %v16815_v53 = vadd.f32 %v16626_v35, %v5957_v34  ;;  %v19264_v34 = vld [vmem:[#allocation58_spill] sm:$0xff]  ;;  %v19266_v23 = vld [vmem:[#allocation60_spill] sm:$0xff] }
 0x704   : > { %v11476_v61 = vpop.f32.mrb[159].mxu1 }
 0x705   : > { %v5801_v20 = vadd.f32 %v11474_v48, %v16595_v14  ;;  %v11477_v59 = vadd.f32 %v11476_v61, %v11475_v19  ;;  %v6057_v1 = vadd.f32 %v6056_v54, %v16815_v53  ;;  %v19268_v48 = vld [vmem:[#allocation24_spill] sm:$0xff]  ;;  %v19269_v61 = vld [vmem:[#allocation63_spill] sm:$0xff] }
 0x707   : > { %v5962_v26 = vadd.f32 %v16685_v52, %v5801_v20  ;;  %v5804_v28 = vadd.f32 %v11477_v59, %v16598_v46  ;;  %v6025_v46 = vld [vmem:[%s18772_s11] sm:$0xff] }
 0x708   : > { %v16836_v55 = vpack.c.bf16 %v6026_v0, %v6025_v46  ;;  %v19270_v20 = vld [vmem:[#allocation62_spill] sm:$0xff] }
 0x709   : > { %v16822_v39 = vadd.f32 %v16626_v35, %v5962_v26  ;;  %v5965_v5 = vadd.f32 %v16693_v45, %v5804_v28  ;;  %v19271_v26 = vld [vmem:[#allocation64_spill] sm:$0xff] }
 0x70b   : > { %v6058_v12 = vadd.f32 %v6057_v1, %v16822_v39  ;;  %v16827_v30 = vadd.f32 %v16626_v35, %v5965_v5  ;;  %v6027_v35 = vld [vmem:[%s18772_s11 + $0x10] sm:$0xff] }
 0x70c   : > { %v16848_v3 = vpack.c.bf16 %v6028_v51, %v6027_v35 }
 0x70d   : > { %v6059_v9 = vadd.f32 %v6058_v12, %v16827_v30  ;;  %v19272_v12 = vld [vmem:[#allocation65_spill] sm:$0xff] }
 0x70f   : > { %v6060_v14 = vrot.slane %v6059_v9, 4 }
 0x711   : > { %v6061_v44 = vadd.f32 %v6060_v14, %v6059_v9  ;;  %v19273_v14 = vld [vmem:[#allocation66_spill] sm:$0xff] }
 0x713   : > { %v6062_v47 = vrot.slane %v6061_v44, 2 }
 0x715   : > { %v6063_v52 = vadd.f32 %v6062_v47, %v6061_v44 }
 0x717   : > { %v6064_v45 = vrot.slane %v6063_v52, 1 }
 0x719   : > { %v6065_v25 = vadd.f32 %v6064_v45, %v6063_v52 }
 0x71b   : > { %12179 = vmatmul.mubr.f32.vlgmr.msra.gmra.mrb[160].mxu1 %v6065_v25 }
 0x71c   : > { %12388 = vmatpush3.bf16.msra.mxu1 %v16836_v55  ;;  %12189 = vmatprep.mubr.msk.f32.mxu1 %vm19249_vm12, %v19248_v22 }
 0x71d   : > { %12389 = vmatprep.subr.bf16.mxu1 %v19247_v42 }
 0x720   : > { %12391 = vmatpush3.bf16.msra.mxu1 %v16848_v3 }
 0x721   : > { %12392 = vmatprep.subr.bf16.mxu1 %v19247_v42 }
 0x7ee   : > { %v6132_v41 = vpop.f32.mrb[160].mxu1 }
 0x7ef   : > { %v6137_v36 = vmul.f32 0.0009765625, %v6132_v41  ;;  %v12180_v8 = vpop.f32.mrb[161].mxu1 }
 0x7f1   : > { %12190 = vmatmul.mubr.msk.f32.vlgmr.msra.gmra.mrb[162].mxu1 %vm19261_vm6, %v6137_v36 }
 0x7f2   : > { %12394 = vmatpush3.bf16.msra.mxu1 %v16426_v31  ;;  %12224 = vmatprep.mubr.msk.f32.mxu1 %vm19249_vm12, %v19248_v22  ;;  %v19265_v31 = vld [vmem:[#allocation59_spill] sm:$0xff] }
 0x7f3   : > { %12395 = vmatprep.subr.bf16.mxu1 %v19247_v42 }
 0x7f6   : > { %12397 = vmatpush3.bf16.msra.mxu1 %v16462_v56  ;;  %v19267_v56 = vld [vmem:[#allocation61_spill] sm:$0xff] }
 0x7f7   : > { %12398 = vmatprep.subr.bf16.mxu1 %v19247_v42 }
 0x7fa   : > { %12400 = vmatpush3.bf16.msra.mxu1 %v19262_v57 }
 0x7fb   : > { %12401 = vmatprep.subr.bf16.mxu1 %v19247_v42 }
 0x7fe   : > { %12403 = vmatpush3.bf16.msra.mxu1 %v19263_v27 }
 0x7ff   : > { %12404 = vmatprep.subr.bf16.mxu1 %v19247_v42 }
 0x802   : > { %12406 = vmatpush3.bf16.msra.mxu1 %v19264_v34 }
 0x803   : > { %12407 = vmatprep.subr.bf16.mxu1 %v19247_v42 }
 0x806   : > { %12409 = vmatpush3.bf16.msra.mxu1 %v19265_v31 }
 0x807   : > { %12410 = vmatprep.subr.bf16.mxu1 %v19247_v42 }
 0x80a   : > { %12412 = vmatpush3.bf16.msra.mxu1 %v19266_v23 }
 0x80b   : > { %12413 = vmatprep.subr.bf16.mxu1 %v19247_v42 }
 0x80e   : > { %12415 = vmatpush3.bf16.msra.mxu1 %v19267_v56 }
 0x80f   : > { %12416 = vmatprep.subr.bf16.mxu1 %v19247_v42 }
 0x8c4   : > { %v6207_v10 = vpop.f32.mrb[162].mxu1 }
 0x8c5   : > { %v12191_v11 = vpop.f32.mrb[163].mxu1  ;;  %v16872_v19 = vrot.slane %v6207_v10, %v19268_v48 }
 0x8c7   : > { %v16876_v54 = vsub.f32 %v19269_v61, %v16872_v19  ;;  %v16880_v59 = vsub.f32 %v19270_v20, %v16872_v19  ;;  %v16884_v28 = vsub.f32 %v19271_v26, %v16872_v19  ;;  %v16892_v9 = vsub.f32 %v19272_v12, %v16872_v19 }
 0x8c8   : > { %v16896_v44 = vsub.f32 %v19273_v14, %v16872_v19  ;;  %v16902_v46 = vsub.f32 %v16671_v13, %v16872_v19  ;;  %v16908_v25 = vsub.f32 %v16681_v49, %v16872_v19  ;;  %v16914_v41 = vsub.f32 %v16689_v32, %v16872_v19 }
 0x8c9   : > { %v6247_v1 = vmul.f32 %v16876_v54, %v16876_v54  ;;  %v6248_v5 = vmul.f32 %v16880_v59, %v16880_v59  ;;  %v6249_v47 = vmul.f32 %v16884_v28, %v16884_v28  ;;  %v6250_v0 = vmul.f32 %v16892_v9, %v16892_v9 }
 0x8ca   : > { %v6251_v35 = vmul.f32 %v16896_v44, %v16896_v44  ;;  %v6252_v13 = vmul.f32 %v16902_v46, %v16902_v46  ;;  %v16920_v8 = vsub.f32 %v16696_v4, %v16872_v19  ;;  %v6253_v49 = vmul.f32 %v16908_v25, %v16908_v25 }
 0x8cb   : > { %v6279_v52 = vadd.f32 %v6248_v5, %v6247_v1  ;;  %v16926_v27 = vsub.f32 %v16706_v2, %v16872_v19  ;;  %v6254_v32 = vmul.f32 %v16914_v41, %v16914_v41  ;;  %v16932_v31 = vsub.f32 %v16710_v63, %v16872_v19 }
 0x8cc   : > { %v6255_v4 = vmul.f32 %v16920_v8, %v16920_v8  ;;  %v16938_v56 = vsub.f32 %v16716_v40, %v16872_v19  ;;  %v16944_v11 = vsub.f32 %v16721_v50, %v16872_v19  ;;  %v16950_v20 = vsub.f32 %v16727_v18, %v16872_v19 }
 0x8cd   : > { %v6280_v45 = vadd.f32 %v6279_v52, %v6249_v47  ;;  %v6256_v2 = vmul.f32 %v16926_v27, %v16926_v27  ;;  %v6257_v63 = vmul.f32 %v16932_v31, %v16932_v31  ;;  %v16956_v1 = vsub.f32 %v16731_v15, %v16872_v19 }
 0x8ce   : > { %v6258_v40 = vmul.f32 %v16938_v56, %v16938_v56  ;;  %v6259_v50 = vmul.f32 %v16944_v11, %v16944_v11  ;;  %v16962_v12 = vsub.f32 %v16739_v6, %v16872_v19  ;;  %v6260_v18 = vmul.f32 %v16950_v20, %v16950_v20 }
 0x8cf   : > { %v6281_v51 = vadd.f32 %v6280_v45, %v6250_v0  ;;  %v16968_v47 = vsub.f32 %v16742_v62, %v16872_v19  ;;  %v6261_v15 = vmul.f32 %v16956_v1, %v16956_v1  ;;  %v16974_v0 = vsub.f32 %v16750_v29, %v16872_v19 }
 0x8d0   : > { %v6262_v6 = vmul.f32 %v16962_v12, %v16962_v12 }
 0x8d1   : > { %v6282_v36 = vadd.f32 %v6281_v51, %v6251_v35  ;;  %v16980_v35 = vsub.f32 %v16754_v33, %v16872_v19  ;;  %v6263_v62 = vmul.f32 %v16968_v47, %v16968_v47  ;;  %v6264_v29 = vmul.f32 %v16974_v0, %v16974_v0 }
 0x8d3   : > { %v6283_v57 = vadd.f32 %v6282_v36, %v6252_v13  ;;  %v16986_v13 = vsub.f32 %v16760_v21, %v16872_v19  ;;  %v6265_v33 = vmul.f32 %v16980_v35, %v16980_v35 }
 0x8d5   : > { %v6284_v34 = vadd.f32 %v6283_v57, %v6253_v49  ;;  %v16992_v49 = vsub.f32 %v16765_v43, %v16872_v19  ;;  %v6266_v21 = vmul.f32 %v16986_v13, %v16986_v13 }
 0x8d7   : > { %v6285_v23 = vadd.f32 %v6284_v34, %v6254_v32  ;;  %v16998_v32 = vsub.f32 %v16771_v7, %v16872_v19  ;;  %v6267_v43 = vmul.f32 %v16992_v49, %v16992_v49 }
 0x8d9   : > { %v6286_v10 = vadd.f32 %v6285_v23, %v6255_v4  ;;  %v17004_v4 = vsub.f32 %v16775_v58, %v16872_v19  ;;  %v6268_v7 = vmul.f32 %v16998_v32, %v16998_v32 }
 0x8db   : > { %v6287_v61 = vadd.f32 %v6286_v10, %v6256_v2  ;;  %v17010_v2 = vsub.f32 %v16783_v37, %v16872_v19  ;;  %v6269_v58 = vmul.f32 %v17004_v4, %v17004_v4 }
 0x8dd   : > { %v6288_v26 = vadd.f32 %v6287_v61, %v6257_v63  ;;  %v17016_v63 = vsub.f32 %v16786_v16, %v16872_v19  ;;  %v6270_v37 = vmul.f32 %v17010_v2, %v17010_v2 }
 0x8df   : > { %v6289_v5 = vadd.f32 %v6288_v26, %v6258_v40  ;;  %v17022_v40 = vsub.f32 %v16794_v24, %v16872_v19  ;;  %v6271_v16 = vmul.f32 %v17016_v63, %v17016_v63 }
 0x8e1   : > { %v6290_v14 = vadd.f32 %v6289_v5, %v6259_v50  ;;  %v17028_v50 = vsub.f32 %v16798_v17, %v16872_v19  ;;  %v6272_v24 = vmul.f32 %v17022_v40, %v17022_v40 }
 0x8e3   : > { %v6291_v52 = vadd.f32 %v6290_v14, %v6260_v18  ;;  %v17034_v18 = vsub.f32 %v16804_v38, %v16872_v19  ;;  %v6273_v17 = vmul.f32 %v17028_v50, %v17028_v50 }
 0x8e5   : > { %v6292_v45 = vadd.f32 %v6291_v52, %v6261_v15  ;;  %v17040_v15 = vsub.f32 %v16809_v60, %v16872_v19  ;;  %v6274_v38 = vmul.f32 %v17034_v18, %v17034_v18 }
 0x8e7   : > { %v6293_v51 = vadd.f32 %v6292_v45, %v6262_v6  ;;  %v17046_v6 = vsub.f32 %v16815_v53, %v16872_v19  ;;  %v6275_v60 = vmul.f32 %v17040_v15, %v17040_v15 }
 0x8e9   : > { %v6294_v36 = vadd.f32 %v6293_v51, %v6263_v62  ;;  %v17052_v62 = vsub.f32 %v16822_v39, %v16872_v19  ;;  %v6276_v53 = vmul.f32 %v17046_v6, %v17046_v6 }
 0x8eb   : > { %v6295_v57 = vadd.f32 %v6294_v36, %v6264_v29  ;;  %v17058_v29 = vsub.f32 %v16827_v30, %v16872_v19 }
 0x8ed   : > { %v6296_v34 = vadd.f32 %v6295_v57, %v6265_v33  ;;  %v6277_v33 = vmul.f32 %v17052_v62, %v17052_v62  ;;  %v6278_v39 = vmul.f32 %v17058_v29, %v17058_v29 }
 0x8ef   : > { %v6297_v23 = vadd.f32 %v6296_v34, %v6266_v21 }
 0x8f1   : > { %v6298_v10 = vadd.f32 %v6297_v23, %v6267_v43 }
 0x8f3   : > { %v6299_v61 = vadd.f32 %v6298_v10, %v6268_v7 }
 0x8f5   : > { %v6300_v26 = vadd.f32 %v6299_v61, %v6269_v58 }
 0x8f7   : > { %v6301_v5 = vadd.f32 %v6300_v26, %v6270_v37 }
 0x8f9   : > { %v6302_v14 = vadd.f32 %v6301_v5, %v6271_v16  ;;  %v12687_v5 = vld [vmem:[#allocation9 + $0x40] sm:$0xff]  }
 0x8fa   : > { %11546 = vmatprep.subr.bf16.mxu0 %v12687_v5  ;;  %v12715_v5 = vld [vmem:[#allocation9 + $0xf0] sm:$0xff]  }
 0x8fb   : > { %v6303_v52 = vadd.f32 %v6302_v14, %v6272_v24  ;;  %v12688_v24 = vld [vmem:[#allocation9] sm:$0xff]   ;;  %v12689_v14 = vld [vmem:[#allocation9 + $0x48] sm:$0xff]  }
 0x8fc   : > { %11547 = vmatpush3.bf16.msra.mxu0 %v12688_v24  ;;  %v12716_v24 = vld [vmem:[#allocation9 + $0xb0] sm:$0xff]  }
 0x8fd   : > { %v6304_v45 = vadd.f32 %v6303_v52, %v6273_v17  ;;  %v12697_v17 = vld [vmem:[#allocation9 + $0xc0] sm:$0xff]   ;;  %11548 = vmatprep.subr.bf16.mxu0 %v12689_v14  ;;  %v12699_v52 = vld [vmem:[#allocation9 + $0xc8] sm:$0xff]   ;;  %v12714_v14 = vld [vmem:[#allocation9 + $0x38] sm:$0xff]  }
 0x8ff   : > { %v6305_v51 = vadd.f32 %v6304_v45, %v6274_v38  ;;  %v12692_v38 = vld [vmem:[#allocation9 + $0x10] sm:$0xff]  }
 0x900   : > { %v12703_v45 = vld [vmem:[#allocation9 + $0xd0] sm:$0xff]  }
 0x901   : > { %v6306_v36 = vadd.f32 %v6305_v51, %v6275_v60  ;;  %v12693_v60 = vld [vmem:[#allocation9 + $0x58] sm:$0xff]   ;;  %v12704_v51 = vld [vmem:[#allocation9 + $0x90] sm:$0xff]  }
 0x903   : > { %v6307_v57 = vadd.f32 %v6306_v36, %v6276_v53  ;;  %v12694_v53 = vld [vmem:[#allocation9 + $0x18] sm:$0xff]  }
 0x904   : > { %v12705_v36 = vld [vmem:[#allocation9 + $0xd8] sm:$0xff]  }
 0x905   : > { %v6308_v21 = vadd.f32 %v6307_v57, %v6277_v33  ;;  %v12695_v33 = vld [vmem:[#allocation9 + $0x60] sm:$0xff]   ;;  %v12707_v57 = vld [vmem:[#allocation9 + $0x98] sm:$0xff]  }
 0x907   : > { %v6309_v34 = vadd.f32 %v6308_v21, %v6278_v39  ;;  %v12696_v39 = vld [vmem:[#allocation9 + $0x20] sm:$0xff]  }
 0x908   : > { %v12709_v21 = vld [vmem:[#allocation9 + $0xe0] sm:$0xff]  }
 0x909   : > { %v6310_v43 = vrot.slane %v6309_v34, 4 }
 0x90b   : > { %v6311_v23 = vadd.f32 %v6310_v43, %v6309_v34  ;;  %v12700_v43 = vld [vmem:[#allocation9 + $0x68] sm:$0xff]  }
 0x90d   : > { %v6312_v7 = vrot.slane %v6311_v23, 2 }
 0x90f   : > { %v6313_v10 = vadd.f32 %v6312_v7, %v6311_v23  ;;  %v12710_v7 = vld [vmem:[#allocation9 + $0xa0] sm:$0xff]  }
 0x911   : > { %v6314_v58 = vrot.slane %v6313_v10, 1 }
 0x913   : > { %v6315_v30 = vadd.f32 %v6314_v58, %v6313_v10  ;;  %v12702_v10 = vld [vmem:[#allocation9 + $0x28] sm:$0xff]   ;;  %v12706_v58 = vld [vmem:[#allocation9 + $0x70] sm:$0xff]  }
 0x915   : > { %12225 = vmatmul.mubr.f32.vlgmr.msra.gmra.mrb[164].mxu1 %v6315_v30  ;;  %v12711_v30 = vld [vmem:[#allocation9 + $0xe8] sm:$0xff]  }
 0x916   : > { %12418 = vmatpush3.bf16.msra.mxu1 %v16836_v55  ;;  %12235 = vmatprep.mubr.msk.f32.mxu1 %vm19249_vm12, %v19248_v22  ;;  %v12690_v55 = vld [vmem:[#allocation9 + $0x8] sm:$0xff]   ;;  %v12698_v22 = vld [vmem:[#allocation9 + $0x80] sm:$0xff]  }
 0x917   : > { %12419 = vmatprep.subr.bf16.mxu1 %v19247_v42  ;;  %v12691_v42 = vld [vmem:[#allocation9 + $0x50] sm:$0xff]   ;;  %11549 = vmatpush3.bf16.msra.mxu0 %v12690_v55  ;;  %v12717_v55 = vld [vmem:[#allocation9 + $0xf8] sm:$0xff]  }
 0x918   : > { %11550 = vmatprep.subr.bf16.mxu0 %v12691_v42  ;;  %v12718_v42 = vld [vmem:[#allocation9 + $0xb8] sm:$0xff]  }
 0x91a   : > { %12421 = vmatpush3.bf16.msra.mxu1 %v16848_v3  ;;  %v12701_v3 = vld [vmem:[#allocation9 + $0x88] sm:$0xff]  }
 0x91b   : > { %11658 = vmatprep.subr.bf16.mxu1 %v12697_v17  ;;  %11551 = vmatpush3.bf16.msra.mxu0 %v12692_v38 }
 0x91c   : > { %11552 = vmatprep.subr.bf16.mxu0 %v12693_v60  ;;  %v17077_v60 = vld [vmem:[#allocation7] ss:$0 sm:$0xff] }
 0x91f   : > { %11553 = vmatpush3.bf16.msra.mxu0 %v12694_v53 }
 0x920   : > { %11554 = vmatprep.subr.bf16.mxu0 %v12695_v33 }
 0x923   : > { %11555 = vmatpush3.bf16.msra.mxu0 %v12696_v39 }
 0x924   : > { %11556 = vmatprep.subr.bf16.mxu0 %v12700_v43 }
 0x927   : > { %11557 = vmatpush3.bf16.msra.mxu0 %v12702_v10 }
 0x928   : > { %11558 = vmatprep.subr.bf16.mxu0 %v12706_v58 }
 0x9e8   : > { %v6382_v19 = vpop.f32.mrb[164].mxu1 }
 0x9e9   : > { %v6386_v61 = vmul.f32 0.0009765625, %v6382_v19  ;;  %v12226_v37 = vpop.f32.mrb[165].mxu1  ;;  %v6007_v19 = vld [vmem:[#allocation4] sm:$0x1] }
 0x9ea   : > { %v12708_v37 = vld [vmem:[#allocation9 + $0x30] sm:$0xff]  }
 0x9eb   : > { %v6387_v26 = vadd.f32 1e-05, %v6386_v61  ;;  %v12713_v61 = vld [vmem:[#allocation9 + $0xa8] sm:$0xff]   ;;  %11559 = vmatpush3.bf16.msra.mxu0 %v12708_v37 }
 0x9ed   : > { %12909 = vrsqrt.f32 %v6387_v26  ;;  %v12712_v26 = vld [vmem:[#allocation9 + $0x78] sm:$0xff]  }
 0x9ee   : > { %11560 = vmatprep.subr.bf16.mxu0 %v12712_v26 }
 0x9ef   : > { %11561 = vmatpush3.bf16.msra.mxu0 %v12714_v14 }
 0x9f7   : > { %v12910_v16 = vpop.eup %12909 }
 0x9f8   : > { %12236 = vmatmul.mubr.msk.f32.vlgmr.msra.gmra.mrb[166].mxu1 %vm19274_vm3, %v12910_v16 }
 0x9f9   : > { %11659 = vmatpush3.bf16.msra.mxu1 %v12698_v22  ;;  %v12719_v22 = vld [vmem:[#allocation9 + $0x140] sm:$0xff]  }
 0x9fa   : > { %11660 = vmatprep.subr.bf16.mxu1 %v12699_v52  ;;  %11770 = vmatprep.subr.bf16.mxu0 %v12719_v22 }
 0x9fd   : > { %11661 = vmatpush3.bf16.msra.mxu1 %v12701_v3 }
 0x9fe   : > { %11662 = vmatprep.subr.bf16.mxu1 %v12703_v45 }
 0xa01   : > { %11663 = vmatpush3.bf16.msra.mxu1 %v12704_v51 }
 0xa02   : > { %11664 = vmatprep.subr.bf16.mxu1 %v12705_v36 }
 0xa05   : > { %11665 = vmatpush3.bf16.msra.mxu1 %v12707_v57 }
 0xa06   : > { %11666 = vmatprep.subr.bf16.mxu1 %v12709_v21 }
 0xa09   : > { %11667 = vmatpush3.bf16.msra.mxu1 %v12710_v7 }
 0xa0a   : > { %11668 = vmatprep.subr.bf16.mxu1 %v12711_v30 }
 0xa0d   : > { %11669 = vmatpush3.bf16.msra.mxu1 %v12713_v61 }
 0xa0e   : > { %11670 = vmatprep.subr.bf16.mxu1 %v12715_v5 }
 0xa11   : > { %11671 = vmatpush3.bf16.msra.mxu1 %v12716_v24 }
 0xa12   : > { %11672 = vmatprep.subr.bf16.mxu1 %v12717_v55 }
 0xa15   : > { %11673 = vmatpush3.bf16.msra.mxu1 %v12718_v42 }
 0xacb   : > { %v6458_v34 = vpop.f32.mrb[166].mxu1 }
 0xacc   : > { %v12237_v23 = vpop.f32.mrb[167].mxu1  ;;  %v6462_v16 = vmul.f32 %v6458_v34, %v6007_v19 }
 0xace   : > { %v6466_v17 = vrot.slane %v6462_v16, %v19268_v48 }
 0xad0   : > { %v6467_v52 = vmul.f32 %v6466_v17, %v16876_v54  ;;  %v6468_v3 = vmul.f32 %v6466_v17, %v16880_v59  ;;  %v6469_v38 = vmul.f32 %v6466_v17, %v16884_v28  ;;  %v6470_v45 = vmul.f32 %v6466_v17, %v16892_v9 }
 0xad1   : > { %v6471_v51 = vmul.f32 %v6466_v17, %v16896_v44  ;;  %v6472_v48 = vmul.f32 %v6466_v17, %v16902_v46  ;;  %v6473_v53 = vmul.f32 %v6466_v17, %v16908_v25  ;;  %v6474_v36 = vmul.f32 %v6466_v17, %v16914_v41 }
 0xad2   : > { %v6475_v54 = vmul.f32 %v6466_v17, %v16920_v8  ;;  %v6476_v59 = vmul.f32 %v6466_v17, %v16926_v27  ;;  %v6477_v28 = vmul.f32 %v6466_v17, %v16932_v31  ;;  %v6478_v9 = vmul.f32 %v6466_v17, %v16938_v56 }
 0xad3   : > { %v6479_v33 = vmul.f32 %v6466_v17, %v16944_v11  ;;  %v6480_v57 = vmul.f32 %v6466_v17, %v16950_v20  ;;  %v6481_v44 = vmul.f32 %v6466_v17, %v16956_v1  ;;  %v6482_v46 = vmul.f32 %v6466_v17, %v16962_v12 }
 0xad4   : > { %v6483_v25 = vmul.f32 %v6466_v17, %v16968_v47  ;;  %v17093_v41 = vadd.f32 %v17077_v60, %v6467_v52  ;;  %v17096_v8 = vadd.f32 %v17077_v60, %v6468_v3  ;;  %v17099_v27 = vadd.f32 %v17077_v60, %v6469_v38 }
 0xad5   : > { %v6484_v31 = vmul.f32 %v6466_v17, %v16974_v0  ;;  %v6485_v56 = vmul.f32 %v6466_v17, %v16980_v35  ;;  %v6486_v11 = vmul.f32 %v6466_v17, %v16986_v13  ;;  %v17105_v20 = vadd.f32 %v17077_v60, %v6470_v45 }
 0xad6   : > { %v17108_v1 = vmul.f32 %v6466_v17, %v16992_v49  ;;  %v17111_v12 = vmul.f32 %v6466_v17, %v16998_v32  ;;  %v17114_v47 = vmul.f32 %v6466_v17, %v17004_v4  ;;  %v17117_v39 = vadd.f32 %v17077_v60, %v6471_v51 }
 0xad7   : > { %v17120_v0 = vmul.f32 %v6466_v17, %v17010_v2  ;;  %v17123_v35 = vmul.f32 %v6466_v17, %v17016_v63  ;;  %v17126_v13 = vadd.f32 %v17077_v60, %v6472_v48  ;;  %v17129_v49 = vadd.f32 %v17077_v60, %v6473_v53 }
 0xad8   : > { %v17132_v32 = vmul.f32 %v6466_v17, %v17022_v40  ;;  %v6537_v4 = vsub.f32 0.0, %v17093_v41  ;;  %v6538_v21 = vsub.f32 0.0, %v17096_v8  ;;  %v6539_v34 = vsub.f32 0.0, %v17099_v27 }
 0xad9   : > { %v17138_v2 = vmul.f32 %v6466_v17, %v17028_v50  ;;  %v17141_v63 = vmul.f32 %v6466_v17, %v17034_v18  ;;  %v17144_v43 = vadd.f32 %v17077_v60, %v6474_v36  ;;  %v6540_v23 = vsub.f32 0.0, %v17105_v20 }
 0xada   : > { %v17148_v40 = vmul.f32 %v6466_v17, %v17040_v15  ;;  %v17151_v7 = vmul.f32 %v6466_v17, %v17046_v6  ;;  %v17154_v10 = vadd.f32 %v17077_v60, %v6475_v54  ;;  %v6541_v50 = vsub.f32 0.0, %v17117_v39 }
 0xadb   : > { %v17158_v58 = vmul.f32 %v6466_v17, %v17052_v62  ;;  %v17161_v18 = vadd.f32 %v17077_v60, %v6476_v59  ;;  %v6542_v30 = vsub.f32 0.0, %v17126_v13  ;;  %v6543_v19 = vsub.f32 0.0, %v17129_v49 }
 0xadc   : > { %v17166_v15 = vadd.f32 %v17077_v60, %v6477_v28  ;;  %v6569_v6 = vmul.f32 1.442695, %v6537_v4  ;;  %v6571_v61 = vmul.f32 1.442695, %v6538_v21  ;;  %v6573_v37 = vmul.f32 1.442695, %v6539_v34 }
 0xadd   : > { %v17169_v26 = vmul.f32 %v6466_v17, %v17058_v29  ;;  %v17172_v16 = vadd.f32 %v17077_v60, %v6478_v9  ;;  %v6544_v62 = vsub.f32 0.0, %v17144_v43  ;;  %v6575_v5 = vmul.f32 1.442695, %v6540_v23 }
 0xade   : > { %v17176_v24 = vadd.f32 %v17077_v60, %v6479_v33  ;;  %v6545_v14 = vsub.f32 0.0, %v17154_v10  ;;  %12911 = vpow2.f32 %v6569_v6  ;;  %v6577_v55 = vmul.f32 1.442695, %v6541_v50 }
 0xadf   : > { %v17180_v22 = vadd.f32 %v17077_v60, %v6480_v57  ;;  %v6546_v42 = vsub.f32 0.0, %v17161_v18  ;;  %12913 = vpow2.f32 %v6571_v61  ;;  %v6579_v29 = vmul.f32 1.442695, %v6542_v30 }
 0xae0   : > { %v17184_v17 = vadd.f32 %v17077_v60, %v6481_v44  ;;  %v6547_v52 = vsub.f32 0.0, %v17166_v15  ;;  %12915 = vpow2.f32 %v6573_v37  ;;  %v6581_v3 = vmul.f32 1.442695, %v6543_v19 }
 0xae1   : > { %v17188_v38 = vadd.f32 %v17077_v60, %v6482_v46  ;;  %v6548_v45 = vsub.f32 0.0, %v17172_v16  ;;  %12917 = vpow2.f32 %v6575_v5  ;;  %v6583_v51 = vmul.f32 1.442695, %v6544_v62 }
 0xae2   : > { %v17192_v48 = vadd.f32 %v17077_v60, %v6483_v25  ;;  %v6549_v53 = vsub.f32 0.0, %v17176_v24  ;;  %12919 = vpow2.f32 %v6577_v55  ;;  %v6585_v36 = vmul.f32 1.442695, %v6545_v14 }
 0xae3   : > { %v17196_v54 = vadd.f32 %v17077_v60, %v6484_v31  ;;  %v6550_v59 = vsub.f32 0.0, %v17180_v22  ;;  %12921 = vpow2.f32 %v6579_v29  ;;  %v6587_v28 = vmul.f32 1.442695, %v6546_v42 }
 0xae4   : > { %v17200_v9 = vadd.f32 %v17077_v60, %v6485_v56  ;;  %v6551_v33 = vsub.f32 0.0, %v17184_v17  ;;  %12923 = vpow2.f32 %v6581_v3  ;;  %v6589_v57 = vmul.f32 1.442695, %v6547_v52 }
 0xae5   : > { %v17204_v44 = vadd.f32 %v17077_v60, %v6486_v11  ;;  %v6552_v46 = vsub.f32 0.0, %v17188_v38  ;;  %12925 = vpow2.f32 %v6583_v51  ;;  %v6591_v25 = vmul.f32 1.442695, %v6548_v45 }
 0xae6   : > { %v17209_v31 = vadd.f32 %v17077_v60, %v17108_v1  ;;  %v6553_v4 = vsub.f32 0.0, %v17192_v48  ;;  %12927 = vpow2.f32 %v6585_v36  ;;  %v6593_v56 = vmul.f32 1.442695, %v6549_v53 }
 0xae7   : > { %v17214_v21 = vadd.f32 %v17077_v60, %v17111_v12  ;;  %v6554_v34 = vsub.f32 0.0, %v17196_v54  ;;  %12929 = vpow2.f32 %v6587_v28  ;;  %v6595_v11 = vmul.f32 1.442695, %v6550_v59 }
 0xae8   : > { %v17217_v23 = vpop.eup %12911  ;;  %v17221_v50 = vadd.f32 %v17077_v60, %v17114_v47  ;;  %v6555_v1 = vsub.f32 0.0, %v17200_v9  ;;  %12931 = vpow2.f32 %v6589_v57  ;;  %v6597_v30 = vmul.f32 1.442695, %v6551_v33 }
 0xae9   : > { %v17224_v19 = vpop.eup %12913  ;;  %v17228_v12 = vadd.f32 %v17077_v60, %v17120_v0  ;;  %v6556_v6 = vsub.f32 0.0, %v17204_v44  ;;  %12933 = vpow2.f32 %v6591_v25  ;;  %v6599_v61 = vmul.f32 1.442695, %v6552_v46 }
 0xaea   : > { %v17231_v37 = vpop.eup %12915  ;;  %v17235_v47 = vadd.f32 %v17077_v60, %v17123_v35  ;;  %v6557_v62 = vsub.f32 0.0, %v17209_v31  ;;  %12935 = vpow2.f32 %v6593_v56  ;;  %v6601_v5 = vmul.f32 1.442695, %v6553_v4 }
 0xaeb   : > { %v17238_v14 = vpop.eup %12917  ;;  %v17242_v0 = vadd.f32 %v17077_v60, %v17132_v32  ;;  %v6558_v55 = vsub.f32 0.0, %v17214_v21  ;;  %12937 = vpow2.f32 %v6595_v11  ;;  %v6603_v42 = vmul.f32 1.442695, %v6554_v34 }
 0xaec   : > { %v17245_v29 = vpop.eup %12919  ;;  %v17249_v35 = vadd.f32 %v17077_v60, %v17138_v2  ;;  %v6559_v52 = vsub.f32 0.0, %v17221_v50  ;;  %12939 = vpow2.f32 %v6597_v30  ;;  %v6605_v3 = vmul.f32 1.442695, %v6555_v1 }
 0xaed   : > { %19275 = vst [vmem:[#allocation49_spill] sm:$0xff] %v17242_v0  ;;  %v17252_v45 = vpop.eup %12921  ;;  %v17256_v32 = vadd.f32 %v17077_v60, %v17141_v63  ;;  %v6560_v51 = vsub.f32 0.0, %v17228_v12  ;;  %12941 = vpow2.f32 %v6599_v61  ;;  %v6607_v53 = vmul.f32 1.442695, %v6556_v6 }
 0xaee   : > { %19276 = vst [vmem:[#allocation57_spill] sm:$0xff] %v17249_v35  ;;  %v17259_v36 = vpop.eup %12923  ;;  %v17263_v2 = vadd.f32 %v17077_v60, %v17148_v40  ;;  %v6561_v59 = vsub.f32 0.0, %v17235_v47  ;;  %12943 = vpow2.f32 %v6601_v5  ;;  %v6609_v28 = vmul.f32 1.442695, %v6557_v62 }
 0xaef   : > { %19277 = vst [vmem:[#allocation58_spill] sm:$0xff] %v17256_v32  ;;  %v17266_v33 = vpop.eup %12925  ;;  %v17270_v63 = vadd.f32 %v17077_v60, %v17151_v7  ;;  %v6562_v57 = vsub.f32 0.0, %v17242_v0  ;;  %12945 = vpow2.f32 %v6603_v42  ;;  %v6611_v46 = vmul.f32 1.442695, %v6558_v55 }
 0xaf0   : > { %19278 = vst [vmem:[#allocation59_spill] sm:$0xff] %v17263_v2  ;;  %v17273_v25 = vpop.eup %12927  ;;  %v17277_v40 = vadd.f32 %v17077_v60, %v17158_v58  ;;  %v6563_v4 = vsub.f32 0.0, %v17249_v35  ;;  %12947 = vpow2.f32 %v6605_v3  ;;  %v6613_v56 = vmul.f32 1.442695, %v6559_v52 }
 0xaf1   : > { %19279 = vst [vmem:[#allocation60_spill] sm:$0xff] %v17270_v63  ;;  %v17280_v34 = vpop.eup %12929  ;;  %v17284_v7 = vadd.f32 %v17077_v60, %v17169_v26  ;;  %v6564_v11 = vsub.f32 0.0, %v17256_v32  ;;  %12949 = vpow2.f32 %v6607_v53  ;;  %v6615_v1 = vmul.f32 1.442695, %v6560_v51 }
 0xaf2   : > { %19280 = vst [vmem:[#allocation61_spill] sm:$0xff] %v17277_v40  ;;  %v17287_v30 = vpop.eup %12931  ;;  %v6565_v6 = vsub.f32 0.0, %v17263_v2  ;;  %12951 = vpow2.f32 %v6609_v28  ;;  %v6617_v58 = vmul.f32 1.442695, %v6561_v59  ;;  %v6566_v62 = vsub.f32 0.0, %v17270_v63 }
 0xaf3   : > { %19281 = vst [vmem:[#allocation24_spill] sm:$0xff] %v17284_v7  ;;  %v17290_v61 = vpop.eup %12933  ;;  %12953 = vpow2.f32 %v6611_v46  ;;  %v6619_v5 = vmul.f32 1.442695, %v6562_v57  ;;  %v6567_v60 = vsub.f32 0.0, %v17277_v40  ;;  %v6621_v26 = vmul.f32 1.442695, %v6563_v4 }
 0xaf4   : > { %v17293_v55 = vpop.eup %12935  ;;  %12955 = vpow2.f32 %v6613_v56  ;;  %v6568_v52 = vsub.f32 0.0, %v17284_v7  ;;  %v6623_v3 = vmul.f32 1.442695, %v6564_v11  ;;  %v6625_v53 = vmul.f32 1.442695, %v6565_v6 }
 0xaf5   : > { %v17296_v42 = vpop.eup %12937  ;;  %12957 = vpow2.f32 %v6615_v1  ;;  %v6627_v28 = vmul.f32 1.442695, %v6566_v62  ;;  %v6827_v57 = vld [vmem:[#allocation2] sm:$0xf8]  ;;  %v6629_v56 = vmul.f32 1.442695, %v6567_v60 }
 0xaf6   : > { %v17299_v51 = vpop.eup %12939  ;;  %12959 = vpow2.f32 %v6617_v58  ;;  %v7144_v4 = vld [vmem:[#allocation2] sm:$0xf0]  ;;  %v6631_v63 = vmul.f32 1.442695, %v6568_v52  ;;  %v6633_v11 = vadd.f32 1.0, %v17217_v23  ;;  %v6634_v62 = vadd.f32 1.0, %v17224_v19 }
 0xaf7   : > { %v17301_v59 = vpop.eup %12941  ;;  %12961 = vpow2.f32 %v6619_v5  ;;  %v19282_v1 = vld [vmem:[#allocation26_spill] sm:$0xff]  ;;  %v7161_v2 = vsel %vm3149_vm5, %v7144_v4, 0  ;;  %v6635_v60 = vadd.f32 1.0, %v17231_v37  ;;  %v6636_v52 = vadd.f32 1.0, %v17238_v14 }
 0xaf8   : > { %v17303_v46 = vpop.eup %12943  ;;  %12963 = vpow2.f32 %v6621_v26  ;;  %vm19283_vm12 = vcmp.ne.s16.totalorder %v19282_v1, 0  ;;  %v7182_v35 = vshll.u32 %v7161_v2, 16  ;;  %v6638_v5 = vadd.f32 1.0, %v17252_v45 }
 0xaf9   : > { %v12946_v40 = vpop.eup %12945  ;;  %12965 = vpow2.f32 %v6623_v3  ;;  %v6844_v6 = vsel %vm19283_vm12, %v6827_v57, 0  ;;  %v6637_v57 = vadd.f32 1.0, %v17245_v29 }
 0xafa   : > { %v12948_v7 = vpop.eup %12947  ;;  %12967 = vpow2.f32 %v6625_v53  ;;  %v6862_v53 = vshrl.u32 %v6844_v6, 16  ;;  %v6865_v23 = vshll.u32 %v6844_v6, 16  ;;  %v6650_v0 = vadd.f32 1.0, %v12946_v40 }
 0xafb   : > { %v12950_v58 = vpop.eup %12949  ;;  %12969 = vpow2.f32 %v6627_v28  ;;  %v7179_v28 = vshrl.u32 %v7161_v2, 16  ;;  %v17322_v2 = vld [vmem:[#allocation2] sm:$0xf0] }
 0xafc   : > { %v12952_v26 = vpop.eup %12951  ;;  %12971 = vpow2.f32 %v6629_v56  ;;  %v6639_v56 = vadd.f32 1.0, %v17259_v36  ;;  %v17317_v14 = vrot.slane %v6862_v53, 3  ;;  %v17319_v6 = vrot.slane %v6865_v23, 4 }
 0xafd   : > { %v12954_v3 = vpop.eup %12953  ;;  %12973 = vpow2.f32 %v6631_v63  ;;  %v6640_v63 = vadd.f32 1.0, %v17266_v33  ;;  %v17324_v45 = vrot.slane %v7179_v28, 4  ;;  %v6644_v23 = vadd.f32 1.0, %v17290_v61 }
 0xafe   : > { %v12956_v32 = vpop.eup %12955  ;;  %12975 = vrcp.f32 %v6633_v11  ;;  %19285 = vst [vmem:[#allocation63_spill] sm:$0xff] %v17317_v14  ;;  %v6641_v11 = vadd.f32 1.0, %v17273_v25  ;;  %v6645_v28 = vadd.f32 1.0, %v17293_v55  ;;  %v6648_v61 = vadd.f32 1.0, %v17301_v59 }
 0xaff   : > { %v12958_v19 = vpop.eup %12957  ;;  %12977 = vrcp.f32 %v6634_v62  ;;  %19286 = vst [vmem:[#allocation62_spill] sm:$0xff] %v17324_v45  ;;  %v17326_v62 = vrot.slane %v7182_v35, 5  ;;  %v6649_v25 = vadd.f32 1.0, %v17303_v46  ;;  %v6651_v55 = vadd.f32 1.0, %v12948_v7 }
 0xb00   : > { %v12960_v4 = vpop.eup %12959  ;;  %12979 = vrcp.f32 %v6635_v60  ;;  %v6642_v60 = vadd.f32 1.0, %v17280_v34  ;;  %v6652_v1 = vadd.f32 1.0, %v12950_v58  ;;  %v6653_v35 = vadd.f32 1.0, %v12952_v26 }
 0xb01   : > { %v12962_v37 = vpop.eup %12961  ;;  %12981 = vrcp.f32 %v6636_v52  ;;  %19287 = vst [vmem:[#allocation64_spill] sm:$0xff] %v17326_v62  ;;  %v6643_v52 = vadd.f32 1.0, %v17287_v30  ;;  %v6646_v30 = vadd.f32 1.0, %v17296_v42  ;;  %v6654_v62 = vadd.f32 1.0, %v12954_v3 }
 0xb02   : > { %v12964_v29 = vpop.eup %12963  ;;  %12983 = vrcp.f32 %v6637_v57  ;;  %v6655_v42 = vadd.f32 1.0, %v12956_v32  ;;  %v6657_v14 = vadd.f32 1.0, %v12960_v4  ;;  %v6658_v46 = vadd.f32 1.0, %v12962_v37 }
 0xb03   : > { %v12966_v36 = vpop.eup %12965  ;;  %12985 = vrcp.f32 %v6638_v5 }
 0xb04   : > { %v12968_v33 = vpop.eup %12967  ;;  %12987 = vrcp.f32 %v6639_v56  ;;  %v6647_v56 = vadd.f32 1.0, %v17299_v51 }
 0xb05   : > { %v12970_v53 = vpop.eup %12969  ;;  %12989 = vrcp.f32 %v6640_v63 }
 0xb06   : > { %v12972_v57 = vpop.eup %12971  ;;  %12991 = vrcp.f32 %v6641_v11  ;;  %v17349_v37 = vadd.f32 1.0, %v12970_v53 }
 0xb07   : > { %v12974_v5 = vpop.eup %12973  ;;  %12993 = vrcp.f32 %v6642_v60  ;;  %v6656_v60 = vadd.f32 1.0, %v12958_v19 }
 0xb08   : > { %v12976_v63 = vpop.eup %12975  ;;  %12995 = vrcp.f32 %v6643_v52 }
 0xb09   : > { %v12978_v11 = vpop.eup %12977  ;;  %12997 = vrcp.f32 %v6644_v23  ;;  %v6697_v34 = vmul.f32 %v12976_v63, %v17093_v41  ;;  %v6659_v41 = vadd.f32 1.0, %v12964_v29  ;;  %v17345_v23 = vadd.f32 1.0, %v12966_v36 }
 0xb0a   : > { %v12980_v45 = vpop.eup %12979  ;;  %12999 = vrcp.f32 %v6645_v28  ;;  %v6698_v51 = vmul.f32 %v12978_v11, %v17096_v8 }
 0xb0b   : > { %v12982_v59 = vpop.eup %12981  ;;  %13001 = vrcp.f32 %v6646_v30  ;;  %v6699_v40 = vmul.f32 %v12980_v45, %v17099_v27  ;;  %v6661_v45 = vadd.f32 1.0, %v12968_v33 }
 0xb0c   : > { %v12984_v7 = vpop.eup %12983  ;;  %13003 = vrcp.f32 %v6647_v56  ;;  %v6700_v58 = vmul.f32 %v12982_v59, %v17105_v20  ;;  %v6730_v26 = vpack.c.bf16 %v6698_v51, %v6697_v34 }
 0xb0d   : > { %v12986_v52 = vpop.eup %12985  ;;  %13005 = vrcp.f32 %v6648_v61  ;;  %v6701_v32 = vmul.f32 %v12984_v7, %v17117_v39 }
 0xb0e   : > { %v12988_v8 = vpop.eup %12987  ;;  %13007 = vrcp.f32 %v6649_v25  ;;  %v6702_v3 = vmul.f32 %v12986_v52, %v17126_v13  ;;  %v6731_v19 = vpack.c.bf16 %v6700_v58, %v6699_v40  ;;  %v6762_v4 = vrot.slane %v6730_v26, 4 }
 0xb0f   : > { %v12990_v27 = vpop.eup %12989  ;;  %13009 = vrcp.f32 %v6650_v0  ;;  %v6703_v20 = vmul.f32 %v12988_v8, %v17129_v49  ;;  %v17353_v25 = vadd.f32 1.0, %v12972_v57  ;;  %v17355_v13 = vadd.f32 1.0, %v12974_v5 }
 0xb10   : > { %v12992_v28 = vpop.eup %12991  ;;  %13011 = vrcp.f32 %v6651_v55  ;;  %v6704_v29 = vmul.f32 %v12990_v27, %v17144_v43  ;;  %v6732_v36 = vpack.c.bf16 %v6702_v3, %v6701_v32  ;;  %v6763_v34 = vrot.slane %v6731_v19, 4  ;;  %6810 = vst [vmem:[#allocation2 + $0x8] sm:$0xf0] %v6762_v4  ;;  %v12733_v43 = vld [vmem:[#allocation9 + $0x1c0] sm:$0xff]  }
 0xb11   : > { %v12994_v39 = vpop.eup %12993  ;;  %13013 = vrcp.f32 %v6652_v1  ;;  %v6705_v33 = vmul.f32 %v12992_v28, %v17154_v10  ;;  %11882 = vmatprep.subr.bf16.mxu1 %v12733_v43  ;;  %v19290_v27 = vrot.slane %v17322_v2, 4 }
 0xb12   : > { %v12996_v53 = vpop.eup %12995  ;;  %13015 = vrcp.f32 %v6653_v35  ;;  %v6706_v0 = vmul.f32 %v12994_v39, %v17161_v18  ;;  %v6733_v49 = vpack.c.bf16 %v6704_v29, %v6703_v20  ;;  %v17360_v30 = vsel %vm1945_vm4, %v6762_v4, %v6763_v34 }
 0xb13   : > { %v12998_v56 = vpop.eup %12997  ;;  %13017 = vrcp.f32 %v6654_v62  ;;  %v6707_v61 = vmul.f32 %v12996_v53, %v17166_v15  ;;  %v6765_v57 = vrot.slane %v6732_v36, 4  ;;  %6811 = vst [vmem:[#allocation2 + $0x10] sm:$0xff] %v17360_v30  ;;  %v7082_v1 = vrot.slane %v17360_v30, 4  ;;  %v19288_v15 = vld [vmem:[#allocation31_spill] sm:$0xff] }
 0xb14   : > { %v13000_v5 = vpop.eup %12999  ;;  %13019 = vrcp.f32 %v6655_v42  ;;  %v6708_v10 = vmul.f32 %v12998_v56, %v17172_v16  ;;  %v6734_v35 = vpack.c.bf16 %v6706_v0, %v6705_v33  ;;  %v6767_v18 = vrot.slane %v6733_v49, 4 }
 0xb15   : > { %v13002_v63 = vpop.eup %13001  ;;  %13021 = vrcp.f32 %v6656_v60  ;;  %v6709_v55 = vmul.f32 %v13000_v5, %v17176_v24  ;;  %v17368_v62 = vsel %vm1945_vm4, %v6763_v34, %v6765_v57  ;;  %vm19289_vm6 = vcmp.ne.s16.totalorder %v19288_v15, 0 }
 0xb16   : > { %v17373_v11 = vsel %vm19289_vm6, %v17360_v30, 0  ;;  %v13004_v51 = vpop.eup %13003  ;;  %13023 = vrcp.f32 %v6657_v14  ;;  %v6710_v42 = vmul.f32 %v13002_v63, %v17180_v22  ;;  %v6735_v16 = vpack.c.bf16 %v6708_v10, %v6707_v61  ;;  %6812 = vst [vmem:[#allocation2 + $0x18] sm:$0xff] %v17368_v62  ;;  %vm19291_vm3 = vmmov %vm19289_vm6  ;;  %v19292_v63 = vld [vmem:[#allocation26_spill] sm:$0xff] }
 0xb17   : > { %v17377_v59 = vsel %vm1945_vm4, %v6765_v57, %v6767_v18  ;;  %v13006_v60 = vpop.eup %13005  ;;  %13025 = vrcp.f32 %v6658_v46  ;;  %v6711_v24 = vmul.f32 %v13004_v51, %v17184_v17  ;;  %v6769_v40 = vrot.slane %v6734_v35, 4  ;;  %v17382_v7 = vld [vmem:[#allocation2 + $0x8] sm:$0xff] }
 0xb18   : > { %6813 = vst [vmem:[#allocation2 + $0x20] sm:$0xff] %v17377_v59  ;;  %v7405_v58 = vshrl.u32 %v17373_v11, 16  ;;  %v13008_v14 = vpop.eup %13007  ;;  %13027 = vrcp.f32 %v6659_v41  ;;  %v6712_v22 = vmul.f32 %v13006_v60, %v17188_v38  ;;  %v6736_v26 = vpack.c.bf16 %v6710_v42, %v6709_v55  ;;  %v19293_v42 = vld [vmem:[#allocation49_spill] sm:$0xff] }
 0xb19   : > { %v6771_v52 = vrot.slane %v6735_v16, 4  ;;  %v13010_v32 = vpop.eup %13009  ;;  %13029 = vrcp.f32 %v17345_v23  ;;  %v6713_v46 = vmul.f32 %v13008_v14, %v17192_v48  ;;  %v17389_v17 = vsel %vm1945_vm4, %v6767_v18, %v6769_v40  ;;  %v19294_v14 = vld [vmem:[#allocation57_spill] sm:$0xff] }
 0xb1a   : > { %v7080_v8 = vrot.slane %v17382_v7, 4  ;;  %v13012_v3 = vpop.eup %13011  ;;  %13031 = vrcp.f32 %v6661_v45  ;;  %v6714_v19 = vmul.f32 %v13010_v32, %v17196_v54  ;;  %v6737_v4 = vpack.c.bf16 %v6712_v22, %v6711_v24  ;;  %6814 = vst [vmem:[#allocation2 + $0x28] sm:$0xff] %v17389_v17 }
 0xb1b   : > { %v17394_v41 = vsel %vm1945_vm4, %v6769_v40, %v6771_v52  ;;  %v13014_v38 = vpop.eup %13013  ;;  %13033 = vrcp.f32 %v17349_v37  ;;  %v6715_v48 = vmul.f32 %v13012_v3, %v17200_v9  ;;  %v6773_v23 = vrot.slane %v6736_v26, 4  ;;  %v12720_v26 = vld [vmem:[#allocation9 + $0x100] sm:$0xff]  }
 0xb1c   : > { %6815 = vst [vmem:[#allocation2 + $0x30] sm:$0xff] %v17394_v41  ;;  %v7081_v45 = vsel %vm1945_vm4, %v19290_v27, %v7080_v8  ;;  %v13016_v20 = vpop.eup %13015  ;;  %13035 = vrcp.f32 %v17353_v25  ;;  %v6716_v54 = vmul.f32 %v13014_v38, %v17204_v44  ;;  %v6738_v28 = vpack.c.bf16 %v6714_v19, %v6713_v46  ;;  %v19296_v27 = vld [vmem:[#allocation59_spill] sm:$0xff] }
 0xb1d   : > { %v6775_v29 = vrot.slane %v6737_v4, 4  ;;  %7128 = vst [vmem:[#allocation3 + $0x8] sm:$0xff] %v7081_v45  ;;  %9190 = vmatprep.mubr.bf16.mxu0 %v7081_v45  ;;  %v13018_v36 = vpop.eup %13017  ;;  %13037 = vrcp.f32 %v17355_v13  ;;  %v6717_v9 = vmul.f32 %v13016_v20, %v17209_v31  ;;  %v17408_v37 = vsel %vm1945_vm4, %v6771_v52, %v6773_v23  ;;  %v7362_v13 = vld [vmem:[#allocation2 + $0x8] sm:$0xf8] }
 0xb1e   : > { %v6845_v2 = vsel %vm19291_vm3, %v17382_v7, 0  ;;  %v13020_v34 = vpop.eup %13019  ;;  %v6718_v39 = vmul.f32 %v13018_v36, %v17214_v21  ;;  %v6739_v44 = vpack.c.bf16 %v6716_v54, %v6715_v48  ;;  %v6777_v33 = vrot.slane %v6738_v28, 4  ;;  %6816 = vst [vmem:[#allocation2 + $0x38] sm:$0xff] %v17408_v37  ;;  %v12721_v48 = vld [vmem:[#allocation9 + $0x148] sm:$0xff]   ;;  %v19297_v20 = vld [vmem:[#allocation63_spill] sm:$0xff] }
 0xb1f   : > { %v17415_v25 = vsel %vm1945_vm4, %v6773_v23, %v6775_v29  ;;  %v13022_v53 = vpop.eup %13021  ;;  %v6719_v31 = vmul.f32 %v13020_v34, %v17221_v50  ;;  %v6870_v0 = vshrl.u32 %v6845_v2, 16  ;;  %v6873_v49 = vshll.u32 %v6845_v2, 16  ;;  %v19299_v2 = vld [vmem:[#allocation60_spill] sm:$0xff] }
 0xb20   : > { %6817 = vst [vmem:[#allocation2 + $0x40] sm:$0xff] %v17415_v25  ;;  %v7083_v43 = vsel %vm1945_vm4, %v7080_v8, %v7082_v1  ;;  %v13024_v21 = vpop.eup %13023  ;;  %v6720_v56 = vmul.f32 %v13022_v53, %v17228_v12  ;;  %v6740_v61 = vpack.c.bf16 %v6718_v39, %v6717_v9  ;;  %v17425_v57 = vsel %vm1945_vm4, %v6775_v29, %v6777_v33  ;;  %v19295_v8 = vld [vmem:[#allocation58_spill] sm:$0xff]  ;;  %v19300_v53 = vld [vmem:[#allocation61_spill] sm:$0xff] }
 0xb21   : > { %v6779_v5 = vrot.slane %v6739_v44, 4  ;;  %7129 = vst [vmem:[#allocation3 + $0x50] sm:$0xff] %v7083_v43  ;;  %v13026_v10 = vpop.eup %13025  ;;  %v6721_v50 = vmul.f32 %v13024_v21, %v17235_v47  ;;  %6818 = vst [vmem:[#allocation2 + $0x48] sm:$0xff] %v17425_v57  ;;  %v6872_v35 = vrot.slane %v6870_v0, 3  ;;  %v6875_v18 = vrot.slane %v6873_v49, 4  ;;  %v12722_v21 = vld [vmem:[#allocation9 + $0x108] sm:$0xff]  }
 0xb22   : > { %v7379_v55 = vsel %vm19283_vm12, %v7362_v13, 0  ;;  %v13028_v51 = vpop.eup %13027  ;;  %v6722_v16 = vmul.f32 %v13026_v10, %v19293_v42  ;;  %v6741_v12 = vpack.c.bf16 %v6720_v56, %v6719_v31  ;;  %v6781_v24 = vrot.slane %v6740_v61, 4  ;;  %v19301_v56 = vld [vmem:[#allocation24_spill] sm:$0xff] }
 0xb23   : > { %v17433_v60 = vsel %vm1945_vm4, %v6777_v33, %v6779_v5  ;;  %v13030_v40 = vpop.eup %13029  ;;  %v6723_v22 = vmul.f32 %v13028_v51, %v19294_v14  ;;  %v17437_v47 = vor.u32 %v6875_v18, %v6872_v35  ;;  %v7397_v52 = vshrl.u32 %v7379_v55, 16  ;;  %v12723_v35 = vld [vmem:[#allocation9 + $0x150] sm:$0xff]   ;;  %v19303_v51 = vld [vmem:[#allocation34_spill] sm:$0xff] }
 0xb24   : > { %6819 = vst [vmem:[#allocation2 + $0x50] sm:$0xff] %v17433_v60  ;;  %v7400_v32 = vshll.u32 %v7379_v55, 16  ;;  %v13032_v46 = vpop.eup %13031  ;;  %v6724_v3 = vmul.f32 %v13030_v40, %v19295_v8  ;;  %v6742_v19 = vpack.c.bf16 %v6722_v16, %v6721_v50  ;;  %v6782_v4 = vsel %vm1945_vm4, %v6779_v5, %v6781_v24 }
 0xb25   : > { %v6783_v38 = vrot.slane %v6741_v12, 4  ;;  %v13034_v23 = vpop.eup %13033  ;;  %v6725_v45 = vmul.f32 %v13032_v46, %v19296_v27  ;;  %6820 = vst [vmem:[#allocation2 + $0x58] sm:$0xff] %v6782_v4  ;;  %v19298_v54 = vor.u32 %v17319_v6, %v19297_v20  ;;  %v7399_v29 = vrot.slane %v7397_v52, 3 }
 0xb26   : > { %v7402_v36 = vrot.slane %v7400_v32, 4  ;;  %v13036_v9 = vpop.eup %13035  ;;  %v6726_v34 = vmul.f32 %v13034_v23, %v19299_v2  ;;  %v6743_v39 = vpack.c.bf16 %v6724_v3, %v6723_v22  ;;  %v6785_v33 = vrot.slane %v6742_v19, 4  ;;  %v12725_v3 = vld [vmem:[#allocation9 + $0x158] sm:$0xff]  }
 0xb27   : > { %v6877_v28 = vsel %vm2593_vm8, %v19298_v54, %v17437_v47  ;;  %v6784_v44 = vsel %vm1945_vm4, %v6781_v24, %v6783_v38  ;;  %v13038_v13 = vpop.eup %13037  ;;  %v6727_v31 = vmul.f32 %v13036_v9, %v19300_v53  ;;  %v7407_v0 = vrot.slane %v7405_v58, 3  ;;  %v19307_v9 = vld [vmem:[#allocation50_spill] sm:$0xff]  ;;  %v12727_v53 = vld [vmem:[#allocation9 + $0x160] sm:$0xff]  }
 0xb28   : > { %7029 = vst [vmem:[#allocation3] sm:$0xff] %v6877_v28  ;;  %9191 = vmatmul.mubr.bf16.vlgmr.msra.gmra.mrb[136].mxu0 %v6877_v28  ;;  %6821 = vst [vmem:[#allocation2 + $0x60] sm:$0xff] %v6784_v44  ;;  %v7403_v6 = vor.u32 %v7402_v36, %v7399_v29  ;;  %v7408_v49 = vshll.u32 %v17373_v11, 16  ;;  %v6728_v61 = vmul.f32 %v13038_v13, %v19301_v56  ;;  %v6787_v50 = vrot.slane %v6743_v39, 4 }
 0xb29   : > { %11771 = vmatpush3.bf16.msra.mxu0 %v12720_v26  ;;  %9198 = vmatprep.mubr.bf16.mxu0 %v7083_v43  ;;  %v6744_v5 = vpack.c.bf16 %v6726_v34, %v6725_v45  ;;  %v6786_v10 = vsel %vm1945_vm4, %v6783_v38, %v6785_v33  ;;  %v7162_v43 = vsel %vm3150_vm2, %v17382_v7, 0  ;;  %vm19304_vm6 = vcmp.ne.s16.totalorder %v19303_v51, 0  ;;  %v12724_v7 = vld [vmem:[#allocation9 + $0x110] sm:$0xff]   ;;  %v12726_v34 = vld [vmem:[#allocation9 + $0x118] sm:$0xff]  }
 0xb2a   : > { %11772 = vmatprep.subr.bf16.mxu0 %v12721_v48  ;;  %6822 = vst [vmem:[#allocation2 + $0x68] sm:$0xff] %v6786_v10  ;;  %v7410_v18 = vrot.slane %v7408_v49, 4  ;;  %v7381_v58 = vsel %vm19304_vm6, %v17368_v62, 0  ;;  %vm19305_vm3 = vmmov %vm19304_vm6  ;;  %v6745_v42 = vpack.c.bf16 %v6728_v61, %v6727_v31  ;;  %v6788_v16 = vsel %vm1945_vm4, %v6785_v33, %v6787_v50  ;;  %v12734_v31 = vld [vmem:[#allocation9 + $0x180] sm:$0xff]   ;;  %v12735_v10 = vld [vmem:[#allocation9 + $0x1c8] sm:$0xff]  }
 0xb2b   : > { %v6846_v11 = vsel %vm19305_vm3, %v17360_v30, 0  ;;  %v6789_v12 = vrot.slane %v6744_v5, 4  ;;  %v7187_v24 = vshrl.u32 %v7162_v43, 16  ;;  %6823 = vst [vmem:[#allocation2 + $0x70] sm:$0xff] %v6788_v16  ;;  %v7190_v14 = vshll.u32 %v7162_v43, 16 }
 0xb2c   : > { %v7411_v40 = vor.u32 %v7410_v18, %v7407_v0  ;;  %v7414_v22 = vshrl.u32 %v7381_v58, 16  ;;  %v7417_v26 = vshll.u32 %v7381_v58, 16  ;;  %v6791_v32 = vrot.slane %v6745_v42, 4  ;;  %v19310_v0 = vld [vmem:[#allocation62_spill] sm:$0xff]  ;;  %v12728_v42 = vld [vmem:[#allocation9 + $0x120] sm:$0xff]  }
 0xb2d   : > { %11773 = vmatpush3.bf16.msra.mxu0 %v12722_v21  ;;  %v6790_v52 = vsel %vm1945_vm4, %v6787_v50, %v6789_v12  ;;  %v7189_v46 = vrot.slane %v7187_v24, 4  ;;  %v6879_v8 = vshrl.u32 %v6846_v11, 16  ;;  %v7192_v4 = vrot.slane %v7190_v14, 5 }
 0xb2e   : > { %11774 = vmatprep.subr.bf16.mxu0 %v12723_v35  ;;  %6824 = vst [vmem:[#allocation2 + $0x78] sm:$0xff] %v6790_v52  ;;  %v7412_v19 = vsel %vm2593_vm8, %v7403_v6, %v7411_v40  ;;  %v7416_v38 = vrot.slane %v7414_v22, 3  ;;  %v7419_v48 = vrot.slane %v7417_v26, 4  ;;  %v6792_v23 = vsel %vm1945_vm4, %v6789_v12, %v6791_v32  ;;  %6826 = vst [vmem:[#allocation2 + $0x88] sm:$0xf] %v6791_v32  ;;  %v19309_v6 = vld [vmem:[#allocation64_spill] sm:$0xff] }
 0xb2f   : > { %7564 = vst [vmem:[#allocation3 + $0x18] sm:$0xff] %v7412_v19  ;;  %9351 = vmatprep.mubr.bf16.mxu1 %v7412_v19  ;;  %v6881_v27 = vrot.slane %v6879_v8, 3  ;;  %v6882_v45 = vshll.u32 %v6846_v11, 16  ;;  %v7084_v20 = vrot.slane %v17368_v62, 4  ;;  %6825 = vst [vmem:[#allocation2 + $0x80] sm:$0xff] %v6792_v23  ;;  %v7193_v54 = vor.u32 %v7192_v4, %v7189_v46  ;;  %v12729_v22 = vld [vmem:[#allocation9 + $0x168] sm:$0xff]  }
 0xb30   : > { %v7420_v28 = vor.u32 %v7419_v48, %v7416_v38  ;;  %v7163_v36 = vsel %vm3151_vm15, %v17360_v30, 0  ;;  %vm19308_vm12 = vcmp.ne.s16.totalorder %v19307_v9, 0  ;;  %v19311_v49 = vor.u32 %v19309_v6, %v19310_v0  ;;  %v12736_v26 = vld [vmem:[#allocation9 + $0x188] sm:$0xff]  }
 0xb31   : > { %v7382_v2 = vsel %vm19308_vm12, %v17377_v59, 0  ;;  %11775 = vmatpush3.bf16.msra.mxu0 %v12724_v7  ;;  %v6884_v39 = vrot.slane %v6882_v45, 4  ;;  %v7085_v44 = vsel %vm1945_vm4, %v7082_v1, %v7084_v20  ;;  %v7196_v33 = vshrl.u32 %v7163_v36, 16  ;;  %vm19312_vm6 = vmmov %vm19308_vm12  ;;  %v12730_v45 = vld [vmem:[#allocation9 + $0x128] sm:$0xff]  }
 0xb32   : > { %v7199_v13 = vshll.u32 %v7163_v36, 16  ;;  %11776 = vmatprep.subr.bf16.mxu0 %v12725_v3  ;;  %v7194_v21 = vsel %vm2415_vm11, %v19311_v49, %v7193_v54  ;;  %v7421_v56 = vsel %vm2593_vm8, %v7411_v40, %v7420_v28  ;;  %7130 = vst [vmem:[#allocation3 + $0x98] sm:$0xff] %v7085_v44  ;;  %v7423_v61 = vshrl.u32 %v7382_v2, 16 }
 0xb33   : > { %v7426_v5 = vshll.u32 %v7382_v2, 16  ;;  %7346 = vst [vmem:[#allocation3 + $0x10] sm:$0xff] %v7194_v21  ;;  %9352 = vmatmul.mubr.bf16.vlgmr.msra.gmra.mrb[168].mxu1 %v7194_v21  ;;  %7565 = vst [vmem:[#allocation3 + $0x60] sm:$0xff] %v7421_v56  ;;  %v6885_v30 = vor.u32 %v6884_v39, %v6881_v27  ;;  %v7198_v1 = vrot.slane %v7196_v33, 4  ;;  %v6847_v35 = vsel %vm19312_vm6, %v17368_v62, 0  ;;  %v12738_v39 = vld [vmem:[#allocation9 + $0x190] sm:$0xff]  }
 0xb34   : > { %v7201_v50 = vrot.slane %v7199_v13, 5  ;;  %9359 = vmatprep.mubr.bf16.mxu1 %v7421_v56  ;;  %v7425_v18 = vrot.slane %v7423_v61, 3  ;;  %v6888_v58 = vshrl.u32 %v6847_v35, 16  ;;  %v6891_v11 = vshll.u32 %v6847_v35, 16  ;;  %11883 = vmatpush3.bf16.msra.mxu1 %v12734_v31  ;;  %v19318_v35 = vld [vmem:[#allocation53_spill] sm:$0xff] }
 0xb35   : > { %v7428_v43 = vrot.slane %v7426_v5, 4  ;;  %11777 = vmatpush3.bf16.msra.mxu0 %v12726_v34  ;;  %v6886_v16 = vsel %vm2593_vm8, %v17437_v47, %v6885_v30  ;;  %v7086_v24 = vrot.slane %v17377_v59, 4  ;;  %v7164_v14 = vsel %vm3152_vm10, %v17368_v62, 0  ;;  %11884 = vmatprep.subr.bf16.mxu1 %v12735_v10  ;;  %v12737_v47 = vld [vmem:[#allocation9 + $0x1d0] sm:$0xff]  }
 0xb36   : > { %v7202_v12 = vor.u32 %v7201_v50, %v7198_v1  ;;  %11778 = vmatprep.subr.bf16.mxu0 %v12727_v53  ;;  %7030 = vst [vmem:[#allocation3 + $0x48] sm:$0xff] %v6886_v16  ;;  %9199 = vmatmul.mubr.bf16.gmra.mrb[140].mxu0 %v6886_v16  ;;  %v6890_v52 = vrot.slane %v6888_v58, 3  ;;  %v6893_v32 = vrot.slane %v6891_v11, 4  ;;  %v7205_v46 = vshrl.u32 %v7164_v14, 16  ;;  %v19314_v62 = vld [vmem:[#allocation51_spill] sm:$0xff]  ;;  %v12739_v53 = vld [vmem:[#allocation9 + $0x1d8] sm:$0xff]  }
 0xb37   : > { %v17492_v7 = vor.u32 %v7428_v43, %v7425_v18  ;;  %9206 = vmatprep.mubr.bf16.mxu0 %v7085_v44  ;;  %v7087_v3 = vsel %vm1945_vm4, %v7084_v20, %v7086_v24  ;;  %v7208_v19 = vshll.u32 %v7164_v14, 16  ;;  %vm19315_vm3 = vcmp.ne.s16.totalorder %v19314_v62, 0  ;;  %v12731_v34 = vld [vmem:[#allocation9 + $0x170] sm:$0xff]   ;;  %v12740_v43 = vld [vmem:[#allocation9 + $0x178] sm:$0xff]  }
 0xb38   : > { %v7203_v8 = vsel %vm2415_vm11, %v7193_v54, %v7202_v12  ;;  %v7383_v4 = vsel %vm19315_vm3, %v17389_v17, 0  ;;  %v6894_v48 = vor.u32 %v6893_v32, %v6890_v52  ;;  %7131 = vst [vmem:[#allocation3 + $0xe0] sm:$0xff] %v7087_v3  ;;  %v7207_v23 = vrot.slane %v7205_v46, 4  ;;  %vm19316_vm12 = vmmov %vm19315_vm3  ;;  %11885 = vmatpush3.bf16.msra.mxu1 %v12736_v26  ;;  %v12741_v58 = vld [vmem:[#allocation9 + $0x198] sm:$0xff]  }
 0xb39   : > { %7347 = vst [vmem:[#allocation3 + $0x58] sm:$0xff] %v7203_v8  ;;  %v7430_v38 = vsel %vm2593_vm8, %v7420_v28, %v17492_v7  ;;  %v7432_v27 = vshrl.u32 %v7383_v4, 16  ;;  %11779 = vmatpush3.bf16.msra.mxu0 %v12728_v42  ;;  %v7210_v36 = vrot.slane %v7208_v19, 5  ;;  %v7435_v54 = vshll.u32 %v7383_v4, 16  ;;  %11886 = vmatprep.subr.bf16.mxu1 %v12737_v47  ;;  %v12742_v19 = vld [vmem:[#allocation9 + $0x138] sm:$0xff]  }
 0xb3a   : > { %7566 = vst [vmem:[#allocation3 + $0xa8] sm:$0xff] %v7430_v38  ;;  %v6848_v20 = vsel %vm19316_vm12, %v17377_v59, 0  ;;  %v7088_v2 = vrot.slane %v17389_v17, 4  ;;  %11780 = vmatprep.subr.bf16.mxu0 %v12729_v22  ;;  %v6895_v28 = vsel %vm2593_vm8, %v6885_v30, %v6894_v48  ;;  %v7165_v21 = vsel %vm3153_vm14, %v17377_v59, 0  ;;  %v12732_v30 = vld [vmem:[#allocation9 + $0x130] sm:$0xff]  }
 0xb3b   : > { %v7434_v44 = vrot.slane %v7432_v27, 3  ;;  %v6897_v33 = vshrl.u32 %v6848_v20, 16  ;;  %v6900_v13 = vshll.u32 %v6848_v20, 16  ;;  %9360 = vmatmul.mubr.bf16.gmra.mrb[172].mxu1 %v7203_v8  ;;  %7031 = vst [vmem:[#allocation3 + $0x90] sm:$0xff] %v6895_v28  ;;  %v7211_v31 = vor.u32 %v7210_v36, %v7207_v23  ;;  %v12744_v27 = vld [vmem:[#allocation9 + $0x1a0] sm:$0xff]  }
 0xb3c   : > { %v7437_v6 = vrot.slane %v7435_v54, 4  ;;  %v17509_v0 = vsel %vm1945_vm4, %v7086_v24, %v7088_v2  ;;  %9367 = vmatprep.mubr.bf16.mxu1 %v7430_v38  ;;  %v7214_v5 = vshrl.u32 %v7165_v21, 16  ;;  %v7217_v10 = vshll.u32 %v7165_v21, 16  ;;  %11887 = vmatpush3.bf16.msra.mxu1 %v12738_v39 }
 0xb3d   : > { %v6899_v56 = vrot.slane %v6897_v33, 3  ;;  %v6902_v61 = vrot.slane %v6900_v13, 4  ;;  %7132 = vst [vmem:[#allocation3 + $0x128] sm:$0xff] %v17509_v0  ;;  %11781 = vmatpush3.bf16.msra.mxu0 %v12730_v45  ;;  %v7212_v1 = vsel %vm2415_vm11, %v7202_v12, %v7211_v31  ;;  %vm19319_vm6 = vcmp.ne.s16.totalorder %v19318_v35, 0  ;;  %11888 = vmatprep.subr.bf16.mxu1 %v12739_v53  ;;  %v12743_v12 = vld [vmem:[#allocation9 + $0x1e0] sm:$0xff]  }
 0xb3e   : > { %v7438_v50 = vor.u32 %v7437_v6, %v7434_v44  ;;  %v7384_v18 = vsel %vm19319_vm6, %v17394_v41, 0  ;;  %vm19320_vm3 = vmmov %vm19319_vm6  ;;  %11782 = vmatprep.subr.bf16.mxu0 %v12731_v34  ;;  %9207 = vmatmul.mubr.bf16.gmra.mrb[144].mxu0 %v6895_v28  ;;  %7348 = vst [vmem:[#allocation3 + $0xa0] sm:$0xff] %v7212_v1  ;;  %v7216_v42 = vrot.slane %v7214_v5, 4  ;;  %v7219_v16 = vrot.slane %v7217_v10, 5  ;;  %v12751_v45 = vld [vmem:[#allocation9 + $0x200] sm:$0xff]   ;;  %v12745_v34 = vld [vmem:[#allocation9 + $0x1e8] sm:$0xff]  }
 0xb3f   : > { %v6849_v59 = vsel %vm19320_vm3, %v17389_v17, 0  ;;  %v6903_v11 = vor.u32 %v6902_v61, %v6899_v56  ;;  %v7441_v24 = vshrl.u32 %v7384_v18, 16  ;;  %9214 = vmatprep.mubr.bf16.mxu0 %v7087_v3  ;;  %v7444_v22 = vshll.u32 %v7384_v18, 16  ;;  %v19321_v3 = vld [vmem:[#allocation40_spill] sm:$0xff]  ;;  %v19323_v44 = vld [vmem:[#allocation55_spill] sm:$0xff]  ;;  %v12746_v5 = vld [vmem:[#allocation9 + $0x1a8] sm:$0xff]  }
 0xb40   : > { %v7439_v14 = vsel %vm2593_vm8, %v17492_v7, %v7438_v50  ;;  %v6906_v26 = vshrl.u32 %v6849_v59, 16  ;;  %v6909_v52 = vshll.u32 %v6849_v59, 16  ;;  %v7220_v46 = vor.u32 %v7219_v16, %v7216_v42  ;;  %11889 = vmatpush3.bf16.msra.mxu1 %v12741_v58  ;;  %v12747_v59 = vld [vmem:[#allocation9 + $0x1f0] sm:$0xff]   ;;  %v19326_v58 = vld [vmem:[#allocation41_spill] sm:$0xff]  ;;  %v19328_v42 = vld [vmem:[#allocation22_spill] sm:$0xff] }
 0xb41   : > { %7567 = vst [vmem:[#allocation3 + $0xf0] sm:$0xff] %v7439_v14  ;;  %v6904_v32 = vsel %vm2593_vm8, %v6894_v48, %v6903_v11  ;;  %v7443_v47 = vrot.slane %v7441_v24, 3  ;;  %v7090_v8 = vrot.slane %v17394_v41, 4  ;;  %11783 = vmatpush3.bf16.msra.mxu0 %v12732_v30  ;;  %v7446_v4 = vrot.slane %v7444_v22, 4  ;;  %11890 = vmatprep.subr.bf16.mxu1 %v12743_v12 }
 0xb42   : > { %7032 = vst [vmem:[#allocation3 + $0xd8] sm:$0xff] %v6904_v32  ;;  %v6908_v38 = vrot.slane %v6906_v26, 3  ;;  %v6911_v23 = vrot.slane %v6909_v52, 4  ;;  %vm19322_vm12 = vcmp.ne.s16.totalorder %v19321_v3, 0  ;;  %11784 = vmatprep.subr.bf16.mxu0 %v12740_v43  ;;  %v7221_v48 = vsel %vm2415_vm11, %v7211_v31, %v7220_v46 }
 0xb43   : > { %v7166_v7 = vsel %vm19322_vm12, %v17389_v17, 0  ;;  %v17533_v36 = vsel %vm1945_vm4, %v7088_v2, %v7090_v8  ;;  %9368 = vmatmul.mubr.bf16.gmra.mrb[176].mxu1 %v7212_v1  ;;  %7349 = vst [vmem:[#allocation3 + $0xe8] sm:$0xff] %v7221_v48  ;;  %v7447_v39 = vor.u32 %v7446_v4, %v7443_v47  ;;  %vm19324_vm6 = vcmp.ne.s16.totalorder %v19323_v44, 0  ;;  %v12749_v4 = vld [vmem:[#allocation9 + $0x1f8] sm:$0xff]  }
 0xb44   : > { %v7223_v54 = vshrl.u32 %v7166_v7, 16  ;;  %v7226_v20 = vshll.u32 %v7166_v7, 16  ;;  %v6912_v28 = vor.u32 %v6911_v23, %v6908_v38  ;;  %7133 = vst [vmem:[#allocation3 + $0x170] sm:$0xff] %v17533_v36  ;;  %v7385_v33 = vsel %vm19324_vm6, %v17408_v37, 0  ;;  %vm19325_vm3 = vmmov %vm19324_vm6  ;;  %9375 = vmatprep.mubr.bf16.mxu1 %v7439_v14  ;;  %11891 = vmatpush3.bf16.msra.mxu1 %v12744_v27 }
 0xb45   : > { %v6850_v17 = vsel %vm19325_vm3, %v17394_v41, 0  ;;  %v7450_v53 = vshrl.u32 %v7385_v33, 16  ;;  %v7453_v31 = vshll.u32 %v7385_v33, 16  ;;  %11785 = vmatpush3.bf16.msra.mxu0 %v12742_v19  ;;  %v7448_v6 = vsel %vm2593_vm8, %v7438_v50, %v7447_v39  ;;  %11892 = vmatprep.subr.bf16.mxu1 %v12745_v34  ;;  %v19331_v34 = vld [vmem:[#allocation30_spill] sm:$0xff] }
 0xb46   : > { %v7225_v2 = vrot.slane %v7223_v54, 4  ;;  %v7228_v13 = vrot.slane %v7226_v20, 5  ;;  %v6913_v21 = vsel %vm2593_vm8, %v6903_v11, %v6912_v28  ;;  %v6915_v56 = vshrl.u32 %v6850_v17, 16  ;;  %12238 = vmatprep.subr.bf16.mxu0 %v12751_v45  ;;  %9215 = vmatmul.mubr.bf16.gmra.mrb[148].mxu0 %v6904_v32  ;;  %7568 = vst [vmem:[#allocation3 + $0x138] sm:$0xff] %v7448_v6  ;;  %v12748_v32 = vld [vmem:[#allocation9 + $0x1b0] sm:$0xff]  }
 0xb47   : > { %v6918_v61 = vshll.u32 %v6850_v17, 16  ;;  %7033 = vst [vmem:[#allocation3 + $0x120] sm:$0xff] %v6913_v21  ;;  %v7452_v30 = vrot.slane %v7450_v53, 3  ;;  %v7455_v1 = vrot.slane %v7453_v31, 4  ;;  %v7092_v18 = vrot.slane %v17408_v37, 4  ;;  %9222 = vmatprep.mubr.bf16.mxu0 %v17509_v0  ;;  %v19333_v31 = vld [vmem:[#allocation23_spill] sm:$0xff] }
 0xb48   : > { %v7229_v10 = vor.u32 %v7228_v13, %v7225_v2  ;;  %v6917_v50 = vrot.slane %v6915_v56, 3  ;;  %vm19327_vm12 = vcmp.ne.s16.totalorder %v19326_v58, 0  ;;  %vm19329_vm6 = vcmp.ne.s16.totalorder %v19328_v42, 0  ;;  %11893 = vmatpush3.bf16.msra.mxu1 %v12746_v5  ;;  %v12750_v2 = vld [vmem:[#allocation9 + $0x1b8] sm:$0xff]  }
 0xb49   : > { %v6920_v43 = vrot.slane %v6918_v61, 4  ;;  %v7167_v11 = vsel %vm19327_vm12, %v17394_v41, 0  ;;  %v7386_v16 = vsel %vm19329_vm6, %v17415_v25, 0  ;;  %v7456_v12 = vor.u32 %v7455_v1, %v7452_v30  ;;  %vm19330_vm3 = vmmov %vm19329_vm6  ;;  %11894 = vmatprep.subr.bf16.mxu1 %v12747_v59 }
 0xb4a   : > { %v17553_v24 = vsel %vm2415_vm11, %v7220_v46, %v7229_v10  ;;  %v17556_v14 = vsel %vm1945_vm4, %v7090_v8, %v7092_v18  ;;  %v7232_v22 = vshrl.u32 %v7167_v11, 16  ;;  %v7235_v26 = vshll.u32 %v7167_v11, 16 }
 0xb4b   : > { %7350 = vst [vmem:[#allocation3 + $0x130] sm:$0xff] %v17553_v24  ;;  %v6921_v0 = vor.u32 %v6920_v43, %v6917_v50  ;;  %7134 = vst [vmem:[#allocation3 + $0x1b8] sm:$0xff] %v17556_v14  ;;  %v7459_v52 = vshrl.u32 %v7386_v16, 16  ;;  %v7462_v41 = vshll.u32 %v7386_v16, 16  ;;  %v7457_v47 = vsel %vm2593_vm8, %v7447_v39, %v7456_v12  ;;  %9376 = vmatmul.mubr.bf16.gmra.mrb[180].mxu1 %v7221_v48  ;;  %v6836_v16 = vld [vmem:[#allocation2 + $0x48] sm:$0xff] }
 0xb4c   : > { %v7234_v19 = vrot.slane %v7232_v22, 4  ;;  %v6851_v46 = vsel %vm19330_vm3, %v17408_v37, 0  ;;  %v7094_v8 = vrot.slane %v17415_v25, 4  ;;  %7569 = vst [vmem:[#allocation3 + $0x180] sm:$0xff] %v7457_v47  ;;  %v7237_v23 = vrot.slane %v7235_v26, 5  ;;  %9383 = vmatprep.mubr.bf16.mxu1 %v7448_v6  ;;  %11895 = vmatpush3.bf16.msra.mxu1 %v12748_v32 }
 0xb4d   : > { %v6922_v38 = vsel %vm2593_vm8, %v6912_v28, %v6921_v0  ;;  %v7461_v7 = vrot.slane %v7459_v52, 3  ;;  %v7464_v27 = vrot.slane %v7462_v41, 4  ;;  %v6924_v45 = vshrl.u32 %v6851_v46, 16  ;;  %11896 = vmatprep.subr.bf16.mxu1 %v12749_v4 }
 0xb4e   : > { %7034 = vst [vmem:[#allocation3 + $0x168] sm:$0xff] %v6922_v38  ;;  %v6927_v54 = vshll.u32 %v6851_v46, 16  ;;  %v17567_v20 = vsel %vm1945_vm4, %v7092_v18, %v7094_v8  ;;  %vm19332_vm12 = vcmp.ne.s16.totalorder %v19331_v34, 0  ;;  %v7238_v33 = vor.u32 %v7237_v23, %v7234_v19  ;;  %9223 = vmatmul.mubr.bf16.gmra.mrb[152].mxu0 %v6913_v21  ;;  %v19338_v46 = vld [vmem:[#allocation32_spill] sm:$0xff] }
 0xb4f   : > { %v7168_v39 = vsel %vm19332_vm12, %v17408_v37, 0  ;;  %v7465_v17 = vor.u32 %v7464_v27, %v7461_v7  ;;  %7135 = vst [vmem:[#allocation3 + $0x200] sm:$0xff] %v17567_v20  ;;  %v6926_v13 = vrot.slane %v6924_v45, 3  ;;  %vm19334_vm6 = vcmp.ne.s16.totalorder %v19333_v31, 0  ;;  %9230 = vmatprep.mubr.bf16.mxu0 %v17533_v36  ;;  %v7055_v23 = vld [vmem:[#allocation2 + $0x50] sm:$0xff] }
 0xb50   : > { %v7241_v48 = vshrl.u32 %v7168_v39, 16  ;;  %v7244_v28 = vshll.u32 %v7168_v39, 16  ;;  %v6929_v53 = vrot.slane %v6927_v54, 4  ;;  %v7387_v6 = vsel %vm19334_vm6, %v17425_v57, 0  ;;  %vm19335_vm3 = vmmov %vm19334_vm6  ;;  %11897 = vmatpush3.bf16.msra.mxu1 %v12750_v2 }
 0xb51   : > { %v6852_v56 = vsel %vm19335_vm3, %v17415_v25, 0  ;;  %v17581_v37 = vsel %vm2415_vm11, %v7229_v10, %v7238_v33  ;;  %v17584_v61 = vsel %vm2593_vm8, %v7456_v12, %v7465_v17  ;;  %v7468_v1 = vshrl.u32 %v7387_v6, 16  ;;  %v19336_v10 = vld [vmem:[#allocation42_spill] sm:$0xff] }
 0xb52   : > { %v7243_v21 = vrot.slane %v7241_v48, 4  ;;  %v7246_v5 = vrot.slane %v7244_v28, 5  ;;  %7351 = vst [vmem:[#allocation3 + $0x178] sm:$0xff] %v17581_v37  ;;  %7570 = vst [vmem:[#allocation3 + $0x1c8] sm:$0xff] %v17584_v61  ;;  %v6930_v30 = vor.u32 %v6929_v53, %v6926_v13  ;;  %v7471_v18 = vshll.u32 %v7387_v6, 16  ;;  %v17618_v13 = vld [vmem:[#allocation2 + $0x58] sm:$0xff] }
 0xb53   : > { %v6933_v59 = vshrl.u32 %v6852_v56, 16  ;;  %v6936_v43 = vshll.u32 %v6852_v56, 16  ;;  %v7096_v36 = vrot.slane %v17425_v57, 4  ;;  %vm19337_vm12 = vcmp.ne.s16.totalorder %v19336_v10, 0  ;;  %9384 = vmatmul.mubr.bf16.gmra.mrb[184].mxu1 %v17553_v24  ;;  %v19341_v6 = vld [vmem:[#allocation43_spill] sm:$0xff] }
 0xb54   : > { %v7247_v50 = vor.u32 %v7246_v5, %v7243_v21  ;;  %v7169_v11 = vsel %vm19337_vm12, %v17415_v25, 0  ;;  %v17593_v12 = vsel %vm2593_vm8, %v6921_v0, %v6930_v30  ;;  %v7470_v22 = vrot.slane %v7468_v1, 3  ;;  %9391 = vmatprep.mubr.bf16.mxu1 %v7457_v47 }
 0xb55   : > { %v7473_v26 = vrot.slane %v7471_v18, 4  ;;  %v6935_v52 = vrot.slane %v6933_v59, 3  ;;  %7035 = vst [vmem:[#allocation3 + $0x1b0] sm:$0xff] %v17593_v12  ;;  %v6938_v57 = vrot.slane %v6936_v43, 4  ;;  %v17601_v32 = vsel %vm1945_vm4, %v7094_v8, %v7096_v36  ;;  %v19343_v59 = vld [vmem:[#allocation33_spill] sm:$0xff] }
 0xb56   : > { %v17598_v41 = vsel %vm2415_vm11, %v7238_v33, %v7247_v50  ;;  %v7250_v25 = vshrl.u32 %v7169_v11, 16  ;;  %7136 = vst [vmem:[#allocation3 + $0x248] sm:$0xff] %v17601_v32  ;;  %v7253_v19 = vshll.u32 %v7169_v11, 16  ;;  %vm19339_vm6 = vcmp.ne.s16.totalorder %v19338_v46, 0  ;;  %9231 = vmatmul.mubr.bf16.gmra.mrb[156].mxu0 %v6922_v38 }
 0xb57   : > { %7352 = vst [vmem:[#allocation3 + $0x1c0] sm:$0xff] %v17598_v41  ;;  %v7474_v0 = vor.u32 %v7473_v26, %v7470_v22  ;;  %v7388_v24 = vsel %vm19339_vm6, %v17433_v60, 0  ;;  %vm19340_vm3 = vmmov %vm19339_vm6  ;;  %v6939_v7 = vor.u32 %v6938_v57, %v6935_v52  ;;  %9238 = vmatprep.mubr.bf16.mxu0 %v17556_v14  ;;  %v7098_v2 = vrot.slane %v7055_v23, 4 }
 0xb58   : > { %v6853_v4 = vsel %vm19340_vm3, %v6836_v16, 0  ;;  %v7252_v27 = vrot.slane %v7250_v25, 4  ;;  %v7477_v8 = vshrl.u32 %v7388_v24, 16  ;;  %v7480_v45 = vshll.u32 %v7388_v24, 16 }
 0xb59   : > { %v17611_v47 = vsel %vm2593_vm8, %v7465_v17, %v7474_v0  ;;  %v7255_v54 = vrot.slane %v7253_v19, 5  ;;  %v6942_v39 = vshrl.u32 %v6853_v4, 16  ;;  %v6945_v33 = vshll.u32 %v6853_v4, 16  ;;  %v17645_v19 = vld [vmem:[#allocation2 + $0x60] sm:$0xff]  ;;  %v19346_v4 = vld [vmem:[#allocation44_spill] sm:$0xff] }
 0xb5a   : > { %7571 = vst [vmem:[#allocation3 + $0x210] sm:$0xff] %v17611_v47  ;;  %v17616_v60 = vsel %vm2593_vm8, %v6930_v30, %v6939_v7  ;;  %v7479_v48 = vrot.slane %v7477_v8, 3  ;;  %v7482_v28 = vrot.slane %v7480_v45, 4  ;;  %vm19342_vm12 = vcmp.ne.s16.totalorder %v19341_v6, 0 }
 0xb5b   : > { %7036 = vst [vmem:[#allocation3 + $0x1f8] sm:$0xff] %v17616_v60  ;;  %v7256_v38 = vor.u32 %v7255_v54, %v7252_v27  ;;  %v6944_v17 = vrot.slane %v6942_v39, 3  ;;  %v6947_v53 = vrot.slane %v6945_v33, 4  ;;  %v7170_v56 = vsel %vm19342_vm12, %v6836_v16, 0  ;;  %9392 = vmatmul.mubr.bf16.gmra.mrb[188].mxu1 %v17581_v37 }
 0xb5c   : > { %v7483_v21 = vor.u32 %v7482_v28, %v7479_v48  ;;  %v17624_v14 = vsel %vm1945_vm4, %v7096_v36, %v7098_v2  ;;  %v7259_v5 = vshrl.u32 %v7170_v56, 16  ;;  %v7262_v30 = vshll.u32 %v7170_v56, 16  ;;  %9399 = vmatprep.mubr.bf16.mxu1 %v17584_v61  ;;  %v19348_v48 = vld [vmem:[#allocation35_spill] sm:$0xff] }
 0xb5d   : > { %v17627_v1 = vsel %vm2415_vm11, %v7247_v50, %v7256_v38  ;;  %v6948_v18 = vor.u32 %v6947_v53, %v6944_v17  ;;  %7137 = vst [vmem:[#allocation3 + $0x290] sm:$0xff] %v17624_v14  ;;  %vm19344_vm6 = vcmp.ne.s16.totalorder %v19343_v59, 0  ;;  %v7100_v24 = vrot.slane %v17618_v13, 4 }
 0xb5e   : > { %v7389_v43 = vsel %vm19344_vm6, %v17618_v13, 0  ;;  %vm19345_vm3 = vmmov %vm19344_vm6  ;;  %7353 = vst [vmem:[#allocation3 + $0x208] sm:$0xff] %v17627_v1  ;;  %v17638_v36 = vsel %vm2593_vm8, %v7474_v0, %v7483_v21  ;;  %v7261_v16 = vrot.slane %v7259_v5, 4  ;;  %v7264_v50 = vrot.slane %v7262_v30, 5  ;;  %9239 = vmatmul.mubr.bf16.gmra.mrb[160].mxu0 %v17593_v12  ;;  %v17668_v5 = vld [vmem:[#allocation2 + $0x68] sm:$0xff] }
 0xb5f   : > { %v6854_v11 = vsel %vm19345_vm3, %v7055_v23, 0  ;;  %v7486_v22 = vshrl.u32 %v7389_v43, 16  ;;  %7572 = vst [vmem:[#allocation3 + $0x258] sm:$0xff] %v17638_v36  ;;  %v17643_v26 = vsel %vm2593_vm8, %v6939_v7, %v6948_v18  ;;  %v7489_v52 = vshll.u32 %v7389_v43, 16  ;;  %9246 = vmatprep.mubr.bf16.mxu0 %v17567_v20 }
 0xb60   : > { %v6951_v57 = vshrl.u32 %v6854_v11, 16  ;;  %v6954_v25 = vshll.u32 %v6854_v11, 16  ;;  %7037 = vst [vmem:[#allocation3 + $0x240] sm:$0xff] %v17643_v26  ;;  %v7265_v37 = vor.u32 %v7264_v50, %v7261_v16  ;;  %vm19347_vm12 = vcmp.ne.s16.totalorder %v19346_v4, 0 }
 0xb61   : > { %v7488_v0 = vrot.slane %v7486_v22, 3  ;;  %v7171_v27 = vsel %vm19347_vm12, %v7055_v23, 0  ;;  %v7491_v61 = vrot.slane %v7489_v52, 4  ;;  %v17657_v39 = vsel %vm1945_vm4, %v7098_v2, %v7100_v24 }
 0xb62   : > { %v6953_v8 = vrot.slane %v6951_v57, 3  ;;  %v6956_v7 = vrot.slane %v6954_v25, 4  ;;  %v7268_v45 = vshrl.u32 %v7171_v27, 16  ;;  %v17654_v54 = vsel %vm2415_vm11, %v7256_v38, %v7265_v37  ;;  %7138 = vst [vmem:[#allocation3 + $0x2d8] sm:$0xff] %v17657_v39 }
 0xb63   : > { %v7271_v33 = vshll.u32 %v7171_v27, 16  ;;  %vm19349_vm6 = vcmp.ne.s16.totalorder %v19348_v48, 0  ;;  %7354 = vst [vmem:[#allocation3 + $0x250] sm:$0xff] %v17654_v54  ;;  %v7492_v12 = vor.u32 %v7491_v61, %v7488_v0  ;;  %v7102_v38 = vrot.slane %v17645_v19, 4  ;;  %9400 = vmatmul.mubr.bf16.gmra.mrb[192].mxu1 %v17598_v41  ;;  %v19352_v41 = vld [vmem:[#allocation25_spill] sm:$0xff] }
 0xb64   : > { %v7390_v28 = vsel %vm19349_vm6, %v17645_v19, 0  ;;  %v6957_v23 = vor.u32 %v6956_v7, %v6953_v8  ;;  %v7270_v17 = vrot.slane %v7268_v45, 4  ;;  %vm19350_vm3 = vmmov %vm19349_vm6  ;;  %9407 = vmatprep.mubr.bf16.mxu1 %v17611_v47  ;;  %v7172_v25 = vsel %vm3160_vm9, %v17618_v13, 0  ;;  %v7160_v48 = vld [vmem:[#allocation2 + $0x80] sm:$0x1f] }
 0xb65   : > { %v7495_v53 = vshrl.u32 %v7390_v28, 16  ;;  %v7273_v20 = vrot.slane %v7271_v33, 5  ;;  %v7498_v56 = vshll.u32 %v7390_v28, 16  ;;  %v6855_v2 = vsel %vm19350_vm3, %v17618_v13, 0 }
 0xb66   : > { %v17671_v30 = vsel %vm2593_vm8, %v7483_v21, %v7492_v12  ;;  %v17674_v43 = vsel %vm2593_vm8, %v6948_v18, %v6957_v23  ;;  %v6960_v16 = vshrl.u32 %v6855_v2, 16  ;;  %v6963_v52 = vshll.u32 %v6855_v2, 16  ;;  %9247 = vmatmul.mubr.bf16.gmra.mrb[164].mxu0 %v17616_v60 }
 0xb67   : > { %v7497_v11 = vrot.slane %v7495_v53, 3  ;;  %7573 = vst [vmem:[#allocation3 + $0x2a0] sm:$0xff] %v17671_v30  ;;  %7038 = vst [vmem:[#allocation3 + $0x288] sm:$0xff] %v17674_v43  ;;  %v7274_v50 = vor.u32 %v7273_v20, %v7270_v17  ;;  %v7500_v22 = vrot.slane %v7498_v56, 4  ;;  %v17680_v57 = vsel %vm1945_vm4, %v7100_v24, %v7102_v38  ;;  %9254 = vmatprep.mubr.bf16.mxu0 %v17601_v32 }
 0xb68   : > { %v6962_v21 = vrot.slane %v6960_v16, 3  ;;  %7139 = vst [vmem:[#allocation3 + $0x320] sm:$0xff] %v17680_v57  ;;  %vm19353_vm12 = vcmp.ne.s16.totalorder %v19352_v41, 0  ;;  %v6965_v47 = vrot.slane %v6963_v52, 4  ;;  %v7277_v8 = vshrl.u32 %v7172_v25, 16 }
 0xb69   : > { %v7391_v0 = vsel %vm19353_vm12, %v17668_v5, 0  ;;  %vm19354_vm6 = vmmov %vm19353_vm12  ;;  %v17694_v24 = vsel %vm2415_vm11, %v7265_v37, %v7274_v50  ;;  %v7501_v61 = vor.u32 %v7500_v22, %v7497_v11  ;;  %v7280_v7 = vshll.u32 %v7172_v25, 16  ;;  %v17703_v11 = vld [vmem:[#allocation2 + $0x70] sm:$0xff] }
 0xb6a   : > { %v6856_v27 = vsel %vm19354_vm6, %v17645_v19, 0  ;;  %7355 = vst [vmem:[#allocation3 + $0x298] sm:$0xff] %v17694_v24  ;;  %v7504_v13 = vshrl.u32 %v7391_v0, 16  ;;  %v7507_v45 = vshll.u32 %v7391_v0, 16  ;;  %v6966_v17 = vor.u32 %v6965_v47, %v6962_v21 }
 0xb6b   : > { %v6969_v33 = vshrl.u32 %v6856_v27, 16  ;;  %v17700_v28 = vsel %vm2593_vm8, %v7492_v12, %v7501_v61  ;;  %v7279_v53 = vrot.slane %v7277_v8, 4  ;;  %v6972_v37 = vshll.u32 %v6856_v27, 16  ;;  %v19355_v12 = vld [vmem:[#allocation46_spill] sm:$0xff]  ;;  %9408 = vmatmul.mubr.bf16.gmra.mrb[196].mxu1 %v17627_v1 }
 0xb6c   : > { %7574 = vst [vmem:[#allocation3 + $0x2e8] sm:$0xff] %v17700_v28  ;;  %v7282_v20 = vrot.slane %v7280_v7, 5  ;;  %v7506_v56 = vrot.slane %v7504_v13, 3  ;;  %v7509_v2 = vrot.slane %v7507_v45, 4  ;;  %v17706_v16 = vsel %vm2593_vm8, %v6957_v23, %v6966_v17  ;;  %v19357_v23 = vld [vmem:[#allocation52_spill] sm:$0xff]  ;;  %9415 = vmatprep.mubr.bf16.mxu1 %v17638_v36 }
 0xb6d   : > { %v6971_v60 = vrot.slane %v6969_v33, 3  ;;  %v6974_v22 = vrot.slane %v6972_v37, 4  ;;  %v7104_v32 = vrot.slane %v17668_v5, 4  ;;  %vm19356_vm3 = vcmp.ne.s16.totalorder %v19355_v12, 0  ;;  %7039 = vst [vmem:[#allocation3 + $0x2d0] sm:$0xff] %v17706_v16 }
 0xb6e   : > { %v7173_v52 = vsel %vm19356_vm3, %v17645_v19, 0  ;;  %v7283_v21 = vor.u32 %v7282_v20, %v7279_v53  ;;  %v7510_v25 = vor.u32 %v7509_v2, %v7506_v56  ;;  %vm19358_vm12 = vcmp.ne.s16.totalorder %v19357_v23, 0  ;;  %9255 = vmatmul.mubr.bf16.gmra.mrb[168].mxu0 %v17643_v26  ;;  %v19360_v56 = vld [vmem:[#allocation29_spill] sm:$0xff]  ;;  %v8115_v12 = vld [vmem:[#allocation2 + $0x10] sm:$0xf0] }
 0xb6f   : > { %v7286_v0 = vshrl.u32 %v7173_v52, 16  ;;  %v7289_v27 = vshll.u32 %v7173_v52, 16  ;;  %v6975_v47 = vor.u32 %v6974_v22, %v6971_v60  ;;  %v17715_v8 = vsel %vm1945_vm4, %v7102_v38, %v7104_v32  ;;  %vm19359_vm6 = vmmov %vm19358_vm12  ;;  %v17742_v60 = vld [vmem:[#allocation2 + $0x78] sm:$0xff]  ;;  %9262 = vmatprep.mubr.bf16.mxu0 %v17624_v14  ;;  %v19362_v14 = vld [vmem:[#allocation54_spill] sm:$0xff] }
 0xb70   : > { %v7392_v7 = vsel %vm19358_vm12, %v17703_v11, 0  ;;  %v6857_v19 = vsel %vm19359_vm6, %v17668_v5, 0  ;;  %v17725_v13 = vsel %vm2415_vm11, %v7274_v50, %v7283_v21  ;;  %v17728_v45 = vsel %vm2593_vm8, %v7501_v61, %v7510_v25  ;;  %7140 = vst [vmem:[#allocation3 + $0x368] sm:$0xff] %v17715_v8  ;;  %v6843_v23 = vld [vmem:[#allocation2 + $0x80] sm:$0xf] }
 0xb71   : > { %v7288_v1 = vrot.slane %v7286_v0, 4  ;;  %v7291_v38 = vrot.slane %v7289_v27, 5  ;;  %7356 = vst [vmem:[#allocation3 + $0x2e0] sm:$0xff] %v17725_v13  ;;  %7575 = vst [vmem:[#allocation3 + $0x330] sm:$0xff] %v17728_v45  ;;  %v17734_v33 = vsel %vm2593_vm8, %v6966_v17, %v6975_v47  ;;  %v7513_v53 = vshrl.u32 %v7392_v7, 16 }
 0xb72   : > { %v7516_v37 = vshll.u32 %v7392_v7, 16  ;;  %v6978_v36 = vshrl.u32 %v6857_v19, 16  ;;  %7040 = vst [vmem:[#allocation3 + $0x318] sm:$0xff] %v17734_v33  ;;  %v6981_v61 = vshll.u32 %v6857_v19, 16  ;;  %v7106_v20 = vrot.slane %v17703_v11, 4 }
 0xb73   : > { %v7292_v50 = vor.u32 %v7291_v38, %v7288_v1  ;;  %vm19361_vm3 = vcmp.ne.s16.totalorder %v19360_v56, 0  ;;  %v7515_v17 = vrot.slane %v7513_v53, 3  ;;  %vm19363_vm12 = vcmp.ne.s16.totalorder %v19362_v14, 0  ;;  %9416 = vmatmul.mubr.bf16.gmra.mrb[200].mxu1 %v17654_v54  ;;  %v7061_v14 = vld [vmem:[#allocation2 + $0x80] sm:$0xf] }
 0xb74   : > { %v7174_v2 = vsel %vm19361_vm3, %v17668_v5, 0  ;;  %v7518_v22 = vrot.slane %v7516_v37, 4  ;;  %v6980_v52 = vrot.slane %v6978_v36, 3  ;;  %v6983_v27 = vrot.slane %v6981_v61, 4  ;;  %vm19364_vm6 = vmmov %vm19363_vm12  ;;  %9423 = vmatprep.mubr.bf16.mxu1 %v17671_v30 }
 0xb75   : > { %v7295_v0 = vshrl.u32 %v7174_v2, 16  ;;  %v17746_v26 = vsel %vm2415_vm11, %v7283_v21, %v7292_v50  ;;  %v17749_v7 = vsel %vm1945_vm4, %v7104_v32, %v7106_v20  ;;  %v7298_v19 = vshll.u32 %v7174_v2, 16 }
 0xb76   : > { %7357 = vst [vmem:[#allocation3 + $0x328] sm:$0xff] %v17746_v26  ;;  %v7519_v1 = vor.u32 %v7518_v22, %v7515_v17  ;;  %7141 = vst [vmem:[#allocation3 + $0x3b0] sm:$0xff] %v17749_v7  ;;  %v7393_v38 = vsel %vm19363_vm12, %v17742_v60, 0  ;;  %v6858_v21 = vsel %vm19364_vm6, %v17703_v11, 0  ;;  %v6984_v53 = vor.u32 %v6983_v27, %v6980_v52  ;;  %9263 = vmatmul.mubr.bf16.gmra.mrb[172].mxu0 %v17674_v43 }
 0xb77   : > { %v7297_v5 = vrot.slane %v7295_v0, 4  ;;  %v7300_v37 = vrot.slane %v7298_v19, 5  ;;  %v7522_v36 = vshrl.u32 %v7393_v38, 16  ;;  %v7525_v32 = vshll.u32 %v7393_v38, 16  ;;  %v7377_v38 = vld [vmem:[#allocation2 + $0x80] sm:$0xff]  ;;  %9270 = vmatprep.mubr.bf16.mxu0 %v17657_v39 }
 0xb78   : > { %v17761_v61 = vsel %vm2593_vm8, %v7510_v25, %v7519_v1  ;;  %v6987_v2 = vshrl.u32 %v6858_v21, 16  ;;  %v6990_v17 = vshll.u32 %v6858_v21, 16  ;;  %v7108_v22 = vrot.slane %v17742_v60, 4 }
 0xb79   : > { %7576 = vst [vmem:[#allocation3 + $0x378] sm:$0xff] %v17761_v61  ;;  %v17767_v0 = vsel %vm2593_vm8, %v6975_v47, %v6984_v53  ;;  %v7301_v52 = vor.u32 %v7300_v37, %v7297_v5  ;;  %v7524_v27 = vrot.slane %v7522_v36, 3  ;;  %v7527_v19 = vrot.slane %v7525_v32, 4  ;;  %v19366_v32 = vld [vmem:[#allocation21_spill] sm:$0xff] }
 0xb7a   : > { %7041 = vst [vmem:[#allocation3 + $0x360] sm:$0xff] %v17767_v0  ;;  %v6989_v54 = vrot.slane %v6987_v2, 3  ;;  %v6992_v25 = vrot.slane %v6990_v17, 4  ;;  %v17771_v21 = vsel %vm1945_vm4, %v7106_v20, %v7108_v22  ;;  %v7175_v30 = vsel %vm3163_vm7, %v17703_v11, 0 }
 0xb7b   : > { %v17778_v47 = vsel %vm2415_vm11, %v7292_v50, %v7301_v52  ;;  %v7528_v5 = vor.u32 %v7527_v19, %v7524_v27  ;;  %7142 = vst [vmem:[#allocation3 + $0x3f8] sm:$0xff] %v17771_v21  ;;  %v7304_v37 = vshrl.u32 %v7175_v30, 16  ;;  %v7307_v36 = vshll.u32 %v7175_v30, 16  ;;  %v7378_v30 = vld [vmem:[#allocation2 + $0x88] sm:$0xf]  ;;  %9424 = vmatmul.mubr.bf16.gmra.mrb[204].mxu1 %v17694_v24 }
 0xb7c   : > { %7358 = vst [vmem:[#allocation3 + $0x370] sm:$0xff] %v17778_v47  ;;  %v6993_v20 = vor.u32 %v6992_v25, %v6989_v54  ;;  %vm19367_vm3 = vcmp.ne.s16.totalorder %v19366_v32, 0  ;;  %v7110_v11 = vrot.slane %v7061_v14, 4  ;;  %9431 = vmatprep.mubr.bf16.mxu1 %v17700_v28 }
 0xb7d   : > { %v7394_v2 = vsel %vm19367_vm3, %v7377_v38, 0  ;;  %vm19368_vm12 = vmmov %vm19367_vm3  ;;  %v17789_v50 = vsel %vm2593_vm8, %v7519_v1, %v7528_v5  ;;  %v7306_v17 = vrot.slane %v7304_v37, 4  ;;  %v7309_v27 = vrot.slane %v7307_v36, 5 }
 0xb7e   : > { %v6859_v43 = vsel %vm19368_vm12, %v17742_v60, 0  ;;  %v7531_v19 = vshrl.u32 %v7394_v2, 16  ;;  %7577 = vst [vmem:[#allocation3 + $0x3c0] sm:$0xff] %v17789_v50  ;;  %v17793_v39 = vsel %vm2593_vm8, %v6984_v53, %v6993_v20  ;;  %v7534_v54 = vshll.u32 %v7394_v2, 16  ;;  %9271 = vmatmul.mubr.bf16.gmra.mrb[176].mxu0 %v17706_v16 }
 0xb7f   : > { %v6996_v25 = vshrl.u32 %v6859_v43, 16  ;;  %v6999_v38 = vshll.u32 %v6859_v43, 16  ;;  %7042 = vst [vmem:[#allocation3 + $0x3a8] sm:$0xff] %v17793_v39  ;;  %v7310_v32 = vor.u32 %v7309_v27, %v7306_v17  ;;  %v17797_v1 = vsel %vm1945_vm4, %v7108_v22, %v7110_v11  ;;  %v19370_v22 = vld [vmem:[#allocation56_spill] sm:$0xff]  ;;  %v7679_v27 = vld [vmem:[#allocation2 + $0x8] sm:$0xf0]  ;;  %9278 = vmatprep.mubr.bf16.mxu0 %v17680_v57 }
 0xb80   : > { %v7533_v14 = vrot.slane %v7531_v19, 3  ;;  %v7176_v36 = vsel %vm3164_vm13, %v17742_v60, 0  ;;  %v7536_v41 = vrot.slane %v7534_v54, 4  ;;  %7143 = vst [vmem:[#allocation3 + $0x440] sm:$0xff] %v17797_v1  ;;  %vm19371_vm6 = vcmp.ne.s16.totalorder %v19370_v22, 0 }
 0xb81   : > { %v6998_v53 = vrot.slane %v6996_v25, 3  ;;  %v7001_v56 = vrot.slane %v6999_v38, 4  ;;  %v7313_v2 = vshrl.u32 %v7176_v36, 16  ;;  %v17806_v43 = vsel %vm2415_vm11, %v7301_v52, %v7310_v32  ;;  %vm19372_vm3 = vmmov %vm19371_vm6  ;;  %v17813_v38 = vld [vmem:[#allocation2 + $0x10] sm:$0xff] }
 0xb82   : > { %v7316_v17 = vshll.u32 %v7176_v36, 16  ;;  %v7395_v11 = vsel %vm19371_vm6, %v7378_v30, 0  ;;  %v6860_v60 = vsel %vm19372_vm3, %v6843_v23, 0  ;;  %7359 = vst [vmem:[#allocation3 + $0x3b8] sm:$0xff] %v17806_v43  ;;  %v7537_v24 = vor.u32 %v7536_v41, %v7533_v14 }
 0xb83   : > { %v7002_v19 = vor.u32 %v7001_v56, %v6998_v53  ;;  %v7315_v54 = vrot.slane %v7313_v2, 4  ;;  %v7540_v25 = vshrl.u32 %v7395_v11, 16  ;;  %v7543_v52 = vshll.u32 %v7395_v11, 16  ;;  %9432 = vmatmul.mubr.bf16.gmra.mrb[208].mxu1 %v17725_v13 }
 0xb84   : > { %v7318_v28 = vrot.slane %v7316_v17, 5  ;;  %v7005_v36 = vshrl.u32 %v6860_v60, 16  ;;  %v7008_v37 = vshll.u32 %v6860_v60, 16  ;;  %v17818_v23 = vsel %vm2593_vm8, %v7528_v5, %v7537_v24  ;;  %9439 = vmatprep.mubr.bf16.mxu1 %v17728_v45 }
 0xb85   : > { %v17821_v30 = vsel %vm2593_vm8, %v6993_v20, %v7002_v19  ;;  %v7542_v41 = vrot.slane %v7540_v25, 3  ;;  %v7696_v14 = vsel %vm3149_vm5, %v7679_v27, 0  ;;  %7578 = vst [vmem:[#allocation3 + $0x408] sm:$0xff] %v17818_v23  ;;  %v7545_v53 = vrot.slane %v7543_v52, 4 }
 0xb86   : > { %7043 = vst [vmem:[#allocation3 + $0x3f0] sm:$0xff] %v17821_v30  ;;  %v7319_v16 = vor.u32 %v7318_v28, %v7315_v54  ;;  %v7007_v2 = vrot.slane %v7005_v36, 3  ;;  %v7010_v17 = vrot.slane %v7008_v37, 4  ;;  %v7697_v57 = vsel %vm3150_vm2, %v17813_v38, 0  ;;  %v8116_v54 = vld [vmem:[#allocation2 + $0x18] sm:$0xff]  ;;  %9279 = vmatmul.mubr.bf16.gmra.mrb[180].mxu0 %v17734_v33 }
 0xb87   : > { %v7714_v5 = vshrl.u32 %v7696_v14, 16  ;;  %v7717_v11 = vshll.u32 %v7696_v14, 16  ;;  %v7177_v60 = vsel %vm3165_vm0, %v7160_v48, 0  ;;  %v7546_v27 = vor.u32 %v7545_v53, %v7542_v41  ;;  %v7580_v14 = vld [vmem:[#allocation2 + $0x8] sm:$0xf0]  ;;  %9286 = vmatprep.mubr.bf16.mxu0 %v17715_v8 }
 0xb88   : > { %v17833_v25 = vsel %vm2415_vm11, %v7310_v32, %v7319_v16  ;;  %v7011_v22 = vor.u32 %v7010_v17, %v7007_v2  ;;  %v7722_v56 = vshrl.u32 %v7697_v57, 16  ;;  %v7725_v52 = vshll.u32 %v7697_v57, 16  ;;  %v7897_v2 = vld [vmem:[#allocation2 + $0x10] sm:$0xf8] }
 0xb89   : > { %7360 = vst [vmem:[#allocation3 + $0x400] sm:$0xff] %v17833_v25  ;;  %v7716_v37 = vrot.slane %v7714_v5, 4  ;;  %v7719_v28 = vrot.slane %v7717_v11, 5  ;;  %v7322_v36 = vshrl.u32 %v7177_v60, 16  ;;  %v17839_v48 = vsel %vm2593_vm8, %v7537_v24, %v7546_v27 }
 0xb8a   : > { %v17842_v32 = vsel %vm2593_vm8, %v7002_v19, %v7011_v22  ;;  %v7724_v41 = vrot.slane %v7722_v56, 4  ;;  %v7325_v53 = vshll.u32 %v7177_v60, 16  ;;  %7579 = vst [vmem:[#allocation3 + $0x450] sm:$0xff] %v17839_v48  ;;  %v7727_v17 = vrot.slane %v7725_v52, 5 }
 0xb8b   : > { %7044 = vst [vmem:[#allocation3 + $0x438] sm:$0xff] %v17842_v32  ;;  %v7720_v13 = vor.u32 %v7719_v28, %v7716_v37  ;;  %v7324_v57 = vrot.slane %v7322_v36, 4  ;;  %v8149_v5 = vrot.slane %v8115_v12, 4  ;;  %v8150_v11 = vrot.slane %v8116_v54, 4  ;;  %v8117_v28 = vld [vmem:[#allocation2 + $0x20] sm:$0xff]  ;;  %9440 = vmatmul.mubr.bf16.gmra.mrb[212].mxu1 %v17746_v26 }
 0xb8c   : > { %v7327_v45 = vrot.slane %v7325_v53, 5  ;;  %v7614_v24 = vrot.slane %v7580_v14, 4  ;;  %v7615_v27 = vrot.slane %v17813_v38, 4  ;;  %v7728_v22 = vor.u32 %v7727_v17, %v7724_v41  ;;  %9447 = vmatprep.mubr.bf16.mxu1 %v17761_v61 }
 0xb8d   : > { %v7698_v19 = vsel %vm3151_vm15, %v8116_v54, 0  ;;  %vm19375_vm12 = vcmp.ne.s16.totalorder %v19292_v63, 0  ;;  %vm19376_vm6 = vcmp.ne.s16.totalorder %v19288_v15, 0  ;;  %v17856_v33 = vsel %vm1945_vm4, %v8149_v5, %v8150_v11 }
 0xb8e   : > { %v7914_v56 = vsel %vm19375_vm12, %v7897_v2, 0  ;;  %v7915_v60 = vsel %vm19376_vm6, %v8116_v54, 0  ;;  %v7328_v12 = vor.u32 %v7327_v45, %v7324_v57  ;;  %v17859_v37 = vsel %vm1945_vm4, %v7614_v24, %v7615_v27  ;;  %8198 = vst [vmem:[#allocation3 + $0x38] sm:$0xff] %v17856_v33  ;;  %v8118_v57 = vld [vmem:[#allocation2 + $0x28] sm:$0xff]  ;;  %9287 = vmatmul.mubr.bf16.gmra.mrb[184].mxu0 %v17767_v0 }
 0xb8f   : > { %v7731_v38 = vshrl.u32 %v7698_v19, 16  ;;  %v17862_v8 = vsel %vm2415_vm11, %v7720_v13, %v7728_v22  ;;  %7663 = vst [vmem:[#allocation3 + $0x20] sm:$0xff] %v17859_v37  ;;  %v7734_v63 = vshll.u32 %v7698_v19, 16  ;;  %v7932_v52 = vshrl.u32 %v7914_v56, 16  ;;  %9294 = vmatprep.mubr.bf16.mxu0 %v17749_v7 }
 0xb90   : > { %v7935_v15 = vshll.u32 %v7914_v56, 16  ;;  %7881 = vst [vmem:[#allocation3 + $0x28] sm:$0xff] %v17862_v8  ;;  %v17868_v54 = vsel %vm2415_vm11, %v7319_v16, %v7328_v12  ;;  %v7940_v14 = vshrl.u32 %v7915_v60, 16  ;;  %v7943_v41 = vshll.u32 %v7915_v60, 16 }
 0xb91   : > { %v7733_v36 = vrot.slane %v7731_v38, 4  ;;  %7361 = vst [vmem:[#allocation3 + $0x448] sm:$0xff] %v17868_v54  ;;  %v7736_v53 = vrot.slane %v7734_v63, 5  ;;  %v7934_v2 = vrot.slane %v7932_v52, 3  ;;  %v8152_v17 = vrot.slane %v8117_v28, 4 }
 0xb92   : > { %v7937_v13 = vrot.slane %v7935_v15, 4  ;;  %v7942_v5 = vrot.slane %v7940_v14, 3  ;;  %v7945_v45 = vrot.slane %v7943_v41, 4  ;;  %v17874_v24 = vsel %vm1945_vm4, %v7615_v27, %v8150_v11 }
 0xb93   : > { %v7699_v16 = vsel %vm3152_vm10, %v8117_v28, 0  ;;  %v7737_v19 = vor.u32 %v7736_v53, %v7733_v36  ;;  %v17879_v26 = vsel %vm1945_vm4, %v8150_v11, %v8152_v17  ;;  %7664 = vst [vmem:[#allocation3 + $0x68] sm:$0xff] %v17874_v24  ;;  %vm19377_vm3 = vcmp.ne.s16.totalorder %v19303_v51, 0  ;;  %v8119_v36 = vld [vmem:[#allocation2 + $0x30] sm:$0xff]  ;;  %9448 = vmatmul.mubr.bf16.gmra.mrb[216].mxu1 %v17778_v47 }
 0xb94   : > { %v7938_v56 = vor.u32 %v7937_v13, %v7934_v2  ;;  %v7740_v60 = vshrl.u32 %v7699_v16, 16  ;;  %v7946_v12 = vor.u32 %v7945_v45, %v7942_v5  ;;  %8199 = vst [vmem:[#allocation3 + $0x80] sm:$0xff] %v17879_v26  ;;  %v7743_v61 = vshll.u32 %v7699_v16, 16  ;;  %7665 = vst [vmem:[#allocation3 + $0xb0] sm:$0xff] %v17879_v26  ;;  %9455 = vmatprep.mubr.bf16.mxu1 %v17789_v50 }
 0xb95   : > { %v7916_v27 = vsel %vm19377_vm3, %v8117_v28, 0  ;;  %v8154_v38 = vrot.slane %v8118_v57, 4  ;;  %v17889_v11 = vsel %vm2415_vm11, %v7728_v22, %v7737_v19  ;;  %v7700_v28 = vsel %vm3153_vm14, %v8118_v57, 0 }
 0xb96   : > { %v7742_v63 = vrot.slane %v7740_v60, 4  ;;  %v7949_v52 = vshrl.u32 %v7916_v27, 16  ;;  %v7952_v15 = vshll.u32 %v7916_v27, 16  ;;  %7882 = vst [vmem:[#allocation3 + $0x70] sm:$0xff] %v17889_v11  ;;  %v17893_v0 = vsel %vm2593_vm8, %v7938_v56, %v7946_v12  ;;  %9295 = vmatmul.mubr.bf16.gmra.mrb[188].mxu0 %v17793_v39 }
 0xb97   : > { %v7745_v14 = vrot.slane %v7743_v61, 5  ;;  %v17896_v51 = vsel %vm1945_vm4, %v8152_v17, %v8154_v38  ;;  %8099 = vst [vmem:[#allocation3 + $0x30] sm:$0xff] %v17893_v0  ;;  %v7749_v41 = vshrl.u32 %v7700_v28, 16  ;;  %v7752_v53 = vshll.u32 %v7700_v28, 16  ;;  %v8120_v61 = vld [vmem:[#allocation2 + $0x38] sm:$0xff]  ;;  %9302 = vmatprep.mubr.bf16.mxu0 %v17771_v21 }
 0xb98   : > { %v7951_v7 = vrot.slane %v7949_v52, 3  ;;  %v7954_v22 = vrot.slane %v7952_v15, 4  ;;  %8200 = vst [vmem:[#allocation3 + $0xc8] sm:$0xff] %v17896_v51  ;;  %7666 = vst [vmem:[#allocation3 + $0xf8] sm:$0xff] %v17896_v51  ;;  %vm19378_vm12 = vcmp.ne.s16.totalorder %v19307_v9, 0  ;;  %v8156_v5 = vrot.slane %v8119_v36, 4 }
 0xb99   : > { %v7746_v2 = vor.u32 %v7745_v14, %v7742_v63  ;;  %v7917_v13 = vsel %vm19378_vm12, %v8118_v57, 0  ;;  %vm19379_vm6 = vcmp.ne.s16.totalorder %v19321_v3, 0  ;;  %v7751_v16 = vrot.slane %v7749_v41, 4 }
 0xb9a   : > { %v7701_v17 = vsel %vm19379_vm6, %v8119_v36, 0  ;;  %v7955_v45 = vor.u32 %v7954_v22, %v7951_v7  ;;  %v7754_v56 = vrot.slane %v7752_v53, 5  ;;  %v7958_v60 = vshrl.u32 %v7917_v13, 16 }
 0xb9b   : > { %v17910_v27 = vsel %vm2415_vm11, %v7737_v19, %v7746_v2  ;;  %v7961_v63 = vshll.u32 %v7917_v13, 16  ;;  %v17913_v9 = vsel %vm1945_vm4, %v8154_v38, %v8156_v5  ;;  %v7758_v57 = vshrl.u32 %v7701_v17, 16  ;;  %9456 = vmatmul.mubr.bf16.gmra.mrb[220].mxu1 %v17806_v43 }
 0xb9c   : > { %7883 = vst [vmem:[#allocation3 + $0xb8] sm:$0xff] %v17910_v27  ;;  %v17917_v52 = vsel %vm2593_vm8, %v7946_v12, %v7955_v45  ;;  %v7755_v47 = vor.u32 %v7754_v56, %v7751_v16  ;;  %v7960_v15 = vrot.slane %v7958_v60, 3  ;;  %8201 = vst [vmem:[#allocation3 + $0x110] sm:$0xff] %v17913_v9  ;;  %v7761_v14 = vshll.u32 %v7701_v17, 16  ;;  %9463 = vmatprep.mubr.bf16.mxu1 %v17818_v23 }
 0xb9d   : > { %7667 = vst [vmem:[#allocation3 + $0x140] sm:$0xff] %v17913_v9  ;;  %8100 = vst [vmem:[#allocation3 + $0x78] sm:$0xff] %v17917_v52  ;;  %v7963_v50 = vrot.slane %v7961_v63, 4  ;;  %v7760_v19 = vrot.slane %v7758_v57, 4  ;;  %vm19380_vm3 = vcmp.ne.s16.totalorder %v19314_v62, 0  ;;  %v8158_v28 = vrot.slane %v8120_v61, 4 }
 0xb9e   : > { %v7918_v38 = vsel %vm19380_vm3, %v8119_v36, 0  ;;  %v17927_v12 = vsel %vm2415_vm11, %v7746_v2, %v7755_v47  ;;  %v7763_v7 = vrot.slane %v7761_v14, 5  ;;  %vm19381_vm12 = vcmp.ne.s16.totalorder %v19326_v58, 0  ;;  %v8121_v36 = vld [vmem:[#allocation2 + $0x40] sm:$0xff]  ;;  %v7904_v14 = vld [vmem:[#allocation2 + $0x48] sm:$0xff]  ;;  %9303 = vmatmul.mubr.bf16.gmra.mrb[192].mxu0 %v17821_v30 }
 0xb9f   : > { %v7967_v22 = vshrl.u32 %v7918_v38, 16  ;;  %v7970_v41 = vshll.u32 %v7918_v38, 16  ;;  %7884 = vst [vmem:[#allocation3 + $0x100] sm:$0xff] %v17927_v12  ;;  %v7964_v53 = vor.u32 %v7963_v50, %v7960_v15  ;;  %v17931_v39 = vsel %vm1945_vm4, %v8156_v5, %v8158_v28  ;;  %9310 = vmatprep.mubr.bf16.mxu0 %v17797_v1 }
 0xba0   : > { %v7702_v13 = vsel %vm19381_vm12, %v8120_v61, 0  ;;  %vm19382_vm6 = vcmp.ne.s16.totalorder %v19318_v35, 0  ;;  %v7764_v21 = vor.u32 %v7763_v7, %v7760_v19  ;;  %8202 = vst [vmem:[#allocation3 + $0x158] sm:$0xff] %v17931_v39  ;;  %7668 = vst [vmem:[#allocation3 + $0x188] sm:$0xff] %v17931_v39  ;;  %v8160_v15 = vrot.slane %v8121_v36, 4 }
 0xba1   : > { %v7919_v62 = vsel %vm19382_vm6, %v8120_v61, 0  ;;  %v7969_v17 = vrot.slane %v7967_v22, 3  ;;  %v7972_v2 = vrot.slane %v7970_v41, 4  ;;  %v7767_v16 = vshrl.u32 %v7702_v13, 16 }
 0xba2   : > { %v17940_v56 = vsel %vm2593_vm8, %v7955_v45, %v7964_v53  ;;  %v7770_v5 = vshll.u32 %v7702_v13, 16  ;;  %v7976_v60 = vshrl.u32 %v7919_v62, 16  ;;  %v7979_v63 = vshll.u32 %v7919_v62, 16 }
 0xba3   : > { %8101 = vst [vmem:[#allocation3 + $0xc0] sm:$0xff] %v17940_v56  ;;  %v17945_v35 = vsel %vm2415_vm11, %v7755_v47, %v7764_v21  ;;  %v7973_v61 = vor.u32 %v7972_v2, %v7969_v17  ;;  %v7769_v57 = vrot.slane %v7767_v16, 4  ;;  %vm19383_vm3 = vcmp.ne.s16.totalorder %v19331_v34, 0  ;;  %v8123_v2 = vld [vmem:[#allocation2 + $0x50] sm:$0xff]  ;;  %9464 = vmatmul.mubr.bf16.gmra.mrb[224].mxu1 %v17833_v25 }
 0xba4   : > { %7885 = vst [vmem:[#allocation3 + $0x148] sm:$0xff] %v17945_v35  ;;  %v7772_v45 = vrot.slane %v7770_v5, 5  ;;  %v7978_v50 = vrot.slane %v7976_v60, 3  ;;  %v7981_v19 = vrot.slane %v7979_v63, 4  ;;  %v7703_v38 = vsel %vm19383_vm3, %v8121_v36, 0  ;;  %9471 = vmatprep.mubr.bf16.mxu1 %v17839_v48 }
 0xba5   : > { %v17952_v43 = vsel %vm2593_vm8, %v7964_v53, %v7973_v61  ;;  %v17955_v47 = vsel %vm1945_vm4, %v8158_v28, %v8160_v15  ;;  %v7776_v7 = vshrl.u32 %v7703_v38, 16  ;;  %v7779_v22 = vshll.u32 %v7703_v38, 16 }
 0xba6   : > { %8102 = vst [vmem:[#allocation3 + $0x108] sm:$0xff] %v17952_v43  ;;  %v7773_v23 = vor.u32 %v7772_v45, %v7769_v57  ;;  %v7982_v41 = vor.u32 %v7981_v19, %v7978_v50  ;;  %8203 = vst [vmem:[#allocation3 + $0x1a0] sm:$0xff] %v17955_v47  ;;  %vm19384_vm12 = vcmp.ne.s16.totalorder %v19323_v44, 0  ;;  %vm19385_vm6 = vcmp.ne.s16.totalorder %v19328_v42, 0  ;;  %9311 = vmatmul.mubr.bf16.gmra.mrb[196].mxu0 %v17842_v32 }
 0xba7   : > { %v7920_v13 = vsel %vm19384_vm12, %v8121_v36, 0  ;;  %v7921_v53 = vsel %vm19385_vm6, %v7904_v14, 0  ;;  %7669 = vst [vmem:[#allocation3 + $0x1d0] sm:$0xff] %v17955_v47  ;;  %v7778_v28 = vrot.slane %v7776_v7, 4  ;;  %v7781_v62 = vrot.slane %v7779_v22, 5  ;;  %v8124_v22 = vld [vmem:[#allocation2 + $0x58] sm:$0xff]  ;;  %9512 = vmatprep.mubr.bf16.mxu0 %v17862_v8 }
 0xba8   : > { %v7985_v17 = vshrl.u32 %v7920_v13, 16  ;;  %v7988_v30 = vshll.u32 %v7920_v13, 16  ;;  %v17967_v16 = vsel %vm2415_vm11, %v7764_v21, %v7773_v23  ;;  %v17970_v5 = vsel %vm2593_vm8, %v7973_v61, %v7982_v41 }
 0xba9   : > { %v7994_v44 = vshrl.u32 %v7921_v53, 16  ;;  %v7997_v36 = vshll.u32 %v7921_v53, 16  ;;  %7886 = vst [vmem:[#allocation3 + $0x190] sm:$0xff] %v17967_v16  ;;  %8103 = vst [vmem:[#allocation3 + $0x150] sm:$0xff] %v17970_v5  ;;  %v7782_v42 = vor.u32 %v7781_v62, %v7778_v28  ;;  %v8162_v63 = vrot.slane %v7904_v14, 4 }
 0xbaa   : > { %v7987_v60 = vrot.slane %v7985_v17, 3  ;;  %v7990_v1 = vrot.slane %v7988_v30, 4  ;;  %vm19386_vm3 = vcmp.ne.s16.totalorder %v19336_v10, 0  ;;  %v8164_v21 = vrot.slane %v8123_v2, 4 }
 0xbab   : > { %v7996_v57 = vrot.slane %v7994_v44, 3  ;;  %v7999_v45 = vrot.slane %v7997_v36, 4  ;;  %v7704_v50 = vsel %vm19386_vm3, %v7904_v14, 0  ;;  %v17978_v61 = vsel %vm2415_vm11, %v7773_v23, %v7782_v42  ;;  %9472 = vmatmul.mubr.bf16.gmra.mrb[228].mxu1 %v17868_v54 }
 0xbac   : > { %v7991_v19 = vor.u32 %v7990_v1, %v7987_v60  ;;  %v17981_v38 = vsel %vm1945_vm4, %v8160_v15, %v8162_v63  ;;  %v7785_v7 = vshrl.u32 %v7704_v50, 16  ;;  %7887 = vst [vmem:[#allocation3 + $0x1d8] sm:$0xff] %v17978_v61  ;;  %v7788_v14 = vshll.u32 %v7704_v50, 16  ;;  %9673 = vmatprep.mubr.bf16.mxu1 %v17856_v33 }
 0xbad   : > { %v8000_v13 = vor.u32 %v7999_v45, %v7996_v57  ;;  %8204 = vst [vmem:[#allocation3 + $0x1e8] sm:$0xff] %v17981_v38  ;;  %v17987_v53 = vsel %vm1945_vm4, %v8162_v63, %v8164_v21  ;;  %7670 = vst [vmem:[#allocation3 + $0x218] sm:$0xff] %v17981_v38  ;;  %vm19388_vm12 = vcmp.ne.s16.totalorder %v19341_v6, 0  ;;  %vm19389_vm6 = vcmp.ne.s16.totalorder %v19333_v31, 0 }
 0xbae   : > { %19387 = vst [vmem:[#allocation65_spill] sm:$0xff] %v17987_v53  ;;  %v7705_v25 = vsel %vm19388_vm12, %v8123_v2, 0  ;;  %v17993_v15 = vsel %vm2593_vm8, %v7982_v41, %v7991_v19  ;;  %v7787_v23 = vrot.slane %v7785_v7, 4  ;;  %8205 = vst [vmem:[#allocation3 + $0x230] sm:$0xff] %v17987_v53  ;;  %v7790_v17 = vrot.slane %v7788_v14, 5  ;;  %9513 = vmatmul.mubr.bf16.vlgmr.msra.gmra.mrb[200].mxu0 %v17859_v37 }
 0xbaf   : > { %v7794_v48 = vshrl.u32 %v7705_v25, 16  ;;  %v7797_v28 = vshll.u32 %v7705_v25, 16  ;;  %7671 = vst [vmem:[#allocation3 + $0x260] sm:$0xff] %v17987_v53  ;;  %v17999_v62 = vsel %vm2593_vm8, %v7991_v19, %v8000_v13  ;;  %8104 = vst [vmem:[#allocation3 + $0x198] sm:$0xff] %v17993_v15  ;;  %v7922_v30 = vsel %vm19389_vm6, %v8123_v2, 0  ;;  %v18013_v2 = vld [vmem:[#allocation2 + $0x60] sm:$0xff]  ;;  %9520 = vmatprep.mubr.bf16.mxu0 %v17889_v11 }
 0xbb0   : > { %v8166_v41 = vrot.slane %v8124_v22, 4  ;;  %8105 = vst [vmem:[#allocation3 + $0x1e0] sm:$0xff] %v17999_v62  ;;  %v8003_v60 = vshrl.u32 %v7922_v30, 16  ;;  %v8006_v1 = vshll.u32 %v7922_v30, 16  ;;  %v7791_v63 = vor.u32 %v7790_v17, %v7787_v23  ;;  %v8216_v53 = vld [vmem:[#allocation2 + $0x20] sm:$0xff] }
 0xbb1   : > { %v7796_v44 = vrot.slane %v7794_v48, 4  ;;  %v7799_v36 = vrot.slane %v7797_v28, 5  ;;  %vm19391_vm3 = vcmp.ne.s16.totalorder %v19346_v4, 0  ;;  %vm19392_vm12 = vcmp.ne.s16.totalorder %v19338_v46, 0  ;;  %v18026_v28 = vld [vmem:[#allocation2 + $0x68] sm:$0xff] }
 0xbb2   : > { %v18007_v32 = vsel %vm1945_vm4, %v8164_v21, %v8166_v41  ;;  %v7706_v57 = vsel %vm19391_vm3, %v8124_v22, 0  ;;  %v7923_v31 = vsel %vm19392_vm12, %v8124_v22, 0  ;;  %v8005_v8 = vrot.slane %v8003_v60, 3 }
 0xbb3   : > { %19390 = vst [vmem:[#allocation66_spill] sm:$0xff] %v18007_v32  ;;  %v7800_v45 = vor.u32 %v7799_v36, %v7796_v44  ;;  %v8008_v50 = vrot.slane %v8006_v1, 4  ;;  %8206 = vst [vmem:[#allocation3 + $0x278] sm:$0xff] %v18007_v32  ;;  %v7803_v19 = vshrl.u32 %v7706_v57, 16  ;;  %v18018_v7 = vsel %vm2415_vm11, %v7782_v42, %v7791_v63  ;;  %v12752_v42 = vld [vmem:[#allocation9 + $0x208] sm:$0xff]   ;;  %9674 = vmatmul.mubr.bf16.vlgmr.msra.gmra.mrb[232].mxu1 %v17893_v0  ;;  %v18082_v0 = vld [vmem:[#allocation2 + $0x78] sm:$0xff] }
 0xbb4   : > { %7672 = vst [vmem:[#allocation3 + $0x2a8] sm:$0xff] %v18007_v32  ;;  %v7806_v21 = vshll.u32 %v7706_v57, 16  ;;  %v8012_v14 = vshrl.u32 %v7923_v31, 16  ;;  %v8015_v25 = vshll.u32 %v7923_v31, 16  ;;  %7888 = vst [vmem:[#allocation3 + $0x220] sm:$0xff] %v18018_v7  ;;  %v8168_v48 = vrot.slane %v18013_v2, 4  ;;  %9681 = vmatprep.mubr.bf16.mxu1 %v17879_v26 }
 0xbb5   : > { %v18023_v46 = vsel %vm2415_vm11, %v7791_v63, %v7800_v45  ;;  %v8009_v22 = vor.u32 %v8008_v50, %v8005_v8  ;;  %v7805_v23 = vrot.slane %v7803_v19, 4  ;;  %v7707_v54 = vsel %vm3160_vm9, %v18013_v2, 0 }
 0xbb6   : > { %19393 = vst [vmem:[#allocation31_spill] sm:$0xff] %v18023_v46  ;;  %7889 = vst [vmem:[#allocation3 + $0x268] sm:$0xff] %v18023_v46  ;;  %v7808_v17 = vrot.slane %v7806_v21, 5  ;;  %v8014_v30 = vrot.slane %v8012_v14, 3  ;;  %v8017_v44 = vrot.slane %v8015_v25, 4  ;;  %v18037_v60 = vsel %vm1945_vm4, %v8166_v41, %v8168_v48  ;;  %v13042_v41 = vld [vmem:[#allocation9 + $0x200] sm:$0xff]   ;;  %9521 = vmatmul.mubr.bf16.gmra.mrb[204].mxu0 %v17874_v24 }
 0xbb7   : > { %v18034_v36 = vsel %vm2593_vm8, %v8000_v13, %v8009_v22  ;;  %19395 = vst [vmem:[#allocation49_spill] sm:$0xff] %v18037_v60  ;;  %v7812_v1 = vshrl.u32 %v7707_v54, 16  ;;  %v7815_v63 = vshll.u32 %v7707_v54, 16  ;;  %8207 = vst [vmem:[#allocation3 + $0x2c0] sm:$0xff] %v18037_v60  ;;  %vm19396_vm6 = vcmp.ne.s16.totalorder %v19343_v59, 0  ;;  %12239 = vmatpush3.bf16.msra.mxu0 %v13042_v41  ;;  %v18048_v21 = vld [vmem:[#allocation2 + $0x70] sm:$0xff]  ;;  %9528 = vmatprep.mubr.bf16.mxu0 %v17910_v27 }
 0xbb8   : > { %19394 = vst [vmem:[#allocation26_spill] sm:$0xff] %v18034_v36  ;;  %8106 = vst [vmem:[#allocation3 + $0x228] sm:$0xff] %v18034_v36  ;;  %v7809_v33 = vor.u32 %v7808_v17, %v7805_v23  ;;  %v8018_v57 = vor.u32 %v8017_v44, %v8014_v30  ;;  %v7924_v31 = vsel %vm19396_vm6, %v18013_v2, 0  ;;  %v8170_v13 = vrot.slane %v18026_v28, 4  ;;  %12240 = vmatprep.subr.bf16.mxu0 %v12752_v42  ;;  %v12753_v14 = vld [vmem:[#allocation9 + $0x210] sm:$0xff]   ;;  %v19400_v17 = vld [vmem:[#allocation46_spill] sm:$0xff] }
 0xbb9   : > { %7673 = vst [vmem:[#allocation3 + $0x2f0] sm:$0xff] %v18037_v60  ;;  %v7814_v8 = vrot.slane %v7812_v1, 4  ;;  %v7817_v37 = vrot.slane %v7815_v63, 5  ;;  %v8021_v50 = vshrl.u32 %v7924_v31, 16  ;;  %v8024_v19 = vshll.u32 %v7924_v31, 16  ;;  %v19404_v31 = vld [vmem:[#allocation29_spill] sm:$0xff] }
 0xbba   : > { %v18051_v25 = vsel %vm2415_vm11, %v7800_v45, %v7809_v33  ;;  %v18054_v59 = vsel %vm2593_vm8, %v8009_v22, %v8018_v57  ;;  %v18057_v23 = vsel %vm1945_vm4, %v8168_v48, %v8170_v13  ;;  %vm19401_vm3 = vcmp.ne.s16.totalorder %v19400_v17, 0  ;;  %v19402_v48 = vld [vmem:[#allocation35_spill] sm:$0xff]  ;;  %v12755_v24 = vld [vmem:[#allocation9 + $0x220] sm:$0xff]  }
 0xbbb   : > { %19397 = vst [vmem:[#allocation57_spill] sm:$0xff] %v18051_v25  ;;  %19398 = vst [vmem:[#allocation58_spill] sm:$0xff] %v18054_v59  ;;  %v7708_v11 = vsel %vm19401_vm3, %v18026_v28, 0  ;;  %v7818_v30 = vor.u32 %v7817_v37, %v7814_v8  ;;  %v8023_v44 = vrot.slane %v8021_v50, 3  ;;  %v8026_v54 = vrot.slane %v8024_v19, 4  ;;  %12241 = vmatpush3.bf16.msra.mxu0 %v12752_v42  ;;  %9682 = vmatmul.mubr.bf16.gmra.mrb[236].mxu1 %v17917_v52  ;;  %v8215_v46 = vld [vmem:[#allocation2 + $0x18] sm:$0xff] }
 0xbbc   : > { %19399 = vst [vmem:[#allocation59_spill] sm:$0xff] %v18057_v23  ;;  %7890 = vst [vmem:[#allocation3 + $0x2b0] sm:$0xff] %v18051_v25  ;;  %v7821_v45 = vshrl.u32 %v7708_v11, 16  ;;  %v7824_v22 = vshll.u32 %v7708_v11, 16  ;;  %vm19403_vm12 = vcmp.ne.s16.totalorder %v19402_v48, 0  ;;  %v8172_v63 = vrot.slane %v18048_v21, 4  ;;  %12242 = vmatprep.subr.bf16.mxu0 %v12753_v14  ;;  %9689 = vmatprep.mubr.bf16.mxu1 %v17896_v51 }
 0xbbd   : > { %8107 = vst [vmem:[#allocation3 + $0x270] sm:$0xff] %v18054_v59  ;;  %8208 = vst [vmem:[#allocation3 + $0x308] sm:$0xff] %v18057_v23  ;;  %v7925_v1 = vsel %vm19403_vm12, %v18026_v28, 0  ;;  %vm19405_vm6 = vcmp.ne.s16.totalorder %v19404_v31, 0  ;;  %v18075_v8 = vsel %vm2415_vm11, %v7809_v33, %v7818_v30  ;;  %v8027_v37 = vor.u32 %v8026_v54, %v8023_v44  ;;  %v12754_v11 = vld [vmem:[#allocation9 + $0x218] sm:$0xff]   ;;  %v19409_v54 = vld [vmem:[#allocation25_spill] sm:$0xff] }
 0xbbe   : > { %7674 = vst [vmem:[#allocation3 + $0x338] sm:$0xff] %v18057_v23  ;;  %v7709_v41 = vsel %vm19405_vm6, %v18048_v21, 0  ;;  %19406 = vst [vmem:[#allocation63_spill] sm:$0xff] %v18075_v8  ;;  %v7823_v50 = vrot.slane %v7821_v45, 4  ;;  %v8030_v19 = vshrl.u32 %v7925_v1, 16  ;;  %v7826_v48 = vrot.slane %v7824_v22, 5  ;;  %9529 = vmatmul.mubr.bf16.gmra.mrb[208].mxu0 %v17879_v26 }
 0xbbf   : > { %7891 = vst [vmem:[#allocation3 + $0x2f8] sm:$0xff] %v18075_v8  ;;  %v8033_v23 = vshll.u32 %v7925_v1, 16  ;;  %v18080_v60 = vsel %vm1945_vm4, %v8170_v13, %v8172_v63  ;;  %v7830_v59 = vshrl.u32 %v7709_v41, 16  ;;  %v18085_v42 = vsel %vm2593_vm8, %v8018_v57, %v8027_v37  ;;  %12243 = vmatpush3.bf16.msra.mxu0 %v12753_v14  ;;  %9536 = vmatprep.mubr.bf16.mxu0 %v17927_v12  ;;  %v12757_v26 = vld [vmem:[#allocation9 + $0x230] sm:$0xff]  }
 0xbc0   : > { %19407 = vst [vmem:[#allocation60_spill] sm:$0xff] %v18080_v60  ;;  %19408 = vst [vmem:[#allocation61_spill] sm:$0xff] %v18085_v42  ;;  %v8032_v33 = vrot.slane %v8030_v19, 3  ;;  %v7833_v44 = vshll.u32 %v7709_v41, 16  ;;  %vm19410_vm3 = vcmp.ne.s16.totalorder %v19409_v54, 0  ;;  %v7827_v13 = vor.u32 %v7826_v48, %v7823_v50  ;;  %12244 = vmatprep.subr.bf16.mxu0 %v12754_v11 }
 0xbc1   : > { %8209 = vst [vmem:[#allocation3 + $0x350] sm:$0xff] %v18080_v60  ;;  %v7926_v45 = vsel %vm19410_vm3, %v18048_v21, 0  ;;  %7675 = vst [vmem:[#allocation3 + $0x380] sm:$0xff] %v18080_v60  ;;  %v8035_v22 = vrot.slane %v8033_v23, 4  ;;  %v7832_v1 = vrot.slane %v7830_v59, 4  ;;  %v8174_v41 = vrot.slane %v18082_v0, 4 }
 0xbc2   : > { %8108 = vst [vmem:[#allocation3 + $0x2b8] sm:$0xff] %v18085_v42  ;;  %v8039_v8 = vshrl.u32 %v7926_v45, 16  ;;  %v7835_v57 = vrot.slane %v7833_v44, 5  ;;  %v8042_v19 = vshll.u32 %v7926_v45, 16  ;;  %v7710_v25 = vsel %vm3163_vm7, %v18082_v0, 0  ;;  %v18099_v60 = vld [vmem:[#allocation2 + $0x80] sm:$0xff] }
 0xbc3   : > { %v18102_v50 = vsel %vm2415_vm11, %v7818_v30, %v7827_v13  ;;  %v8036_v59 = vor.u32 %v8035_v22, %v8032_v33  ;;  %v7839_v48 = vshrl.u32 %v7710_v25, 16  ;;  %v18106_v44 = vsel %vm1945_vm4, %v8172_v63, %v8174_v41  ;;  %v19415_v30 = vld [vmem:[#allocation52_spill] sm:$0xff]  ;;  %12245 = vmatpush3.bf16.msra.mxu0 %v12754_v11  ;;  %9690 = vmatmul.mubr.bf16.gmra.mrb[240].mxu1 %v17940_v56 }
 0xbc4   : > { %19412 = vst [vmem:[#allocation24_spill] sm:$0xff] %v18102_v50  ;;  %v8041_v23 = vrot.slane %v8039_v8, 3  ;;  %7892 = vst [vmem:[#allocation3 + $0x340] sm:$0xff] %v18102_v50  ;;  %v7836_v27 = vor.u32 %v7835_v57, %v7832_v1  ;;  %v8044_v14 = vrot.slane %v8042_v19, 4  ;;  %v7842_v45 = vshll.u32 %v7710_v25, 16  ;;  %v18124_v1 = vld [vmem:[#allocation2 + $0x88] sm:$0xff]  ;;  %12246 = vmatprep.subr.bf16.mxu0 %v12755_v24  ;;  %9697 = vmatprep.mubr.bf16.mxu1 %v17913_v9 }
 0xbc5   : > { %19413 = vst [vmem:[#allocation37_spill] sm:$0xff] %v18106_v44  ;;  %v18109_v42 = vsel %vm2593_vm8, %v8027_v37, %v8036_v59  ;;  %8210 = vst [vmem:[#allocation3 + $0x398] sm:$0xff] %v18106_v44  ;;  %v7841_v32 = vrot.slane %v7839_v48, 4  ;;  %vm19416_vm12 = vcmp.ne.s16.totalorder %v19415_v30, 0  ;;  %v18116_v8 = vrot.slane %v18099_v60, 4  ;;  %v12756_v57 = vld [vmem:[#allocation9 + $0x228] sm:$0xff]  }
 0xbc6   : > { %19414 = vst [vmem:[#allocation34_spill] sm:$0xff] %v18109_v42  ;;  %v7927_v33 = vsel %vm19416_vm12, %v18082_v0, 0  ;;  %7676 = vst [vmem:[#allocation3 + $0x3c8] sm:$0xff] %v18106_v44  ;;  %v18122_v25 = vsel %vm2415_vm11, %v7827_v13, %v7836_v27  ;;  %v8045_v63 = vor.u32 %v8044_v14, %v8041_v23  ;;  %v7844_v37 = vrot.slane %v7842_v45, 5  ;;  %v19420_v23 = vld [vmem:[#allocation54_spill] sm:$0xff]  ;;  %9537 = vmatmul.mubr.bf16.gmra.mrb[212].mxu0 %v17896_v51 }
 0xbc7   : > { %8109 = vst [vmem:[#allocation3 + $0x300] sm:$0xff] %v18109_v42  ;;  %19417 = vst [vmem:[#allocation27_spill] sm:$0xff] %v18122_v25  ;;  %v8048_v22 = vshrl.u32 %v7927_v33, 16  ;;  %v8051_v19 = vshll.u32 %v7927_v33, 16  ;;  %v18130_v52 = vsel %vm1945_vm4, %v8174_v41, %v18116_v8  ;;  %v7711_v13 = vsel %vm3164_vm13, %v18099_v60, 0  ;;  %12247 = vmatpush3.bf16.msra.mxu0 %v12755_v24  ;;  %9544 = vmatprep.mubr.bf16.mxu0 %v17945_v35  ;;  %v18199_v35 = vld [vmem:[%s18775_s14] sm:$0xff]  }
 0xbc8   : > { %7893 = vst [vmem:[#allocation3 + $0x388] sm:$0xff] %v18122_v25  ;;  %19418 = vst [vmem:[#allocation50_spill] sm:$0xff] %v18130_v52  ;;  %vm19421_vm6 = vcmp.ne.s16.totalorder %v19420_v23, 0  ;;  %v7695_v14 = vld [vmem:[#allocation2 + $0x88] sm:$0x1f]  ;;  %v18139_v45 = vsel %vm2593_vm8, %v8036_v59, %v8045_v63  ;;  %v7845_v30 = vor.u32 %v7844_v37, %v7841_v32  ;;  %v7848_v41 = vshrl.u32 %v7711_v13, 16  ;;  %12248 = vmatprep.subr.bf16.mxu0 %v12756_v57 }
 0xbc9   : > { %v7928_v48 = vsel %vm19421_vm6, %v18099_v60, 0  ;;  %19422 = vst [vmem:[#allocation64_spill] sm:$0xff] %v18139_v45  ;;  %v8050_v44 = vrot.slane %v8048_v22, 3  ;;  %8211 = vst [vmem:[#allocation3 + $0x3e0] sm:$0xff] %v18130_v52  ;;  %v8053_v33 = vrot.slane %v8051_v19, 4  ;;  %v7851_v25 = vshll.u32 %v7711_v13, 16 }
 0xbca   : > { %7677 = vst [vmem:[#allocation3 + $0x410] sm:$0xff] %v18130_v52  ;;  %8110 = vst [vmem:[#allocation3 + $0x348] sm:$0xff] %v18139_v45  ;;  %v8057_v42 = vshrl.u32 %v7928_v48, 16  ;;  %v8060_v23 = vshll.u32 %v7928_v48, 16  ;;  %v18147_v59 = vsel %vm2415_vm11, %v7836_v27, %v7845_v30  ;;  %v7850_v32 = vrot.slane %v7848_v41, 4  ;;  %v19424_v41 = vld [vmem:[#allocation21_spill] sm:$0xff] }
 0xbcb   : > { %19423 = vst [vmem:[#allocation62_spill] sm:$0xff] %v18147_v59  ;;  %v8178_v37 = vrot.slane %v18124_v1, 4  ;;  %v7712_v22 = vsel %vm3165_vm0, %v7695_v14, 0  ;;  %7894 = vst [vmem:[#allocation3 + $0x3d0] sm:$0xff] %v18147_v59  ;;  %v8054_v19 = vor.u32 %v8053_v33, %v8050_v44  ;;  %v7853_v13 = vrot.slane %v7851_v25, 5  ;;  %12249 = vmatpush3.bf16.msra.mxu0 %v12756_v57  ;;  %9698 = vmatmul.mubr.bf16.gmra.mrb[244].mxu1 %v17952_v43 }
 0xbcc   : > { %v8059_v52 = vrot.slane %v8057_v42, 3  ;;  %v8062_v48 = vrot.slane %v8060_v23, 4  ;;  %v8131_v45 = vld [vmem:[#allocation2 + $0x90] sm:$0xf]  ;;  %v7857_v24 = vshrl.u32 %v7712_v22, 16  ;;  %v7860_v27 = vshll.u32 %v7712_v22, 16  ;;  %12250 = vmatprep.subr.bf16.mxu0 %v12757_v26  ;;  %9705 = vmatprep.mubr.bf16.mxu1 %v17931_v39 }
 0xbcd   : > { %v18155_v12 = vsel %vm1945_vm4, %v18116_v8, %v8178_v37  ;;  %vm19425_vm3 = vcmp.ne.s16.totalorder %v19424_v41, 0  ;;  %v7596_v14 = vld [vmem:[#allocation2 + $0x88] sm:$0xf]  ;;  %v18161_v36 = vsel %vm2593_vm8, %v8045_v63, %v8054_v19  ;;  %v7854_v59 = vor.u32 %v7853_v13, %v7850_v32  ;;  %v8214_v25 = vld [vmem:[#allocation2 + $0x10] sm:$0xf0] }
 0xbce   : > { %v7929_v50 = vsel %vm19425_vm3, %v18124_v1, 0  ;;  %v8063_v44 = vor.u32 %v8062_v48, %v8059_v52  ;;  %8212 = vst [vmem:[#allocation3 + $0x428] sm:$0xff] %v18155_v12  ;;  %8111 = vst [vmem:[#allocation3 + $0x390] sm:$0xff] %v18161_v36  ;;  %v7859_v33 = vrot.slane %v7857_v24, 4  ;;  %v7862_v23 = vrot.slane %v7860_v27, 5  ;;  %v12758_v32 = vld [vmem:[#allocation9 + $0x238] sm:$0xff]   ;;  %9545 = vmatmul.mubr.bf16.gmra.mrb[216].mxu0 %v17913_v9 }
 0xbcf   : > { %v8066_v42 = vshrl.u32 %v7929_v50, 16  ;;  %v8069_v22 = vshll.u32 %v7929_v50, 16  ;;  %v8180_v41 = vrot.slane %v8131_v45, 4  ;;  %v18168_v63 = vsel %vm2415_vm11, %v7845_v30, %v7854_v59  ;;  %12251 = vmatpush3.bf16.msra.mxu0 %v12757_v26  ;;  %9552 = vmatprep.mubr.bf16.mxu0 %v17967_v16 }
 0xbd0   : > { %v18171_v52 = vsel %vm2593_vm8, %v8054_v19, %v8063_v44  ;;  %v7645_v57 = vrot.slane %v7596_v14, 4  ;;  %7895 = vst [vmem:[#allocation3 + $0x418] sm:$0xff] %v18168_v63  ;;  %v7863_v50 = vor.u32 %v7862_v23, %v7859_v33  ;;  %v8231_v24 = vsel %vm3149_vm5, %v8214_v25, 0  ;;  %v8217_v33 = vld [vmem:[#allocation2 + $0x28] sm:$0xff]  ;;  %12252 = vmatprep.subr.bf16.mxu0 %v12758_v32 }
 0xbd1   : > { %v8068_v56 = vrot.slane %v8066_v42, 3  ;;  %8112 = vst [vmem:[#allocation3 + $0x3d8] sm:$0xff] %v18171_v52  ;;  %v8071_v45 = vrot.slane %v8069_v22, 4  ;;  %v18176_v13 = vsel %vm1945_vm4, %v8178_v37, %v8180_v41  ;;  %v8232_v19 = vsel %vm3150_vm2, %v8215_v46, 0  ;;  %v7913_v37 = vld [vmem:[#allocation2 + $0x90] sm:$0xf] }
 0xbd2   : > { %8213 = vst [vmem:[#allocation3 + $0x470] sm:$0xff] %v18176_v13  ;;  %v18184_v30 = vsel %vm1945_vm4, %v18116_v8, %v7645_v57  ;;  %v8233_v27 = vsel %vm3151_vm15, %v8216_v53, 0  ;;  %v8249_v14 = vshrl.u32 %v8231_v24, 16  ;;  %v18192_v42 = vsel %vm2415_vm11, %v7854_v59, %v7863_v50  ;;  %v8218_v59 = vld [vmem:[#allocation2 + $0x30] sm:$0xff] }
 0xbd3   : > { %v8072_v51 = vor.u32 %v8071_v45, %v8068_v56  ;;  %7678 = vst [vmem:[#allocation3 + $0x458] sm:$0xff] %v18184_v30  ;;  %v8252_v25 = vshll.u32 %v8231_v24, 16  ;;  %v8257_v8 = vshrl.u32 %v8232_v19, 16  ;;  %7896 = vst [vmem:[#allocation3 + $0x460] sm:$0xff] %v18192_v42  ;;  %v8260_v29 = vshll.u32 %v8232_v19, 16  ;;  %v19427_v41 = vld [vmem:[#allocation56_spill] sm:$0xff]  ;;  %12253 = vmatpush3.bf16.msra.mxu0 %v12758_v32  ;;  %9706 = vmatmul.mubr.bf16.gmra.mrb[248].mxu1 %v17970_v5 }
 0xbd4   : > { %v8251_v55 = vrot.slane %v8249_v14, 4  ;;  %v8266_v53 = vshrl.u32 %v8233_v27, 16  ;;  %v8269_v46 = vshll.u32 %v8233_v27, 16  ;;  %vm19428_vm4 = vcmp.ne.s16.totalorder %v19427_v41, 0  ;;  %v8219_v14 = vld [vmem:[#allocation2 + $0x38] sm:$0xff]  ;;  %12286 = vmatprep.subr.bf16.mxu0 %v18199_v35  ;;  %9713 = vmatprep.mubr.bf16.mxu1 %v17955_v47 }
 0xbd5   : > { %v18202_v26 = vsel %vm2593_vm8, %v8063_v44, %v8072_v51  ;;  %v8254_v23 = vrot.slane %v8252_v25, 5  ;;  %v8259_v22 = vrot.slane %v8257_v8, 4  ;;  %v7930_v56 = vsel %vm19428_vm4, %v7913_v37, 0 }
 0xbd6   : > { %8113 = vst [vmem:[#allocation3 + $0x420] sm:$0xff] %v18202_v26  ;;  %v8262_v57 = vrot.slane %v8260_v29, 5  ;;  %v8268_v50 = vrot.slane %v8266_v53, 4  ;;  %v8271_v45 = vrot.slane %v8269_v46, 5  ;;  %v8075_v48 = vshrl.u32 %v7930_v56, 16  ;;  %v8220_v46 = vld [vmem:[#allocation2 + $0x40] sm:$0xff]  ;;  %9553 = vmatmul.mubr.bf16.gmra.mrb[220].mxu0 %v17931_v39 }
 0xbd7   : > { %v8255_v24 = vor.u32 %v8254_v23, %v8251_v55  ;;  %v8078_v19 = vshll.u32 %v7930_v56, 16  ;;  %v8234_v44 = vsel %vm3152_vm10, %v8217_v33, 0  ;;  %v8235_v27 = vsel %vm3153_vm14, %v8218_v59, 0  ;;  %v8221_v23 = vld [vmem:[#allocation2 + $0x48] sm:$0xff]  ;;  %9560 = vmatprep.mubr.bf16.mxu0 %v17978_v61 }
 0xbd8   : > { %v8263_v37 = vor.u32 %v8262_v57, %v8259_v22  ;;  %v8272_v25 = vor.u32 %v8271_v45, %v8268_v50  ;;  %v8077_v8 = vrot.slane %v8075_v48, 3  ;;  %v8275_v29 = vshrl.u32 %v8234_v44, 16  ;;  %v8222_v57 = vld [vmem:[#allocation2 + $0x50] sm:$0xff] }
 0xbd9   : > { %v8080_v53 = vrot.slane %v8078_v19, 4  ;;  %v8278_v43 = vshll.u32 %v8234_v44, 16  ;;  %v8284_v32 = vshrl.u32 %v8235_v27, 16  ;;  %v8287_v55 = vshll.u32 %v8235_v27, 16 }
 0xbda   : > { %v18216_v40 = vsel %vm2415_vm11, %v8255_v24, %v8263_v37  ;;  %v18219_v49 = vsel %vm2415_vm11, %v8263_v37, %v8272_v25  ;;  %v8277_v33 = vrot.slane %v8275_v29, 4  ;;  %vm19429_vm5 = vcmp.ne.s16.totalorder %v19321_v3, 0 }
 0xbdb   : > { %v8236_v59 = vsel %vm19429_vm5, %v8219_v14, 0  ;;  %8416 = vst [vmem:[#allocation3 + $0x40] sm:$0xff] %v18216_v40  ;;  %8417 = vst [vmem:[#allocation3 + $0x88] sm:$0xff] %v18219_v49  ;;  %v8081_v22 = vor.u32 %v8080_v53, %v8077_v8  ;;  %v8280_v41 = vrot.slane %v8278_v43, 5  ;;  %v8286_v56 = vrot.slane %v8284_v32, 4  ;;  %v8223_v8 = vld [vmem:[#allocation2 + $0x58] sm:$0xff]  ;;  %9714 = vmatmul.mubr.bf16.gmra.mrb[252].mxu1 %v17993_v15 }
 0xbdc   : > { %v8289_v9 = vrot.slane %v8287_v55, 5  ;;  %vm19430_vm2 = vcmp.ne.s16.totalorder %v19326_v58, 0  ;;  %v8293_v45 = vshrl.u32 %v8236_v59, 16  ;;  %v8296_v48 = vshll.u32 %v8236_v59, 16  ;;  %9721 = vmatprep.mubr.bf16.mxu1 %v17981_v38 }
 0xbdd   : > { %v8237_v50 = vsel %vm19430_vm2, %v8220_v46, 0  ;;  %vm19431_vm15 = vcmp.ne.s16.totalorder %v19331_v34, 0  ;;  %v18231_v24 = vsel %vm2593_vm8, %v8072_v51, %v8081_v22  ;;  %v8281_v16 = vor.u32 %v8280_v41, %v8277_v33 }
 0xbde   : > { %v8238_v3 = vsel %vm19431_vm15, %v8221_v23, 0  ;;  %v8290_v19 = vor.u32 %v8289_v9, %v8286_v56  ;;  %v8302_v44 = vshrl.u32 %v8237_v50, 16  ;;  %8114 = vst [vmem:[#allocation3 + $0x468] sm:$0xff] %v18231_v24  ;;  %v8295_v27 = vrot.slane %v8293_v45, 4  ;;  %9561 = vmatmul.mubr.bf16.gmra.mrb[224].mxu0 %v17955_v47 }
 0xbdf   : > { %v8298_v14 = vrot.slane %v8296_v48, 5  ;;  %v8305_v37 = vshll.u32 %v8237_v50, 16  ;;  %vm19432_vm10 = vcmp.ne.s16.totalorder %v19336_v10, 0  ;;  %v18238_v34 = vsel %vm2415_vm11, %v8272_v25, %v8281_v16  ;;  %9568 = vmatprep.mubr.bf16.mxu0 %v18018_v7 }
 0xbe0   : > { %v8239_v58 = vsel %vm19432_vm10, %v8222_v57, 0  ;;  %v18241_v51 = vsel %vm2415_vm11, %v8281_v16, %v8290_v19  ;;  %v8304_v29 = vrot.slane %v8302_v44, 4  ;;  %v8311_v53 = vshrl.u32 %v8238_v3, 16  ;;  %8418 = vst [vmem:[#allocation3 + $0xd0] sm:$0xff] %v18238_v34 }
 0xbe1   : > { %8419 = vst [vmem:[#allocation3 + $0x118] sm:$0xff] %v18241_v51  ;;  %v8299_v43 = vor.u32 %v8298_v14, %v8295_v27  ;;  %v8307_v10 = vrot.slane %v8305_v37, 5  ;;  %v8314_v32 = vshll.u32 %v8238_v3, 16  ;;  %v8320_v55 = vshrl.u32 %v8239_v58, 16 }
 0xbe2   : > { %v8313_v46 = vrot.slane %v8311_v53, 4  ;;  %v8323_v5 = vshll.u32 %v8239_v58, 16  ;;  %vm19433_vm8 = vcmp.ne.s16.totalorder %v19341_v6, 0  ;;  %vm19434_vm14 = vcmp.ne.s16.totalorder %v19346_v4, 0 }
 0xbe3   : > { %v8240_v25 = vsel %vm19433_vm8, %v8223_v8, 0  ;;  %v8241_v23 = vsel %vm19434_vm14, %v18013_v2, 0  ;;  %v18253_v33 = vsel %vm2415_vm11, %v8290_v19, %v8299_v43  ;;  %v8308_v59 = vor.u32 %v8307_v10, %v8304_v29  ;;  %v8230_v10 = vld [vmem:[#allocation2 + $0x90] sm:$0x1f]  ;;  %9722 = vmatmul.mubr.bf16.gmra.mrb[0].mxu1 %v17999_v62 }
 0xbe4   : > { %v8316_v22 = vrot.slane %v8314_v32, 5  ;;  %v8322_v41 = vrot.slane %v8320_v55, 4  ;;  %8420 = vst [vmem:[#allocation3 + $0x160] sm:$0xff] %v18253_v33  ;;  %v8325_v56 = vrot.slane %v8323_v5, 5  ;;  %v8329_v9 = vshrl.u32 %v8240_v25, 16 }
 0xbe5   : > { %v8332_v6 = vshll.u32 %v8240_v25, 16  ;;  %v8338_v57 = vshrl.u32 %v8241_v23, 16  ;;  %v18258_v50 = vsel %vm2415_vm11, %v8299_v43, %v8308_v59  ;;  %v8341_v2 = vshll.u32 %v8241_v23, 16 }
 0xbe6   : > { %v8317_v4 = vor.u32 %v8316_v22, %v8313_v46  ;;  %v8242_v39 = vsel %vm3160_vm9, %v18026_v28, 0  ;;  %8421 = vst [vmem:[#allocation3 + $0x1a8] sm:$0xff] %v18258_v50  ;;  %v8326_v45 = vor.u32 %v8325_v56, %v8322_v41  ;;  %v8331_v48 = vrot.slane %v8329_v9, 4  ;;  %9569 = vmatmul.mubr.bf16.gmra.mrb[228].mxu0 %v17981_v38  ;;  %v19441_v38 = vld [vmem:[#allocation57_spill] sm:$0xff] }
 0xbe7   : > { %v8334_v61 = vrot.slane %v8332_v6, 5  ;;  %v8340_v3 = vrot.slane %v8338_v57, 4  ;;  %v8343_v19 = vrot.slane %v8341_v2, 5  ;;  %vm19435_vm12 = vcmp.ne.s16.totalorder %v19400_v17, 0  ;;  %v19437_v2 = vld [vmem:[#allocation65_spill] sm:$0xff] }
 0xbe8   : > { %v18265_v16 = vsel %vm2415_vm11, %v8308_v59, %v8317_v4  ;;  %v8243_v44 = vsel %vm19435_vm12, %v18048_v21, 0  ;;  %v8347_v27 = vshrl.u32 %v8242_v39, 16  ;;  %v18272_v18 = vsel %vm2415_vm11, %v8317_v4, %v8326_v45  ;;  %9729 = vmatprep.mubr.bf16.mxu1 %v19437_v2 }
 0xbe9   : > { %8422 = vst [vmem:[#allocation3 + $0x1f0] sm:$0xff] %v18265_v16  ;;  %v8335_v28 = vor.u32 %v8334_v61, %v8331_v48  ;;  %v8350_v14 = vshll.u32 %v8242_v39, 16  ;;  %v8356_v37 = vshrl.u32 %v8243_v44, 16  ;;  %8423 = vst [vmem:[#allocation3 + $0x238] sm:$0xff] %v18272_v18  ;;  %v8344_v58 = vor.u32 %v8343_v19, %v8340_v3  ;;  %v19438_v19 = vld [vmem:[#allocation31_spill] sm:$0xff] }
 0xbea   : > { %v8349_v8 = vrot.slane %v8347_v27, 4  ;;  %v8359_v29 = vshll.u32 %v8243_v44, 16  ;;  %vm19436_vm9 = vcmp.ne.s16.totalorder %v19404_v31, 0  ;;  %v8245_v43 = vsel %vm3163_vm7, %v18099_v60, 0  ;;  %9576 = vmatprep.mubr.bf16.mxu0 %v19438_v19 }
 0xbeb   : > { %v8244_v21 = vsel %vm19436_vm9, %v18082_v0, 0  ;;  %v18281_v15 = vsel %vm2415_vm11, %v8326_v45, %v8335_v28  ;;  %v8352_v17 = vrot.slane %v8350_v14, 5  ;;  %v8358_v53 = vrot.slane %v8356_v37, 4  ;;  %v19439_v14 = vld [vmem:[#allocation26_spill] sm:$0xff] }
 0xbec   : > { %v18288_v32 = vsel %vm2415_vm11, %v8335_v28, %v8344_v58  ;;  %8424 = vst [vmem:[#allocation3 + $0x280] sm:$0xff] %v18281_v15  ;;  %v8361_v55 = vrot.slane %v8359_v29, 5  ;;  %v8365_v31 = vshrl.u32 %v8244_v21, 16  ;;  %v8368_v0 = vshll.u32 %v8244_v21, 16  ;;  %9730 = vmatmul.mubr.bf16.gmra.mrb[4].mxu1 %v19439_v14  ;;  %v19440_v37 = vld [vmem:[#allocation66_spill] sm:$0xff]  ;;  %v19444_v29 = vld [vmem:[#allocation63_spill] sm:$0xff] }
 0xbed   : > { %8425 = vst [vmem:[#allocation3 + $0x2c8] sm:$0xff] %v18288_v32  ;;  %v8353_v46 = vor.u32 %v8352_v17, %v8349_v8  ;;  %v8374_v5 = vshrl.u32 %v8245_v43, 16  ;;  %v8377_v25 = vshll.u32 %v8245_v43, 16  ;;  %v8246_v60 = vsel %vm3164_vm13, %v18124_v1, 0  ;;  %9737 = vmatprep.mubr.bf16.mxu1 %v19440_v37  ;;  %v19443_v8 = vld [vmem:[#allocation49_spill] sm:$0xff]  ;;  %v19446_v43 = vld [vmem:[#allocation59_spill] sm:$0xff] }
 0xbee   : > { %v8362_v47 = vor.u32 %v8361_v55, %v8358_v53  ;;  %v8367_v54 = vrot.slane %v8365_v31, 4  ;;  %v8370_v23 = vrot.slane %v8368_v0, 5  ;;  %v8247_v59 = vsel %vm3165_vm0, %v8230_v10, 0  ;;  %9577 = vmatmul.mubr.bf16.gmra.mrb[232].mxu0 %v19437_v2  ;;  %v19445_v17 = vld [vmem:[#allocation61_spill] sm:$0xff] }
 0xbef   : > { %v18299_v22 = vsel %vm2415_vm11, %v8344_v58, %v8353_v46  ;;  %v8376_v41 = vrot.slane %v8374_v5, 4  ;;  %v8379_v7 = vrot.slane %v8377_v25, 5  ;;  %v8383_v56 = vshrl.u32 %v8246_v60, 16  ;;  %9584 = vmatprep.mubr.bf16.mxu0 %v19441_v38  ;;  %v19442_v58 = vld [vmem:[#allocation58_spill] sm:$0xff]  ;;  %v18342_v25 = vld [vmem:[%s18774_s13] ss:$0 sm:$0xff] }
 0xbf0   : > { %v18302_v9 = vsel %vm2415_vm11, %v8353_v46, %v8362_v47  ;;  %8426 = vst [vmem:[#allocation3 + $0x310] sm:$0xff] %v18299_v22  ;;  %v8371_v6 = vor.u32 %v8370_v23, %v8367_v54  ;;  %v8386_v11 = vshll.u32 %v8246_v60, 16  ;;  %v8392_v1 = vshrl.u32 %v8247_v59, 16  ;;  %v19447_v46 = vld [vmem:[#allocation24_spill] sm:$0xff]  ;;  %v19448_v5 = vld [vmem:[#allocation34_spill] sm:$0xff] }
 0xbf1   : > { %8427 = vst [vmem:[#allocation3 + $0x358] sm:$0xff] %v18302_v9  ;;  %v8380_v20 = vor.u32 %v8379_v7, %v8376_v41  ;;  %v8385_v57 = vrot.slane %v8383_v56, 4  ;;  %v8395_v4 = vshll.u32 %v8247_v59, 16  ;;  %v19449_v60 = vld [vmem:[#allocation60_spill] sm:$0xff]  ;;  %v19450_v59 = vld [vmem:[#allocation27_spill] sm:$0xff]  ;;  %v19453_v38 = vld [vmem:[#allocation62_spill] sm:$0xff] }
 0xbf2   : > { %v18309_v39 = vsel %vm2415_vm11, %v8362_v47, %v8371_v6  ;;  %v8388_v45 = vrot.slane %v8386_v11, 5  ;;  %v8394_v48 = vrot.slane %v8392_v1, 4 }
 0xbf3   : > { %v18312_v61 = vsel %vm2415_vm11, %v8371_v6, %v8380_v20  ;;  %8428 = vst [vmem:[#allocation3 + $0x3a0] sm:$0xff] %v18309_v39  ;;  %v8397_v3 = vrot.slane %v8395_v4, 5  ;;  %v19451_v4 = vld [vmem:[#allocation64_spill] sm:$0xff] }
 0xbf4   : > { %8429 = vst [vmem:[#allocation3 + $0x3e8] sm:$0xff] %v18312_v61  ;;  %v8389_v62 = vor.u32 %v8388_v45, %v8385_v57  ;;  %9738 = vmatmul.mubr.bf16.gmra.mrb[8].mxu1 %v19442_v58 }
 0xbf5   : > { %v8398_v44 = vor.u32 %v8397_v3, %v8394_v48  ;;  %9745 = vmatprep.mubr.bf16.mxu1 %v19443_v8  ;;  %v19452_v3 = vld [vmem:[#allocation37_spill] sm:$0xff] }
 0xbf6   : > { %v18319_v27 = vsel %vm2415_vm11, %v8380_v20, %v8389_v62  ;;  %9585 = vmatmul.mubr.bf16.gmra.mrb[236].mxu0 %v19440_v37 }
 0xbf7   : > { %v18322_v28 = vsel %vm2415_vm11, %v8389_v62, %v8398_v44  ;;  %8430 = vst [vmem:[#allocation3 + $0x430] sm:$0xff] %v18319_v27  ;;  %9592 = vmatprep.mubr.bf16.mxu0 %v19444_v29 }
 0xbf8   : > { %8431 = vst [vmem:[#allocation3 + $0x478] sm:$0xff] %v18322_v28 }
 0xbfb   : > { %v11562_v21 = vpop.f32.mrb[136].mxu0 }
 0xbfc   : > { %9746 = vmatmul.mubr.bf16.gmra.mrb[12].mxu1 %v19445_v17  ;;  %v11563_v53 = vpop.f32.mrb[137].mxu0 }
 0xbfd   : > { %9753 = vmatprep.mubr.bf16.mxu1 %v19446_v43  ;;  %v11564_v10 = vadd.f32 %v11563_v53, %v11562_v21  ;;  %v11565_v55 = vpop.f32.mrb[138].mxu0 }
 0xbfe   : > { %v11566_v31 = vpop.f32.mrb[139].mxu0  ;;  %9593 = vmatmul.mubr.bf16.gmra.mrb[240].mxu0 %v19443_v8 }
 0xbff   : > { %v11567_v0 = vadd.f32 %v11566_v31, %v11565_v55  ;;  %9600 = vmatprep.mubr.bf16.mxu0 %v19447_v46  ;;  %v9193_v47 = vadd.f32 %v11564_v10, %v18342_v25  ;;  %v19454_v46 = vld [vmem:[#allocation50_spill] sm:$0xff] }
 0xc01   : > { %v9196_v41 = vadd.f32 %v11567_v0, %v18342_v25 }
 0xc04   : > { %9754 = vmatmul.mubr.bf16.gmra.mrb[16].mxu1 %v19448_v5 }
 0xc05   : > { %9761 = vmatprep.mubr.bf16.mxu1 %v19449_v60 }
 0xc06   : > { %v11674_v54 = vpop.f32.mrb[168].mxu1  ;;  %9601 = vmatmul.mubr.bf16.gmra.mrb[244].mxu0 %v19446_v43 }
 0xc07   : > { %v11675_v23 = vpop.f32.mrb[169].mxu1  ;;  %9608 = vmatprep.mubr.bf16.mxu0 %v19450_v59 }
 0xc08   : > { %v11676_v7 = vadd.f32 %v11675_v23, %v11674_v54  ;;  %v11677_v56 = vpop.f32.mrb[170].mxu1 }
 0xc09   : > { %v11678_v6 = vpop.f32.mrb[171].mxu1  ;;  %v11568_v11 = vpop.f32.mrb[140].mxu0 }
 0xc0a   : > { %v18349_v1 = vadd.f32 %v11676_v7, %v9193_v47  ;;  %v11679_v20 = vadd.f32 %v11678_v6, %v11677_v56  ;;  %v11569_v57 = vpop.f32.mrb[141].mxu0 }
 0xc0b   : > { %v11570_v2 = vadd.f32 %v11569_v57, %v11568_v11  ;;  %v11571_v45 = vpop.f32.mrb[142].mxu0 }
 0xc0c   : > { %9762 = vmatmul.mubr.bf16.gmra.mrb[20].mxu1 %v19451_v4  ;;  %v18352_v48 = vadd.f32 %v11679_v20, %v9196_v41  ;;  %v11572_v62 = vpop.f32.mrb[143].mxu0 }
 0xc0d   : > { %9769 = vmatprep.mubr.bf16.mxu1 %v19452_v3  ;;  %v11573_v19 = vadd.f32 %v11572_v62, %v11571_v45  ;;  %v9201_v44 = vadd.f32 %v11570_v2, %v18342_v25 }
 0xc0e   : > { %v11680_v14 = vpop.f32.mrb[172].mxu1  ;;  %9609 = vmatmul.mubr.bf16.gmra.mrb[248].mxu0 %v19449_v60 }
 0xc0f   : > { %v11681_v37 = vpop.f32.mrb[173].mxu1  ;;  %9616 = vmatprep.mubr.bf16.mxu0 %v19453_v38  ;;  %v9204_v58 = vadd.f32 %v11573_v19, %v18342_v25 }
 0xc10   : > { %v11682_v8 = vadd.f32 %v11681_v37, %v11680_v14  ;;  %v11683_v29 = vpop.f32.mrb[174].mxu1 }
 0xc11   : > { %v11684_v21 = vpop.f32.mrb[175].mxu1  ;;  %v11574_v17 = vpop.f32.mrb[144].mxu0 }
 0xc12   : > { %v18359_v53 = vadd.f32 %v11682_v8, %v9201_v44  ;;  %v11685_v43 = vadd.f32 %v11684_v21, %v11683_v29  ;;  %v11575_v10 = vpop.f32.mrb[145].mxu0 }
 0xc13   : > { %v11576_v55 = vadd.f32 %v11575_v10, %v11574_v17  ;;  %v11577_v31 = vpop.f32.mrb[146].mxu0 }
 0xc14   : > { %9770 = vmatmul.mubr.bf16.gmra.mrb[24].mxu1 %v18161_v36  ;;  %v18362_v0 = vadd.f32 %v11685_v43, %v9204_v58  ;;  %v11578_v5 = vpop.f32.mrb[147].mxu0 }
 0xc15   : > { %9777 = vmatprep.mubr.bf16.mxu1 %v19454_v46  ;;  %v11579_v60 = vadd.f32 %v11578_v5, %v11577_v31  ;;  %v9209_v47 = vadd.f32 %v11576_v55, %v18342_v25 }
 0xc16   : > { %v11686_v54 = vpop.f32.mrb[176].mxu1  ;;  %9617 = vmatmul.mubr.bf16.gmra.mrb[252].mxu0 %v19452_v3 }
 0xc17   : > { %v11687_v23 = vpop.f32.mrb[177].mxu1  ;;  %9624 = vmatprep.mubr.bf16.mxu0 %v18168_v63  ;;  %v9212_v59 = vadd.f32 %v11579_v60, %v18342_v25 }
 0xc18   : > { %v11688_v41 = vadd.f32 %v11687_v23, %v11686_v54  ;;  %v11689_v36 = vpop.f32.mrb[178].mxu1 }
 0xc19   : > { %v11690_v7 = vpop.f32.mrb[179].mxu1  ;;  %v11580_v56 = vpop.f32.mrb[148].mxu0 }
 0xc1a   : > { %v18369_v6 = vadd.f32 %v11688_v41, %v9209_v47  ;;  %v11691_v11 = vadd.f32 %v11690_v7, %v11689_v36  ;;  %v11581_v20 = vpop.f32.mrb[149].mxu0 }
 0xc1b   : > { %v11582_v57 = vadd.f32 %v11581_v20, %v11580_v56  ;;  %v11583_v4 = vpop.f32.mrb[150].mxu0 }
 0xc1c   : > { %9778 = vmatmul.mubr.bf16.gmra.mrb[28].mxu1 %v18171_v52  ;;  %v18372_v2 = vadd.f32 %v11691_v11, %v9212_v59  ;;  %v11584_v45 = vpop.f32.mrb[151].mxu0 }
 0xc1d   : > { %9785 = vmatprep.mubr.bf16.mxu1 %v18155_v12  ;;  %v11585_v63 = vadd.f32 %v11584_v45, %v11583_v4  ;;  %v9217_v3 = vadd.f32 %v11582_v57, %v18342_v25  ;;  %v12761_v45 = vld [vmem:[%s18775_s14 + $0x10] sm:$0xff]  }
 0xc1e   : > { %v11692_v62 = vpop.f32.mrb[180].mxu1  ;;  %9625 = vmatmul.mubr.bf16.gmra.mrb[0].mxu0 %v19454_v46 }
 0xc1f   : > { %v11693_v19 = vpop.f32.mrb[181].mxu1  ;;  %9632 = vmatprep.mubr.bf16.mxu0 %v18192_v42  ;;  %v9220_v44 = vadd.f32 %v11585_v63, %v18342_v25 }
 0xc20   : > { %v11694_v14 = vadd.f32 %v11693_v19, %v11692_v62  ;;  %v11695_v52 = vpop.f32.mrb[182].mxu1 }
 0xc21   : > { %v11696_v37 = vpop.f32.mrb[183].mxu1  ;;  %v11586_v38 = vpop.f32.mrb[152].mxu0 }
 0xc22   : > { %v18379_v58 = vadd.f32 %v11694_v14, %v9217_v3  ;;  %v11697_v8 = vadd.f32 %v11696_v37, %v11695_v52  ;;  %v11587_v12 = vpop.f32.mrb[153].mxu0  ;;  %v12762_v52 = vld [vmem:[%s18775_s14 + $0x18] sm:$0xff]  }
 0xc23   : > { %v11588_v29 = vadd.f32 %v11587_v12, %v11586_v38  ;;  %v11589_v21 = vpop.f32.mrb[154].mxu0 }
 0xc24   : > { %9786 = vmatmul.mubr.bf16.gmra.mrb[32].mxu1 %v18202_v26  ;;  %v18382_v17 = vadd.f32 %v11697_v8, %v9220_v44  ;;  %v11590_v43 = vpop.f32.mrb[155].mxu0 }
 0xc25   : > { %9793 = vmatprep.mubr.bf16.mxu1 %v18176_v13  ;;  %v11591_v42 = vadd.f32 %v11590_v43, %v11589_v21  ;;  %v9225_v10 = vadd.f32 %v11588_v29, %v18342_v25 }
 0xc26   : > { %v11698_v55 = vpop.f32.mrb[184].mxu1  ;;  %9633 = vmatmul.mubr.bf16.gmra.mrb[4].mxu0 %v18184_v30 }
 0xc27   : > { %v11699_v31 = vpop.f32.mrb[185].mxu1  ;;  %12254 = vmatprep.mubr.bf16.mxu0 %v18216_v40  ;;  %v9228_v46 = vadd.f32 %v11591_v42, %v18342_v25  ;;  %v12760_v40 = vld [vmem:[%s18775_s14 + $0x8] sm:$0xff]  }
 0xc28   : > { %v11700_v5 = vadd.f32 %v11699_v31, %v11698_v55  ;;  %v11701_v26 = vpop.f32.mrb[186].mxu1 }
 0xc29   : > { %v11702_v60 = vpop.f32.mrb[187].mxu1  ;;  %v11592_v47 = vpop.f32.mrb[156].mxu0 }
 0xc2a   : > { %v18389_v54 = vadd.f32 %v11700_v5, %v9225_v10  ;;  %v11703_v23 = vadd.f32 %v11702_v60, %v11701_v26  ;;  %v11593_v13 = vpop.f32.mrb[157].mxu0 }
 0xc2b   : > { %v11594_v59 = vadd.f32 %v11593_v13, %v11592_v47  ;;  %v11595_v41 = vpop.f32.mrb[158].mxu0 }
 0xc2c   : > { %9794 = vmatmul.mubr.bf16.gmra.mrb[36].mxu1 %v18231_v24  ;;  %v18392_v36 = vadd.f32 %v11703_v23, %v9228_v46  ;;  %v11596_v30 = vpop.f32.mrb[159].mxu0 }
 0xc2d   : > { %v11597_v7 = vadd.f32 %v11596_v30, %v11595_v41  ;;  %v9233_v56 = vadd.f32 %v11594_v59, %v18342_v25 }
 0xc2e   : > { %v11704_v11 = vpop.f32.mrb[188].mxu1  ;;  %12255 = vmatmul.mubr.bf16.vlgmr.msra.gmra.mrb[8].mxu0 %v18219_v49 }
 0xc2f   : > { %v11705_v20 = vpop.f32.mrb[189].mxu1  ;;  %12287 = vmatpush3.bf16.msra.mxu0 %v18199_v35  ;;  %12258 = vmatprep.mubr.bf16.mxu0 %v18238_v34  ;;  %v9236_v24 = vadd.f32 %v11597_v7, %v18342_v25 }
 0xc30   : > { %v11706_v57 = vadd.f32 %v11705_v20, %v11704_v11  ;;  %v11707_v4 = vpop.f32.mrb[190].mxu1  ;;  %12288 = vmatprep.subr.bf16.mxu0 %v12760_v40 }
 0xc31   : > { %v11708_v63 = vpop.f32.mrb[191].mxu1  ;;  %v11598_v3 = vpop.f32.mrb[160].mxu0 }
 0xc32   : > { %v18405_v62 = vadd.f32 %v11706_v57, %v9233_v56  ;;  %v11709_v19 = vadd.f32 %v11708_v63, %v11707_v4  ;;  %v11599_v49 = vpop.f32.mrb[161].mxu0 }
 0xc33   : > { %v11600_v44 = vadd.f32 %v11599_v49, %v11598_v3  ;;  %v11601_v14 = vpop.f32.mrb[162].mxu0  ;;  %12289 = vmatpush3.bf16.msra.mxu0 %v12760_v40 }
 0xc34   : > { %v18407_v35 = vadd.f32 %v11709_v19, %v9236_v24  ;;  %v11602_v34 = vpop.f32.mrb[163].mxu0  ;;  %12290 = vmatprep.subr.bf16.mxu0 %v12761_v45 }
 0xc35   : > { %v11603_v37 = vadd.f32 %v11602_v34, %v11601_v14  ;;  %v9241_v38 = vadd.f32 %v11600_v44, %v18342_v25 }
 0xc36   : > { %v11710_v8 = vpop.f32.mrb[192].mxu1  ;;  %12259 = vmatmul.mubr.bf16.gmra.mrb[12].mxu0 %v18241_v51 }
 0xc37   : > { %v11711_v12 = vpop.f32.mrb[193].mxu1  ;;  %12262 = vmatprep.mubr.bf16.mxu0 %v18253_v33  ;;  %12291 = vmatpush3.bf16.msra.mxu0 %v12761_v45  ;;  %v9244_v29 = vadd.f32 %v11603_v37, %v18342_v25 }
 0xc38   : > { %v11712_v21 = vadd.f32 %v11711_v12, %v11710_v8  ;;  %v11713_v43 = vpop.f32.mrb[194].mxu1  ;;  %12292 = vmatprep.subr.bf16.mxu0 %v12762_v52 }
 0xc39   : > { %v11714_v42 = vpop.f32.mrb[195].mxu1  ;;  %v11604_v10 = vpop.f32.mrb[164].mxu0 }
 0xc3a   : > { %v18416_v55 = vadd.f32 %v11712_v21, %v9241_v38  ;;  %v11715_v31 = vadd.f32 %v11714_v42, %v11713_v43  ;;  %v11605_v46 = vpop.f32.mrb[165].mxu0 }
 0xc3b   : > { %v11606_v5 = vadd.f32 %v11605_v46, %v11604_v10  ;;  %v11607_v26 = vpop.f32.mrb[166].mxu0  ;;  %12293 = vmatpush3.bf16.msra.mxu0 %v12762_v52 }
 0xc3c   : > { %v18418_v60 = vadd.f32 %v11715_v31, %v9244_v29  ;;  %v11608_v51 = vpop.f32.mrb[167].mxu0 }
 0xc3d   : > { %v11609_v47 = vadd.f32 %v11608_v51, %v11607_v26  ;;  %v9249_v33 = vadd.f32 %v11606_v5, %v18342_v25 }
 0xc3e   : > { %v11716_v23 = vpop.f32.mrb[196].mxu1  ;;  %12263 = vmatmul.mubr.bf16.gmra.mrb[16].mxu0 %v18258_v50 }
 0xc3f   : > { %v11717_v13 = vpop.f32.mrb[197].mxu1  ;;  %12266 = vmatprep.mubr.bf16.mxu0 %v18265_v16  ;;  %v9252_v59 = vadd.f32 %v11609_v47, %v18342_v25 }
 0xc40   : > { %v11718_v41 = vadd.f32 %v11717_v13, %v11716_v23  ;;  %v11719_v30 = vpop.f32.mrb[198].mxu1 }
 0xc41   : > { %v11720_v40 = vpop.f32.mrb[199].mxu1  ;;  %v11610_v7 = vpop.f32.mrb[168].mxu0 }
 0xc42   : > { %v18424_v56 = vadd.f32 %v11718_v41, %v9249_v33  ;;  %v11721_v11 = vadd.f32 %v11720_v40, %v11719_v30  ;;  %v11611_v20 = vpop.f32.mrb[169].mxu0 }
 0xc43   : > { %v11612_v24 = vadd.f32 %v11611_v20, %v11610_v7  ;;  %v11613_v57 = vpop.f32.mrb[170].mxu0 }
 0xc44   : > { %v18426_v4 = vadd.f32 %v11721_v11, %v9252_v59  ;;  %v11614_v45 = vpop.f32.mrb[171].mxu0 }
 0xc45   : > { %v11615_v63 = vadd.f32 %v11614_v45, %v11613_v57  ;;  %v9257_v50 = vadd.f32 %v11612_v24, %v18342_v25 }
 0xc46   : > { %v11722_v3 = vpop.f32.mrb[200].mxu1  ;;  %12267 = vmatmul.mubr.bf16.gmra.mrb[20].mxu0 %v18272_v18 }
 0xc47   : > { %v11723_v16 = vpop.f32.mrb[201].mxu1  ;;  %12270 = vmatprep.mubr.bf16.mxu0 %v18281_v15  ;;  %v9260_v19 = vadd.f32 %v11615_v63, %v18342_v25 }
 0xc48   : > { %v11724_v49 = vadd.f32 %v11723_v16, %v11722_v3  ;;  %v11725_v44 = vpop.f32.mrb[202].mxu1 }
 0xc49   : > { %v11726_v14 = vpop.f32.mrb[203].mxu1  ;;  %v11616_v34 = vpop.f32.mrb[172].mxu0 }
 0xc4a   : > { %v18432_v52 = vadd.f32 %v11724_v49, %v9257_v50  ;;  %v11727_v37 = vadd.f32 %v11726_v14, %v11725_v44  ;;  %v11617_v38 = vpop.f32.mrb[173].mxu0 }
 0xc4b   : > { %v11618_v8 = vadd.f32 %v11617_v38, %v11616_v34  ;;  %v11619_v12 = vpop.f32.mrb[174].mxu0 }
 0xc4c   : > { %v18434_v29 = vadd.f32 %v11727_v37, %v9260_v19  ;;  %v11620_v21 = vpop.f32.mrb[175].mxu0 }
 0xc4d   : > { %v11621_v43 = vadd.f32 %v11620_v21, %v11619_v12  ;;  %v9265_v18 = vadd.f32 %v11618_v8, %v18342_v25 }
 0xc4e   : > { %v11728_v42 = vpop.f32.mrb[204].mxu1  ;;  %12271 = vmatmul.mubr.bf16.gmra.mrb[24].mxu0 %v18288_v32 }
 0xc4f   : > { %v11729_v15 = vpop.f32.mrb[205].mxu1  ;;  %12274 = vmatprep.mubr.bf16.mxu0 %v18299_v22  ;;  %v9268_v10 = vadd.f32 %v11621_v43, %v18342_v25 }
 0xc50   : > { %v11730_v31 = vadd.f32 %v11729_v15, %v11728_v42  ;;  %v11731_v46 = vpop.f32.mrb[206].mxu1 }
 0xc51   : > { %v11732_v5 = vpop.f32.mrb[207].mxu1  ;;  %v11622_v26 = vpop.f32.mrb[176].mxu0 }
 0xc52   : > { %v18440_v51 = vadd.f32 %v11730_v31, %v9265_v18  ;;  %v11733_v47 = vadd.f32 %v11732_v5, %v11731_v46  ;;  %v11623_v33 = vpop.f32.mrb[177].mxu0 }
 0xc53   : > { %v11624_v23 = vadd.f32 %v11623_v33, %v11622_v26  ;;  %v11625_v13 = vpop.f32.mrb[178].mxu0 }
 0xc54   : > { %v18442_v59 = vadd.f32 %v11733_v47, %v9268_v10  ;;  %v11626_v41 = vpop.f32.mrb[179].mxu0  ;;  %v13043_v10 = vld [vmem:[%s13473_s19] sm:$0xff]  }
 0xc55   : > { %v11627_v30 = vadd.f32 %v11626_v41, %v11625_v13  ;;  %v9273_v32 = vadd.f32 %v11624_v23, %v18342_v25 }
 0xc56   : > { %v11734_v40 = vpop.f32.mrb[208].mxu1  ;;  %12275 = vmatmul.mubr.bf16.gmra.mrb[28].mxu0 %v18302_v9 }
 0xc57   : > { %v11735_v22 = vpop.f32.mrb[209].mxu1  ;;  %12278 = vmatprep.mubr.bf16.mxu0 %v18309_v39  ;;  %v9276_v7 = vadd.f32 %v11627_v30, %v18342_v25 }
 0xc58   : > { %v11736_v11 = vadd.f32 %v11735_v22, %v11734_v40  ;;  %v11737_v20 = vpop.f32.mrb[210].mxu1  ;;  %v13044_v22 = vld [vmem:[%s13473_s19 + $0x8] sm:$0xff]  }
 0xc59   : > { %v11738_v24 = vpop.f32.mrb[211].mxu1  ;;  %v11628_v57 = vpop.f32.mrb[180].mxu0 }
 0xc5a   : > { %v18448_v45 = vadd.f32 %v11736_v11, %v9273_v32  ;;  %v11739_v63 = vadd.f32 %v11738_v24, %v11737_v20  ;;  %v11629_v50 = vpop.f32.mrb[181].mxu0  ;;  %v13045_v20 = vld [vmem:[%s13473_s19 + $0x10] sm:$0xff]  }
 0xc5b   : > { %v11630_v3 = vadd.f32 %v11629_v50, %v11628_v57  ;;  %v11631_v16 = vpop.f32.mrb[182].mxu0 }
 0xc5c   : > { %v18450_v19 = vadd.f32 %v11739_v63, %v9276_v7  ;;  %v11632_v49 = vpop.f32.mrb[183].mxu0 }
 0xc5d   : > { %v11633_v44 = vadd.f32 %v11632_v49, %v11631_v16  ;;  %v9281_v9 = vadd.f32 %v11630_v3, %v18342_v25 }
 0xc5e   : > { %v11740_v39 = vpop.f32.mrb[212].mxu1  ;;  %12279 = vmatmul.mubr.bf16.gmra.mrb[32].mxu0 %v18312_v61 }
 0xc5f   : > { %v11741_v14 = vpop.f32.mrb[213].mxu1  ;;  %12282 = vmatprep.mubr.bf16.mxu0 %v18319_v27  ;;  %v9284_v34 = vadd.f32 %v11633_v44, %v18342_v25 }
 0xc60   : > { %v11742_v37 = vadd.f32 %v11741_v14, %v11740_v39  ;;  %v11743_v38 = vpop.f32.mrb[214].mxu1 }
 0xc61   : > { %v11744_v8 = vpop.f32.mrb[215].mxu1  ;;  %v11634_v12 = vpop.f32.mrb[184].mxu0 }
 0xc62   : > { %v18456_v21 = vadd.f32 %v11742_v37, %v9281_v9  ;;  %v11745_v43 = vadd.f32 %v11744_v8, %v11743_v38  ;;  %v11635_v18 = vpop.f32.mrb[185].mxu0  ;;  %v13046_v38 = vld [vmem:[%s13473_s19 + $0x18] sm:$0xff]  }
 0xc63   : > { %v11636_v42 = vadd.f32 %v11635_v18, %v11634_v12  ;;  %v11637_v15 = vpop.f32.mrb[186].mxu0 }
 0xc64   : > { %v18459_v31 = vadd.f32 %v11745_v43, %v9284_v34  ;;  %v11638_v61 = vpop.f32.mrb[187].mxu0  ;;  %v13047_v43 = vld [vmem:[%s13473_s19 + $0x20] sm:$0xff]  }
 0xc65   : > { %v11639_v46 = vadd.f32 %v11638_v61, %v11637_v15  ;;  %v9289_v27 = vadd.f32 %v11636_v42, %v18342_v25 }
 0xc66   : > { %v11746_v5 = vpop.f32.mrb[216].mxu1  ;;  %12283 = vmatmul.mubr.bf16.gmra.mrb[36].mxu0 %v18322_v28 }
 0xc67   : > { %v11747_v26 = vpop.f32.mrb[217].mxu1  ;;  %12294 = vmatprep.mubr.msk.bf16.mxu0 %vm1140_vm1, %v13043_v10  ;;  %v9292_v47 = vadd.f32 %v11639_v46, %v18342_v25 }
 0xc68   : > { %v11748_v33 = vadd.f32 %v11747_v26, %v11746_v5  ;;  %v11749_v23 = vpop.f32.mrb[218].mxu1 }
 0xc69   : > { %v11750_v13 = vpop.f32.mrb[219].mxu1  ;;  %v11640_v41 = vpop.f32.mrb[188].mxu0 }
 0xc6a   : > { %v18465_v30 = vadd.f32 %v11748_v33, %v9289_v27  ;;  %v11751_v32 = vadd.f32 %v11750_v13, %v11749_v23  ;;  %v11641_v40 = vpop.f32.mrb[189].mxu0 }
 0xc6b   : > { %v11642_v7 = vadd.f32 %v11641_v40, %v11640_v41  ;;  %v11643_v11 = vpop.f32.mrb[190].mxu0 }
 0xc6c   : > { %v18469_v24 = vadd.f32 %v11751_v32, %v9292_v47  ;;  %v11644_v28 = vpop.f32.mrb[191].mxu0  ;;  %v13048_v32 = vld [vmem:[%s13473_s19 + $0x28] sm:$0xff]  }
 0xc6d   : > { %v11645_v57 = vadd.f32 %v11644_v28, %v11643_v11  ;;  %v9297_v63 = vadd.f32 %v11642_v7, %v18342_v25  ;;  %v13049_v7 = vld [vmem:[%s13473_s19 + $0x30] sm:$0xff]  }
 0xc6e   : > { %v11752_v50 = vpop.f32.mrb[220].mxu1  ;;  %12295 = vmatmul.mubr.msk.bf16.vlgmr.msra.gmra.mrb[8].mxu0 %vm1140_vm1, %v13044_v22 }
 0xc6f   : > { %v11753_v3 = vpop.f32.mrb[221].mxu1  ;;  %12298 = vmatprep.mubr.msk.bf16.mxu0 %vm1140_vm1, %v13045_v20  ;;  %v9300_v16 = vadd.f32 %v11645_v57, %v18342_v25 }
 0xc70   : > { %v11754_v49 = vadd.f32 %v11753_v3, %v11752_v50  ;;  %v11755_v44 = vpop.f32.mrb[222].mxu1 }
 0xc71   : > { %v11756_v9 = vpop.f32.mrb[223].mxu1  ;;  %v11646_v39 = vpop.f32.mrb[192].mxu0 }
 0xc72   : > { %v18475_v14 = vadd.f32 %v11754_v49, %v9297_v63  ;;  %v11757_v34 = vadd.f32 %v11756_v9, %v11755_v44  ;;  %v11647_v37 = vpop.f32.mrb[193].mxu0 }
 0xc73   : > { %v11648_v8 = vadd.f32 %v11647_v37, %v11646_v39  ;;  %v11649_v12 = vpop.f32.mrb[194].mxu0 }
 0xc74   : > { %v18479_v18 = vadd.f32 %v11757_v34, %v9300_v16  ;;  %v11650_v42 = vpop.f32.mrb[195].mxu0 }
 0xc75   : > { %v11651_v15 = vadd.f32 %v11650_v42, %v11649_v12  ;;  %v9305_v10 = vadd.f32 %v11648_v8, %v18342_v25 }
 0xc76   : > { %v11758_v61 = vpop.f32.mrb[224].mxu1  ;;  %12299 = vmatmul.mubr.msk.bf16.gmra.mrb[12].mxu0 %vm1140_vm1, %v13046_v38  ;;  %v13050_v38 = vld [vmem:[%s13473_s19 + $0x38] sm:$0xff]  }
 0xc77   : > { %v11759_v46 = vpop.f32.mrb[225].mxu1  ;;  %12302 = vmatprep.mubr.msk.bf16.mxu0 %vm1140_vm1, %v13047_v43  ;;  %v9308_v27 = vadd.f32 %v11651_v15, %v18342_v25  ;;  %v13051_v43 = vld [vmem:[%s13473_s19 + $0x40] sm:$0xff]  }
 0xc78   : > { %v11760_v5 = vadd.f32 %v11759_v46, %v11758_v61  ;;  %v11761_v26 = vpop.f32.mrb[226].mxu1 }
 0xc79   : > { %v11762_v47 = vpop.f32.mrb[227].mxu1  ;;  %v11652_v33 = vpop.f32.mrb[196].mxu0 }
 0xc7a   : > { %v18485_v23 = vadd.f32 %v11760_v5, %v9305_v10  ;;  %v11763_v13 = vadd.f32 %v11762_v47, %v11761_v26  ;;  %v11653_v41 = vpop.f32.mrb[197].mxu0 }
 0xc7b   : > { %v11654_v40 = vadd.f32 %v11653_v41, %v11652_v33  ;;  %v11655_v22 = vpop.f32.mrb[198].mxu0 }
 0xc7c   : > { %v18489_v11 = vadd.f32 %v11763_v13, %v9308_v27  ;;  %v11656_v20 = vpop.f32.mrb[199].mxu0 }
 0xc7d   : > { %v11657_v28 = vadd.f32 %v11656_v20, %v11655_v22  ;;  %v9313_v57 = vadd.f32 %v11654_v40, %v18342_v25  ;;  %v13053_v22 = vld [vmem:[%s13473_s19 + $0x50] sm:$0xff]  }
 0xc7e   : > { %v11764_v63 = vpop.f32.mrb[228].mxu1  ;;  %12303 = vmatmul.mubr.msk.bf16.gmra.mrb[16].mxu0 %vm1140_vm1, %v13048_v32  ;;  %v13052_v32 = vld [vmem:[%s13473_s19 + $0x48] sm:$0xff]  }
 0xc7f   : > { %v11765_v50 = vpop.f32.mrb[229].mxu1  ;;  %12306 = vmatprep.mubr.msk.bf16.mxu0 %vm1140_vm1, %v13049_v7  ;;  %v9316_v3 = vadd.f32 %v11657_v28, %v18342_v25 }
 0xc80   : > { %v11766_v16 = vadd.f32 %v11765_v50, %v11764_v63  ;;  %v11767_v49 = vpop.f32.mrb[230].mxu1 }
 0xc81   : > { %v11768_v44 = vpop.f32.mrb[231].mxu1  ;;  %v11786_v9 = vpop.f32.mrb[200].mxu0 }
 0xc82   : > { %v18495_v39 = vadd.f32 %v11766_v16, %v9313_v57  ;;  %v11769_v34 = vadd.f32 %v11768_v44, %v11767_v49  ;;  %v11787_v37 = vpop.f32.mrb[201].mxu0 }
 0xc83   : > { %v11788_v8 = vadd.f32 %v11787_v37, %v11786_v9  ;;  %v11789_v12 = vpop.f32.mrb[202].mxu0  ;;  %v13054_v37 = vld [vmem:[%s13473_s19 + $0x58] sm:$0xff]  }
 0xc84   : > { %v18499_v42 = vadd.f32 %v11769_v34, %v9316_v3  ;;  %v11790_v15 = vpop.f32.mrb[203].mxu0 }
 0xc85   : > { %v18502_v10 = vadd.f32 %v11788_v8, %v18349_v1  ;;  %v11791_v25 = vadd.f32 %v11790_v15, %v11789_v12  ;;  %v13055_v12 = vld [vmem:[%s13473_s19 + $0x60] sm:$0xff]  }
 0xc86   : > { %v11898_v61 = vpop.f32.mrb[232].mxu1  ;;  %12307 = vmatmul.mubr.msk.bf16.gmra.mrb[20].mxu0 %vm1140_vm1, %v13050_v38 }
 0xc87   : > { %v9518_v46 = vadd.f32 %v11791_v25, %v18352_v48  ;;  %v11899_v27 = vpop.f32.mrb[233].mxu1  ;;  %12310 = vmatprep.mubr.msk.bf16.mxu0 %vm1140_vm1, %v13051_v43 }
 0xc88   : > { %v18507_v5 = vadd.f32 %v11899_v27, %v11898_v61  ;;  %v11901_v26 = vpop.f32.mrb[234].mxu1 }
 0xc89   : > { %v11902_v47 = vpop.f32.mrb[235].mxu1  ;;  %v11792_v33 = vpop.f32.mrb[204].mxu0 }
 0xc8a   : > { %v11903_v13 = vadd.f32 %v11902_v47, %v11901_v26  ;;  %v11793_v41 = vpop.f32.mrb[205].mxu0 }
 0xc8b   : > { %v11794_v1 = vadd.f32 %v11793_v41, %v11792_v33  ;;  %v11795_v40 = vpop.f32.mrb[206].mxu0  ;;  %v13056_v41 = vld [vmem:[%s13473_s19 + $0x68] sm:$0xff]  }
 0xc8c   : > { %v18511_v7 = vadd.f32 %v11903_v13, %v9518_v46  ;;  %v11796_v20 = vpop.f32.mrb[207].mxu0 }
 0xc8d   : > { %v9523_v48 = vadd.f32 %v11794_v1, %v18359_v53  ;;  %v11797_v28 = vadd.f32 %v11796_v20, %v11795_v40  ;;  %v13057_v20 = vld [vmem:[%s13473_s19 + $0x70] sm:$0xff]  }
 0xc8e   : > { %v11904_v57 = vpop.f32.mrb[236].mxu1  ;;  %12311 = vmatmul.mubr.msk.bf16.gmra.mrb[24].mxu0 %vm1140_vm1, %v13052_v32 }
 0xc8f   : > { %v9526_v63 = vadd.f32 %v11797_v28, %v18362_v0  ;;  %v11905_v50 = vpop.f32.mrb[237].mxu1  ;;  %12314 = vmatprep.mubr.msk.bf16.mxu0 %vm1140_vm1, %v13053_v22 }
 0xc90   : > { %v11906_v3 = vadd.f32 %v11905_v50, %v11904_v57  ;;  %v11907_v16 = vpop.f32.mrb[238].mxu1 }
 0xc91   : > { %v11908_v49 = vpop.f32.mrb[239].mxu1  ;;  %v11798_v44 = vpop.f32.mrb[208].mxu0 }
 0xc92   : > { %v11909_v9 = vadd.f32 %v11908_v49, %v11907_v16  ;;  %v11799_v34 = vpop.f32.mrb[209].mxu0  ;;  %v18518_v38 = vadd.f32 %v11906_v3, %v9523_v48 }
 0xc93   : > { %v11800_v53 = vadd.f32 %v11799_v34, %v11798_v44  ;;  %v11801_v8 = vpop.f32.mrb[210].mxu0  ;;  %v13058_v34 = vld [vmem:[%s13473_s19 + $0x78] sm:$0xff]   ;;  %s563_s19 = sand.u32 1, %s13205_s22  }
 0xc94   : > { %v18521_v43 = vadd.f32 %v11909_v9, %v9526_v63  ;;  %v11802_v15 = vpop.f32.mrb[211].mxu0  ;;  %s10609_s24 = sshll.u32 %s563_s19, 7  ;;  %s18720_s25 = scalar_lea.sflag [#allocation6], %s563_s19 }
 0xc95   : > { %v9531_v0 = vadd.f32 %v11800_v53, %v18369_v6  ;;  %v11803_v25 = vadd.f32 %v11802_v15, %v11801_v8  ;;  %s18635_s17 = scalar_lea.vmem [#allocation10], %s10609_s24 }
 0xc96   : > { %v11910_v61 = vpop.f32.mrb[240].mxu1  ;;  %12315 = vmatmul.mubr.msk.bf16.gmra.mrb[28].mxu0 %vm1140_vm1, %v13054_v37  ;;  %s10497_s26 = sshll.u32 %s18635_s17, 4  ;;  %s18714_s26 = int_to_ptr.vmem [resolvable:$true] %s10497_s26 }
 0xc97   : > { %v9534_v46 = vadd.f32 %v11803_v25, %v18372_v2  ;;  %v11911_v27 = vpop.f32.mrb[241].mxu1  ;;  %12318 = vmatprep.mubr.msk.bf16.mxu0 %vm1140_vm1, %v13055_v12  ;;  %s13143_s20 = scalar_lea.vmem %s18714_s26, 2048  ;;  %p13150_p4 = scmp.lt.s32.totalorder %s18714_s26, %s13148_s15 }
 0xc98   : > { %v11912_v26 = vadd.f32 %v11911_v27, %v11910_v61  ;;  %v11913_v47 = vpop.f32.mrb[242].mxu1  ;;  %p13144_p12 = scmp.ne.s32.totalorder %s18714_s26, %s13143_s20 }
 0xc99   : > { %v11914_v33 = vpop.f32.mrb[243].mxu1  ;;  %v11804_v13 = vpop.f32.mrb[212].mxu0 }
 0xc9a   : > { %v18528_v32 = vadd.f32 %v11912_v26, %v9531_v0  ;;  %v11915_v1 = vadd.f32 %v11914_v33, %v11913_v47  ;;  %v11805_v40 = vpop.f32.mrb[213].mxu0  ;;  %p13145_p2 = pnand %p13144_p12, %p19459_p10 }
 0xc9b   : > { %v11806_v6 = vadd.f32 %v11805_v40, %v11804_v13  ;;  %v11807_v22 = vpop.f32.mrb[214].mxu0 }
 0xc9c   : > { %v18531_v48 = vadd.f32 %v11915_v1, %v9534_v46  ;;  %v11808_v28 = vpop.f32.mrb[215].mxu0  ;;  %p13146_p3 = pneg %p13145_p2 }
 0xc9d   : > { %v9539_v2 = vadd.f32 %v11806_v6, %v18379_v58  ;;  %v11809_v57 = vadd.f32 %v11808_v28, %v11807_v22 }
 0xc9e   : > { %v11916_v63 = vpop.f32.mrb[244].mxu1  ;;  %12319 = vmatmul.mubr.msk.bf16.gmra.mrb[32].mxu0 %vm1140_vm1, %v13056_v41 }
 0xc9f   : > { %v9542_v50 = vadd.f32 %v11809_v57, %v18382_v17  ;;  %v11917_v3 = vpop.f32.mrb[245].mxu1  ;;  %12322 = vmatprep.mubr.msk.bf16.mxu0 %vm1140_vm1, %v13057_v20 }
 0xca0   : > { %v11918_v16 = vadd.f32 %v11917_v3, %v11916_v63  ;;  %v11919_v49 = vpop.f32.mrb[246].mxu1 }
 0xca1   : > { %v11920_v44 = vpop.f32.mrb[247].mxu1  ;;  %v11810_v9 = vpop.f32.mrb[216].mxu0 }
 0xca2   : > { %v18538_v37 = vadd.f32 %v11918_v16, %v9539_v2  ;;  %v11921_v53 = vadd.f32 %v11920_v44, %v11919_v49  ;;  %v11811_v8 = vpop.f32.mrb[217].mxu0 }
 0xca3   : > { %v11812_v12 = vadd.f32 %v11811_v8, %v11810_v9  ;;  %v11813_v58 = vpop.f32.mrb[218].mxu0 }
 0xca4   : > { %v18540_v15 = vadd.f32 %v11921_v53, %v9542_v50  ;;  %v11814_v0 = vpop.f32.mrb[219].mxu0 }
 0xca5   : > { %v9547_v25 = vadd.f32 %v11812_v12, %v18389_v54  ;;  %v11815_v17 = vadd.f32 %v11814_v0, %v11813_v58 }
 0xca6   : > { %v11922_v61 = vpop.f32.mrb[248].mxu1  ;;  %12323 = vmatmul.mubr.msk.bf16.gmra.mrb[36].mxu0 %vm1140_vm1, %v13058_v34 }
 0xca7   : > { %v9550_v46 = vadd.f32 %v11815_v17, %v18392_v36  ;;  %v11923_v27 = vpop.f32.mrb[249].mxu1 }
 0xca8   : > { %v11924_v26 = vadd.f32 %v11923_v27, %v11922_v61  ;;  %v11925_v47 = vpop.f32.mrb[250].mxu1 }
 0xca9   : > { %v11926_v33 = vpop.f32.mrb[251].mxu1  ;;  %v11816_v13 = vpop.f32.mrb[220].mxu0 }
 0xcaa   : > { %v18545_v41 = vadd.f32 %v11924_v26, %v9547_v25  ;;  %v11927_v1 = vadd.f32 %v11926_v33, %v11925_v47  ;;  %v11817_v40 = vpop.f32.mrb[221].mxu0 }
 0xcab   : > { %v11818_v6 = vadd.f32 %v11817_v40, %v11816_v13  ;;  %v11819_v22 = vpop.f32.mrb[222].mxu0 }
 0xcac   : > { %v18547_v20 = vadd.f32 %v11927_v1, %v9550_v46  ;;  %v11820_v54 = vpop.f32.mrb[223].mxu0 }
 0xcad   : > { %v9555_v28 = vadd.f32 %v11818_v6, %v18405_v62  ;;  %v11821_v2 = vadd.f32 %v11820_v54, %v11819_v22 }
 0xcae   : > { %v11928_v57 = vpop.f32.mrb[252].mxu1 }
 0xcaf   : > { %v9558_v36 = vadd.f32 %v11821_v2, %v18407_v35  ;;  %v11929_v63 = vpop.f32.mrb[253].mxu1 }
 0xcb0   : > { %v11930_v50 = vadd.f32 %v11929_v63, %v11928_v57  ;;  %v11931_v3 = vpop.f32.mrb[254].mxu1 }
 0xcb1   : > { %v11932_v16 = vpop.f32.mrb[255].mxu1  ;;  %v11822_v49 = vpop.f32.mrb[224].mxu0 }
 0xcb2   : > { %v18551_v44 = vadd.f32 %v11930_v50, %v9555_v28  ;;  %v11933_v9 = vadd.f32 %v11932_v16, %v11931_v3  ;;  %v11823_v34 = vpop.f32.mrb[225].mxu0 }
 0xcb3   : > { %v11824_v53 = vadd.f32 %v11823_v34, %v11822_v49  ;;  %v11825_v8 = vpop.f32.mrb[226].mxu0 }
 0xcb4   : > { %v18553_v12 = vadd.f32 %v11933_v9, %v9558_v36  ;;  %v11826_v58 = vpop.f32.mrb[227].mxu0 }
 0xcb5   : > { %v9563_v62 = vadd.f32 %v11824_v53, %v18416_v55  ;;  %v11827_v0 = vadd.f32 %v11826_v58, %v11825_v8  ;;  %v18567_v53 = vadd.f32 %v18507_v5, %v18502_v10 }
 0xcb6   : > { %v11934_v25 = vpop.f32.mrb[0].mxu1 }
 0xcb7   : > { %v9566_v35 = vadd.f32 %v11827_v0, %v18418_v60  ;;  %v11935_v17 = vpop.f32.mrb[1].mxu1 }
 0xcb8   : > { %v11936_v61 = vadd.f32 %v11935_v17, %v11934_v25  ;;  %v11937_v46 = vpop.f32.mrb[2].mxu1 }
 0xcb9   : > { %v11938_v27 = vpop.f32.mrb[3].mxu1  ;;  %v11828_v26 = vpop.f32.mrb[228].mxu0 }
 0xcba   : > { %v18557_v47 = vadd.f32 %v11936_v61, %v9563_v62  ;;  %v11939_v33 = vadd.f32 %v11938_v27, %v11937_v46  ;;  %v11829_v13 = vpop.f32.mrb[229].mxu0 }
 0xcbb   : > { %v11830_v1 = vadd.f32 %v11829_v13, %v11828_v26  ;;  %v11831_v40 = vpop.f32.mrb[230].mxu0 }
 0xcbc   : > { %v18559_v6 = vadd.f32 %v11939_v33, %v9566_v35  ;;  %v11832_v22 = vpop.f32.mrb[231].mxu0 }
 0xcbd   : > { %v9571_v55 = vadd.f32 %v11830_v1, %v18424_v56  ;;  %v11833_v54 = vadd.f32 %v11832_v22, %v11831_v40 }
 0xcbf   : > { %v11940_v28 = vpop.f32.mrb[4].mxu1  ;;  %v9574_v60 = vadd.f32 %v11833_v54, %v18426_v4 }
 0xcc0   : > { %v11941_v2 = vpop.f32.mrb[5].mxu1 }
 0xcc1   : > { %v11942_v57 = vadd.f32 %v11941_v2, %v11940_v28  ;;  %v11943_v36 = vpop.f32.mrb[6].mxu1  ;;  %v11834_v50 = vpop.f32.mrb[232].mxu0 }
 0xcc2   : > { %v11944_v63 = vpop.f32.mrb[7].mxu1  ;;  %v11835_v49 = vpop.f32.mrb[233].mxu0 }
 0xcc3   : > { %v18563_v3 = vadd.f32 %v11942_v57, %v9571_v55  ;;  %v11945_v16 = vadd.f32 %v11944_v63, %v11943_v36  ;;  %v11836_v9 = vadd.f32 %v11835_v49, %v11834_v50  ;;  %v11837_v34 = vpop.f32.mrb[234].mxu0 }
 0xcc4   : > { %v11838_v8 = vpop.f32.mrb[235].mxu0 }
 0xcc5   : > { %v18569_v56 = vadd.f32 %v11945_v16, %v9574_v60  ;;  %v9579_v4 = vadd.f32 %v11836_v9, %v18432_v52  ;;  %v11839_v58 = vadd.f32 %v11838_v8, %v11837_v34 }
 0xcc7   : > { %v11946_v62 = vpop.f32.mrb[8].mxu1  ;;  %v9582_v0 = vadd.f32 %v11839_v58, %v18434_v29 }
 0xcc8   : > { %v11947_v25 = vpop.f32.mrb[9].mxu1 }
 0xcc9   : > { %v11948_v35 = vadd.f32 %v11947_v25, %v11946_v62  ;;  %v11949_v17 = vpop.f32.mrb[10].mxu1  ;;  %v11840_v46 = vpop.f32.mrb[236].mxu0 }
 0xcca   : > { %v11950_v61 = vpop.f32.mrb[11].mxu1  ;;  %v11841_v33 = vpop.f32.mrb[237].mxu0 }
 0xccb   : > { %v18573_v27 = vadd.f32 %v11948_v35, %v9579_v4  ;;  %v11951_v26 = vadd.f32 %v11950_v61, %v11949_v17  ;;  %v11842_v10 = vadd.f32 %v11841_v33, %v11840_v46  ;;  %v11843_v5 = vpop.f32.mrb[238].mxu0 }
 0xccc   : > { %v11844_v1 = vpop.f32.mrb[239].mxu0 }
 0xccd   : > { %v18575_v13 = vadd.f32 %v11951_v26, %v9582_v0  ;;  %v9587_v52 = vadd.f32 %v11842_v10, %v18440_v51  ;;  %v11845_v40 = vadd.f32 %v11844_v1, %v11843_v5 }
 0xccf   : > { %v11952_v22 = vpop.f32.mrb[12].mxu1  ;;  %v9590_v29 = vadd.f32 %v11845_v40, %v18442_v59 }
 0xcd0   : > { %v11953_v55 = vpop.f32.mrb[13].mxu1 }
 0xcd1   : > { %v11954_v54 = vadd.f32 %v11953_v55, %v11952_v22  ;;  %v11955_v28 = vpop.f32.mrb[14].mxu1  ;;  %v11846_v2 = vpop.f32.mrb[240].mxu0 }
 0xcd2   : > { %v11956_v60 = vpop.f32.mrb[15].mxu1  ;;  %v11847_v63 = vpop.f32.mrb[241].mxu0 }
 0xcd3   : > { %v18579_v57 = vadd.f32 %v11954_v54, %v9587_v52  ;;  %v11957_v36 = vadd.f32 %v11956_v60, %v11955_v28  ;;  %v11848_v50 = vadd.f32 %v11847_v63, %v11846_v2  ;;  %v11849_v16 = vpop.f32.mrb[242].mxu0 }
 0xcd4   : > { %v11850_v9 = vpop.f32.mrb[243].mxu0 }
 0xcd5   : > { %v18581_v49 = vadd.f32 %v11957_v36, %v9590_v29  ;;  %v9595_v51 = vadd.f32 %v11848_v50, %v18448_v45  ;;  %v11851_v34 = vadd.f32 %v11850_v9, %v11849_v16 }
 0xcd7   : > { %v11958_v8 = vpop.f32.mrb[16].mxu1  ;;  %v9598_v59 = vadd.f32 %v11851_v34, %v18450_v19 }
 0xcd8   : > { %v11959_v4 = vpop.f32.mrb[17].mxu1 }
 0xcd9   : > { %v11960_v58 = vadd.f32 %v11959_v4, %v11958_v8  ;;  %v11961_v62 = vpop.f32.mrb[18].mxu1  ;;  %v11852_v25 = vpop.f32.mrb[244].mxu0 }
 0xcda   : > { %v11962_v0 = vpop.f32.mrb[19].mxu1  ;;  %v11853_v61 = vpop.f32.mrb[245].mxu0 }
 0xcdb   : > { %v18585_v35 = vadd.f32 %v11960_v58, %v9595_v51  ;;  %v11963_v17 = vadd.f32 %v11962_v0, %v11961_v62  ;;  %v11854_v46 = vadd.f32 %v11853_v61, %v11852_v25  ;;  %v11855_v26 = vpop.f32.mrb[246].mxu0 }
 0xcdc   : > { %v11856_v10 = vpop.f32.mrb[247].mxu0 }
 0xcdd   : > { %v18587_v33 = vadd.f32 %v11963_v17, %v9598_v59  ;;  %v9603_v45 = vadd.f32 %v11854_v46, %v18456_v21  ;;  %v11857_v5 = vadd.f32 %v11856_v10, %v11855_v26 }
 0xcdf   : > { %v11964_v1 = vpop.f32.mrb[20].mxu1  ;;  %v9606_v19 = vadd.f32 %v11857_v5, %v18459_v31 }
 0xce0   : > { %v11965_v52 = vpop.f32.mrb[21].mxu1 }
 0xce1   : > { %v11966_v40 = vadd.f32 %v11965_v52, %v11964_v1  ;;  %v11967_v22 = vpop.f32.mrb[22].mxu1  ;;  %v11858_v55 = vpop.f32.mrb[248].mxu0 }
 0xce2   : > { %v11968_v29 = vpop.f32.mrb[23].mxu1  ;;  %v11859_v60 = vpop.f32.mrb[249].mxu0 }
 0xce3   : > { %v18591_v54 = vadd.f32 %v11966_v40, %v9603_v45  ;;  %v11969_v28 = vadd.f32 %v11968_v29, %v11967_v22  ;;  %v11860_v2 = vadd.f32 %v11859_v60, %v11858_v55  ;;  %v11861_v36 = vpop.f32.mrb[250].mxu0 }
 0xce4   : > { %v11862_v50 = vpop.f32.mrb[251].mxu0 }
 0xce5   : > { %v18593_v63 = vadd.f32 %v11969_v28, %v9606_v19  ;;  %v9611_v21 = vadd.f32 %v11860_v2, %v18465_v30  ;;  %v11863_v16 = vadd.f32 %v11862_v50, %v11861_v36 }
 0xce7   : > { %v11970_v9 = vpop.f32.mrb[24].mxu1  ;;  %v9614_v31 = vadd.f32 %v11863_v16, %v18469_v24 }
 0xce8   : > { %v11971_v51 = vpop.f32.mrb[25].mxu1 }
 0xce9   : > { %v11972_v34 = vadd.f32 %v11971_v51, %v11970_v9  ;;  %v11973_v8 = vpop.f32.mrb[26].mxu1  ;;  %v11864_v4 = vpop.f32.mrb[252].mxu0 }
 0xcea   : > { %v11974_v59 = vpop.f32.mrb[27].mxu1  ;;  %v11865_v0 = vpop.f32.mrb[253].mxu0 }
 0xceb   : > { %v18597_v58 = vadd.f32 %v11972_v34, %v9611_v21  ;;  %v11975_v62 = vadd.f32 %v11974_v59, %v11973_v8  ;;  %v11866_v25 = vadd.f32 %v11865_v0, %v11864_v4  ;;  %v11867_v17 = vpop.f32.mrb[254].mxu0 }
 0xcec   : > { %v11868_v46 = vpop.f32.mrb[255].mxu0 }
 0xced   : > { %v18599_v61 = vadd.f32 %v11975_v62, %v9614_v31  ;;  %v9619_v30 = vadd.f32 %v11866_v25, %v18475_v14  ;;  %v11869_v26 = vadd.f32 %v11868_v46, %v11867_v17 }
 0xcef   : > { %v11976_v10 = vpop.f32.mrb[28].mxu1  ;;  %v9622_v24 = vadd.f32 %v11869_v26, %v18479_v18 }
 0xcf0   : > { %v11977_v45 = vpop.f32.mrb[29].mxu1 }
 0xcf1   : > { %v11978_v5 = vadd.f32 %v11977_v45, %v11976_v10  ;;  %v11979_v1 = vpop.f32.mrb[30].mxu1  ;;  %v11870_v52 = vpop.f32.mrb[0].mxu0 }
 0xcf2   : > { %v11980_v19 = vpop.f32.mrb[31].mxu1  ;;  %v11871_v29 = vpop.f32.mrb[1].mxu0 }
 0xcf3   : > { %v18603_v40 = vadd.f32 %v11978_v5, %v9619_v30  ;;  %v11981_v22 = vadd.f32 %v11980_v19, %v11979_v1  ;;  %v11872_v55 = vadd.f32 %v11871_v29, %v11870_v52  ;;  %v11873_v28 = vpop.f32.mrb[2].mxu0  ;;  %v18623_v19 = vld [vmem:[%s19455_s0] ss:$0 sm:$0xff]  ;;  %s13149_s0 = scalar_lea.vmem %s13148_s15, 4096 }
 0xcf4   : > { %v11874_v2 = vpop.f32.mrb[3].mxu0  ;;  %p13151_p7 = scmp.lt.s32.totalorder %s13149_s0, %s13143_s20 }
 0xcf5   : > { %v18605_v60 = vadd.f32 %v11981_v22, %v9622_v24  ;;  %v9627_v14 = vadd.f32 %v11872_v55, %v18485_v23  ;;  %v11875_v36 = vadd.f32 %v11874_v2, %v11873_v28  ;;  %v12444_v28 = vadd.f32 %v18623_v19, %v18511_v7 }
 0xcf6   : > { %p13152_p8 = por %p13151_p7, %p13150_p4 }
 0xcf7   : > { %v11982_v50 = vpop.f32.mrb[32].mxu1  ;;  %v9630_v18 = vadd.f32 %v11875_v36, %v18489_v11 }
 0xcf8   : > { %v11983_v21 = vpop.f32.mrb[33].mxu1  ;;  %p13153_p11 = pnand %p13152_p8, %p13146_p3 }
 0xcf9   : > { %v11984_v16 = vadd.f32 %v11983_v21, %v11982_v50  ;;  %v11985_v9 = vpop.f32.mrb[34].mxu1  ;;  %v11876_v51 = vpop.f32.mrb[4].mxu0 }
 0xcfa   : > { %v11986_v31 = vpop.f32.mrb[35].mxu1  ;;  %v11877_v59 = vpop.f32.mrb[5].mxu0 }
 0xcfb   : > { %v18609_v34 = vadd.f32 %v11984_v16, %v9627_v14  ;;  %v11987_v8 = vadd.f32 %v11986_v31, %v11985_v9  ;;  %v11878_v4 = vadd.f32 %v11877_v59, %v11876_v51  ;;  %v11879_v62 = vpop.f32.mrb[6].mxu0  ;;  %v12450_v31 = vadd.f32 %v18623_v19, %v18540_v15 }
 0xcfc   : > { %v11880_v25 = vpop.f32.mrb[7].mxu0  ;;  %v12452_v59 = vadd.f32 %v18623_v19, %v18531_v48  ;;  %v12456_v15 = vadd.f32 %v18623_v19, %v18545_v41  ;;  %v12458_v48 = vadd.f32 %v18623_v19, %v18553_v12  ;;  %v12462_v41 = vadd.f32 %v18623_v19, %v18563_v3 }
 0xcfd   : > { %v18611_v0 = vadd.f32 %v11987_v8, %v9630_v18  ;;  %v9635_v23 = vadd.f32 %v11878_v4, %v18495_v39  ;;  %v11881_v17 = vadd.f32 %v11880_v25, %v11879_v62  ;;  %v12464_v12 = vadd.f32 %v18623_v19, %v18557_v47 }
 0xcfe   : > { %v12470_v47 = vadd.f32 %v18623_v19, %v18579_v57 }
 0xcff   : > { %v11988_v11 = vpop.f32.mrb[36].mxu1  ;;  %v9638_v46 = vadd.f32 %v11881_v17, %v18499_v42  ;;  %v12442_v42 = vadd.f32 %v18623_v19, %v18521_v43  ;;  %v12446_v43 = vadd.f32 %v18623_v19, %v18538_v37 }
 0xd00   : > { %v11989_v30 = vpop.f32.mrb[37].mxu1 }
 0xd01   : > { %v11990_v26 = vadd.f32 %v11989_v30, %v11988_v11  ;;  %v11991_v10 = vpop.f32.mrb[38].mxu1 }
 0xd02   : > { %v11992_v24 = vpop.f32.mrb[39].mxu1 }
 0xd03   : > { %v18615_v45 = vadd.f32 %v11990_v26, %v9635_v23  ;;  %v11993_v5 = vadd.f32 %v11992_v24, %v11991_v10  ;;  %v12460_v10 = vadd.f32 %v18623_v19, %v18547_v20  ;;  %v12466_v20 = vadd.f32 %v18623_v19, %v18569_v56 }
 0xd04   : > { %v12472_v56 = vadd.f32 %v18623_v19, %v18573_v27  ;;  %v12478_v27 = vadd.f32 %v18623_v19, %v18591_v54 }
 0xd05   : > { %v18617_v1 = vadd.f32 %v11993_v5, %v9638_v46 }
 0xd41   : > { %v12296_v39 = vpop.f32.mrb[8].mxu0 }
 0xd42   : > { %v12438_v52 = vadd.f32 %v12296_v39, %v18518_v38  ;;  %v10164_v22 = vpop.f32.mrb[9].mxu0 }
 0xd43   : > { %v12440_v29 = vadd.f32 %v10164_v22, %v18567_v53  ;;  %v12297_v55 = vpop.f32.mrb[10].mxu0  ;;  %v12448_v53 = vadd.f32 %v18623_v19, %v18528_v32  ;;  %v12454_v32 = vadd.f32 %v18623_v19, %v18551_v44 }
 0xd44   : > { %v12439_v2 = vadd.f32 %v12438_v52, %v18623_v19  ;;  %v12443_v14 = vadd.f32 %v12442_v42, %v12297_v55  ;;  %v10167_v36 = vpop.f32.mrb[11].mxu0 }
 0xd45   : > { %v12441_v50 = vadd.f32 %v12440_v29, %v18623_v19  ;;  %v12445_v18 = vadd.f32 %v12444_v28, %v10167_v36 }
 0xd46   : > { %v10915_v38 = vpack.c.bf16 %v12443_v14, %v12439_v2  ;;  %v12468_v2 = vadd.f32 %v18623_v19, %v18559_v6  ;;  %v12474_v6 = vadd.f32 %v18623_v19, %v18581_v49  ;;  %v12480_v49 = vadd.f32 %v18623_v19, %v18585_v35 }
 0xd47   : > { %v10910_v21 = vpack.c.bf16 %v12445_v18, %v12441_v50  ;;  %v12486_v35 = vadd.f32 %v18623_v19, %v18603_v40 }
 0xd48   : > { %10987 = vst [vmem:[%s18635_s17 + $0x8] sm:$0xff] %v10915_v38  }
 0xd49   : > { %10911 = vst [vmem:[%s18635_s17] sm:$0xff] %v10910_v21   ;;  %v12300_v7 = vpop.f32.mrb[12].mxu0 }
 0xd4a   : > { %v12447_v16 = vadd.f32 %v12446_v43, %v12300_v7  ;;  %v10180_v9 = vpop.f32.mrb[13].mxu0 }
 0xd4b   : > { %v12449_v51 = vadd.f32 %v12448_v53, %v10180_v9  ;;  %v12301_v8 = vpop.f32.mrb[14].mxu0 }
 0xd4c   : > { %v12451_v4 = vadd.f32 %v12450_v31, %v12301_v8  ;;  %v10183_v62 = vpop.f32.mrb[15].mxu0 }
 0xd4d   : > { %v12453_v25 = vadd.f32 %v12452_v59, %v10183_v62 }
 0xd4e   : > { %v10925_v37 = vpack.c.bf16 %v12451_v4, %v12447_v16  ;;  %v12476_v16 = vadd.f32 %v18623_v19, %v18575_v13  ;;  %v12482_v13 = vadd.f32 %v18623_v19, %v18593_v63  ;;  %v12488_v63 = vadd.f32 %v18623_v19, %v18597_v58 }
 0xd4f   : > { %v10920_v23 = vpack.c.bf16 %v12453_v25, %v12449_v51  ;;  %v12494_v58 = vadd.f32 %v18623_v19, %v18615_v45 }
 0xd50   : > { %10989 = vst [vmem:[%s18635_s17 + $0x18] sm:$0xff] %v10925_v37  }
 0xd51   : > { %10988 = vst [vmem:[%s18635_s17 + $0x10] sm:$0xff] %v10920_v23   ;;  %v12304_v17 = vpop.f32.mrb[16].mxu0  ;;  %v12484_v23 = vadd.f32 %v18623_v19, %v18587_v33  ;;  %v12490_v33 = vadd.f32 %v18623_v19, %v18605_v60  ;;  %v12496_v60 = vadd.f32 %v18623_v19, %v18609_v34 }
 0xd52   : > { %v12455_v11 = vadd.f32 %v12454_v32, %v12304_v17  ;;  %v10196_v46 = vpop.f32.mrb[17].mxu0 }
 0xd53   : > { %v12457_v30 = vadd.f32 %v12456_v15, %v10196_v46  ;;  %v12305_v26 = vpop.f32.mrb[18].mxu0 }
 0xd54   : > { %v12459_v24 = vadd.f32 %v12458_v48, %v12305_v26  ;;  %v10199_v5 = vpop.f32.mrb[19].mxu0 }
 0xd55   : > { %v12461_v39 = vadd.f32 %v12460_v10, %v10199_v5 }
 0xd56   : > { %v10935_v44 = vpack.c.bf16 %v12459_v24, %v12455_v11  ;;  %v12492_v24 = vadd.f32 %v18623_v19, %v18599_v61 }
 0xd57   : > { %v10930_v52 = vpack.c.bf16 %v12461_v39, %v12457_v30 }
 0xd58   : > { %10991 = vst [vmem:[%s18635_s17 + $0x28] sm:$0xff] %v10935_v44  }
 0xd59   : > { %10990 = vst [vmem:[%s18635_s17 + $0x20] sm:$0xff] %v10930_v52   ;;  %v12308_v22 = vpop.f32.mrb[20].mxu0 }
 0xd5a   : > { %v12463_v42 = vadd.f32 %v12462_v41, %v12308_v22  ;;  %v10212_v29 = vpop.f32.mrb[21].mxu0 }
 0xd5b   : > { %v12465_v55 = vadd.f32 %v12464_v12, %v10212_v29  ;;  %v12309_v28 = vpop.f32.mrb[22].mxu0  ;;  %v12498_v12 = vadd.f32 %v18623_v19, %v18617_v1 }
 0xd5c   : > { %v12467_v14 = vadd.f32 %v12466_v20, %v12309_v28  ;;  %v10215_v36 = vpop.f32.mrb[23].mxu0  ;;  %v12500_v20 = vadd.f32 %v18623_v19, %v18611_v0 }
 0xd5d   : > { %v12469_v50 = vadd.f32 %v12468_v2, %v10215_v36 }
 0xd5e   : > { %v10945_v3 = vpack.c.bf16 %v12467_v14, %v12463_v42 }
 0xd5f   : > { %v10940_v18 = vpack.c.bf16 %v12469_v50, %v12465_v55 }
 0xd60   : > { %10993 = vst [vmem:[%s18635_s17 + $0x38] sm:$0xff] %v10945_v3  }
 0xd61   : > { %10992 = vst [vmem:[%s18635_s17 + $0x30] sm:$0xff] %v10940_v18   ;;  %v12312_v38 = vpop.f32.mrb[24].mxu0 }
 0xd62   : > { %v12471_v21 = vadd.f32 %v12470_v47, %v12312_v38  ;;  %v10228_v43 = vpop.f32.mrb[25].mxu0 }
 0xd63   : > { %v12473_v7 = vadd.f32 %v12472_v56, %v10228_v43  ;;  %v12313_v53 = vpop.f32.mrb[26].mxu0 }
 0xd64   : > { %v12475_v9 = vadd.f32 %v12474_v6, %v12313_v53  ;;  %v10231_v31 = vpop.f32.mrb[27].mxu0 }
 0xd65   : > { %v12477_v51 = vadd.f32 %v12476_v16, %v10231_v31 }
 0xd66   : > { %v10955_v57 = vpack.c.bf16 %v12475_v9, %v12471_v21 }
 0xd67   : > { %v10950_v8 = vpack.c.bf16 %v12477_v51, %v12473_v7 }
 0xd68   : > { %10995 = vst [vmem:[%s18635_s17 + $0x48] sm:$0xff] %v10955_v57  }
 0xd69   : > { %10994 = vst [vmem:[%s18635_s17 + $0x40] sm:$0xff] %v10950_v8   ;;  %v12316_v59 = vpop.f32.mrb[28].mxu0 }
 0xd6a   : > { %v12479_v4 = vadd.f32 %v12478_v27, %v12316_v59  ;;  %v10244_v62 = vpop.f32.mrb[29].mxu0 }
 0xd6b   : > { %v12481_v25 = vadd.f32 %v12480_v49, %v10244_v62  ;;  %v12317_v37 = vpop.f32.mrb[30].mxu0 }
 0xd6c   : > { %v12483_v32 = vadd.f32 %v12482_v13, %v12317_v37  ;;  %v10247_v17 = vpop.f32.mrb[31].mxu0 }
 0xd6d   : > { %v12485_v15 = vadd.f32 %v12484_v23, %v10247_v17 }
 0xd6e   : > { %v10965_v54 = vpack.c.bf16 %v12483_v32, %v12479_v4 }
 0xd6f   : > { %v10960_v11 = vpack.c.bf16 %v12485_v15, %v12481_v25 }
 0xd70   : > { %10997 = vst [vmem:[%s18635_s17 + $0x58] sm:$0xff] %v10965_v54  }
 0xd71   : > { %10996 = vst [vmem:[%s18635_s17 + $0x50] sm:$0xff] %v10960_v11   ;;  %v12320_v46 = vpop.f32.mrb[32].mxu0 }
 0xd72   : > { %v12487_v48 = vadd.f32 %v12486_v35, %v12320_v46  ;;  %v10260_v30 = vpop.f32.mrb[33].mxu0 }
 0xd73   : > { %v12489_v26 = vadd.f32 %v12488_v63, %v10260_v30  ;;  %v12321_v10 = vpop.f32.mrb[34].mxu0 }
 0xd74   : > { %v12491_v5 = vadd.f32 %v12490_v33, %v12321_v10  ;;  %v10263_v39 = vpop.f32.mrb[35].mxu0 }
 0xd75   : > { %v12493_v40 = vadd.f32 %v12492_v24, %v10263_v39 }
 0xd76   : > { %v10975_v44 = vpack.c.bf16 %v12491_v5, %v12487_v48 }
 0xd77   : > { %v10970_v52 = vpack.c.bf16 %v12493_v40, %v12489_v26 }
 0xd78   : > { %10999 = vst [vmem:[%s18635_s17 + $0x68] sm:$0xff] %v10975_v44  }
 0xd79   : > { %10998 = vst [vmem:[%s18635_s17 + $0x60] sm:$0xff] %v10970_v52   ;;  %v12324_v41 = vpop.f32.mrb[36].mxu0 }
 0xd7a   : > { %v12495_v22 = vadd.f32 %v12494_v58, %v12324_v41  ;;  %v10276_v61 = vpop.f32.mrb[37].mxu0 }
 0xd7b   : > { %v12497_v42 = vadd.f32 %v12496_v60, %v10276_v61  ;;  %v12325_v29 = vpop.f32.mrb[38].mxu0 }
 0xd7c   : > { %v12499_v45 = vadd.f32 %v12498_v12, %v12325_v29  ;;  %v10279_v55 = vpop.f32.mrb[39].mxu0 }
 0xd7d   : > { %v12501_v28 = vadd.f32 %v12500_v20, %v10279_v55 }
 0xd7e   : > { %v10985_v34 = vpack.c.bf16 %v12499_v45, %v12495_v22 }
 0xd7f   : > { %v10980_v1 = vpack.c.bf16 %v12501_v28, %v12497_v42 }
 0xd80   : > { %11001 = vst [vmem:[%s18635_s17 + $0x78] sm:$0xff] %v10985_v34  }
 0xd81   : > { %11000 = vst [vmem:[%s18635_s17 + $0x70] sm:$0xff] %v10980_v1  }
 0xd82   : > { %13156 = shalt.err (!%p13153_p11)
}
 0xd83   : > { %s13157_s19 = scalar_lea.hbm %s18712_s21, 2048  ;;  %s13161_s29 = scalar_lea.hbm %s19458_s27, 4096 }
 0xd84   : > { %p13158_p13 = scmp.ne.s32.totalorder %s18712_s21, %s13157_s19  ;;  %p13162_p6 = scmp.lt.u32.totalorder %s18712_s21, %s19458_s27 }
 0xd85   : > { %p13163_p5 = scmp.lt.u32.totalorder %s13161_s29, %s13157_s19  ;;  %p13165_p12 = scmp.lt.u32.totalorder %s13157_s19, %s18712_s21 }
 0xd86   : > { %p13159_p0 = pnand %p13158_p13, %p19459_p10 }
 0xd87   : > { %p13164_p9 = por %p13163_p5, %p13162_p6 }
 0xd88   : > { %p13160_p1 = pneg %p13159_p0 }
 0xd89   : > { %p13166_p2 = por %p13165_p12, %p13164_p9 }
 0xd8b   : > { %p13167_p3 = pnand %p13166_p2, %p13160_p1 }
 0xd8d   : > { %13170 = shalt.err (!%p13167_p3)
}
 0xd8e   : > { %s13226_s23 = smov 64   ;;  %s13227_s20 = smov 4  }
 0xd8f   : > { %12546 = dma.vmem_to_hbm [thread:$0]  (%p19459_p10), %s18714_s26, 2048, %s18712_s21, %s18720_s25, %s13226_s23, %s13226_s23, %s13227_s20  }
 0xd90 PF: > { %s19460_s28 = sld [smem:[#allocation16_spill]]  ;;  %s19461_s15 = sld [smem:[#allocation14_spill]] }
 0xd91   : > { %s19462_s0 = sld [smem:[#allocation20_spill]] }
 0xd96   : > { %p12568_p4 = scmp.ge.s32.totalorder %s19460_s28, 2  ;;  %s10512_s24 = sand.u32 1, %s19461_s15  }
 0xd97   : > { %p19463_p7 = scmp.ne.s32.totalorder %s19462_s0, 0  ;;  %s10513_s19 = scalar_lea.sflag [#allocation6], %s10512_s24 }
 0xd99   : > { %p12559_p8 = pnand %p12568_p4, %p19463_p7 }
 0xd9b   : > { %13196 = dma.done.wait (!%p12559_p8), %s10513_s19, 2048  }
 0xd9c   : > { %13198 = vsyncadd (!%p12559_p8), %s10513_s19, 4294965248  ;;  %s19464_s24 = sld [smem:[#allocation17_spill]]  ;;  %s19465_s17 = sld [smem:[#allocation15_spill]] }
 0xd9d   : > { %s19466_s23 = sld [smem:[#allocation18_spill]]  ;;  %s19467_s21 = smov %s13205_s22 }
 0xda2   : > { %p28_p11 = scmp.ge.s32.totalorder %s19464_s24, 4   ;;  %s19468_s22 = smov %s19465_s17 }
 0xda4   :  { %30 = sbr.rel (!%p28_p11) target bundleno = 9 (0x9), region = 135 }
 0xdab   :  { %10518 = vsyncpa [#allocation5], 1 }
 0xdac   :  { %10520 = vsyncpa [#allocation5 + $0x1], 1 }
 0xdad   :  { %10521 = vsyncpa [#allocation8], 1 }
 0xdae   :  { %10522 = vsyncpa [#allocation6], 1 }
 0xdaf   :  { %10524 = vsyncpa [#allocation6 + $0x1], 1 }

</bundles_post_ra>
